<compile_context>
chip_gen: v5e
topology: v5e:2x2
jax: 0.10.0
libtpu: 0.0.40
codegen_flags: <defaults>
</compile_context>

<pallas_src>
import jax
import jax.numpy as jnp
from jax import lax
from jax.experimental import pallas as pl
from jax.experimental.pallas import tpu as pltpu


# ConvTranspose2d(k=4, s=2, p=1) phase decomposition: output row oh = 2*q + ph
# pulls from padded-mid row (q + hoff) with kernel row kh:
#   ph=0: (hoff=1, kh=1), (hoff=0, kh=3)
#   ph=1: (hoff=2, kh=0), (hoff=1, kh=2)
# (identical decomposition along the width axis)
_PHASE_TAPS = {0: ((1, 1), (0, 3)), 1: ((2, 0), (1, 2))}


def _decoder_kernel(xp_ref, w1_ref, b1_ref, w2_ref, b2_ref, o_ref, mid_ref):
    # xp_ref : (1, H+2, W+2, Cin)  bf16  spatially pre-padded input (one item)
    # w1_ref : (3, 3, Cin, Cm)     bf16  conv3x3 weights, HWIO (Cm lane-padded)
    # b1_ref : (1, Cm)             f32
    # w2_ref : (4, 4, Cm, Co)      bf16  deconv weights, HWIO (Co lane-padded)
    # b2_ref : (1, Co)             f32
    # o_ref  : (1, H*W, 4*Co)      f32   all 4 deconv phases, lane-dense
    # mid_ref: (H+2, W+2, Cm)      bf16  scratch: zero-padded ConvRelu output
    Hp2, Wp2, Cm = mid_ref.shape
    H, W = Hp2 - 2, Wp2 - 2
    HW = H * W

    # ---- stage 1: 3x3 conv (pad=1) + bias + ReLU: 9 accumulating dots --------
    xp = xp_ref[0]                                            # (H+2, W+2, Cin) bf16
    Cin = xp.shape[-1]
    acc1 = None
    for kh in range(3):
        for kw in range(3):
            tap = xp[kh:kh + H, kw:kw + W, :].reshape(HW, Cin)
            d = jnp.dot(tap, w1_ref[kh, kw], preferred_element_type=jnp.float32)
            acc1 = d if acc1 is None else acc1 + d
    mid = jnp.maximum(acc1 + b1_ref[...], 0.0).astype(jnp.bfloat16)   # (HW, Cm)

    # ---- zero-padded bf16 copy of mid: only the 1-wide border is zeroed ------
    mid_ref[0:1, :, :] = jnp.zeros((1, Wp2, Cm), jnp.bfloat16)
    mid_ref[H + 1:H + 2, :, :] = jnp.zeros((1, Wp2, Cm), jnp.bfloat16)
    mid_ref[:, 0:1, :] = jnp.zeros((Hp2, 1, Cm), jnp.bfloat16)
    mid_ref[:, W + 1:W + 2, :] = jnp.zeros((Hp2, 1, Cm), jnp.bfloat16)
    mid_ref[1:H + 1, 1:W + 1, :] = mid.reshape(H, W, Cm)

    # ---- stage 2: ConvTranspose2d(k=4, s=2, p=1) + bias + ReLU ---------------
    # Per output phase (ph, pw): 4 accumulating dots -> exactly 16*Cm*Co MACs
    # per pixel (no zero-row waste).  Phases are concatenated into one
    # lane-dense (HW, 4*Co) store.
    phase_out = []
    for ph in range(2):
        for pw in range(2):
            acc2 = None
            for hoff, kh in _PHASE_TAPS[ph]:
                for woff, kw in _PHASE_TAPS[pw]:
                    tap = mid_ref[hoff:hoff + H, woff:woff + W, :].reshape(HW, Cm)
                    d = jnp.dot(tap, w2_ref[kh, kw],
                                preferred_element_type=jnp.float32)
                    acc2 = d if acc2 is None else acc2 + d
            phase_out.append(jnp.maximum(acc2 + b2_ref[...], 0.0))
    o_ref[0] = jnp.concatenate(phase_out, axis=-1)            # (HW, 4*Co) f32


def _round_up(x, m):
    return (x + m - 1) // m * m


def decoder_block_forward(x_nchw, w1, b1, w2, b2):
    """x_nchw: (N, Cin, H, W); w1: (Cm, Cin, 3, 3); b1: (Cm,);
    w2: (Cm, Co, 4, 4); b2: (Co,).
    Returns (N, Co, 2H, 2W) matching PyTorch DecoderBlock(is_deconv=True)."""
    N, Cin, H, W = x_nchw.shape
    Cm = w1.shape[0]
    Co = w2.shape[1]
    # Lane padding: Cm -> multiple of 128 (mid scratch lane dim / stage-1 N /
    # stage-2 K), Co -> multiple of 32 so 4*Co_p is a multiple of 128
    # (unmasked lane-dense output store).
    Cm_p = _round_up(Cm, 128)
    Co_p = _round_up(Co, 32)

    # --- layout / weight preparation (pure glue, fuses into adjacent XLA ops) -
    x = jnp.transpose(x_nchw, (0, 2, 3, 1))                        # NHWC
    xp = jnp.pad(x, ((0, 0), (1, 1), (1, 1), (0, 0))).astype(jnp.bfloat16)

    w1_hwio = jnp.transpose(w1, (2, 3, 1, 0))                      # (3,3,Cin,Cm)
    w1_hwio = jnp.pad(w1_hwio, ((0, 0), (0, 0), (0, 0), (0, Cm_p - Cm)))
    w1_hwio = w1_hwio.astype(jnp.bfloat16)
    b1r = jnp.pad(b1, (0, Cm_p - Cm)).reshape(1, Cm_p).astype(jnp.float32)

    w2_hwio = jnp.transpose(w2, (2, 3, 0, 1))                      # (4,4,Cm,Co)
    w2_hwio = jnp.pad(w2_hwio, ((0, 0), (0, 0), (0, Cm_p - Cm), (0, Co_p - Co)))
    w2_hwio = w2_hwio.astype(jnp.bfloat16)
    b2r = jnp.pad(b2, (0, Co_p - Co)).reshape(1, Co_p).astype(jnp.float32)

    # --- explicit VMEM budget --------------------------------------------------
    blk_in = (H + 2) * (W + 2) * Cin * 2                           # bf16 input block
    blk_out = H * W * 4 * Co_p * 4                                 # f32 output block
    w_bytes = (9 * Cin * Cm_p + 16 * Cm_p * Co_p) * 2 + (Cm_p + Co_p) * 4
    scratch_bytes = (H + 2) * (W + 2) * Cm_p * 2                   # bf16 mid scratch
    # accs (f32), single per-tap copies (bf16), phase results + concat (f32)
    tmp_bytes = H * W * (8 * Cm_p + 2 * Cin + 36 * Co_p)
    vmem_need = 2 * (blk_in + blk_out + w_bytes) + scratch_bytes + tmp_bytes + (8 << 20)
    try:
        cap = int(pltpu.get_tpu_info().vmem_capacity_bytes * 0.8)  # ~102 MiB v5e/v6e, ~51 MiB v7x
    except Exception:
        cap = 100 << 20
    vmem_limit = int(min(max(vmem_need, 32 << 20), cap))

    out = pl.pallas_call(
        _decoder_kernel,
        out_shape=jax.ShapeDtypeStruct((N, H * W, 4 * Co_p), jnp.float32),
        grid_spec=pltpu.PrefetchScalarGridSpec(
            num_scalar_prefetch=0,
            grid=(N,),
            in_specs=[
                pl.BlockSpec((1, H + 2, W + 2, Cin), lambda n: (n, 0, 0, 0)),
                pl.BlockSpec((3, 3, Cin, Cm_p), lambda n: (0, 0, 0, 0)),
                pl.BlockSpec((1, Cm_p), lambda n: (0, 0)),
                pl.BlockSpec((4, 4, Cm_p, Co_p), lambda n: (0, 0, 0, 0)),
                pl.BlockSpec((1, Co_p), lambda n: (0, 0)),
            ],
            out_specs=pl.BlockSpec((1, H * W, 4 * Co_p), lambda n: (n, 0, 0)),
            scratch_shapes=[pltpu.VMEM((H + 2, W + 2, Cm_p), jnp.bfloat16)],
        ),
        compiler_params=pltpu.CompilerParams(
            dimension_semantics=("parallel",),
            vmem_limit_bytes=vmem_limit),
    )(xp, w1_hwio, b1r, w2_hwio, b2r)

    # phase interleave + channel un-pad + NHWC->NCHW in one fused transpose:
    # out[n, q*W + r, (2*ph+pw)*Co_p + co] -> y[n, co, 2q+ph, 2r+pw]
    y = out.reshape(N, H, W, 2, 2, Co_p)[..., :Co]
    y = jnp.transpose(y, (0, 5, 1, 3, 2, 4)).reshape(N, Co, 2 * H, 2 * W)
    return y


def ref_forward(x_nchw, w1, b1, w2, b2):
    """Pure-JAX f32 reference matching the PyTorch module semantics."""
    y = lax.conv_general_dilated(
        x_nchw, w1, (1, 1), ((1, 1), (1, 1)),
        dimension_numbers=('NCHW', 'OIHW', 'NCHW'))
    y = jnp.maximum(y + b1[None, :, None, None], 0.0)
    # ConvTranspose2d == lhs-dilated conv with spatially-flipped kernel
    w2_conv = jnp.transpose(w2[:, :, ::-1, ::-1], (1, 0, 2, 3))    # (Co, Cm, 4, 4)
    z = lax.conv_general_dilated(
        y, w2_conv, (1, 1), ((2, 2), (2, 2)), lhs_dilation=(2, 2),
        dimension_numbers=('NCHW', 'OIHW', 'NCHW'))
    z = jnp.maximum(z + b2[None, :, None, None], 0.0)
    return z


if __name__ == "__main__":
    N, Cin, Cm, Co, H, W = 2, 4, 8, 4, 16, 16
    key = jax.random.PRNGKey(0)
    k0, k1, k2, k3, k4 = jax.random.split(key, 5)
    x = jax.random.normal(k0, (N, Cin, H, W), jnp.float32)
    w1 = jax.random.normal(k1, (Cm, Cin, 3, 3), jnp.float32) * 0.1
    b1 = jax.random.normal(k2, (Cm,), jnp.float32) * 0.1
    w2 = jax.random.normal(k3, (Cm, Co, 4, 4), jnp.float32) * 0.1
    b2 = jax.random.normal(k4, (Co,), jnp.float32) * 0.1

    out = decoder_block_forward(x, w1, b1, w2, b2)
    out = jax.block_until_ready(out)

    ref = ref_forward(x, w1, b1, w2, b2)
    assert out.shape == (N, Co, 2 * H, 2 * W), out.shape
    # bf16 matmul inputs (f32 accumulation) -> loosened tolerance vs f32 ref.
    assert jnp.allclose(out, ref, atol=3e-2, rtol=3e-2), "mismatch vs reference"
    print("KERNEL_OK")
</pallas_src>

<mosaic_0001>
module attributes {stable_mosaic.version = 11 : i64} {
  func.func @_decoder_kernel(%arg0: i32, %arg1: memref<1x18x18x4xbf16, #tpu.memory_space<vmem>>, %arg2: memref<3x3x4x128xbf16, #tpu.memory_space<vmem>>, %arg3: memref<1x128xf32, #tpu.memory_space<vmem>>, %arg4: memref<4x4x128x32xbf16, #tpu.memory_space<vmem>>, %arg5: memref<1x32xf32, #tpu.memory_space<vmem>>, %arg6: memref<1x256x128xf32, #tpu.memory_space<vmem>>, %arg7: memref<18x18x128xbf16, #tpu.memory_space<vmem>>) attributes {dimension_semantics = [#tpu.dimension_semantics<parallel>], iteration_bounds = array<i64: 2>, scalar_prefetch = 0 : i64, scratch_operands = 1 : i64, tpu.core_type = #tpu.core_type<tc>, window_params = [{transform_indices = @transform_0, window_bounds = array<i64: 1, 18, 18, 4>}, {pipeline_mode = #tpu.pipeline_mode<synchronous>, transform_indices = @transform_1, window_bounds = array<i64: 3, 3, 4, 128>}, {pipeline_mode = #tpu.pipeline_mode<synchronous>, transform_indices = @transform_2, window_bounds = array<i64: 1, 128>}, {pipeline_mode = #tpu.pipeline_mode<synchronous>, transform_indices = @transform_3, window_bounds = array<i64: 4, 4, 128, 32>}, {pipeline_mode = #tpu.pipeline_mode<synchronous>, transform_indices = @transform_4, window_bounds = array<i64: 1, 32>}, {transform_indices = @transform_5, window_bounds = array<i64: 1, 256, 128>}]} {
    %c0 = arith.constant 0 : index
    %c0_0 = arith.constant 0 : index
    %c0_1 = arith.constant 0 : index
    %c0_2 = arith.constant 0 : index
    %0 = vector.load %arg1[%c0, %c0_0, %c0_1, %c0_2] : memref<1x18x18x4xbf16, #tpu.memory_space<vmem>>, vector<1x18x18x4xbf16>
    %1 = vector.shape_cast %0 : vector<1x18x18x4xbf16> to vector<18x18x4xbf16>
    %2 = vector.extract_strided_slice %1 {offsets = [0, 0, 0], sizes = [16, 16, 4], strides = [1, 1, 1]} : vector<18x18x4xbf16> to vector<16x16x4xbf16>
    %3 = vector.shape_cast %2 : vector<16x16x4xbf16> to vector<256x4xbf16>
    %c0_3 = arith.constant 0 : index
    %c0_4 = arith.constant 0 : index
    %c0_5 = arith.constant 0 : index
    %c0_6 = arith.constant 0 : index
    %4 = vector.load %arg2[%c0_3, %c0_4, %c0_5, %c0_6] : memref<3x3x4x128xbf16, #tpu.memory_space<vmem>>, vector<1x1x4x128xbf16>
    %5 = vector.shape_cast %4 : vector<1x1x4x128xbf16> to vector<4x128xbf16>
    %cst = arith.constant dense<0.000000e+00> : vector<256x128xf32>
    %6 = tpu.matmul %3, %5, %cst {dimension_numbers = #tpu.dot_dimension_numbers<[1], [0], [0], [1], [0, 0, 1, 1], [], []>} : vector<256x4xbf16>, vector<4x128xbf16>, vector<256x128xf32> -> vector<256x128xf32>
    %7 = vector.extract_strided_slice %1 {offsets = [0, 1, 0], sizes = [16, 16, 4], strides = [1, 1, 1]} : vector<18x18x4xbf16> to vector<16x16x4xbf16>
    %8 = vector.shape_cast %7 : vector<16x16x4xbf16> to vector<256x4xbf16>
    %c0_7 = arith.constant 0 : index
    %c1 = arith.constant 1 : index
    %c0_8 = arith.constant 0 : index
    %c0_9 = arith.constant 0 : index
    %9 = vector.load %arg2[%c0_7, %c1, %c0_8, %c0_9] : memref<3x3x4x128xbf16, #tpu.memory_space<vmem>>, vector<1x1x4x128xbf16>
    %10 = vector.shape_cast %9 : vector<1x1x4x128xbf16> to vector<4x128xbf16>
    %cst_10 = arith.constant dense<0.000000e+00> : vector<256x128xf32>
    %11 = tpu.matmul %8, %10, %cst_10 {dimension_numbers = #tpu.dot_dimension_numbers<[1], [0], [0], [1], [0, 0, 1, 1], [], []>} : vector<256x4xbf16>, vector<4x128xbf16>, vector<256x128xf32> -> vector<256x128xf32>
    %12 = arith.addf %6, %11 : vector<256x128xf32>
    %13 = vector.extract_strided_slice %1 {offsets = [0, 2, 0], sizes = [16, 16, 4], strides = [1, 1, 1]} : vector<18x18x4xbf16> to vector<16x16x4xbf16>
    %14 = vector.shape_cast %13 : vector<16x16x4xbf16> to vector<256x4xbf16>
    %c0_11 = arith.constant 0 : index
    %c2 = arith.constant 2 : index
    %c0_12 = arith.constant 0 : index
    %c0_13 = arith.constant 0 : index
    %15 = vector.load %arg2[%c0_11, %c2, %c0_12, %c0_13] : memref<3x3x4x128xbf16, #tpu.memory_space<vmem>>, vector<1x1x4x128xbf16>
    %16 = vector.shape_cast %15 : vector<1x1x4x128xbf16> to vector<4x128xbf16>
    %cst_14 = arith.constant dense<0.000000e+00> : vector<256x128xf32>
    %17 = tpu.matmul %14, %16, %cst_14 {dimension_numbers = #tpu.dot_dimension_numbers<[1], [0], [0], [1], [0, 0, 1, 1], [], []>} : vector<256x4xbf16>, vector<4x128xbf16>, vector<256x128xf32> -> vector<256x128xf32>
    %18 = arith.addf %12, %17 : vector<256x128xf32>
    %19 = vector.extract_strided_slice %1 {offsets = [1, 0, 0], sizes = [16, 16, 4], strides = [1, 1, 1]} : vector<18x18x4xbf16> to vector<16x16x4xbf16>
    %20 = vector.shape_cast %19 : vector<16x16x4xbf16> to vector<256x4xbf16>
    %c1_15 = arith.constant 1 : index
    %c0_16 = arith.constant 0 : index
    %c0_17 = arith.constant 0 : index
    %c0_18 = arith.constant 0 : index
    %21 = vector.load %arg2[%c1_15, %c0_16, %c0_17, %c0_18] : memref<3x3x4x128xbf16, #tpu.memory_space<vmem>>, vector<1x1x4x128xbf16>
    %22 = vector.shape_cast %21 : vector<1x1x4x128xbf16> to vector<4x128xbf16>
    %cst_19 = arith.constant dense<0.000000e+00> : vector<256x128xf32>
    %23 = tpu.matmul %20, %22, %cst_19 {dimension_numbers = #tpu.dot_dimension_numbers<[1], [0], [0], [1], [0, 0, 1, 1], [], []>} : vector<256x4xbf16>, vector<4x128xbf16>, vector<256x128xf32> -> vector<256x128xf32>
    %24 = arith.addf %18, %23 : vector<256x128xf32>
    %25 = vector.extract_strided_slice %1 {offsets = [1, 1, 0], sizes = [16, 16, 4], strides = [1, 1, 1]} : vector<18x18x4xbf16> to vector<16x16x4xbf16>
    %26 = vector.shape_cast %25 : vector<16x16x4xbf16> to vector<256x4xbf16>
    %c1_20 = arith.constant 1 : index
    %c1_21 = arith.constant 1 : index
    %c0_22 = arith.constant 0 : index
    %c0_23 = arith.constant 0 : index
    %27 = vector.load %arg2[%c1_20, %c1_21, %c0_22, %c0_23] : memref<3x3x4x128xbf16, #tpu.memory_space<vmem>>, vector<1x1x4x128xbf16>
    %28 = vector.shape_cast %27 : vector<1x1x4x128xbf16> to vector<4x128xbf16>
    %cst_24 = arith.constant dense<0.000000e+00> : vector<256x128xf32>
    %29 = tpu.matmul %26, %28, %cst_24 {dimension_numbers = #tpu.dot_dimension_numbers<[1], [0], [0], [1], [0, 0, 1, 1], [], []>} : vector<256x4xbf16>, vector<4x128xbf16>, vector<256x128xf32> -> vector<256x128xf32>
    %30 = arith.addf %24, %29 : vector<256x128xf32>
    %31 = vector.extract_strided_slice %1 {offsets = [1, 2, 0], sizes = [16, 16, 4], strides = [1, 1, 1]} : vector<18x18x4xbf16> to vector<16x16x4xbf16>
    %32 = vector.shape_cast %31 : vector<16x16x4xbf16> to vector<256x4xbf16>
    %c1_25 = arith.constant 1 : index
    %c2_26 = arith.constant 2 : index
    %c0_27 = arith.constant 0 : index
    %c0_28 = arith.constant 0 : index
    %33 = vector.load %arg2[%c1_25, %c2_26, %c0_27, %c0_28] : memref<3x3x4x128xbf16, #tpu.memory_space<vmem>>, vector<1x1x4x128xbf16>
    %34 = vector.shape_cast %33 : vector<1x1x4x128xbf16> to vector<4x128xbf16>
    %cst_29 = arith.constant dense<0.000000e+00> : vector<256x128xf32>
    %35 = tpu.matmul %32, %34, %cst_29 {dimension_numbers = #tpu.dot_dimension_numbers<[1], [0], [0], [1], [0, 0, 1, 1], [], []>} : vector<256x4xbf16>, vector<4x128xbf16>, vector<256x128xf32> -> vector<256x128xf32>
    %36 = arith.addf %30, %35 : vector<256x128xf32>
    %37 = vector.extract_strided_slice %1 {offsets = [2, 0, 0], sizes = [16, 16, 4], strides = [1, 1, 1]} : vector<18x18x4xbf16> to vector<16x16x4xbf16>
    %38 = vector.shape_cast %37 : vector<16x16x4xbf16> to vector<256x4xbf16>
    %c2_30 = arith.constant 2 : index
    %c0_31 = arith.constant 0 : index
    %c0_32 = arith.constant 0 : index
    %c0_33 = arith.constant 0 : index
    %39 = vector.load %arg2[%c2_30, %c0_31, %c0_32, %c0_33] : memref<3x3x4x128xbf16, #tpu.memory_space<vmem>>, vector<1x1x4x128xbf16>
    %40 = vector.shape_cast %39 : vector<1x1x4x128xbf16> to vector<4x128xbf16>
    %cst_34 = arith.constant dense<0.000000e+00> : vector<256x128xf32>
    %41 = tpu.matmul %38, %40, %cst_34 {dimension_numbers = #tpu.dot_dimension_numbers<[1], [0], [0], [1], [0, 0, 1, 1], [], []>} : vector<256x4xbf16>, vector<4x128xbf16>, vector<256x128xf32> -> vector<256x128xf32>
    %42 = arith.addf %36, %41 : vector<256x128xf32>
    %43 = vector.extract_strided_slice %1 {offsets = [2, 1, 0], sizes = [16, 16, 4], strides = [1, 1, 1]} : vector<18x18x4xbf16> to vector<16x16x4xbf16>
    %44 = vector.shape_cast %43 : vector<16x16x4xbf16> to vector<256x4xbf16>
    %c2_35 = arith.constant 2 : index
    %c1_36 = arith.constant 1 : index
    %c0_37 = arith.constant 0 : index
    %c0_38 = arith.constant 0 : index
    %45 = vector.load %arg2[%c2_35, %c1_36, %c0_37, %c0_38] : memref<3x3x4x128xbf16, #tpu.memory_space<vmem>>, vector<1x1x4x128xbf16>
    %46 = vector.shape_cast %45 : vector<1x1x4x128xbf16> to vector<4x128xbf16>
    %cst_39 = arith.constant dense<0.000000e+00> : vector<256x128xf32>
    %47 = tpu.matmul %44, %46, %cst_39 {dimension_numbers = #tpu.dot_dimension_numbers<[1], [0], [0], [1], [0, 0, 1, 1], [], []>} : vector<256x4xbf16>, vector<4x128xbf16>, vector<256x128xf32> -> vector<256x128xf32>
    %48 = arith.addf %42, %47 : vector<256x128xf32>
    %49 = vector.extract_strided_slice %1 {offsets = [2, 2, 0], sizes = [16, 16, 4], strides = [1, 1, 1]} : vector<18x18x4xbf16> to vector<16x16x4xbf16>
    %50 = vector.shape_cast %49 : vector<16x16x4xbf16> to vector<256x4xbf16>
    %c2_40 = arith.constant 2 : index
    %c2_41 = arith.constant 2 : index
    %c0_42 = arith.constant 0 : index
    %c0_43 = arith.constant 0 : index
    %51 = vector.load %arg2[%c2_40, %c2_41, %c0_42, %c0_43] : memref<3x3x4x128xbf16, #tpu.memory_space<vmem>>, vector<1x1x4x128xbf16>
    %52 = vector.shape_cast %51 : vector<1x1x4x128xbf16> to vector<4x128xbf16>
    %cst_44 = arith.constant dense<0.000000e+00> : vector<256x128xf32>
    %53 = tpu.matmul %50, %52, %cst_44 {dimension_numbers = #tpu.dot_dimension_numbers<[1], [0], [0], [1], [0, 0, 1, 1], [], []>} : vector<256x4xbf16>, vector<4x128xbf16>, vector<256x128xf32> -> vector<256x128xf32>
    %54 = arith.addf %48, %53 : vector<256x128xf32>
    %c0_45 = arith.constant 0 : index
    %c0_46 = arith.constant 0 : index
    %55 = vector.load %arg3[%c0_45, %c0_46] : memref<1x128xf32, #tpu.memory_space<vmem>>, vector<1x128xf32>
    %56 = vector.broadcast %55 : vector<1x128xf32> to vector<256x128xf32>
    %57 = arith.addf %54, %56 : vector<256x128xf32>
    %cst_47 = arith.constant 0.000000e+00 : f32
    %58 = vector.broadcast %cst_47 : f32 to vector<256x128xf32>
    %59 = arith.maximumf %57, %58 : vector<256x128xf32>
    %60 = arith.truncf %59 : vector<256x128xf32> to vector<256x128xbf16>
    %cst_48 = arith.constant 0.000000e+00 : bf16
    %61 = vector.broadcast %cst_48 : bf16 to vector<1x18x128xbf16>
    %c0_49 = arith.constant 0 : index
    %c0_50 = arith.constant 0 : index
    %c0_51 = arith.constant 0 : index
    %62 = vector.load %arg7[%c0_49, %c0_50, %c0_51] : memref<18x18x128xbf16, #tpu.memory_space<vmem>>, vector<1x18x128xbf16>
    tpu.vector_store %arg7[%c0_49, %c0_50, %c0_51], %61 {strides = array<i32>} : memref<18x18x128xbf16, #tpu.memory_space<vmem>>, vector<1x18x128xbf16>,
    %cst_52 = arith.constant 0.000000e+00 : bf16
    %63 = vector.broadcast %cst_52 : bf16 to vector<1x18x128xbf16>
    %c17 = arith.constant 17 : index
    %c0_53 = arith.constant 0 : index
    %c0_54 = arith.constant 0 : index
    %64 = vector.load %arg7[%c17, %c0_53, %c0_54] : memref<18x18x128xbf16, #tpu.memory_space<vmem>>, vector<1x18x128xbf16>
    tpu.vector_store %arg7[%c17, %c0_53, %c0_54], %63 {strides = array<i32>} : memref<18x18x128xbf16, #tpu.memory_space<vmem>>, vector<1x18x128xbf16>,
    %cst_55 = arith.constant 0.000000e+00 : bf16
    %65 = vector.broadcast %cst_55 : bf16 to vector<18x1x128xbf16>
    %c0_56 = arith.constant 0 : index
    %c0_57 = arith.constant 0 : index
    %c0_58 = arith.constant 0 : index
    %66 = vector.load %arg7[%c0_56, %c0_57, %c0_58] : memref<18x18x128xbf16, #tpu.memory_space<vmem>>, vector<18x1x128xbf16>
    tpu.vector_store %arg7[%c0_56, %c0_57, %c0_58], %65 {strides = array<i32>} : memref<18x18x128xbf16, #tpu.memory_space<vmem>>, vector<18x1x128xbf16>,
    %cst_59 = arith.constant 0.000000e+00 : bf16
    %67 = vector.broadcast %cst_59 : bf16 to vector<18x1x128xbf16>
    %c0_60 = arith.constant 0 : index
    %c17_61 = arith.constant 17 : index
    %c0_62 = arith.constant 0 : index
    %68 = vector.load %arg7[%c0_60, %c17_61, %c0_62] : memref<18x18x128xbf16, #tpu.memory_space<vmem>>, vector<18x1x128xbf16>
    tpu.vector_store %arg7[%c0_60, %c17_61, %c0_62], %67 {strides = array<i32>} : memref<18x18x128xbf16, #tpu.memory_space<vmem>>, vector<18x1x128xbf16>,
    %69 = vector.shape_cast %60 : vector<256x128xbf16> to vector<16x16x128xbf16>
    %c1_63 = arith.constant 1 : index
    %c1_64 = arith.constant 1 : index
    %c0_65 = arith.constant 0 : index
    %70 = vector.load %arg7[%c1_63, %c1_64, %c0_65] : memref<18x18x128xbf16, #tpu.memory_space<vmem>>, vector<16x16x128xbf16>
    tpu.vector_store %arg7[%c1_63, %c1_64, %c0_65], %69 {strides = array<i32>} : memref<18x18x128xbf16, #tpu.memory_space<vmem>>, vector<16x16x128xbf16>,
    %c1_66 = arith.constant 1 : index
    %c1_67 = arith.constant 1 : index
    %c0_68 = arith.constant 0 : index
    %71 = vector.load %arg7[%c1_66, %c1_67, %c0_68] : memref<18x18x128xbf16, #tpu.memory_space<vmem>>, vector<16x16x128xbf16>
    %72 = vector.shape_cast %71 : vector<16x16x128xbf16> to vector<256x128xbf16>
    %c1_69 = arith.constant 1 : index
    %c1_70 = arith.constant 1 : index
    %c0_71 = arith.constant 0 : index
    %c0_72 = arith.constant 0 : index
    %73 = vector.load %arg4[%c1_69, %c1_70, %c0_71, %c0_72] : memref<4x4x128x32xbf16, #tpu.memory_space<vmem>>, vector<1x1x128x32xbf16>
    %74 = vector.shape_cast %73 : vector<1x1x128x32xbf16> to vector<128x32xbf16>
    %cst_73 = arith.constant dense<0.000000e+00> : vector<256x32xf32>
    %75 = tpu.matmul %72, %74, %cst_73 {dimension_numbers = #tpu.dot_dimension_numbers<[1], [0], [0], [1], [0, 0, 1, 1], [], []>} : vector<256x128xbf16>, vector<128x32xbf16>, vector<256x32xf32> -> vector<256x32xf32>
    %c1_74 = arith.constant 1 : index
    %c0_75 = arith.constant 0 : index
    %c0_76 = arith.constant 0 : index
    %76 = vector.load %arg7[%c1_74, %c0_75, %c0_76] : memref<18x18x128xbf16, #tpu.memory_space<vmem>>, vector<16x16x128xbf16>
    %77 = vector.shape_cast %76 : vector<16x16x128xbf16> to vector<256x128xbf16>
    %c1_77 = arith.constant 1 : index
    %c3 = arith.constant 3 : index
    %c0_78 = arith.constant 0 : index
    %c0_79 = arith.constant 0 : index
    %78 = vector.load %arg4[%c1_77, %c3, %c0_78, %c0_79] : memref<4x4x128x32xbf16, #tpu.memory_space<vmem>>, vector<1x1x128x32xbf16>
    %79 = vector.shape_cast %78 : vector<1x1x128x32xbf16> to vector<128x32xbf16>
    %cst_80 = arith.constant dense<0.000000e+00> : vector<256x32xf32>
    %80 = tpu.matmul %77, %79, %cst_80 {dimension_numbers = #tpu.dot_dimension_numbers<[1], [0], [0], [1], [0, 0, 1, 1], [], []>} : vector<256x128xbf16>, vector<128x32xbf16>, vector<256x32xf32> -> vector<256x32xf32>
    %81 = arith.addf %75, %80 : vector<256x32xf32>
    %c0_81 = arith.constant 0 : index
    %c1_82 = arith.constant 1 : index
    %c0_83 = arith.constant 0 : index
    %82 = vector.load %arg7[%c0_81, %c1_82, %c0_83] : memref<18x18x128xbf16, #tpu.memory_space<vmem>>, vector<16x16x128xbf16>
    %83 = vector.shape_cast %82 : vector<16x16x128xbf16> to vector<256x128xbf16>
    %c3_84 = arith.constant 3 : index
    %c1_85 = arith.constant 1 : index
    %c0_86 = arith.constant 0 : index
    %c0_87 = arith.constant 0 : index
    %84 = vector.load %arg4[%c3_84, %c1_85, %c0_86, %c0_87] : memref<4x4x128x32xbf16, #tpu.memory_space<vmem>>, vector<1x1x128x32xbf16>
    %85 = vector.shape_cast %84 : vector<1x1x128x32xbf16> to vector<128x32xbf16>
    %cst_88 = arith.constant dense<0.000000e+00> : vector<256x32xf32>
    %86 = tpu.matmul %83, %85, %cst_88 {dimension_numbers = #tpu.dot_dimension_numbers<[1], [0], [0], [1], [0, 0, 1, 1], [], []>} : vector<256x128xbf16>, vector<128x32xbf16>, vector<256x32xf32> -> vector<256x32xf32>
    %87 = arith.addf %81, %86 : vector<256x32xf32>
    %c0_89 = arith.constant 0 : index
    %c0_90 = arith.constant 0 : index
    %c0_91 = arith.constant 0 : index
    %88 = vector.load %arg7[%c0_89, %c0_90, %c0_91] : memref<18x18x128xbf16, #tpu.memory_space<vmem>>, vector<16x16x128xbf16>
    %89 = vector.shape_cast %88 : vector<16x16x128xbf16> to vector<256x128xbf16>
    %c3_92 = arith.constant 3 : index
    %c3_93 = arith.constant 3 : index
    %c0_94 = arith.constant 0 : index
    %c0_95 = arith.constant 0 : index
    %90 = vector.load %arg4[%c3_92, %c3_93, %c0_94, %c0_95] : memref<4x4x128x32xbf16, #tpu.memory_space<vmem>>, vector<1x1x128x32xbf16>
    %91 = vector.shape_cast %90 : vector<1x1x128x32xbf16> to vector<128x32xbf16>
    %cst_96 = arith.constant dense<0.000000e+00> : vector<256x32xf32>
    %92 = tpu.matmul %89, %91, %cst_96 {dimension_numbers = #tpu.dot_dimension_numbers<[1], [0], [0], [1], [0, 0, 1, 1], [], []>} : vector<256x128xbf16>, vector<128x32xbf16>, vector<256x32xf32> -> vector<256x32xf32>
    %93 = arith.addf %87, %92 : vector<256x32xf32>
    %c0_97 = arith.constant 0 : index
    %c0_98 = arith.constant 0 : index
    %94 = vector.load %arg5[%c0_97, %c0_98] : memref<1x32xf32, #tpu.memory_space<vmem>>, vector<1x32xf32>
    %95 = vector.broadcast %94 : vector<1x32xf32> to vector<256x32xf32>
    %96 = arith.addf %93, %95 : vector<256x32xf32>
    %cst_99 = arith.constant 0.000000e+00 : f32
    %97 = vector.broadcast %cst_99 : f32 to vector<256x32xf32>
    %98 = arith.maximumf %96, %97 : vector<256x32xf32>
    %c1_100 = arith.constant 1 : index
    %c2_101 = arith.constant 2 : index
    %c0_102 = arith.constant 0 : index
    %99 = vector.load %arg7[%c1_100, %c2_101, %c0_102] : memref<18x18x128xbf16, #tpu.memory_space<vmem>>, vector<16x16x128xbf16>
    %100 = vector.shape_cast %99 : vector<16x16x128xbf16> to vector<256x128xbf16>
    %c1_103 = arith.constant 1 : index
    %c0_104 = arith.constant 0 : index
    %c0_105 = arith.constant 0 : index
    %c0_106 = arith.constant 0 : index
    %101 = vector.load %arg4[%c1_103, %c0_104, %c0_105, %c0_106] : memref<4x4x128x32xbf16, #tpu.memory_space<vmem>>, vector<1x1x128x32xbf16>
    %102 = vector.shape_cast %101 : vector<1x1x128x32xbf16> to vector<128x32xbf16>
    %cst_107 = arith.constant dense<0.000000e+00> : vector<256x32xf32>
    %103 = tpu.matmul %100, %102, %cst_107 {dimension_numbers = #tpu.dot_dimension_numbers<[1], [0], [0], [1], [0, 0, 1, 1], [], []>} : vector<256x128xbf16>, vector<128x32xbf16>, vector<256x32xf32> -> vector<256x32xf32>
    %c1_108 = arith.constant 1 : index
    %c1_109 = arith.constant 1 : index
    %c0_110 = arith.constant 0 : index
    %104 = vector.load %arg7[%c1_108, %c1_109, %c0_110] : memref<18x18x128xbf16, #tpu.memory_space<vmem>>, vector<16x16x128xbf16>
    %105 = vector.shape_cast %104 : vector<16x16x128xbf16> to vector<256x128xbf16>
    %c1_111 = arith.constant 1 : index
    %c2_112 = arith.constant 2 : index
    %c0_113 = arith.constant 0 : index
    %c0_114 = arith.constant 0 : index
    %106 = vector.load %arg4[%c1_111, %c2_112, %c0_113, %c0_114] : memref<4x4x128x32xbf16, #tpu.memory_space<vmem>>, vector<1x1x128x32xbf16>
    %107 = vector.shape_cast %106 : vector<1x1x128x32xbf16> to vector<128x32xbf16>
    %cst_115 = arith.constant dense<0.000000e+00> : vector<256x32xf32>
    %108 = tpu.matmul %105, %107, %cst_115 {dimension_numbers = #tpu.dot_dimension_numbers<[1], [0], [0], [1], [0, 0, 1, 1], [], []>} : vector<256x128xbf16>, vector<128x32xbf16>, vector<256x32xf32> -> vector<256x32xf32>
    %109 = arith.addf %103, %108 : vector<256x32xf32>
    %c0_116 = arith.constant 0 : index
    %c2_117 = arith.constant 2 : index
    %c0_118 = arith.constant 0 : index
    %110 = vector.load %arg7[%c0_116, %c2_117, %c0_118] : memref<18x18x128xbf16, #tpu.memory_space<vmem>>, vector<16x16x128xbf16>
    %111 = vector.shape_cast %110 : vector<16x16x128xbf16> to vector<256x128xbf16>
    %c3_119 = arith.constant 3 : index
    %c0_120 = arith.constant 0 : index
    %c0_121 = arith.constant 0 : index
    %c0_122 = arith.constant 0 : index
    %112 = vector.load %arg4[%c3_119, %c0_120, %c0_121, %c0_122] : memref<4x4x128x32xbf16, #tpu.memory_space<vmem>>, vector<1x1x128x32xbf16>
    %113 = vector.shape_cast %112 : vector<1x1x128x32xbf16> to vector<128x32xbf16>
    %cst_123 = arith.constant dense<0.000000e+00> : vector<256x32xf32>
    %114 = tpu.matmul %111, %113, %cst_123 {dimension_numbers = #tpu.dot_dimension_numbers<[1], [0], [0], [1], [0, 0, 1, 1], [], []>} : vector<256x128xbf16>, vector<128x32xbf16>, vector<256x32xf32> -> vector<256x32xf32>
    %115 = arith.addf %109, %114 : vector<256x32xf32>
    %c0_124 = arith.constant 0 : index
    %c1_125 = arith.constant 1 : index
    %c0_126 = arith.constant 0 : index
    %116 = vector.load %arg7[%c0_124, %c1_125, %c0_126] : memref<18x18x128xbf16, #tpu.memory_space<vmem>>, vector<16x16x128xbf16>
    %117 = vector.shape_cast %116 : vector<16x16x128xbf16> to vector<256x128xbf16>
    %c3_127 = arith.constant 3 : index
    %c2_128 = arith.constant 2 : index
    %c0_129 = arith.constant 0 : index
    %c0_130 = arith.constant 0 : index
    %118 = vector.load %arg4[%c3_127, %c2_128, %c0_129, %c0_130] : memref<4x4x128x32xbf16, #tpu.memory_space<vmem>>, vector<1x1x128x32xbf16>
    %119 = vector.shape_cast %118 : vector<1x1x128x32xbf16> to vector<128x32xbf16>
    %cst_131 = arith.constant dense<0.000000e+00> : vector<256x32xf32>
    %120 = tpu.matmul %117, %119, %cst_131 {dimension_numbers = #tpu.dot_dimension_numbers<[1], [0], [0], [1], [0, 0, 1, 1], [], []>} : vector<256x128xbf16>, vector<128x32xbf16>, vector<256x32xf32> -> vector<256x32xf32>
    %121 = arith.addf %115, %120 : vector<256x32xf32>
    %c0_132 = arith.constant 0 : index
    %c0_133 = arith.constant 0 : index
    %122 = vector.load %arg5[%c0_132, %c0_133] : memref<1x32xf32, #tpu.memory_space<vmem>>, vector<1x32xf32>
    %123 = vector.broadcast %122 : vector<1x32xf32> to vector<256x32xf32>
    %124 = arith.addf %121, %123 : vector<256x32xf32>
    %cst_134 = arith.constant 0.000000e+00 : f32
    %125 = vector.broadcast %cst_134 : f32 to vector<256x32xf32>
    %126 = arith.maximumf %124, %125 : vector<256x32xf32>
    %c2_135 = arith.constant 2 : index
    %c1_136 = arith.constant 1 : index
    %c0_137 = arith.constant 0 : index
    %127 = vector.load %arg7[%c2_135, %c1_136, %c0_137] : memref<18x18x128xbf16, #tpu.memory_space<vmem>>, vector<16x16x128xbf16>
    %128 = vector.shape_cast %127 : vector<16x16x128xbf16> to vector<256x128xbf16>
    %c0_138 = arith.constant 0 : index
    %c1_139 = arith.constant 1 : index
    %c0_140 = arith.constant 0 : index
    %c0_141 = arith.constant 0 : index
    %129 = vector.load %arg4[%c0_138, %c1_139, %c0_140, %c0_141] : memref<4x4x128x32xbf16, #tpu.memory_space<vmem>>, vector<1x1x128x32xbf16>
    %130 = vector.shape_cast %129 : vector<1x1x128x32xbf16> to vector<128x32xbf16>
    %cst_142 = arith.constant dense<0.000000e+00> : vector<256x32xf32>
    %131 = tpu.matmul %128, %130, %cst_142 {dimension_numbers = #tpu.dot_dimension_numbers<[1], [0], [0], [1], [0, 0, 1, 1], [], []>} : vector<256x128xbf16>, vector<128x32xbf16>, vector<256x32xf32> -> vector<256x32xf32>
    %c2_143 = arith.constant 2 : index
    %c0_144 = arith.constant 0 : index
    %c0_145 = arith.constant 0 : index
    %132 = vector.load %arg7[%c2_143, %c0_144, %c0_145] : memref<18x18x128xbf16, #tpu.memory_space<vmem>>, vector<16x16x128xbf16>
    %133 = vector.shape_cast %132 : vector<16x16x128xbf16> to vector<256x128xbf16>
    %c0_146 = arith.constant 0 : index
    %c3_147 = arith.constant 3 : index
    %c0_148 = arith.constant 0 : index
    %c0_149 = arith.constant 0 : index
    %134 = vector.load %arg4[%c0_146, %c3_147, %c0_148, %c0_149] : memref<4x4x128x32xbf16, #tpu.memory_space<vmem>>, vector<1x1x128x32xbf16>
    %135 = vector.shape_cast %134 : vector<1x1x128x32xbf16> to vector<128x32xbf16>
    %cst_150 = arith.constant dense<0.000000e+00> : vector<256x32xf32>
    %136 = tpu.matmul %133, %135, %cst_150 {dimension_numbers = #tpu.dot_dimension_numbers<[1], [0], [0], [1], [0, 0, 1, 1], [], []>} : vector<256x128xbf16>, vector<128x32xbf16>, vector<256x32xf32> -> vector<256x32xf32>
    %137 = arith.addf %131, %136 : vector<256x32xf32>
    %c1_151 = arith.constant 1 : index
    %c1_152 = arith.constant 1 : index
    %c0_153 = arith.constant 0 : index
    %138 = vector.load %arg7[%c1_151, %c1_152, %c0_153] : memref<18x18x128xbf16, #tpu.memory_space<vmem>>, vector<16x16x128xbf16>
    %139 = vector.shape_cast %138 : vector<16x16x128xbf16> to vector<256x128xbf16>
    %c2_154 = arith.constant 2 : index
    %c1_155 = arith.constant 1 : index
    %c0_156 = arith.constant 0 : index
    %c0_157 = arith.constant 0 : index
    %140 = vector.load %arg4[%c2_154, %c1_155, %c0_156, %c0_157] : memref<4x4x128x32xbf16, #tpu.memory_space<vmem>>, vector<1x1x128x32xbf16>
    %141 = vector.shape_cast %140 : vector<1x1x128x32xbf16> to vector<128x32xbf16>
    %cst_158 = arith.constant dense<0.000000e+00> : vector<256x32xf32>
    %142 = tpu.matmul %139, %141, %cst_158 {dimension_numbers = #tpu.dot_dimension_numbers<[1], [0], [0], [1], [0, 0, 1, 1], [], []>} : vector<256x128xbf16>, vector<128x32xbf16>, vector<256x32xf32> -> vector<256x32xf32>
    %143 = arith.addf %137, %142 : vector<256x32xf32>
    %c1_159 = arith.constant 1 : index
    %c0_160 = arith.constant 0 : index
    %c0_161 = arith.constant 0 : index
    %144 = vector.load %arg7[%c1_159, %c0_160, %c0_161] : memref<18x18x128xbf16, #tpu.memory_space<vmem>>, vector<16x16x128xbf16>
    %145 = vector.shape_cast %144 : vector<16x16x128xbf16> to vector<256x128xbf16>
    %c2_162 = arith.constant 2 : index
    %c3_163 = arith.constant 3 : index
    %c0_164 = arith.constant 0 : index
    %c0_165 = arith.constant 0 : index
    %146 = vector.load %arg4[%c2_162, %c3_163, %c0_164, %c0_165] : memref<4x4x128x32xbf16, #tpu.memory_space<vmem>>, vector<1x1x128x32xbf16>
    %147 = vector.shape_cast %146 : vector<1x1x128x32xbf16> to vector<128x32xbf16>
    %cst_166 = arith.constant dense<0.000000e+00> : vector<256x32xf32>
    %148 = tpu.matmul %145, %147, %cst_166 {dimension_numbers = #tpu.dot_dimension_numbers<[1], [0], [0], [1], [0, 0, 1, 1], [], []>} : vector<256x128xbf16>, vector<128x32xbf16>, vector<256x32xf32> -> vector<256x32xf32>
    %149 = arith.addf %143, %148 : vector<256x32xf32>
    %c0_167 = arith.constant 0 : index
    %c0_168 = arith.constant 0 : index
    %150 = vector.load %arg5[%c0_167, %c0_168] : memref<1x32xf32, #tpu.memory_space<vmem>>, vector<1x32xf32>
    %151 = vector.broadcast %150 : vector<1x32xf32> to vector<256x32xf32>
    %152 = arith.addf %149, %151 : vector<256x32xf32>
    %cst_169 = arith.constant 0.000000e+00 : f32
    %153 = vector.broadcast %cst_169 : f32 to vector<256x32xf32>
    %154 = arith.maximumf %152, %153 : vector<256x32xf32>
    %c2_170 = arith.constant 2 : index
    %c2_171 = arith.constant 2 : index
    %c0_172 = arith.constant 0 : index
    %155 = vector.load %arg7[%c2_170, %c2_171, %c0_172] : memref<18x18x128xbf16, #tpu.memory_space<vmem>>, vector<16x16x128xbf16>
    %156 = vector.shape_cast %155 : vector<16x16x128xbf16> to vector<256x128xbf16>
    %c0_173 = arith.constant 0 : index
    %c0_174 = arith.constant 0 : index
    %c0_175 = arith.constant 0 : index
    %c0_176 = arith.constant 0 : index
    %157 = vector.load %arg4[%c0_173, %c0_174, %c0_175, %c0_176] : memref<4x4x128x32xbf16, #tpu.memory_space<vmem>>, vector<1x1x128x32xbf16>
    %158 = vector.shape_cast %157 : vector<1x1x128x32xbf16> to vector<128x32xbf16>
    %cst_177 = arith.constant dense<0.000000e+00> : vector<256x32xf32>
    %159 = tpu.matmul %156, %158, %cst_177 {dimension_numbers = #tpu.dot_dimension_numbers<[1], [0], [0], [1], [0, 0, 1, 1], [], []>} : vector<256x128xbf16>, vector<128x32xbf16>, vector<256x32xf32> -> vector<256x32xf32>
    %c2_178 = arith.constant 2 : index
    %c1_179 = arith.constant 1 : index
    %c0_180 = arith.constant 0 : index
    %160 = vector.load %arg7[%c2_178, %c1_179, %c0_180] : memref<18x18x128xbf16, #tpu.memory_space<vmem>>, vector<16x16x128xbf16>
    %161 = vector.shape_cast %160 : vector<16x16x128xbf16> to vector<256x128xbf16>
    %c0_181 = arith.constant 0 : index
    %c2_182 = arith.constant 2 : index
    %c0_183 = arith.constant 0 : index
    %c0_184 = arith.constant 0 : index
    %162 = vector.load %arg4[%c0_181, %c2_182, %c0_183, %c0_184] : memref<4x4x128x32xbf16, #tpu.memory_space<vmem>>, vector<1x1x128x32xbf16>
    %163 = vector.shape_cast %162 : vector<1x1x128x32xbf16> to vector<128x32xbf16>
    %cst_185 = arith.constant dense<0.000000e+00> : vector<256x32xf32>
    %164 = tpu.matmul %161, %163, %cst_185 {dimension_numbers = #tpu.dot_dimension_numbers<[1], [0], [0], [1], [0, 0, 1, 1], [], []>} : vector<256x128xbf16>, vector<128x32xbf16>, vector<256x32xf32> -> vector<256x32xf32>
    %165 = arith.addf %159, %164 : vector<256x32xf32>
    %c1_186 = arith.constant 1 : index
    %c2_187 = arith.constant 2 : index
    %c0_188 = arith.constant 0 : index
    %166 = vector.load %arg7[%c1_186, %c2_187, %c0_188] : memref<18x18x128xbf16, #tpu.memory_space<vmem>>, vector<16x16x128xbf16>
    %167 = vector.shape_cast %166 : vector<16x16x128xbf16> to vector<256x128xbf16>
    %c2_189 = arith.constant 2 : index
    %c0_190 = arith.constant 0 : index
    %c0_191 = arith.constant 0 : index
    %c0_192 = arith.constant 0 : index
    %168 = vector.load %arg4[%c2_189, %c0_190, %c0_191, %c0_192] : memref<4x4x128x32xbf16, #tpu.memory_space<vmem>>, vector<1x1x128x32xbf16>
    %169 = vector.shape_cast %168 : vector<1x1x128x32xbf16> to vector<128x32xbf16>
    %cst_193 = arith.constant dense<0.000000e+00> : vector<256x32xf32>
    %170 = tpu.matmul %167, %169, %cst_193 {dimension_numbers = #tpu.dot_dimension_numbers<[1], [0], [0], [1], [0, 0, 1, 1], [], []>} : vector<256x128xbf16>, vector<128x32xbf16>, vector<256x32xf32> -> vector<256x32xf32>
    %171 = arith.addf %165, %170 : vector<256x32xf32>
    %c1_194 = arith.constant 1 : index
    %c1_195 = arith.constant 1 : index
    %c0_196 = arith.constant 0 : index
    %172 = vector.load %arg7[%c1_194, %c1_195, %c0_196] : memref<18x18x128xbf16, #tpu.memory_space<vmem>>, vector<16x16x128xbf16>
    %173 = vector.shape_cast %172 : vector<16x16x128xbf16> to vector<256x128xbf16>
    %c2_197 = arith.constant 2 : index
    %c2_198 = arith.constant 2 : index
    %c0_199 = arith.constant 0 : index
    %c0_200 = arith.constant 0 : index
    %174 = vector.load %arg4[%c2_197, %c2_198, %c0_199, %c0_200] : memref<4x4x128x32xbf16, #tpu.memory_space<vmem>>, vector<1x1x128x32xbf16>
    %175 = vector.shape_cast %174 : vector<1x1x128x32xbf16> to vector<128x32xbf16>
    %cst_201 = arith.constant dense<0.000000e+00> : vector<256x32xf32>
    %176 = tpu.matmul %173, %175, %cst_201 {dimension_numbers = #tpu.dot_dimension_numbers<[1], [0], [0], [1], [0, 0, 1, 1], [], []>} : vector<256x128xbf16>, vector<128x32xbf16>, vector<256x32xf32> -> vector<256x32xf32>
    %177 = arith.addf %171, %176 : vector<256x32xf32>
    %c0_202 = arith.constant 0 : index
    %c0_203 = arith.constant 0 : index
    %178 = vector.load %arg5[%c0_202, %c0_203] : memref<1x32xf32, #tpu.memory_space<vmem>>, vector<1x32xf32>
    %179 = vector.broadcast %178 : vector<1x32xf32> to vector<256x32xf32>
    %180 = arith.addf %177, %179 : vector<256x32xf32>
    %cst_204 = arith.constant 0.000000e+00 : f32
    %181 = vector.broadcast %cst_204 : f32 to vector<256x32xf32>
    %182 = arith.maximumf %180, %181 : vector<256x32xf32>
    %183 = tpu.concatenate %98, %126, %154, %182 in 1 : vector<256x32xf32>, vector<256x32xf32>, vector<256x32xf32>, vector<256x32xf32> -> vector<256x128xf32>
    %c0_205 = arith.constant 0 : index
    %c0_206 = arith.constant 0 : index
    %c0_207 = arith.constant 0 : index
    %184 = vector.load %arg6[%c0_205, %c0_206, %c0_207] : memref<1x256x128xf32, #tpu.memory_space<vmem>>, vector<1x256x128xf32>
    %185 = vector.shape_cast %184 : vector<1x256x128xf32> to vector<256x128xf32>
    %186 = vector.shape_cast %183 : vector<256x128xf32> to vector<1x256x128xf32>
    tpu.vector_store %arg6[%c0_205, %c0_206, %c0_207], %186 {strides = array<i32>} : memref<1x256x128xf32, #tpu.memory_space<vmem>>, vector<1x256x128xf32>,
    return
  }
  func.func @transform_0(%arg0: i32) -> (i32, i32, i32, i32) {
    %c0_i32 = arith.constant 0 : i32
    %c0_i32_0 = arith.constant 0 : i32
    %c0_i32_1 = arith.constant 0 : i32
    %c0_i32_2 = arith.constant 0 : i32
    return %arg0, %c0_i32, %c0_i32_0, %c0_i32_1 : i32, i32, i32, i32
  }
  func.func @transform_1(%arg0: i32) -> (i32, i32, i32, i32) {
    %c0_i32 = arith.constant 0 : i32
    %c0_i32_0 = arith.constant 0 : i32
    %c0_i32_1 = arith.constant 0 : i32
    %c0_i32_2 = arith.constant 0 : i32
    %c0_i32_3 = arith.constant 0 : i32
    return %c0_i32, %c0_i32_0, %c0_i32_1, %c0_i32_2 : i32, i32, i32, i32
  }
  func.func @transform_2(%arg0: i32) -> (i32, i32) {
    %c0_i32 = arith.constant 0 : i32
    %c0_i32_0 = arith.constant 0 : i32
    %c0_i32_1 = arith.constant 0 : i32
    return %c0_i32, %c0_i32_0 : i32, i32
  }
  func.func @transform_3(%arg0: i32) -> (i32, i32, i32, i32) {
    %c0_i32 = arith.constant 0 : i32
    %c0_i32_0 = arith.constant 0 : i32
    %c0_i32_1 = arith.constant 0 : i32
    %c0_i32_2 = arith.constant 0 : i32
    %c0_i32_3 = arith.constant 0 : i32
    return %c0_i32, %c0_i32_0, %c0_i32_1, %c0_i32_2 : i32, i32, i32, i32
  }
  func.func @transform_4(%arg0: i32) -> (i32, i32) {
    %c0_i32 = arith.constant 0 : i32
    %c0_i32_0 = arith.constant 0 : i32
    %c0_i32_1 = arith.constant 0 : i32
    return %c0_i32, %c0_i32_0 : i32, i32
  }
  func.func @transform_5(%arg0: i32) -> (i32, i32, i32) {
    %c0_i32 = arith.constant 0 : i32
    %c0_i32_0 = arith.constant 0 : i32
    %c0_i32_1 = arith.constant 0 : i32
    return %arg0, %c0_i32, %c0_i32_0 : i32, i32, i32
  }
}

</mosaic_0001>

<bundles_post_ra>
// kernel: tpu_custom_call.1
= control target key start
LH: loop header
LB: loop body
LE: loop exit
PB: predicated region body
PF: predicated region fallthrough
CT: control target
= control target key end

     0   :  { %10 = vsyncpa [#allocation4], 0  ;;  %s14601_s0 = inlined_call_operand.vmem [shape: bf16[2,18,18,4], index: 0, kind: input, shape index: {}]   ;;  %s14602_s1 = inlined_call_operand.vmem [shape: bf16[3,3,4,128], index: 1, kind: input, shape index: {}]   ;;  %s14603_s2 = inlined_call_operand.vmem [shape: f32[1,128], index: 2, kind: input, shape index: {}]   ;;  %s14604_s3 = inlined_call_operand.vmem [shape: bf16[4,4,128,32], index: 3, kind: input, shape index: {}]   ;;  %s14605_s4 = inlined_call_operand.vmem [shape: f32[1,32], index: 4, kind: input, shape index: {}]   ;;  %s14606_s5 = inlined_call_operand.hbm [shape: f32[2,256,128], index: 5, kind: output, shape index: {}]  }
   0x1   :  { %12 = vsyncpa [#allocation4 + $0x1], 0  ;;  %s10735_s18 = smov 0   ;;  %s10737_s19 = smov 0  }
   0x2   :  { %s10739_s20 = smov 0   ;;  %s10741_s21 = smov 0  }
   0x3 LB: > { %s10756_s22 = sadd.s32 4294967295, %s10697_s21   ;;  %s9017_s23 = sadd.s32 4294967294, %s10697_s21   ;;  %s10697_s21 = sphi %s10741_s21, %s14971_s21   ;;  %s10693_s20 = sphi %s10739_s20, %s14970_s20   ;;  %s10689_s19 = sphi %s10737_s19, %s14969_s19   ;;  %s10685_s18 = sphi %s10735_s18, %s14968_s18  }
   0x4   : > { %s10760_s24 = sadd.s32 1, %s10697_s21   ;;  %s135_s25 = sadd.s32 1, %s10693_s20 }
   0x5   : > { %s132_s26 = ssub.s32 %s10697_s21, %s10760_s24  ;;  %p145_p0 = scmp.ne.s32.totalorder %s10693_s20, %s10689_s19 }
   0x6   : > { %p133_p1 = scmp.eq.s32.totalorder %s132_s26, 0  ;;  %p146_p2 = scmp.eq.s32.totalorder %s10756_s22, 1 }
   0x7   : > { %p151_p3 = scmp.ne.s32.totalorder %s10689_s19, %s10685_s18  ;;  %p152_p4 = scmp.eq.s32.totalorder %s9017_s23, 1 }
   0x8   : > { %s10771_s27 = scalar_select %p133_p1, %s10693_s20, %s135_s25  }
   0x9   : > { %p10773_p5 = por %p146_p2, %p145_p0  ;;  %p10777_p6 = por %p152_p4, %p151_p3 }
   0xa   : > { %p9020_p7 = scmp.ge.s32.totalorder %s10697_s21, 1  ;;  %p190_p8 = scmp.lt.s32.totalorder %s10697_s21, 3 }
   0xc   : > { %p191_p9 = pnand %p9020_p7, %p190_p8 }
   0xe   : > { %194 = sbr.rel (%p191_p9) target bundleno = 1906 (0x772), region = 40 }
  0x13   : > { %v9023_v0 = vld [vmem:[%s14602_s1 + $0x2] sm:$0x3]  ;;  %vm765_vm0 = vcmask 1041408   ;;  %p218_p10 = scmp.lt.s32.totalorder %s10756_s22, 1  ;;  %v9136_v2 = vld [vmem:[%s14602_s1 + $0x4] sm:$0x3] }
  0x14   : > { %v767_v1 = vsel %vm765_vm0, %v9023_v0, 0  ;;  %v9153_v3 = vld [vmem:[%s14602_s1 + $0x6] sm:$0x3]  ;;  %v278_v4 = vld [vmem:[%s14602_s1] sm:$0x3]  ;;  %v1308_v5 = vsel %vm765_vm0, %v9136_v2, 0 }
  0x15   : > { %776 = vmatpush.bf16.msra.mxu0 %v767_v1  ;;  %10457 = vmatpush.bf16.msra.mxu1 %v767_v1  ;;  %s219_s7 = scalar_select %p218_p10, %s10756_s22, 1  ;;  %v1442_v6 = vsel %vm765_vm0, %v9153_v3, 0  ;;  %v987_v7 = vsel %vm765_vm0, %v278_v4, 0  ;;  %v9174_v8 = vld [vmem:[%s14602_s1 + $0x8] sm:$0x3]  ;;  %vm716_vm3 = vcmask 31744  }
  0x16   : > { %10458 = vmatpush.bf16.msra.mxu2 %v767_v1  ;;  %10459 = vmatpush.bf16.msra.mxu3 %v767_v1  ;;  %v1598_v9 = vsel %vm765_vm0, %v9174_v8, 0  ;;  %vm279_vm1 = vsmask.f32 3328  ;;  %vm280_vm2 = vsmask.f32 7440  ;;  %vm1094_vm5 = vcmask 1042432  }
  0x17   : > { %s10460_s14 = smul.u32 216, %s219_s7  ;;  %vm10846_vm4 = vmor %vm279_vm1, %vm280_vm2  ;;  %vm1095_vm6 = vcmask 1046532   ;;  %vm2398_vm8 = vcmask 1040384   ;;  %vm2399_vm9 = vsmask.f32 256  ;;  %vm2834_vm13 = vcmask 1043456  }
  0x18   : > { %vm11159_vm7 = vmor %vm1094_vm5, %vm1095_vm6  ;;  %vm2455_vm11 = vsmask.f32 7938  ;;  %vm2511_vm15 = vsmask.f32 4368  ;;  %s10700_s8 = smov 32   ;;  %vm8808_vm1 = vcmask 261120  }
  0x19   : > { %s10808_s25 = scalar_lea.vmem %s14601_s0, %s10460_s14  ;;  %996 = vmatpush.bf16.msrb.mxu1 %v987_v7  ;;  %1607 = vmatpush.bf16.msrb.mxu0 %v1598_v9  ;;  %vm11763_vm10 = vmand %vm2398_vm8, %vm2399_vm9  ;;  %s10701_s14 = smov 64   ;;  %vm8841_vm2 = vcmask 523264  }
  0x1a   : > { %1317 = vmatpush.bf16.msrb.mxu2 %v1308_v5  ;;  %1451 = vmatpush.bf16.msrb.mxu3 %v1442_v6  ;;  %v10811_v10 = vld [vmem:[%s10808_s25] sm:$0xf]  ;;  %v10814_v11 = vld [vmem:[%s10808_s25 + $0x4] sm:$0xf]  ;;  %v10817_v12 = vld [vmem:[%s10808_s25 + $0x8] sm:$0x1] }
  0x1b   : > { %v283_v13 = vshrl.u32 %v10811_v10, 16  ;;  %v286_v14 = vshll.u32 %v10811_v10, 16  ;;  %v292_v15 = vshll.u32 %v10814_v11, 16  ;;  %v296_v16 = vshrl.u32 %v10814_v11, 16  ;;  %v10824_v17 = vld [vmem:[%s10808_s25 + $0x30] sm:$0xf]  ;;  %vm11776_vm12 = vmand %vm2398_vm8, %vm2455_vm11 }
  0x1c   : > { %v302_v18 = vshll.u32 %v10817_v12, 16  ;;  %v10828_v19 = vld [vmem:[%s10808_s25 + $0x34] sm:$0xf]  ;;  %v10831_v20 = vld [vmem:[%s10808_s25 + $0x38] sm:$0x1]  ;;  %v379_v27 = vshrl.u32 %v10824_v17, 16  ;;  %vm11848_vm14 = vmand %vm2834_vm13, %vm2455_vm11 }
  0x1d   : > { %v285_v21 = vrot.slane %v283_v13, 4  ;;  %v288_v22 = vrot.slane %v286_v14, 5  ;;  %v294_v23 = vrot.slane %v292_v15, 5  ;;  %v298_v24 = vrot.slane %v296_v16, 4  ;;  %v10834_v25 = vld [vmem:[%s10808_s25 + $0x60] sm:$0xf] }
  0x1e   : > { %v304_v26 = vrot.slane %v302_v18, 5  ;;  %v382_v28 = vshll.u32 %v10824_v17, 16  ;;  %v388_v29 = vshll.u32 %v10828_v19, 16  ;;  %v392_v32 = vshrl.u32 %v10828_v19, 16  ;;  %v10842_v34 = vld [vmem:[%s10808_s25 + $0x64] sm:$0xf] }
  0x1f   : > { %v289_v30 = vor.u32 %v288_v22, %v285_v21  ;;  %v299_v31 = vor.u32 %v298_v24, %v294_v23  ;;  %v398_v33 = vshll.u32 %v10831_v20, 16  ;;  %v381_v36 = vrot.slane %v379_v27, 4  ;;  %v10852_v45 = vld [vmem:[%s10808_s25 + $0x68] sm:$0x1]  ;;  %v260_v61 = vld [vmem:[%s10808_s25 + $0x90] sm:$0xf] }
  0x20   : > { %v384_v37 = vrot.slane %v382_v28, 5  ;;  %v390_v38 = vrot.slane %v388_v29, 5  ;;  %v475_v39 = vshrl.u32 %v10834_v25, 16  ;;  %v394_v42 = vrot.slane %v392_v32, 4  ;;  %v261_v1 = vld [vmem:[%s10808_s25 + $0x94] sm:$0xf] }
  0x21   : > { %v290_v40 = vrot.slane %v289_v30, 4  ;;  %v300_v41 = vrot.slane %v299_v31, 4  ;;  %v400_v43 = vrot.slane %v398_v33, 5  ;;  %v478_v47 = vshll.u32 %v10834_v25, 16  ;;  %v262_v2 = vld [vmem:[%s10808_s25 + $0x98] sm:$0x1] }
  0x22   : > { %v385_v44 = vor.u32 %v384_v37, %v381_v36  ;;  %v477_v46 = vrot.slane %v475_v39, 4  ;;  %v484_v48 = vshll.u32 %v10842_v34, 16  ;;  %v395_v51 = vor.u32 %v394_v42, %v390_v38  ;;  %v10878_v27 = vld [vmem:[%s10808_s25 + $0x10] sm:$0xf]  ;;  %v10883_v32 = vld [vmem:[%s10808_s25 + $0x14] sm:$0x1] }
  0x23   : > { %v295_v49 = vsel %vm10846_vm4, %v290_v40, %v294_v23  ;;  %v305_v50 = vsel %vm10846_vm4, %v300_v41, %v304_v26  ;;  %v488_v52 = vshrl.u32 %v10842_v34, 16  ;;  %v480_v56 = vrot.slane %v478_v47, 5  ;;  %v10875_v26 = vld [vmem:[%s10808_s25 + $0xc] sm:$0xf]  ;;  %v10891_v42 = vld [vmem:[%s10808_s25 + $0x3c] sm:$0xf] }
  0x24   : > { %v668_v53 = vunpack.c.l.b16 %v295_v49  ;;  %v669_v54 = vunpack.c.l.b16 %v305_v50  ;;  %v386_v55 = vrot.slane %v385_v44, 4  ;;  %v396_v57 = vrot.slane %v395_v51, 4  ;;  %s215_s26 = sand.u32 1, %s10689_s19   ;;  %s10456_s7 = sshll.u32 %s10756_s22, 8 }
  0x25   : > { %v486_v58 = vrot.slane %v484_v48, 5  ;;  %v490_v59 = vrot.slane %v488_v52, 4  ;;  %v494_v60 = vshll.u32 %v10852_v45, 16  ;;  %v481_v0 = vor.u32 %v480_v56, %v477_v46  ;;  %v10898_v52 = vld [vmem:[%s10808_s25 + $0x40] sm:$0xf]  ;;  %s9021_s30 = sshll.u32 %s215_s26, 8  ;;  %s8951_s11 = scalar_lea.hbm %s14606_s5, %s10456_s7 }
  0x26   : > { %v700_v62 = vpack.c.b16 %v669_v54, %v668_v53  ;;  %v391_v63 = vsel %vm10846_vm4, %v386_v55, %v390_v38  ;;  %v401_v3 = vsel %vm10846_vm4, %v396_v57, %v400_v43  ;;  %v571_v9 = vshrl.u32 %v260_v61, 16  ;;  %v10905_v56 = vld [vmem:[%s10808_s25 + $0x44] sm:$0x1]  ;;  %s14429_s6 = scalar_lea.vmem [#allocation3], %s9021_s30  ;;  %s8940_s22 = scalar_lea.sflag [#allocation4], %s215_s26 }
  0x27   : > { %v676_v4 = vunpack.c.l.b16 %v391_v63  ;;  %v491_v5 = vor.u32 %v490_v59, %v486_v58  ;;  %v496_v6 = vrot.slane %v494_v60, 5  ;;  %v677_v7 = vunpack.c.l.b16 %v401_v3  ;;  %s8952_s12 = sshll.u32 %s14429_s6, 4  ;;  %s8953_s12 = int_to_ptr.vmem [resolvable:$true] %s8952_s12 }
  0x28   : > { %9024 = vmatmul.msk.bf16.vlgmr.msra.gmra.mxu0 %vm716_vm3, %v700_v62  ;;  %v482_v8 = vrot.slane %v481_v0, 4  ;;  %v574_v13 = vshll.u32 %v260_v61, 16  ;;  %v580_v15 = vshll.u32 %v261_v1, 16  ;;  %v584_v16 = vshrl.u32 %v261_v1, 16  ;;  %v10912_v62 = vld [vmem:[%s10808_s25 + $0x6c] sm:$0xf] }
  0x29   : > { %v492_v14 = vrot.slane %v491_v5, 4  ;;  %v590_v18 = vshll.u32 %v262_v2, 16  ;;  %v10870_v21 = vpack.c.b16 %v677_v7, %v676_v4  ;;  %v573_v23 = vrot.slane %v571_v9, 4 }
  0x2a   : > { %v487_v22 = vsel %vm10846_vm4, %v482_v8, %v486_v58  ;;  %v576_v24 = vrot.slane %v574_v13, 5  ;;  %v582_v30 = vrot.slane %v580_v15, 5  ;;  %v586_v31 = vrot.slane %v584_v16, 4  ;;  %v10920_v13 = vld [vmem:[%s10808_s25 + $0x70] sm:$0xf] }
  0x2b   : > { %v497_v28 = vsel %vm10846_vm4, %v492_v14, %v496_v6  ;;  %v684_v29 = vunpack.c.l.b16 %v487_v22  ;;  %9028 = vmatmul.msk.bf16.vlgmr.msra.gmra.mxu1 %vm716_vm3, %v10870_v21  ;;  %v592_v37 = vrot.slane %v590_v18, 5  ;;  %v307_v39 = vshrl.u32 %v10875_v26, 16 }
  0x2c   : > { %v685_v33 = vunpack.c.l.b16 %v497_v28  ;;  %v577_v36 = vor.u32 %v576_v24, %v573_v23  ;;  %v587_v38 = vor.u32 %v586_v31, %v582_v30  ;;  %v310_v40 = vshll.u32 %v10875_v26, 16  ;;  %v10926_v23 = vld [vmem:[%s10808_s25 + $0x74] sm:$0x1] }
  0x2d   : > { %v316_v41 = vshll.u32 %v10878_v27, 16  ;;  %v320_v46 = vshrl.u32 %v10878_v27, 16  ;;  %v326_v47 = vshll.u32 %v10883_v32, 16  ;;  %v309_v49 = vrot.slane %v307_v39, 4 }
  0x2e   : > { %v10893_v43 = vpack.c.b16 %v685_v33, %v684_v29  ;;  %v578_v44 = vrot.slane %v577_v36, 4  ;;  %v588_v48 = vrot.slane %v587_v38, 4  ;;  %v312_v50 = vrot.slane %v310_v40, 5  ;;  %v263_v38 = vld [vmem:[%s10808_s25 + $0x9c] sm:$0xf] }
  0x2f   : > { %v318_v51 = vrot.slane %v316_v41, 5  ;;  %v322_v54 = vrot.slane %v320_v46, 4  ;;  %v328_v55 = vrot.slane %v326_v47, 5  ;;  %v403_v57 = vshrl.u32 %v10891_v42, 16 }
  0x30   : > { %14683 = vst [vmem:[#allocation6_spill] sm:$0xff] %v10893_v43  ;;  %9032 = vmatmul.msk.bf16.vlgmr.msra.gmra.mxu2 %vm716_vm3, %v10893_v43  ;;  %v583_v53 = vsel %vm10846_vm4, %v578_v44, %v582_v30  ;;  %v593_v58 = vsel %vm10846_vm4, %v588_v48, %v592_v37  ;;  %v313_v60 = vor.u32 %v312_v50, %v309_v49  ;;  %v406_v61 = vshll.u32 %v10891_v42, 16  ;;  %v264_v44 = vld [vmem:[%s10808_s25 + $0xa0] sm:$0xf] }
  0x31   : > { %v692_v59 = vunpack.c.l.b16 %v583_v53  ;;  %v693_v63 = vunpack.c.l.b16 %v593_v58  ;;  %v323_v0 = vor.u32 %v322_v54, %v318_v51  ;;  %v405_v1 = vrot.slane %v403_v57, 4 }
  0x32   : > { %v412_v2 = vshll.u32 %v10898_v52, 16  ;;  %v314_v3 = vrot.slane %v313_v60, 4  ;;  %v408_v4 = vrot.slane %v406_v61, 5  ;;  %v416_v5 = vshrl.u32 %v10898_v52, 16 }
  0x33   : > { %v422_v6 = vshll.u32 %v10905_v56, 16  ;;  %v10917_v7 = vpack.c.b16 %v693_v63, %v692_v59  ;;  %v324_v8 = vrot.slane %v323_v0, 4  ;;  %v499_v14 = vshrl.u32 %v10912_v62, 16 }
  0x34   : > { %v414_v9 = vrot.slane %v412_v2, 5  ;;  %v319_v15 = vsel %vm10846_vm4, %v314_v3, %v318_v51  ;;  %v409_v16 = vor.u32 %v408_v4, %v405_v1  ;;  %v418_v18 = vrot.slane %v416_v5, 4 }
  0x35   : > { %14684 = vst [vmem:[#allocation7_spill] sm:$0xff] %v10917_v7  ;;  %v424_v22 = vrot.slane %v422_v6, 5  ;;  %9036 = vmatmul.msk.bf16.vlgmr.msra.gmra.mxu3 %vm716_vm3, %v10917_v7  ;;  %v329_v24 = vsel %vm10846_vm4, %v324_v8, %v328_v55  ;;  %v670_v28 = vunpack.c.l.b16 %v319_v15  ;;  %v501_v29 = vrot.slane %v499_v14, 4  ;;  %v265_v55 = vld [vmem:[%s10808_s25 + $0xa4] sm:$0x1] }
  0x36   : > { %v502_v30 = vshll.u32 %v10912_v62, 16  ;;  %v671_v31 = vunpack.c.l.b16 %v329_v24  ;;  %v410_v33 = vrot.slane %v409_v16, 4  ;;  %v419_v36 = vor.u32 %v418_v18, %v414_v9  ;;  %v10948_v6 = vld [vmem:[%s10808_s25 + $0x18] sm:$0xf]  ;;  %v10955_v16 = vld [vmem:[%s10808_s25 + $0x1c] sm:$0xf] }
  0x37   : > { %v508_v37 = vshll.u32 %v10920_v13, 16  ;;  %v512_v40 = vshrl.u32 %v10920_v13, 16  ;;  %v518_v41 = vshll.u32 %v10926_v23, 16  ;;  %v595_v58 = vshrl.u32 %v263_v38, 16 }
  0x38   : > { %v504_v39 = vrot.slane %v502_v30, 5  ;;  %v10938_v46 = vpack.c.b16 %v671_v31, %v670_v28  ;;  %v415_v47 = vsel %vm10846_vm4, %v410_v33, %v414_v9  ;;  %v420_v48 = vrot.slane %v419_v36, 4  ;;  %v10958_v28 = vld [vmem:[%s10808_s25 + $0x20] sm:$0x1] }
  0x39   : > { %v510_v49 = vrot.slane %v508_v37, 5  ;;  %v678_v50 = vunpack.c.l.b16 %v415_v47  ;;  %v514_v53 = vrot.slane %v512_v40, 4  ;;  %v520_v54 = vrot.slane %v518_v41, 5 }
  0x3a   : > { %v505_v51 = vor.u32 %v504_v39, %v501_v29  ;;  %9025 = vmatmul.msk.bf16.gmra.mxu0 %vm716_vm3, %v10938_v46  ;;  %v425_v57 = vsel %vm10846_vm4, %v420_v48, %v424_v22  ;;  %v598_v59 = vshll.u32 %v263_v38, 16  ;;  %v604_v60 = vshll.u32 %v264_v44, 16  ;;  %v10970_v48 = vld [vmem:[%s10808_s25 + $0x48] sm:$0xf] }
  0x3b   : > { %v679_v61 = vunpack.c.l.b16 %v425_v57  ;;  %v515_v0 = vor.u32 %v514_v53, %v510_v49  ;;  %v608_v1 = vshrl.u32 %v264_v44, 16  ;;  %v597_v2 = vrot.slane %v595_v58, 4 }
  0x3c   : > { %v506_v63 = vrot.slane %v505_v51, 4  ;;  %v600_v3 = vrot.slane %v598_v59, 5  ;;  %v606_v4 = vrot.slane %v604_v60, 5  ;;  %v614_v5 = vshll.u32 %v265_v55, 16  ;;  %v10980_v55 = vld [vmem:[%s10808_s25 + $0x50] sm:$0x1] }
  0x3d   : > { %v10950_v8 = vpack.c.b16 %v679_v61, %v678_v50  ;;  %v516_v14 = vrot.slane %v515_v0, 4  ;;  %v610_v15 = vrot.slane %v608_v1, 4  ;;  %v331_v31 = vshrl.u32 %v10948_v6, 16 }
  0x3e   : > { %v511_v9 = vsel %vm10846_vm4, %v506_v63, %v510_v49  ;;  %v601_v22 = vor.u32 %v600_v3, %v597_v2  ;;  %v616_v24 = vrot.slane %v614_v5, 5  ;;  %v334_v33 = vshll.u32 %v10948_v6, 16 }
  0x3f   : > { %v686_v18 = vunpack.c.l.b16 %v511_v9  ;;  %9029 = vmatmul.msk.bf16.gmra.mxu1 %vm716_vm3, %v10950_v8  ;;  %v521_v29 = vsel %vm10846_vm4, %v516_v14, %v520_v54  ;;  %v611_v30 = vor.u32 %v610_v15, %v606_v4  ;;  %v340_v38 = vshll.u32 %v10955_v16, 16  ;;  %v10977_v54 = vld [vmem:[%s10808_s25 + $0x4c] sm:$0xf]  ;;  %v10992_v9 = vld [vmem:[%s10808_s25 + $0x78] sm:$0xf] }
  0x40   : > { %v687_v36 = vunpack.c.l.b16 %v521_v29  ;;  %v602_v37 = vrot.slane %v601_v22, 4  ;;  %v344_v39 = vshrl.u32 %v10955_v16, 16  ;;  %v333_v41 = vrot.slane %v331_v31, 4  ;;  %14686 = vst [vmem:[#allocation9_spill] sm:$0xff] %v10992_v9 }
  0x41   : > { %v612_v40 = vrot.slane %v611_v30, 4  ;;  %v336_v44 = vrot.slane %v334_v33, 5  ;;  %v350_v47 = vshll.u32 %v10958_v28, 16  ;;  %v342_v51 = vrot.slane %v340_v38, 5 }
  0x42   : > { %v10972_v49 = vpack.c.b16 %v687_v36, %v686_v18  ;;  %v607_v50 = vsel %vm10846_vm4, %v602_v37, %v606_v4  ;;  %v346_v53 = vrot.slane %v344_v39, 4  ;;  %v427_v0 = vshrl.u32 %v10970_v48, 16  ;;  %v11002_v36 = vld [vmem:[%s10808_s25 + $0x80] sm:$0x1] }
  0x43   : > { %v617_v57 = vsel %vm10846_vm4, %v612_v40, %v616_v24  ;;  %v694_v58 = vunpack.c.l.b16 %v607_v50  ;;  %v337_v59 = vor.u32 %v336_v44, %v333_v41  ;;  %v352_v60 = vrot.slane %v350_v47, 5  ;;  %v10997_v24 = vld [vmem:[%s10808_s25 + $0x7c] sm:$0xf]  ;;  %14689 = vst [vmem:[#allocation12_spill] sm:$0xff] %v11002_v36 }
  0x44   : > { %14685 = vst [vmem:[#allocation8_spill] sm:$0xff] %v10972_v49  ;;  %9033 = vmatmul.msk.bf16.gmra.mxu2 %vm716_vm3, %v10972_v49  ;;  %v695_v61 = vunpack.c.l.b16 %v617_v57  ;;  %v347_v63 = vor.u32 %v346_v53, %v342_v51  ;;  %v430_v1 = vshll.u32 %v10970_v48, 16  ;;  %v436_v3 = vshll.u32 %v10977_v54, 16 }
  0x45   : > { %v338_v2 = vrot.slane %v337_v59, 4  ;;  %v440_v4 = vshrl.u32 %v10977_v54, 16  ;;  %v446_v5 = vshll.u32 %v10980_v55, 16  ;;  %v429_v18 = vrot.slane %v427_v0, 4  ;;  %14688 = vst [vmem:[#allocation11_spill] sm:$0xff] %v10997_v24 }
  0x46   : > { %v10994_v14 = vpack.c.b16 %v695_v61, %v694_v58  ;;  %v348_v15 = vrot.slane %v347_v63, 4  ;;  %v432_v22 = vrot.slane %v430_v1, 5  ;;  %v438_v30 = vrot.slane %v436_v3, 5  ;;  %v11014_v59 = vld [vmem:[%s10808_s25 + $0xa8] sm:$0xf] }
  0x47   : > { %v343_v29 = vsel %vm10846_vm4, %v338_v2, %v342_v51  ;;  %v442_v31 = vrot.slane %v440_v4, 4  ;;  %v448_v33 = vrot.slane %v446_v5, 5  ;;  %v523_v40 = vshrl.u32 %v10992_v9, 16  ;;  %14690 = vst [vmem:[#allocation13_spill] sm:$0xff] %v11014_v59  ;;  %v11019_v1 = vld [vmem:[%s10808_s25 + $0xac] sm:$0xf] }
  0x48   : > { %14687 = vst [vmem:[#allocation10_spill] sm:$0xff] %v10994_v14  ;;  %9037 = vmatmul.msk.bf16.gmra.mxu3 %vm716_vm3, %v10994_v14  ;;  %v353_v37 = vsel %vm10846_vm4, %v348_v15, %v352_v60  ;;  %v672_v38 = vunpack.c.l.b16 %v343_v29  ;;  %v433_v39 = vor.u32 %v432_v22, %v429_v18  ;;  %v526_v47 = vshll.u32 %v10992_v9, 16  ;;  %v11024_v5 = vld [vmem:[%s10808_s25 + $0xb0] sm:$0x1] }
  0x49   : > { %v673_v41 = vunpack.c.l.b16 %v353_v37  ;;  %v443_v44 = vor.u32 %v442_v31, %v438_v30  ;;  %v532_v50 = vshll.u32 %v10997_v24, 16  ;;  %v525_v53 = vrot.slane %v523_v40, 4  ;;  %14691 = vst [vmem:[#allocation14_spill] sm:$0xff] %v11019_v1 }
  0x4a   : > { %v434_v51 = vrot.slane %v433_v39, 4  ;;  %v536_v57 = vshrl.u32 %v10997_v24, 16  ;;  %v542_v58 = vshll.u32 %v11002_v36, 16  ;;  %v528_v63 = vrot.slane %v526_v47, 5  ;;  %14692 = vst [vmem:[#allocation15_spill] sm:$0xff] %v11024_v5 }
  0x4b   : > { %v11016_v60 = vpack.c.b16 %v673_v41, %v672_v38  ;;  %v444_v61 = vrot.slane %v443_v44, 4  ;;  %v534_v0 = vrot.slane %v532_v50, 5  ;;  %v619_v29 = vshrl.u32 %v11014_v59, 16  ;;  %v11036_v47 = vld [vmem:[%s10808_s25 + $0x24] sm:$0xf] }
  0x4c   : > { %v439_v2 = vsel %vm10846_vm4, %v434_v51, %v438_v30  ;;  %v538_v3 = vrot.slane %v536_v57, 4  ;;  %v544_v4 = vrot.slane %v542_v58, 5  ;;  %v529_v22 = vor.u32 %v528_v63, %v525_v53  ;;  %v11041_v57 = vld [vmem:[%s10808_s25 + $0x28] sm:$0xf]  ;;  %v11112_v24 = vld [vmem:[%s10808_s25 + $0xbc] sm:$0x1] }
  0x4d   : > { %9026 = vmatmul.msk.bf16.gmra.mxu0 %vm716_vm3, %v11016_v60  ;;  %v449_v15 = vsel %vm10846_vm4, %v444_v61, %v448_v33  ;;  %v680_v18 = vunpack.c.l.b16 %v439_v2  ;;  %v622_v30 = vshll.u32 %v11014_v59, 16  ;;  %v628_v38 = vshll.u32 %v11019_v1, 16  ;;  %v11046_v2 = vld [vmem:[%s10808_s25 + $0x2c] sm:$0x1] }
  0x4e   : > { %v681_v31 = vunpack.c.l.b16 %v449_v15  ;;  %v539_v37 = vor.u32 %v538_v3, %v534_v0  ;;  %v530_v39 = vrot.slane %v529_v22, 4  ;;  %v621_v40 = vrot.slane %v619_v29, 4 }
  0x4f   : > { %v632_v41 = vshrl.u32 %v11019_v1, 16  ;;  %v638_v44 = vshll.u32 %v11024_v5, 16  ;;  %v624_v51 = vrot.slane %v622_v30, 5  ;;  %v630_v53 = vrot.slane %v628_v38, 5  ;;  %v11056_v30 = vld [vmem:[%s10808_s25 + $0x54] sm:$0xf] }
  0x50   : > { %v11038_v33 = vpack.c.b16 %v681_v31, %v680_v18  ;;  %v540_v50 = vrot.slane %v539_v37, 4  ;;  %v535_v58 = vsel %vm10846_vm4, %v530_v39, %v534_v0  ;;  %v355_v22 = vshrl.u32 %v11036_v47, 16  ;;  %v11068_v5 = vld [vmem:[%s10808_s25 + $0x5c] sm:$0x1] }
  0x51   : > { %v634_v61 = vrot.slane %v632_v41, 4  ;;  %v640_v63 = vrot.slane %v638_v44, 5  ;;  %v688_v15 = vunpack.c.l.b16 %v535_v58  ;;  %v625_v18 = vor.u32 %v624_v51, %v621_v40  ;;  %v11063_v58 = vld [vmem:[%s10808_s25 + $0x58] sm:$0xf] }
  0x52   : > { %14693 = vst [vmem:[#allocation16_spill] sm:$0xff] %v11038_v33  ;;  %9030 = vmatmul.msk.bf16.gmra.mxu1 %vm716_vm3, %v11038_v33  ;;  %v545_v3 = vsel %vm10846_vm4, %v540_v50, %v544_v4  ;;  %v358_v0 = vshll.u32 %v11036_v47, 16  ;;  %v364_v37 = vshll.u32 %v11041_v57, 16  ;;  %v357_v39 = vrot.slane %v355_v22, 4 }
  0x53   : > { %v689_v29 = vunpack.c.l.b16 %v545_v3  ;;  %v635_v31 = vor.u32 %v634_v61, %v630_v53  ;;  %v626_v38 = vrot.slane %v625_v18, 4  ;;  %v368_v41 = vshrl.u32 %v11041_v57, 16 }
  0x54   : > { %v374_v4 = vshll.u32 %v11046_v2, 16  ;;  %v360_v50 = vrot.slane %v358_v0, 5  ;;  %v366_v51 = vrot.slane %v364_v37, 5  ;;  %v451_v18 = vshrl.u32 %v11056_v30, 16  ;;  %v11077_v0 = vld [vmem:[%s10808_s25 + $0x84] sm:$0xf] }
  0x55   : > { %v11060_v44 = vpack.c.b16 %v689_v29, %v688_v15  ;;  %v636_v40 = vrot.slane %v635_v31, 4  ;;  %v631_v61 = vsel %vm10846_vm4, %v626_v38, %v630_v53  ;;  %v370_v3 = vrot.slane %v368_v41, 4  ;;  %14695 = vst [vmem:[#allocation18_spill] sm:$0xff] %v11077_v0 }
  0x56   : > { %v376_v59 = vrot.slane %v374_v4, 5  ;;  %v696_v22 = vunpack.c.l.b16 %v631_v61  ;;  %v361_v29 = vor.u32 %v360_v50, %v357_v39  ;;  %v454_v31 = vshll.u32 %v11056_v30, 16  ;;  %v11085_v50 = vld [vmem:[%s10808_s25 + $0x88] sm:$0xf] }
  0x57   : > { %14694 = vst [vmem:[#allocation17_spill] sm:$0xff] %v11060_v44  ;;  %9034 = vmatmul.msk.bf16.gmra.mxu2 %vm716_vm3, %v11060_v44  ;;  %v641_v15 = vsel %vm10846_vm4, %v636_v40, %v640_v63  ;;  %v371_v37 = vor.u32 %v370_v3, %v366_v51  ;;  %v453_v38 = vrot.slane %v451_v18, 4  ;;  %v460_v41 = vshll.u32 %v11063_v58, 16 }
  0x58   : > { %v697_v53 = vunpack.c.l.b16 %v641_v15  ;;  %v362_v4 = vrot.slane %v361_v29, 4  ;;  %v456_v1 = vrot.slane %v454_v31, 5  ;;  %v464_v14 = vshrl.u32 %v11063_v58, 16  ;;  %14697 = vst [vmem:[#allocation20_spill] sm:$0xff] %v11085_v50  ;;  %v11091_v31 = vld [vmem:[%s10808_s25 + $0x8c] sm:$0x1] }
  0x59   : > { %v470_v7 = vshll.u32 %v11068_v5, 16  ;;  %v372_v40 = vrot.slane %v371_v37, 4  ;;  %v462_v39 = vrot.slane %v460_v41, 5  ;;  %v547_v61 = vshrl.u32 %v11077_v0, 16  ;;  %14698 = vst [vmem:[#allocation21_spill] sm:$0xff] %v11091_v31 }
  0x5a   : > { %v11082_v63 = vpack.c.b16 %v697_v53, %v696_v22  ;;  %v367_v3 = vsel %vm10846_vm4, %v362_v4, %v366_v51  ;;  %v457_v18 = vor.u32 %v456_v1, %v453_v38  ;;  %v466_v15 = vrot.slane %v464_v14, 4  ;;  %v11100_v1 = vld [vmem:[%s10808_s25 + $0xb4] sm:$0xf] }
  0x5b   : > { %v472_v29 = vrot.slane %v470_v7, 5  ;;  %v377_v22 = vsel %vm10846_vm4, %v372_v40, %v376_v59  ;;  %v674_v53 = vunpack.c.l.b16 %v367_v3  ;;  %v549_v37 = vrot.slane %v547_v61, 4  ;;  %14699 = vst [vmem:[#allocation22_spill] sm:$0xff] %v11100_v1 }
  0x5c   : > { %14696 = vst [vmem:[#allocation19_spill] sm:$0xff] %v11082_v63  ;;  %9038 = vmatmul.msk.bf16.gmra.mxu3 %vm716_vm3, %v11082_v63  ;;  %v550_v41 = vshll.u32 %v11077_v0, 16  ;;  %v675_v9 = vunpack.c.l.b16 %v377_v22  ;;  %v458_v36 = vrot.slane %v457_v18, 4  ;;  %v467_v51 = vor.u32 %v466_v15, %v462_v39  ;;  %v11105_v63 = vld [vmem:[%s10808_s25 + $0xb8] sm:$0xf] }
  0x5d   : > { %v556_v14 = vshll.u32 %v11085_v50, 16  ;;  %v560_v38 = vshrl.u32 %v11085_v50, 16  ;;  %v566_v4 = vshll.u32 %v11091_v31, 16 }
  0x5e   : > { %v552_v7 = vrot.slane %v550_v41, 5  ;;  %v11107_v59 = vpack.c.b16 %v675_v9, %v674_v53  ;;  %v463_v40 = vsel %vm10846_vm4, %v458_v36, %v462_v39  ;;  %v468_v61 = vrot.slane %v467_v51, 4 }
  0x5f   : > { %v558_v3 = vrot.slane %v556_v14, 5  ;;  %v682_v18 = vunpack.c.l.b16 %v463_v40  ;;  %v562_v22 = vrot.slane %v560_v38, 4  ;;  %v568_v0 = vrot.slane %v566_v4, 5 }
  0x60   : > { %v553_v15 = vor.u32 %v552_v7, %v549_v37  ;;  %9027 = vmatmul.msk.bf16.gmra.mxu0 %vm716_vm3, %v11107_v59  ;;  %v473_v41 = vsel %vm10846_vm4, %v468_v61, %v472_v29  ;;  %v643_v9 = vshrl.u32 %v11100_v1, 16  ;;  %v646_v53 = vshll.u32 %v11100_v1, 16 }
  0x61   : > { %v652_v36 = vshll.u32 %v11105_v63, 16  ;;  %v683_v39 = vunpack.c.l.b16 %v473_v41  ;;  %v563_v14 = vor.u32 %v562_v22, %v558_v3  ;;  %v656_v37 = vshrl.u32 %v11105_v63, 16  ;;  %v9230_v22 = vld [vmem:[%s14602_s1 + $0xe] sm:$0x3] }
  0x62   : > { %v554_v51 = vrot.slane %v553_v15, 4  ;;  %v645_v7 = vrot.slane %v643_v9, 4  ;;  %v648_v38 = vrot.slane %v646_v53, 5  ;;  %v662_v40 = vshll.u32 %v11112_v24, 16  ;;  %v9209_v15 = vld [vmem:[%s14602_s1 + $0xc] sm:$0x3] }
  0x63   : > { %v654_v4 = vrot.slane %v652_v36, 5  ;;  %v11123_v31 = vpack.c.b16 %v683_v39, %v682_v18  ;;  %v564_v61 = vrot.slane %v563_v14, 4  ;;  %v658_v50 = vrot.slane %v656_v37, 4  ;;  %v9192_v18 = vld [vmem:[%s14602_s1 + $0xa] sm:$0x3] }
  0x64   : > { %v559_v29 = vsel %vm10846_vm4, %v554_v51, %v558_v3  ;;  %v649_v44 = vor.u32 %v648_v38, %v645_v7  ;;  %v664_v9 = vrot.slane %v662_v40, 5  ;;  %v1099_v39 = vrot.slane %v10814_v11, 5  ;;  %v9248_v51 = vld [vmem:[%s14602_s1 + $0x10] sm:$0x3] }
  0x65   : > { %14700 = vst [vmem:[#allocation23_spill] sm:$0xff] %v11123_v31  ;;  %v690_v1 = vunpack.c.l.b16 %v559_v29  ;;  %9031 = vmatmul.msk.bf16.gmra.mxu1 %vm716_vm3, %v11123_v31  ;;  %v569_v3 = vsel %vm10846_vm4, %v564_v61, %v568_v0  ;;  %v659_v41 = vor.u32 %v658_v50, %v654_v4  ;;  %v1872_v37 = vsel %vm765_vm0, %v9209_v15, 0 }
  0x66   : > { %v691_v53 = vunpack.c.l.b16 %v569_v3  ;;  %v650_v36 = vrot.slane %v649_v44, 4  ;;  %v2028_v7 = vsel %vm765_vm0, %v9230_v22, 0  ;;  %v1738_v38 = vsel %vm765_vm0, %v9192_v18, 0  ;;  %1881 = vmatpush.bf16.msra.mxu2 %v1872_v37 }
  0x67   : > { %v660_v14 = vrot.slane %v659_v41, 4  ;;  %2037 = vmatpush.bf16.msra.mxu3 %v2028_v7  ;;  %1747 = vmatpush.bf16.msra.mxu1 %v1738_v38  ;;  %v2168_v50 = vsel %vm765_vm0, %v9248_v51, 0  ;;  %v1102_v61 = vrot.slane %v10817_v12, 5  ;;  %v14702_v15 = vmov 0  ;;  %vm11872_vm0 = vmor %vm2399_vm9, %vm2511_vm15 }
  0x68   : > { %v11147_v29 = vpack.c.b16 %v691_v53, %v690_v1  ;;  %v655_v0 = vsel %vm10846_vm4, %v650_v36, %v654_v4  ;;  %2177 = vmatpush.bf16.msra.mxu0 %v2168_v50  ;;  %v9121_v1 = vrot.slane %v10875_v26, 9  ;;  %v1106_v4 = vrot.slane %v10878_v27, 5  ;;  %v10262_v36 = vld [vmem:[%s10808_s25] sm:$0xff] }
  0x69   : > { %v665_v11 = vsel %vm10846_vm4, %v660_v14, %v664_v9  ;;  %v698_v44 = vunpack.c.l.b16 %v655_v0  ;;  %v14703_v15 = vsel %vm11159_vm7, 4294967295, %v14702_v15  ;;  %v9120_v22 = vrot.slane %v10811_v10, 9 }
  0x6a   : > { %14701 = vst [vmem:[#allocation24_spill] sm:$0xff] %v11147_v29  ;;  %9035 = vmatmul.msk.bf16.gmra.mxu2 %vm716_vm3, %v11147_v29  ;;  %v699_v40 = vunpack.c.l.b16 %v665_v11  ;;  %v1101_v18 = vrot.slane %v1099_v39, 4  ;;  %v1109_v3 = vrot.slane %v10883_v32, 5  ;;  %v1107_v9 = vsel %vm11159_vm7, %v9121_v1, %v1106_v4 }
  0x6b   : > { %14704 = vst [vmem:[#allocation25_spill] sm:$0xff] %v14703_v15  ;;  %v1108_v26 = vrot.slane %v1106_v4, 4  ;;  %v1213_v53 = vunpack.c.l.b16 %v1107_v9  ;;  %v1100_v27 = vsel %vm11159_vm7, %v9120_v22, %v1099_v39  ;;  %v9122_v7 = vrot.slane %v10948_v6, 9  ;;  %v11208_v9 = vld [vmem:[%s10808_s25 + $0x18] sm:$0xff] }
  0x6c   : > { %v11165_v41 = vpack.c.b16 %v699_v40, %v698_v44  ;;  %v1103_v10 = vsel %vm11159_vm7, %v1101_v18, %v1102_v61  ;;  %v1211_v14 = vunpack.c.l.b16 %v1100_v27  ;;  %v1113_v38 = vrot.slane %v10955_v16, 5  ;;  %v10263_v40 = vld [vmem:[%s10808_s25 + $0xc] sm:$0xff] }
  0x6d   : > { %v1110_v12 = vsel %vm11159_vm7, %v1108_v26, %v1109_v3  ;;  %v1212_v37 = vunpack.c.l.b16 %v1103_v10  ;;  %v1116_v39 = vrot.slane %v10958_v28, 5  ;;  %v9123_v6 = vrot.slane %v11036_v47, 9  ;;  %v11237_v27 = vld [vmem:[%s10808_s25 + $0x30] sm:$0xff] }
  0x6e   : > { %9039 = vmatmul.msk.bf16.gmra.mxu3 %vm716_vm3, %v11165_v41  ;;  %v1214_v32 = vunpack.c.l.b16 %v1110_v12  ;;  %v1114_v11 = vsel %vm11159_vm7, %v9122_v7, %v1113_v38  ;;  %v1115_v44 = vrot.slane %v1113_v38, 4  ;;  %v1120_v16 = vrot.slane %v11041_v57, 5  ;;  %v11221_v57 = vld [vmem:[%s10808_s25 + $0x24] sm:$0xff] }
  0x6f   : > { %v1243_v0 = vpack.c.b16 %v1212_v37, %v1211_v14  ;;  %v1215_v50 = vunpack.c.l.b16 %v1114_v11  ;;  %v1123_v28 = vrot.slane %v11046_v2, 5  ;;  %v1127_v12 = vrot.slane %v10828_v19, 5 }
  0x70   : > { %9175 = vmatmul.msk.bf16.vlgmr.msrb.gmra.mxu0 %vm716_vm3, %v10938_v46  ;;  %v11180_v51 = vpack.c.b16 %v1214_v32, %v1213_v53  ;;  %v1117_v46 = vsel %vm11159_vm7, %v1115_v44, %v1116_v39  ;;  %v1121_v61 = vsel %vm11159_vm7, %v9123_v6, %v1120_v16  ;;  %v1122_v22 = vrot.slane %v1120_v16, 4 }
  0x71   : > { %v1216_v1 = vunpack.c.l.b16 %v1117_v46  ;;  %v1217_v18 = vunpack.c.l.b16 %v1121_v61  ;;  %v9124_v10 = vrot.slane %v10824_v17, 9  ;;  %v1129_v32 = vrot.slane %v1127_v12, 4 }
  0x72   : > { %v1124_v3 = vsel %vm11159_vm7, %v1122_v22, %v1123_v28  ;;  %v1134_v44 = vrot.slane %v10898_v52, 5  ;;  %v1137_v6 = vrot.slane %v10905_v56, 5 }
  0x73   : > { %v11192_v4 = vpack.c.b16 %v1216_v1, %v1215_v50  ;;  %v1218_v26 = vunpack.c.l.b16 %v1124_v3  ;;  %v1128_v37 = vsel %vm11159_vm7, %v9124_v10, %v1127_v12  ;;  %v11267_v50 = vld [vmem:[%s10808_s25 + $0x3c] sm:$0xff]  ;;  %v1141_v12 = vrot.slane %v10977_v54, 5 }
  0x74   : > { %v1219_v17 = vunpack.c.l.b16 %v1128_v37  ;;  %v1136_v1 = vrot.slane %v1134_v44, 4  ;;  %v9126_v37 = vrot.slane %v10970_v48, 9 }
  0x75   : > { %9104 = vmatmul.msk.bf16.vlgmr.msrb.gmra.mxu1 %vm716_vm3, %v10262_v36  ;;  %v11210_v47 = vpack.c.b16 %v1218_v26, %v1217_v18  ;;  %v1130_v36 = vrot.slane %v10831_v20, 5 }
  0x76   : > { %v1138_v28 = vsel %vm11159_vm7, %v1136_v1, %v1137_v6 }
  0x77   : > { %v1131_v19 = vsel %vm11159_vm7, %v1129_v32, %v1130_v36  ;;  %v1222_v56 = vunpack.c.l.b16 %v1138_v28  ;;  %v11301_v32 = vld [vmem:[%s10808_s25 + $0x48] sm:$0xff]  ;;  %v1148_v28 = vrot.slane %v11063_v58, 5 }
  0x78   : > { %v1220_v38 = vunpack.c.l.b16 %v1131_v19  ;;  %14707 = vst [vmem:[#allocation28_spill] sm:$0xff] %v11301_v32  ;;  %v1143_v19 = vrot.slane %v1141_v12, 4 }
  0x7a   : > { %9137 = vmatmul.msk.bf16.vlgmr.msrb.gmra.mxu2 %vm716_vm3, %v1243_v0  ;;  %v11257_v39 = vpack.c.b16 %v1220_v38, %v1219_v17  ;;  %v1144_v17 = vrot.slane %v10980_v55, 5 }
  0x7e   : > { %9158 = vmatmul.msk.bf16.vlgmr.msrb.gmra.mxu3 %vm716_vm3, %v10263_v40 }
  0x80   : > { %9176 = vmatmul.msk.bf16.gmra.mxu0 %vm716_vm3, %v11016_v60 }
  0x85   : > { %9105 = vmatmul.msk.bf16.gmra.mxu1 %vm716_vm3, %v10263_v40  ;;  %v9125_v40 = vrot.slane %v10891_v42, 9 }
  0x87   : > { %v1135_v52 = vsel %vm11159_vm7, %v9125_v40, %v1134_v44  ;;  %v1142_v44 = vsel %vm11159_vm7, %v9126_v37, %v1141_v12  ;;  %v1145_v40 = vsel %vm11159_vm7, %v1143_v19, %v1144_v17  ;;  %v11335_v12 = vld [vmem:[%s10808_s25 + $0x54] sm:$0xff]  ;;  %v9127_v37 = vrot.slane %v11056_v30, 9 }
  0x88   : > { %v1221_v42 = vunpack.c.l.b16 %v1135_v52  ;;  %v1223_v48 = vunpack.c.l.b16 %v1142_v44  ;;  %v1224_v1 = vunpack.c.l.b16 %v1145_v40  ;;  %14711 = vst [vmem:[#allocation32_spill] sm:$0xff] %v11335_v12  ;;  %v1150_v19 = vrot.slane %v1148_v28, 4 }
  0x89   : > { %v1151_v17 = vrot.slane %v11068_v5, 5  ;;  %v1149_v40 = vsel %vm11159_vm7, %v9127_v37, %v1148_v28  ;;  %v1155_v37 = vrot.slane %v10842_v34, 5 }
  0x8a   : > { %9138 = vmatmul.msk.bf16.gmra.mxu2 %vm716_vm3, %v11180_v51  ;;  %v11291_v3 = vpack.c.b16 %v1222_v56, %v1221_v42  ;;  %v11325_v52 = vpack.c.b16 %v1224_v1, %v1223_v48  ;;  %v1225_v5 = vunpack.c.l.b16 %v1149_v40  ;;  %v1158_v40 = vrot.slane %v10852_v45, 5 }
  0x8b   : > { %v1152_v48 = vsel %vm11159_vm7, %v1150_v19, %v1151_v17  ;;  %v11367_v19 = vld [vmem:[%s10808_s25 + $0x60] sm:$0xff] }
  0x8c   : > { %14710 = vst [vmem:[#allocation31_spill] sm:$0xff] %v11325_v52  ;;  %v1226_v1 = vunpack.c.l.b16 %v1152_v48  ;;  %v9128_v48 = vrot.slane %v10834_v25, 9 }
  0x8d   : > { %14715 = vst [vmem:[#allocation36_spill] sm:$0xff] %v11367_v19 }
  0x8e   : > { %9159 = vmatmul.msk.bf16.gmra.mxu3 %vm716_vm3, %v11208_v9  ;;  %v1156_v34 = vsel %vm11159_vm7, %v9128_v48, %v1155_v37 }
  0x90   : > { %9177 = vmatmul.msk.bf16.gmra.mxu0 %vm716_vm3, %v11107_v59 }
  0x95   : > { %9106 = vmatmul.msk.bf16.gmra.mxu1 %vm716_vm3, %v11208_v9 }
  0x9a   : > { %9139 = vmatmul.msk.bf16.gmra.mxu2 %vm716_vm3, %v11192_v4 }
  0x9e   : > { %9160 = vmatmul.msk.bf16.gmra.mxu3 %vm716_vm3, %v11221_v57 }
  0xa0   : > { %9178 = vmatmul.msk.bf16.gmra.mxu0 %vm716_vm3, %v10870_v21 }
  0xa5   : > { %v11227_v2 = vpop.f32.mrf.mxu0  ;;  %9107 = vmatmul.msk.bf16.gmra.mxu1 %vm716_vm3, %v11221_v57 }
  0xa8   : > { %v11231_v53 = vpop.f32.mrf.mxu1 }
  0xaa   : > { %9140 = vmatmul.msk.bf16.gmra.mxu2 %vm716_vm3, %v11210_v47 }
  0xad   : > { %v11241_v14 = vpop.f32.mrf.mxu0 }
  0xae   : > { %9161 = vmatmul.msk.bf16.gmra.mxu3 %vm716_vm3, %v11237_v27 }
  0xb0   : > { %9179 = vmatmul.msk.bf16.gmra.mxu0 %vm716_vm3, %v10950_v8  ;;  %v11251_v7 = vpop.f32.mrf.mxu1 }
  0xb3   : > { %v11253_v20 = vpop.f32.mrf.mxu2 }
  0xb5   : > { %9108 = vmatmul.msk.bf16.gmra.mxu1 %vm716_vm3, %v11237_v27 }
  0xb7   : > { %v11259_v0 = vpop.f32.mrf.mxu0 }
  0xb8   : > { %v11261_v11 = vpop.f32.mrf.mxu3 }
  0xb9   : > { %14705 = vst [vmem:[#allocation26_spill] sm:$0xff] %v11261_v11 }
  0xba   : > { %9141 = vmatmul.msk.bf16.gmra.mxu2 %vm716_vm3, %v11257_v39 }
  0xbb   : > { %v11273_v16 = vpop.f32.mrf.mxu2 }
  0xbc   : > { %v11269_v46 = vpop.f32.mrf.mxu1 }
  0xbe   : > { %9162 = vmatmul.msk.bf16.gmra.mxu3 %vm716_vm3, %v11267_v50 }
  0xbf   : > { %v11281_v61 = vpop.f32.mrf.mxu0 }
  0xc0   : > { %v11283_v22 = vpop.f32.mrf.mxu3  ;;  %9180 = vmatmul.msk.bf16.gmra.mxu0 %vm716_vm3, %v11038_v33 }
  0xc1   : > { %14706 = vst [vmem:[#allocation27_spill] sm:$0xff] %v11283_v22 }
  0xc4   : > { %v11287_v18 = vpop.f32.mrf.mxu1 }
  0xc5   : > { %9109 = vmatmul.msk.bf16.gmra.mxu1 %vm716_vm3, %v11267_v50 }
  0xc7   : > { %v11293_v26 = vpop.f32.mrf.mxu2 }
  0xca   : > { %v11296_v10 = vpop.f32.mrf.mxu0  ;;  %9142 = vmatmul.msk.bf16.gmra.mxu2 %vm716_vm3, %v11291_v3 }
  0xcb   : > { %v11303_v36 = vpop.f32.mrf.mxu3 }
  0xcc   : > { %14708 = vst [vmem:[#allocation29_spill] sm:$0xff] %v11303_v36 }
  0xce   : > { %9163 = vmatmul.msk.bf16.gmra.mxu3 %vm716_vm3, %v11301_v32 }
  0xcf   : > { %v11309_v38 = vpop.f32.mrf.mxu1  ;;  %v11311_v54 = vpop.f32.mrf.mxu2 }
  0xd0   : > { %9181 = vmatmul.msk.bf16.gmra.mxu0 %vm716_vm3, %v11123_v31 }
  0xd2   : > { %v11319_v55 = vpop.f32.mrf.mxu0 }
  0xd3   : > { %v11321_v6 = vpop.f32.mrf.mxu3 }
  0xd4   : > { %14709 = vst [vmem:[#allocation30_spill] sm:$0xff] %v11321_v6 }
  0xd5   : > { %9110 = vmatmul.msk.bf16.gmra.mxu1 %vm716_vm3, %v11301_v32 }
  0xd7   : > { %v11328_v42 = vpop.f32.mrf.mxu1 }
  0xda   : > { %v11330_v56 = vpop.f32.mrf.mxu2  ;;  %9143 = vmatmul.msk.bf16.gmra.mxu2 %vm716_vm3, %v11325_v52 }
  0xdd   : > { %v11339_v44 = vpop.f32.mrf.mxu0 }
  0xde   : > { %9164 = vmatmul.msk.bf16.gmra.mxu3 %vm716_vm3, %v11335_v12 }
  0xdf   : > { %v11343_v58 = vpop.f32.mrf.mxu3 }
  0xe0   : > { %14712 = vst [vmem:[#allocation33_spill] sm:$0xff] %v11343_v58  ;;  %9182 = vmatmul.msk.bf16.gmra.mxu0 %vm716_vm3, %v10893_v43  ;;  %v11359_v58 = vpack.c.b16 %v1226_v1, %v1225_v5  ;;  %v1157_v43 = vrot.slane %v1155_v37, 4  ;;  %v1162_v37 = vrot.slane %v10920_v13, 5 }
  0xe2   : > { %v11351_v30 = vpop.f32.mrf.mxu1  ;;  %v11353_v6 = vpop.f32.mrf.mxu2  ;;  %14713 = vst [vmem:[#allocation34_spill] sm:$0xff] %v11359_v58  ;;  %v1159_v1 = vsel %vm11159_vm7, %v1157_v43, %v1158_v40  ;;  %v11397_v43 = vld [vmem:[%s10808_s25 + $0x6c] sm:$0xff] }
  0xe5   : > { %9111 = vmatmul.msk.bf16.gmra.mxu1 %vm716_vm3, %v11335_v12  ;;  %v11357_v31 = vpop.f32.mrf.mxu0  ;;  %v1228_v12 = vunpack.c.l.b16 %v1159_v1  ;;  %v9129_v1 = vrot.slane %v10912_v62, 9 }
  0xe7   : > { %v11361_v28 = vpop.f32.mrf.mxu3 }
  0xe8   : > { %14714 = vst [vmem:[#allocation35_spill] sm:$0xff] %v11361_v28  ;;  %v1227_v28 = vunpack.c.l.b16 %v1156_v34  ;;  %v1165_v34 = vrot.slane %v10926_v23, 5 }
  0xea   : > { %9144 = vmatmul.msk.bf16.gmra.mxu2 %vm716_vm3, %v11359_v58  ;;  %v11369_v17 = vpop.f32.mrf.mxu1  ;;  %v11389_v33 = vpack.c.b16 %v1228_v12, %v1227_v28  ;;  %v1163_v28 = vsel %vm11159_vm7, %v9129_v1, %v1162_v37 }
  0xec   : > { %14718 = vst [vmem:[#allocation39_spill] sm:$0xff] %v11389_v33 }
  0xed   : > { %v11373_v36 = vpop.f32.mrf.mxu2  ;;  %v1609_v5 = vpop.f32.mrf.mxu0 }
  0xee   : > { %9165 = vmatmul.msk.bf16.gmra.mxu3 %vm716_vm3, %v11367_v19 }
  0xf0   : > { %9183 = vmatmul.msk.bf16.gmra.mxu0 %vm716_vm3, %v10972_v49  ;;  %v1164_v49 = vrot.slane %v1162_v37, 4 }
  0xf1   : > { %v11383_v45 = vpop.f32.mrf.mxu3 }
  0xf2   : > { %14716 = vst [vmem:[#allocation37_spill] sm:$0xff] %v11383_v45  ;;  %v998_v25 = vpop.f32.mrf.mxu1 }
  0xf3   : > { %v999_v45 = vadd.f32 %v998_v25, %v11227_v2  ;;  %v1229_v2 = vunpack.c.l.b16 %v1163_v28 }
  0xf5   : > { %v11385_v22 = vpop.f32.mrf.mxu2  ;;  %9112 = vmatmul.msk.bf16.gmra.mxu1 %vm716_vm3, %v11367_v19  ;;  %v1611_v58 = vpop.f32.mrf.mxu0 }
  0xf6   : > { %14717 = vst [vmem:[#allocation38_spill] sm:$0xff] %v11385_v22 }
  0xf9   : > { %v11392_v48 = vpop.f32.mrf.mxu3 }
  0xfa   : > { %14719 = vst [vmem:[#allocation40_spill] sm:$0xff] %v11392_v48  ;;  %9145 = vmatmul.msk.bf16.gmra.mxu2 %vm716_vm3, %v11389_v33  ;;  %v1000_v40 = vpop.f32.mrf.mxu1  ;;  %v1166_v48 = vsel %vm11159_vm7, %v1164_v49, %v1165_v34  ;;  %v14720_v33 = vld [vmem:[#allocation17_spill] sm:$0xff]  ;;  %v14721_v34 = vld [vmem:[#allocation11_spill] sm:$0xff] }
  0xfb   : > { %v1230_v25 = vunpack.c.l.b16 %v1166_v48  ;;  %v1001_v32 = vadd.f32 %v1000_v40, %v11241_v14  ;;  %v1169_v1 = vrot.slane %v14721_v34, 5  ;;  %v11421_v48 = vld [vmem:[%s10808_s25 + $0x78] sm:$0xff] }
  0xfd   : > { %v1319_v19 = vpop.f32.mrf.mxu2  ;;  %v1614_v12 = vpop.f32.mrf.mxu0  ;;  %v11415_v49 = vpack.c.b16 %v1230_v25, %v1229_v2 }
  0xfe   : > { %9166 = vmatmul.msk.bf16.gmra.mxu3 %vm716_vm3, %v11397_v43  ;;  %v1399_v13 = vadd.f32 %v1319_v19, %v999_v45 }
 0x100   : > { %9184 = vmatmul.msk.bf16.gmra.mxu0 %vm716_vm3, %v14720_v33 }
 0x101   : > { %v1453_v23 = vpop.f32.mrf.mxu3 }
 0x102   : > { %v1533_v62 = vadd.f32 %v1453_v23, %v1399_v13  ;;  %v1003_v11 = vpop.f32.mrf.mxu1  ;;  %v14723_v13 = vld [vmem:[#allocation9_spill] sm:$0xff]  ;;  %v1171_v23 = vrot.slane %v1169_v1, 4 }
 0x103   : > { %v9130_v28 = vrot.slane %v14723_v13, 9 }
 0x104   : > { %v11411_v22 = vadd.f32 %v1609_v5, %v1533_v62  ;;  %v14722_v5 = vld [vmem:[#allocation12_spill] sm:$0xff]  ;;  %v1004_v62 = vadd.f32 %v1003_v11, %v11259_v0 }
 0x105   : > { %v1321_v19 = vpop.f32.mrf.mxu2  ;;  %9113 = vmatmul.msk.bf16.gmra.mxu1 %vm716_vm3, %v11397_v43  ;;  %v1616_v45 = vpop.f32.mrf.mxu0  ;;  %v1172_v40 = vrot.slane %v14722_v5, 5 }
 0x106   : > { %v1400_v37 = vadd.f32 %v1321_v19, %v1001_v32  ;;  %v1170_v19 = vsel %vm11159_vm7, %v9130_v28, %v1169_v1 }
 0x109   : > { %v1455_v33 = vpop.f32.mrf.mxu3 }
 0x10a   : > { %v1534_v52 = vadd.f32 %v1455_v33, %v1400_v37  ;;  %9146 = vmatmul.msk.bf16.gmra.mxu2 %vm716_vm3, %v11415_v49  ;;  %v1005_v14 = vpop.f32.mrf.mxu1  ;;  %v1173_v37 = vsel %vm11159_vm7, %v1171_v23, %v1172_v40  ;;  %v14726_v23 = vld [vmem:[#allocation20_spill] sm:$0xff] }
 0x10b   : > { %v1006_v5 = vadd.f32 %v1005_v14, %v11281_v61 }
 0x10c   : > { %v11426_v32 = vadd.f32 %v1611_v58, %v1534_v52  ;;  %v1231_v52 = vunpack.c.l.b16 %v1170_v19  ;;  %v1232_v58 = vunpack.c.l.b16 %v1173_v37  ;;  %v14729_v37 = vld [vmem:[#allocation18_spill] sm:$0xff] }
 0x10d   : > { %v1324_v2 = vpop.f32.mrf.mxu2  ;;  %v1619_v25 = vpop.f32.mrf.mxu0 }
 0x10e   : > { %14724 = vst [vmem:[#allocation11_spill] sm:$0xff] %v11426_v32  ;;  %9167 = vmatmul.msk.bf16.gmra.mxu3 %vm716_vm3, %v11421_v48  ;;  %v1401_v33 = vadd.f32 %v1324_v2, %v1004_v62  ;;  %v11441_v40 = vpack.c.b16 %v1232_v58, %v1231_v52  ;;  %v1176_v2 = vrot.slane %v14726_v23, 5  ;;  %v14731_v23 = vld [vmem:[#allocation7_spill] sm:$0xff] }
 0x110   : > { %9185 = vmatmul.msk.bf16.gmra.mxu0 %vm716_vm3, %v11147_v29 }
 0x111   : > { %v1458_v34 = vpop.f32.mrf.mxu3 }
 0x112   : > { %v1535_v0 = vadd.f32 %v1458_v34, %v1401_v33  ;;  %v1008_v11 = vpop.f32.mrf.mxu1  ;;  %v11447_v33 = vld [vmem:[%s10808_s25 + $0x84] sm:$0xff]  ;;  %v9131_v34 = vrot.slane %v14729_v37, 9 }
 0x113   : > { %14727 = vst [vmem:[#allocation9_spill] sm:$0xff] %v11447_v33  ;;  %v1009_v52 = vadd.f32 %v1008_v11, %v11296_v10 }
 0x114   : > { %v11437_v13 = vadd.f32 %v1614_v12, %v1535_v0  ;;  %v14728_v12 = vld [vmem:[#allocation21_spill] sm:$0xff]  ;;  %v1178_v0 = vrot.slane %v1176_v2, 4 }
 0x115   : > { %v1326_v62 = vpop.f32.mrf.mxu2  ;;  %9114 = vmatmul.msk.bf16.gmra.mxu1 %vm716_vm3, %v11421_v48  ;;  %v1621_v1 = vpop.f32.mrf.mxu0  ;;  %v1179_v14 = vrot.slane %v14728_v12, 5 }
 0x116   : > { %14725 = vst [vmem:[#allocation12_spill] sm:$0xff] %v11437_v13  ;;  %v1402_v28 = vadd.f32 %v1326_v62, %v1006_v5 }
 0x119   : > { %v1460_v29 = vpop.f32.mrf.mxu3 }
 0x11a   : > { %v1536_v32 = vadd.f32 %v1460_v29, %v1402_v28  ;;  %9147 = vmatmul.msk.bf16.gmra.mxu2 %vm716_vm3, %v11441_v40  ;;  %v1010_v61 = vpop.f32.mrf.mxu1  ;;  %v1177_v28 = vsel %vm11159_vm7, %v9131_v34, %v1176_v2 }
 0x11b   : > { %v1011_v19 = vadd.f32 %v1010_v61, %v11319_v55  ;;  %v1180_v55 = vsel %vm11159_vm7, %v1178_v0, %v1179_v14  ;;  %v10508_v0 = vld [vmem:[%s10808_s25 + $0x94] sm:$0xf] }
 0x11c   : > { %v11453_v58 = vadd.f32 %v1616_v45, %v1536_v32  ;;  %v1233_v32 = vunpack.c.l.b16 %v1177_v28  ;;  %v1234_v11 = vunpack.c.l.b16 %v1180_v55  ;;  %v11474_v28 = vld [vmem:[%s10808_s25 + $0x90] sm:$0xff] }
 0x11d   : > { %v1329_v5 = vpop.f32.mrf.mxu2  ;;  %v1624_v62 = vpop.f32.mrf.mxu0  ;;  %14733 = vst [vmem:[#allocation18_spill] sm:$0xff] %v11474_v28 }
 0x11e   : > { %14730 = vst [vmem:[#allocation20_spill] sm:$0xff] %v11453_v58  ;;  %9168 = vmatmul.msk.bf16.gmra.mxu3 %vm716_vm3, %v11447_v33  ;;  %v1403_v29 = vadd.f32 %v1329_v5, %v1009_v52  ;;  %v11468_v34 = vpack.c.b16 %v1234_v11, %v1233_v32  ;;  %v1183_v5 = vrot.slane %v10508_v0, 5 }
 0x120   : > { %9186 = vmatmul.msk.bf16.gmra.mxu0 %vm716_vm3, %v14731_v23 }
 0x121   : > { %v1463_v61 = vpop.f32.mrf.mxu3 }
 0x122   : > { %v1537_v10 = vadd.f32 %v1463_v61, %v1403_v29  ;;  %v1013_v45 = vpop.f32.mrf.mxu1 }
 0x123   : > { %v1014_v12 = vadd.f32 %v1013_v45, %v11339_v44  ;;  %v10510_v45 = vld [vmem:[%s10808_s25 + $0x90] sm:$0xf] }
 0x124   : > { %v11464_v37 = vadd.f32 %v1619_v25, %v1537_v10  ;;  %v10509_v25 = vld [vmem:[%s10808_s25 + $0x98] sm:$0x1]  ;;  %v9132_v23 = vrot.slane %v10510_v45, 9 }
 0x125   : > { %v1331_v52 = vpop.f32.mrf.mxu2  ;;  %9115 = vmatmul.msk.bf16.gmra.mxu1 %vm716_vm3, %v11447_v33  ;;  %v1626_v2 = vpop.f32.mrf.mxu0  ;;  %v1186_v55 = vrot.slane %v10509_v25, 5  ;;  %v14744_v33 = vld [vmem:[#allocation15_spill] sm:$0xff] }
 0x126   : > { %14732 = vst [vmem:[#allocation21_spill] sm:$0xff] %v11464_v37  ;;  %v1404_v14 = vadd.f32 %v1331_v52, %v1011_v19  ;;  %v1185_v37 = vrot.slane %v1183_v5, 4 }
 0x128   : > { %v1187_v0 = vsel %vm11159_vm7, %v1185_v37, %v1186_v55  ;;  %v10511_v55 = vld [vmem:[%s10808_s25 + $0xa0] sm:$0xf] }
 0x129   : > { %v1465_v29 = vpop.f32.mrf.mxu3  ;;  %v1236_v25 = vunpack.c.l.b16 %v1187_v0 }
 0x12a   : > { %v1538_v61 = vadd.f32 %v1465_v29, %v1404_v14  ;;  %9148 = vmatmul.msk.bf16.gmra.mxu2 %vm716_vm3, %v11468_v34  ;;  %v1015_v44 = vpop.f32.mrf.mxu1  ;;  %v1184_v14 = vsel %vm11159_vm7, %v9132_v23, %v1183_v5  ;;  %v14735_v29 = vld [vmem:[#allocation10_spill] sm:$0xff] }
 0x12b   : > { %v1016_v10 = vadd.f32 %v1015_v44, %v11357_v31  ;;  %v1235_v44 = vunpack.c.l.b16 %v1184_v14 }
 0x12c   : > { %v11479_v19 = vadd.f32 %v1621_v1, %v1538_v61 }
 0x12d   : > { %v1334_v32 = vpop.f32.mrf.mxu2  ;;  %v1629_v11 = vpop.f32.mrf.mxu0  ;;  %v11493_v37 = vpack.c.b16 %v1236_v25, %v1235_v44 }
 0x12e   : > { %14734 = vst [vmem:[#allocation41_spill] sm:$0xff] %v11479_v19  ;;  %9169 = vmatmul.msk.bf16.gmra.mxu3 %vm716_vm3, %v11474_v28  ;;  %v1405_v52 = vadd.f32 %v1334_v32, %v1014_v12  ;;  %v1190_v32 = vrot.slane %v10511_v55, 5 }
 0x12f   : > { %14737 = vst [vmem:[#allocation43_spill] sm:$0xff] %v11493_v37 }
 0x130   : > { %9187 = vmatmul.msk.bf16.gmra.mxu0 %vm716_vm3, %v14735_v29 }
 0x131   : > { %v1468_v31 = vpop.f32.mrf.mxu3 }
 0x132   : > { %v1539_v1 = vadd.f32 %v1468_v31, %v1405_v52  ;;  %v1018_v61 = vpop.f32.mrf.mxu1  ;;  %v11499_v52 = vld [vmem:[%s10808_s25 + $0x9c] sm:$0xff] }
 0x133   : > { %14738 = vst [vmem:[#allocation44_spill] sm:$0xff] %v11499_v52  ;;  %v10513_v31 = vld [vmem:[%s10808_s25 + $0x9c] sm:$0xf] }
 0x134   : > { %v11489_v45 = vadd.f32 %v1624_v62, %v1539_v1  ;;  %v10512_v62 = vld [vmem:[%s10808_s25 + $0xa4] sm:$0x1]  ;;  %v9133_v1 = vrot.slane %v10513_v31, 9 }
 0x135   : > { %v1336_v12 = vpop.f32.mrf.mxu2  ;;  %9116 = vmatmul.msk.bf16.gmra.mxu1 %vm716_vm3, %v11474_v28  ;;  %v1631_v23 = vpop.f32.mrf.mxu0  ;;  %v1193_v0 = vrot.slane %v10512_v62, 5  ;;  %v14740_v62 = vld [vmem:[#allocation19_spill] sm:$0xff] }
 0x136   : > { %14736 = vst [vmem:[#allocation42_spill] sm:$0xff] %v11489_v45  ;;  %v1406_v5 = vadd.f32 %v1336_v12, %v1016_v10  ;;  %v1192_v45 = vrot.slane %v1190_v32, 4  ;;  %v1019_v10 = vadd.f32 %v1018_v61, %v11231_v53  ;;  %v272_v61 = vld [vmem:[%s10808_s25 + $0xc0] sm:$0xf] }
 0x138   : > { %v1194_v55 = vsel %vm11159_vm7, %v1192_v45, %v1193_v0  ;;  %v1569_v0 = vshll.u32 %v272_v61, 16 }
 0x139   : > { %v1470_v29 = vpop.f32.mrf.mxu3 }
 0x13a   : > { %v1540_v19 = vadd.f32 %v1470_v29, %v1406_v5  ;;  %9149 = vmatmul.msk.bf16.gmra.mxu2 %vm716_vm3, %v11493_v37  ;;  %v1020_v14 = vpop.f32.mrf.mxu1  ;;  %v1191_v5 = vsel %vm11159_vm7, %v9133_v1, %v1190_v32  ;;  %v1566_v32 = vshrl.u32 %v272_v61, 16  ;;  %v274_v61 = vld [vmem:[%s10808_s25 + $0xc8] sm:$0x1] }
 0x13b   : > { %v1021_v58 = vadd.f32 %v1020_v14, %v11251_v7 }
 0x13c   : > { %v11504_v44 = vadd.f32 %v1626_v2, %v1540_v19  ;;  %v1237_v2 = vunpack.c.l.b16 %v1191_v5  ;;  %v1238_v19 = vunpack.c.l.b16 %v1194_v55  ;;  %v14743_v55 = vld [vmem:[#allocation14_spill] sm:$0xff] }
 0x13d   : > { %v1339_v25 = vpop.f32.mrf.mxu2  ;;  %v1634_v12 = vpop.f32.mrf.mxu0 }
 0x13e   : > { %14739 = vst [vmem:[#allocation45_spill] sm:$0xff] %v11504_v44  ;;  %9170 = vmatmul.msk.bf16.gmra.mxu3 %vm716_vm3, %v11499_v52  ;;  %v1407_v29 = vadd.f32 %v1339_v25, %v1019_v10  ;;  %v273_v44 = vld [vmem:[%s10808_s25 + $0xc4] sm:$0xf]  ;;  %v11523_v5 = vpack.c.b16 %v1238_v19, %v1237_v2 }
 0x13f   : > { %v1575_v1 = vshll.u32 %v273_v44, 16  ;;  %v1579_v25 = vshrl.u32 %v273_v44, 16  ;;  %v1200_v44 = vrot.slane %v14744_v33, 5 }
 0x140   : > { %9188 = vmatmul.msk.bf16.gmra.mxu0 %vm716_vm3, %v14740_v62  ;;  %14742 = vst [vmem:[#allocation47_spill] sm:$0xff] %v11523_v5 }
 0x141   : > { %v1473_v31 = vpop.f32.mrf.mxu3  ;;  %v1577_v14 = vrot.slane %v1575_v1, 5  ;;  %v1581_v62 = vrot.slane %v1579_v25, 4 }
 0x142   : > { %v1541_v28 = vadd.f32 %v1473_v31, %v1407_v29  ;;  %v1023_v53 = vpop.f32.mrf.mxu1  ;;  %v1197_v31 = vrot.slane %v14743_v55, 5 }
 0x143   : > { %v1582_v25 = vor.u32 %v1581_v62, %v1577_v14 }
 0x144   : > { %v11517_v37 = vadd.f32 %v1629_v11, %v1541_v28  ;;  %v1568_v28 = vrot.slane %v1566_v32, 4  ;;  %v1571_v11 = vrot.slane %v1569_v0, 5  ;;  %v1199_v19 = vrot.slane %v1197_v31, 4 }
 0x145   : > { %v1341_v10 = vpop.f32.mrf.mxu2  ;;  %9117 = vmatmul.msk.bf16.gmra.mxu1 %vm716_vm3, %v11499_v52  ;;  %v11521_v45 = vpop.f32.mrf.mxu0  ;;  %v11529_v52 = vld [vmem:[%s10808_s25 + $0xa8] sm:$0xff] }
 0x146   : > { %14741 = vst [vmem:[#allocation46_spill] sm:$0xff] %v11517_v37  ;;  %v1408_v29 = vadd.f32 %v1341_v10, %v1021_v58  ;;  %v14745_v58 = vld [vmem:[#allocation13_spill] sm:$0xff]  ;;  %v1024_v10 = vadd.f32 %v1023_v53, %v11269_v46  ;;  %v1572_v1 = vor.u32 %v1571_v11, %v1568_v28  ;;  %v1201_v33 = vsel %vm11159_vm7, %v1199_v19, %v1200_v44 }
 0x147   : > { %v9134_v2 = vrot.slane %v14745_v58, 9 }
 0x149   : > { %v1475_v7 = vpop.f32.mrf.mxu3 }
 0x14a   : > { %v1542_v37 = vadd.f32 %v1475_v7, %v1408_v29  ;;  %9150 = vmatmul.msk.bf16.gmra.mxu2 %vm716_vm3, %v11523_v5  ;;  %v1025_v13 = vpop.f32.mrf.mxu1  ;;  %v1585_v29 = vshll.u32 %v274_v61, 16  ;;  %v1198_v5 = vsel %vm11159_vm7, %v9134_v2, %v1197_v31  ;;  %v1240_v61 = vunpack.c.l.b16 %v1201_v33 }
 0x14b   : > { %v1239_v11 = vunpack.c.l.b16 %v1198_v5  ;;  %v1026_v58 = vadd.f32 %v1025_v13, %v11287_v18  ;;  %v1204_v5 = vrot.slane %v11105_v63, 5  ;;  %v1207_v33 = vrot.slane %v11112_v24, 5  ;;  %v10319_v24 = vld [vmem:[%s14604_s3 + $0x378] sm:$0xff] }
 0x14c   : > { %v11535_v55 = vadd.f32 %v1631_v23, %v1542_v37  ;;  %v1573_v23 = vrot.slane %v1572_v1, 4  ;;  %v1583_v37 = vrot.slane %v1582_v25, 4  ;;  %v1587_v53 = vrot.slane %v1585_v29, 5  ;;  %v10277_v29 = vld [vmem:[%s10808_s25 + $0xb4] sm:$0xff]  ;;  %4409 = vmatpush.bf16.msrb.mxu3 %v10319_v24 }
 0x14d   : > { %v1344_v32 = vpop.f32.mrf.mxu2  ;;  %v1639_v0 = vpop.f32.mrf.mxu0  ;;  %v11554_v1 = vpack.c.b16 %v1240_v61, %v1239_v11 }
 0x14e   : > { %9171 = vmatmul.msk.bf16.gmra.mxu3 %vm716_vm3, %v11529_v52  ;;  %v1409_v7 = vadd.f32 %v1344_v32, %v1024_v10  ;;  %v1578_v2 = vsel %vm10846_vm4, %v1573_v23, %v1577_v14  ;;  %v1588_v19 = vsel %vm10846_vm4, %v1583_v37, %v1587_v53  ;;  %v14746_v14 = vld [vmem:[#allocation22_spill] sm:$0xff]  ;;  %v1206_v23 = vrot.slane %v1204_v5, 4 }
 0x14f   : > { %v1591_v25 = vunpack.c.l.b16 %v1578_v2  ;;  %v1592_v18 = vunpack.c.l.b16 %v1588_v19 }
 0x150   : > { %9189 = vmatmul.msk.bf16.gmra.mxu0 %vm716_vm3, %v11165_v41 }
 0x151   : > { %v1478_v46 = vpop.f32.mrf.mxu3  ;;  %v11563_v53 = vpack.c.b16 %v1592_v18, %v1591_v25  ;;  %v10311_v25 = vld [vmem:[%s14604_s3 + $0x1f8] sm:$0xff] }
 0x152   : > { %v1543_v28 = vadd.f32 %v1478_v46, %v1409_v7  ;;  %v1028_v62 = vpop.f32.mrf.mxu1  ;;  %v9135_v46 = vrot.slane %v14746_v14, 9  ;;  %3558 = vmatpush.bf16.msrb.mxu1 %v10311_v25 }
 0x153   : > { %v1029_v37 = vadd.f32 %v1028_v62, %v11309_v38 }
 0x154   : > { %v11546_v10 = vadd.f32 %v1634_v12, %v1543_v28  ;;  %v1205_v38 = vsel %vm11159_vm7, %v9135_v46, %v1204_v5  ;;  %v10343_v5 = vld [vmem:[%s14604_s3 + $0x3f8] sm:$0xff] }
 0x155   : > { %v1346_v31 = vpop.f32.mrf.mxu2  ;;  %9118 = vmatmul.msk.bf16.gmra.mxu1 %vm716_vm3, %v11529_v52  ;;  %v1641_v44 = vpop.f32.mrf.mxu0  ;;  %v1241_v19 = vunpack.c.l.b16 %v1205_v38  ;;  %4723 = vmatpush.bf16.msrb.mxu0 %v10343_v5 }
 0x156   : > { %v1410_v32 = vadd.f32 %v1346_v31, %v1026_v58  ;;  %v10303_v58 = vld [vmem:[%s14604_s3 + $0x178] sm:$0xff] }
 0x157   : > { %3759 = vmatpush.bf16.msrb.mxu2 %v10303_v58 }
 0x159   : > { %v1480_v13 = vpop.f32.mrf.mxu3 }
 0x15a   : > { %v1544_v12 = vadd.f32 %v1480_v13, %v1410_v32  ;;  %9151 = vmatmul.msk.bf16.gmra.mxu2 %vm716_vm3, %v11554_v1  ;;  %v1030_v7 = vpop.f32.mrf.mxu1 }
 0x15b   : > { %v1031_v18 = vadd.f32 %v1030_v7, %v11328_v42 }
 0x15c   : > { %v11566_v63 = vadd.f32 %v11521_v45, %v1544_v12  ;;  %v1208_v45 = vsel %vm11159_vm7, %v1206_v23, %v1207_v33 }
 0x15d   : > { %v1349_v28 = vpop.f32.mrf.mxu2  ;;  %v1644_v11 = vpop.f32.mrf.mxu0  ;;  %v1242_v32 = vunpack.c.l.b16 %v1208_v45 }
 0x15e   : > { %9172 = vmatmul.msk.bf16.gmra.mxu3 %vm716_vm3, %v10277_v29  ;;  %v1411_v61 = vadd.f32 %v1349_v28, %v1029_v37  ;;  %v10278_v28 = vld [vmem:[%s10808_s25 + $0xc0] sm:$0xff] }
 0x15f   : > { %v11591_v46 = vpack.c.b16 %v1242_v32, %v1241_v19 }
 0x160   : > { %9190 = vmatmul.msk.bf16.gmra.mxu0 %vm716_vm3, %v11563_v53 }
 0x161   : > { %v1483_v62 = vpop.f32.mrf.mxu3 }
 0x162   : > { %v1545_v31 = vadd.f32 %v1483_v62, %v1411_v61  ;;  %v1033_v2 = vpop.f32.mrf.mxu1 }
 0x163   : > { %v1034_v42 = vadd.f32 %v1033_v2, %v11351_v30 }
 0x164   : > { %v11588_v13 = vadd.f32 %v1639_v0, %v1545_v31 }
 0x165   : > { %v1351_v12 = vpop.f32.mrf.mxu2  ;;  %9119 = vmatmul.msk.bf16.gmra.mxu1 %vm716_vm3, %v10277_v29  ;;  %v1646_v33 = vpop.f32.mrf.mxu0 }
 0x166   : > { %v1412_v14 = vadd.f32 %v1351_v12, %v1031_v18 }
 0x169   : > { %v1485_v23 = vpop.f32.mrf.mxu3 }
 0x16a   : > { %v1546_v37 = vadd.f32 %v1485_v23, %v1412_v14  ;;  %9152 = vmatmul.msk.bf16.gmra.mxu2 %vm716_vm3, %v11591_v46  ;;  %v1035_v61 = vpop.f32.mrf.mxu1  ;;  %v10318_v14 = vld [vmem:[%s14604_s3 + $0x370] sm:$0xff] }
 0x16b   : > { %v1036_v62 = vadd.f32 %v1035_v61, %v11369_v17  ;;  %4410 = vmatpush.bf16.msrb.mxu3 %v10318_v14  ;;  %v10342_v23 = vld [vmem:[%s14604_s3 + $0x3f0] sm:$0xff] }
 0x16c   : > { %v11597_v7 = vadd.f32 %v1641_v44, %v1546_v37  ;;  %4724 = vmatpush.bf16.msrb.mxu0 %v10342_v23 }
 0x16d   : > { %v1354_v0 = vpop.f32.mrf.mxu2  ;;  %v1649_v58 = vpop.f32.mrf.mxu0 }
 0x16e   : > { %9173 = vmatmul.msk.bf16.gmra.mxu3 %vm716_vm3, %v10278_v28  ;;  %v1413_v29 = vadd.f32 %v1354_v0, %v1034_v42 }
 0x170   : > { %9249 = vmatmul.msk.bf16.vlgmr.msra.gmra.mxu0 %vm716_vm3, %v11192_v4 }
 0x171   : > { %v1488_v24 = vpop.f32.mrf.mxu3 }
 0x172   : > { %v1547_v38 = vadd.f32 %v1488_v24, %v1413_v29  ;;  %v1038_v45 = vpop.f32.mrf.mxu1 }
 0x173   : > { %v1039_v5 = vadd.f32 %v1038_v45, %v11253_v20 }
 0x174   : > { %v11603_v31 = vadd.f32 %v1644_v11, %v1547_v38 }
 0x175   : > { %v1356_v19 = vpop.f32.mrf.mxu2  ;;  %9193 = vmatmul.msk.bf16.vlgmr.msra.gmra.mxu1 %vm716_vm3, %v11180_v51  ;;  %v1651_v30 = vpop.f32.mrf.mxu0  ;;  %v10302_v51 = vld [vmem:[%s14604_s3 + $0x170] sm:$0xff] }
 0x176   : > { %v1414_v44 = vadd.f32 %v1356_v19, %v1036_v62  ;;  %3760 = vmatpush.bf16.msrb.mxu2 %v10302_v51 }
 0x179   : > { %v1490_v2 = vpop.f32.mrf.mxu3 }
 0x17a   : > { %v1548_v32 = vadd.f32 %v1490_v2, %v1414_v44  ;;  %9214 = vmatmul.msk.bf16.vlgmr.msra.gmra.mxu2 %vm716_vm3, %v11208_v9  ;;  %v1040_v25 = vpop.f32.mrf.mxu1 }
 0x17b   : > { %v1041_v37 = vadd.f32 %v1040_v25, %v11273_v16 }
 0x17c   : > { %v11610_v18 = vadd.f32 %v1646_v33, %v1548_v32 }
 0x17d   : > { %v1359_v12 = vpop.f32.mrf.mxu2  ;;  %v1654_v17 = vpop.f32.mrf.mxu0 }
 0x17e   : > { %9231 = vmatmul.msk.bf16.vlgmr.msra.gmra.mxu3 %vm716_vm3, %v11016_v60  ;;  %v1415_v11 = vadd.f32 %v1359_v12, %v1039_v5  ;;  %v10310_v60 = vld [vmem:[%s14604_s3 + $0x1f0] sm:$0xff] }
 0x17f   : > { %3559 = vmatpush.bf16.msrb.mxu1 %v10310_v60 }
 0x180   : > { %9250 = vmatmul.msk.bf16.gmra.mxu0 %vm716_vm3, %v11210_v47 }
 0x181   : > { %v1493_v9 = vpop.f32.mrf.mxu3 }
 0x182   : > { %v1549_v20 = vadd.f32 %v1493_v9, %v1415_v11  ;;  %v1043_v33 = vpop.f32.mrf.mxu1  ;;  %v10317_v9 = vld [vmem:[%s14604_s3 + $0x368] sm:$0xff] }
 0x183   : > { %v1044_v45 = vadd.f32 %v1043_v33, %v11293_v26  ;;  %4411 = vmatpush.bf16.msrb.mxu3 %v10317_v9  ;;  %v10341_v33 = vld [vmem:[%s14604_s3 + $0x3e8] sm:$0xff]  ;;  %v10300_v9 = vld [vmem:[%s14604_s3 + $0x160] sm:$0xff] }
 0x184   : > { %v11629_v28 = vadd.f32 %v1649_v58, %v1549_v20  ;;  %4725 = vmatpush.bf16.msrb.mxu0 %v10341_v33  ;;  %v10308_v33 = vld [vmem:[%s14604_s3 + $0x1e0] sm:$0xff] }
 0x185   : > { %v1361_v61 = vpop.f32.mrf.mxu2  ;;  %9194 = vmatmul.msk.bf16.gmra.mxu1 %vm716_vm3, %v11192_v4  ;;  %v1656_v42 = vpop.f32.mrf.mxu0 }
 0x186   : > { %v1416_v0 = vadd.f32 %v1361_v61, %v1041_v37 }
 0x189   : > { %v1495_v29 = vpop.f32.mrf.mxu3 }
 0x18a   : > { %v1550_v24 = vadd.f32 %v1495_v29, %v1416_v0  ;;  %9215 = vmatmul.msk.bf16.gmra.mxu2 %vm716_vm3, %v11221_v57  ;;  %v1045_v38 = vpop.f32.mrf.mxu1 }
 0x18b   : > { %v1046_v32 = vadd.f32 %v1045_v38, %v11311_v54 }
 0x18c   : > { %v11636_v62 = vadd.f32 %v1651_v30, %v1550_v24 }
 0x18d   : > { %v1364_v16 = vpop.f32.mrf.mxu2  ;;  %v1659_v19 = vpop.f32.mrf.mxu0 }
 0x18e   : > { %9232 = vmatmul.msk.bf16.gmra.mxu3 %vm716_vm3, %v11107_v59  ;;  %v1417_v58 = vadd.f32 %v1364_v16, %v1044_v45 }
 0x190   : > { %9251 = vmatmul.msk.bf16.gmra.mxu0 %vm716_vm3, %v11257_v39 }
 0x191   : > { %v1498_v4 = vpop.f32.mrf.mxu3 }
 0x192   : > { %v1551_v44 = vadd.f32 %v1498_v4, %v1417_v58  ;;  %v1048_v2 = vpop.f32.mrf.mxu1 }
 0x193   : > { %v1049_v11 = vadd.f32 %v1048_v2, %v11330_v56 }
 0x194   : > { %v11643_v57 = vadd.f32 %v1654_v17, %v1551_v44  ;;  %v14748_v44 = vld [vmem:[#allocation38_spill] sm:$0xff] }
 0x195   : > { %v1366_v25 = vpop.f32.mrf.mxu2  ;;  %9195 = vmatmul.msk.bf16.gmra.mxu1 %vm716_vm3, %v11210_v47  ;;  %v1661_v26 = vpop.f32.mrf.mxu0  ;;  %v10301_v47 = vld [vmem:[%s14604_s3 + $0x168] sm:$0xff] }
 0x196   : > { %v1418_v30 = vadd.f32 %v1366_v25, %v1046_v32  ;;  %3761 = vmatpush.bf16.msrb.mxu2 %v10301_v47  ;;  %v14751_v47 = vld [vmem:[#allocation16_spill] sm:$0xff] }
 0x199   : > { %v1500_v5 = vpop.f32.mrf.mxu3 }
 0x19a   : > { %v1552_v12 = vadd.f32 %v1500_v5, %v1418_v30  ;;  %9216 = vmatmul.msk.bf16.gmra.mxu2 %vm716_vm3, %v11237_v27  ;;  %v1050_v59 = vpop.f32.mrf.mxu1  ;;  %v14749_v5 = vld [vmem:[#allocation28_spill] sm:$0xff] }
 0x19b   : > { %v1051_v60 = vadd.f32 %v1050_v59, %v11353_v6  ;;  %3762 = vmatpush.bf16.msrb.mxu2 %v10300_v9 }
 0x19c   : > { %v11650_v51 = vadd.f32 %v1656_v42, %v1552_v12  ;;  %v14750_v12 = vld [vmem:[#allocation26_spill] sm:$0xff] }
 0x19d   : > { %v1369_v14 = vpop.f32.mrf.mxu2  ;;  %v1664_v54 = vpop.f32.mrf.mxu0 }
 0x19e   : > { %9233 = vmatmul.msk.bf16.gmra.mxu3 %vm716_vm3, %v10870_v21  ;;  %v1419_v17 = vadd.f32 %v1369_v14, %v1049_v11  ;;  %v10309_v21 = vld [vmem:[%s14604_s3 + $0x1e8] sm:$0xff] }
 0x19f   : > { %3560 = vmatpush.bf16.msrb.mxu1 %v10309_v21 }
 0x1a0   : > { %9252 = vmatmul.msk.bf16.gmra.mxu0 %vm716_vm3, %v11291_v3 }
 0x1a1   : > { %v1503_v27 = vpop.f32.mrf.mxu3 }
 0x1a2   : > { %v1553_v56 = vadd.f32 %v1503_v27, %v1419_v17  ;;  %v1053_v20 = vpop.f32.mrf.mxu1  ;;  %v10316_v27 = vld [vmem:[%s14604_s3 + $0x360] sm:$0xff] }
 0x1a3   : > { %v1054_v38 = vadd.f32 %v1053_v20, %v11373_v36  ;;  %4412 = vmatpush.bf16.msrb.mxu3 %v10316_v27  ;;  %3561 = vmatpush.bf16.msrb.mxu1 %v10308_v33  ;;  %v14760_v33 = vld [vmem:[#allocation33_spill] sm:$0xff] }
 0x1a4   : > { %v11669_v23 = vadd.f32 %v1659_v19, %v1553_v56  ;;  %v14747_v19 = vld [vmem:[#allocation31_spill] sm:$0xff]  ;;  %v14752_v56 = vld [vmem:[#allocation34_spill] sm:$0xff] }
 0x1a5   : > { %v1371_v37 = vpop.f32.mrf.mxu2  ;;  %9196 = vmatmul.msk.bf16.gmra.mxu1 %vm716_vm3, %v11257_v39  ;;  %v1666_v61 = vpop.f32.mrf.mxu0 }
 0x1a6   : > { %v1420_v42 = vadd.f32 %v1371_v37, %v1051_v60  ;;  %v10340_v60 = vld [vmem:[%s14604_s3 + $0x3e0] sm:$0xff] }
 0x1a7   : > { %v14753_v37 = vld [vmem:[#allocation27_spill] sm:$0xff]  ;;  %4726 = vmatpush.bf16.msrb.mxu0 %v10340_v60 }
 0x1a9   : > { %v1505_v0 = vpop.f32.mrf.mxu3 }
 0x1aa   : > { %v1554_v29 = vadd.f32 %v1505_v0, %v1420_v42  ;;  %9217 = vmatmul.msk.bf16.gmra.mxu2 %vm716_vm3, %v11267_v50  ;;  %v1055_v24 = vpop.f32.mrf.mxu1 }
 0x1ab   : > { %v1056_v2 = vadd.f32 %v1055_v24, %v14748_v44  ;;  %v14755_v44 = vld [vmem:[#allocation29_spill] sm:$0xff] }
 0x1ac   : > { %v11688_v11 = vadd.f32 %v1661_v26, %v1554_v29 }
 0x1ad   : > { %v1374_v45 = vpop.f32.mrf.mxu2  ;;  %v1669_v6 = vpop.f32.mrf.mxu0 }
 0x1ae   : > { %9234 = vmatmul.msk.bf16.gmra.mxu3 %vm716_vm3, %v10950_v8  ;;  %v1421_v16 = vadd.f32 %v1374_v45, %v1054_v38 }
 0x1b0   : > { %9253 = vmatmul.msk.bf16.gmra.mxu0 %vm716_vm3, %v14747_v19 }
 0x1b1   : > { %v1508_v39 = vpop.f32.mrf.mxu3 }
 0x1b2   : > { %v1555_v58 = vadd.f32 %v1508_v39, %v1421_v16  ;;  %v1058_v4 = vpop.f32.mrf.mxu1  ;;  %v14754_v39 = vld [vmem:[#allocation32_spill] sm:$0xff] }
 0x1b3   : > { %v1059_v59 = vadd.f32 %v1058_v4, %v14750_v12 }
 0x1b4   : > { %v11709_v0 = vadd.f32 %v1664_v54, %v1555_v58  ;;  %v14756_v54 = vld [vmem:[#allocation23_spill] sm:$0xff] }
 0x1b5   : > { %v1376_v32 = vpop.f32.mrf.mxu2  ;;  %9197 = vmatmul.msk.bf16.gmra.mxu1 %vm716_vm3, %v11291_v3  ;;  %v11683_v50 = vpop.f32.mrf.mxu0 }
 0x1b6   : > { %v1422_v36 = vadd.f32 %v1376_v32, %v1056_v2 }
 0x1b9   : > { %v1510_v25 = vpop.f32.mrf.mxu3 }
 0x1ba   : > { %v1556_v30 = vadd.f32 %v1510_v25, %v1422_v36  ;;  %9218 = vmatmul.msk.bf16.gmra.mxu2 %vm716_vm3, %v14749_v5  ;;  %v1060_v8 = vpop.f32.mrf.mxu1 }
 0x1bb   : > { %v1061_v42 = vadd.f32 %v1060_v8, %v14753_v37 }
 0x1bc   : > { %v11722_v25 = vadd.f32 %v1666_v61, %v1556_v30  ;;  %v14759_v30 = vld [vmem:[#allocation36_spill] sm:$0xff] }
 0x1bd   : > { %v1379_v14 = vpop.f32.mrf.mxu2  ;;  %v11690_v17 = vpop.f32.mrf.mxu0 }
 0x1be   : > { %9235 = vmatmul.msk.bf16.gmra.mxu3 %vm716_vm3, %v14751_v47  ;;  %v1423_v3 = vadd.f32 %v1379_v14, %v1059_v59  ;;  %v14758_v59 = vld [vmem:[#allocation30_spill] sm:$0xff] }
 0x1c0   : > { %9254 = vmatmul.msk.bf16.gmra.mxu0 %vm716_vm3, %v14752_v56 }
 0x1c1   : > { %v1513_v26 = vpop.f32.mrf.mxu3 }
 0x1c2   : > { %v1557_v20 = vadd.f32 %v1513_v26, %v1423_v3  ;;  %v1063_v21 = vpop.f32.mrf.mxu1 }
 0x1c3   : > { %v1064_v2 = vadd.f32 %v1063_v21, %v14755_v44  ;;  %v14762_v44 = vld [vmem:[#allocation35_spill] sm:$0xff] }
 0x1c4   : > { %v11731_v27 = vadd.f32 %v1669_v6, %v1557_v20  ;;  %v10299_v6 = vld [vmem:[%s14604_s3 + $0x158] sm:$0xff] }
 0x1c5   : > { %v1381_v29 = vpop.f32.mrf.mxu2  ;;  %9198 = vmatmul.msk.bf16.gmra.mxu1 %vm716_vm3, %v14747_v19  ;;  %v11713_v24 = vpop.f32.mrf.mxu0  ;;  %v14757_v19 = vld [vmem:[#allocation39_spill] sm:$0xff]  ;;  %v10315_v20 = vld [vmem:[%s14604_s3 + $0x358] sm:$0xff]  ;;  %3763 = vmatpush.bf16.msrb.mxu2 %v10299_v6 }
 0x1c6   : > { %v1424_v38 = vadd.f32 %v1381_v29, %v1061_v42  ;;  %v14761_v29 = vld [vmem:[#allocation6_spill] sm:$0xff]  ;;  %4413 = vmatpush.bf16.msrb.mxu3 %v10315_v20  ;;  %v14772_v20 = vld [vmem:[#allocation40_spill] sm:$0xff] }
 0x1c9   : > { %v1515_v45 = vpop.f32.mrf.mxu3 }
 0x1ca   : > { %v1558_v16 = vadd.f32 %v1515_v45, %v1424_v38  ;;  %9219 = vmatmul.msk.bf16.gmra.mxu2 %vm716_vm3, %v14754_v39  ;;  %v1065_v4 = vpop.f32.mrf.mxu1 }
 0x1cb   : > { %v1066_v14 = vadd.f32 %v1065_v4, %v14758_v59  ;;  %v14764_v59 = vmov 0 }
 0x1cc   : > { %v11749_v38 = vadd.f32 %v11683_v50, %v1558_v16  ;;  %v14765_v59 = vsel %vm11763_vm10, 4294967295, %v14764_v59 }
 0x1cd   : > { %v1384_v32 = vpop.f32.mrf.mxu2  ;;  %v11718_v36 = vpop.f32.mrf.mxu0  ;;  %14766 = vst [vmem:[#allocation15_spill] sm:$0xff] %v14765_v59 }
 0x1ce   : > { %9236 = vmatmul.msk.bf16.gmra.mxu3 %vm716_vm3, %v14756_v54  ;;  %v1425_v58 = vadd.f32 %v1384_v32, %v1064_v2 }
 0x1d0   : > { %9255 = vmatmul.msk.bf16.gmra.mxu0 %vm716_vm3, %v14757_v19 }
 0x1d1   : > { %v1518_v5 = vpop.f32.mrf.mxu3 }
 0x1d2   : > { %v1559_v8 = vadd.f32 %v1518_v5, %v1425_v58  ;;  %v1068_v12 = vpop.f32.mrf.mxu1 }
 0x1d3   : > { %v1069_v60 = vadd.f32 %v1068_v12, %v14760_v33 }
 0x1d4   : > { %v11757_v5 = vadd.f32 %v11690_v17, %v1559_v8  ;;  %v14767_v17 = vld [vmem:[#allocation37_spill] sm:$0xff] }
 0x1d5   : > { %v1386_v47 = vpop.f32.mrf.mxu2  ;;  %9199 = vmatmul.msk.bf16.gmra.mxu1 %vm716_vm3, %v14752_v56  ;;  %v11729_v3 = vpop.f32.mrf.mxu0 }
 0x1d6   : > { %v1426_v9 = vadd.f32 %v1386_v47, %v1066_v14  ;;  %14763 = vst [vmem:[#allocation14_spill] sm:$0xff] %v11757_v5 }
 0x1d9   : > { %v1520_v26 = vpop.f32.mrf.mxu3 }
 0x1da   : > { %v1560_v61 = vadd.f32 %v1520_v26, %v1426_v9  ;;  %9220 = vmatmul.msk.bf16.gmra.mxu2 %vm716_vm3, %v14759_v30  ;;  %v1070_v21 = vpop.f32.mrf.mxu1  ;;  %v14768_v26 = vld [vmem:[#allocation8_spill] sm:$0xff]  ;;  %v14769_v30 = vmov 0 }
 0x1db   : > { %v1071_v2 = vadd.f32 %v1070_v21, %v14762_v44  ;;  %v14770_v30 = vsel %vm11776_vm12, 4294967295, %v14769_v30 }
 0x1dc   : > { %14771 = vst [vmem:[#allocation13_spill] sm:$0xff] %v14770_v30 }
 0x1dd   : > { %v1389_v37 = vpop.f32.mrf.mxu2  ;;  %v11736_v42 = vpop.f32.mrf.mxu0 }
 0x1de   : > { %9237 = vmatmul.msk.bf16.gmra.mxu3 %vm716_vm3, %v14761_v29  ;;  %v1427_v56 = vadd.f32 %v1389_v37, %v1069_v60  ;;  %v2460_v37 = vld [vmem:[#allocation2 + $0x14] sm:$0x1]  ;;  %v10307_v29 = vld [vmem:[%s14604_s3 + $0x1d8] sm:$0xff] }
 0x1df   : > { %v2461_v6 = vsel %vm11776_vm12, 0, %v2460_v37  ;;  %3562 = vmatpush.bf16.msrb.mxu1 %v10307_v29 }
 0x1e0   : > { %9256 = vmatmul.msk.bf16.gmra.mxu0 %vm716_vm3, %v11415_v49  ;;  %2462 = vst [vmem:[#allocation2 + $0x14] sm:$0x1] %v2461_v6 }
 0x1e1   : > { %v1523_v45 = vpop.f32.mrf.mxu3 }
 0x1e2   : > { %v1561_v39 = vadd.f32 %v1523_v45, %v1427_v56  ;;  %v1073_v4 = vpop.f32.mrf.mxu1  ;;  %v10339_v56 = vld [vmem:[%s14604_s3 + $0x3d8] sm:$0xff] }
 0x1e3   : > { %v1074_v8 = vadd.f32 %v1073_v4, %v14767_v17  ;;  %v11792_v4 = vadd.f32 %v11713_v24, %v1560_v61  ;;  %4727 = vmatpush.bf16.msrb.mxu0 %v10339_v56 }
 0x1e5   : > { %v1391_v32 = vpop.f32.mrf.mxu2  ;;  %9200 = vmatmul.msk.bf16.gmra.mxu1 %vm716_vm3, %v14757_v19  ;;  %v11754_v54 = vpop.f32.mrf.mxu0  ;;  %v2404_v19 = vld [vmem:[#allocation2 + $0xc] sm:$0x1]  ;;  %14773 = vst [vmem:[#allocation22_spill] sm:$0xff] %v11792_v4 }
 0x1e6   : > { %v1428_v58 = vadd.f32 %v1391_v32, %v1071_v2  ;;  %v2405_v14 = vsel %vm11763_vm10, 0, %v2404_v19 }
 0x1e7   : > { %2406 = vst [vmem:[#allocation2 + $0xc] sm:$0x1] %v2405_v14 }
 0x1e9   : > { %v1525_v12 = vpop.f32.mrf.mxu3 }
 0x1ea   : > { %v1562_v50 = vadd.f32 %v1525_v12, %v1428_v58  ;;  %9221 = vmatmul.msk.bf16.gmra.mxu2 %vm716_vm3, %v11397_v43  ;;  %v1075_v16 = vpop.f32.mrf.mxu1 }
 0x1eb   : > { %v1076_v45 = vadd.f32 %v1075_v16, %v14772_v20  ;;  %v2407_v16 = vld [vmem:[#allocation2 + $0x18] sm:$0x1] }
 0x1ec   : > { %v2408_v24 = vsel %vm11763_vm10, 0, %v2407_v16 }
 0x1ed   : > { %v1394_v47 = vpop.f32.mrf.mxu2  ;;  %v2179_v9 = vpop.f32.mrf.mxu0  ;;  %2409 = vst [vmem:[#allocation2 + $0x18] sm:$0x1] %v2408_v24  ;;  %v2410_v24 = vld [vmem:[#allocation2 + $0x24] sm:$0x1] }
 0x1ee   : > { %9238 = vmatmul.msk.bf16.gmra.mxu3 %vm716_vm3, %v14768_v26  ;;  %v1429_v43 = vadd.f32 %v1394_v47, %v1074_v8  ;;  %v14775_v8 = vld [vmem:[#allocation17_spill] sm:$0xff] }
 0x1f0   : > { %9257 = vmatmul.msk.bf16.gmra.mxu0 %vm716_vm3, %v11441_v40 }
 0x1f1   : > { %v1528_v21 = vpop.f32.mrf.mxu3 }
 0x1f2   : > { %v11780_v33 = vadd.f32 %v1528_v21, %v1429_v43  ;;  %v1749_v60 = vpop.f32.mrf.mxu1  ;;  %v11813_v43 = vld [vmem:[%s14603_s2] ss:$0 sm:$0xff] }
 0x1f3   : > { %v1829_v61 = vadd.f32 %v1749_v60, %v11411_v22  ;;  %v2463_v21 = vld [vmem:[#allocation2 + $0x20] sm:$0x1] }
 0x1f4   : > { %v14776_v60 = vld [vmem:[#allocation11_spill] sm:$0xff] }
 0x1f5   : > { %v1396_v44 = vpop.f32.mrf.mxu2  ;;  %9201 = vmatmul.msk.bf16.gmra.mxu1 %vm716_vm3, %v11415_v49  ;;  %v2181_v2 = vpop.f32.mrf.mxu0  ;;  %v11804_v49 = vadd.f32 %v11718_v36, %v1561_v39  ;;  %v2464_v36 = vsel %vm11776_vm12, 0, %v2463_v21 }
 0x1f6   : > { %v1430_v32 = vadd.f32 %v1396_v44, %v1076_v45  ;;  %2465 = vst [vmem:[#allocation2 + $0x20] sm:$0x1] %v2464_v36  ;;  %v11824_v45 = vadd.f32 %v11729_v3, %v1562_v50  ;;  %v10298_v3 = vld [vmem:[%s14604_s3 + $0x150] sm:$0xff] }
 0x1f7   : > { %14774 = vst [vmem:[#allocation31_spill] sm:$0xff] %v11804_v49  ;;  %v10314_v50 = vld [vmem:[%s14604_s3 + $0x350] sm:$0xff]  ;;  %3764 = vmatpush.bf16.msrb.mxu2 %v10298_v3  ;;  %v2478_v49 = vld [vmem:[#allocation2 + $0x5c] sm:$0x1] }
 0x1f8   : > { %14777 = vst [vmem:[#allocation38_spill] sm:$0xff] %v11824_v45  ;;  %4414 = vmatpush.bf16.msrb.mxu3 %v10314_v50  ;;  %v12049_v45 = vld [vmem:[%s10808_s25 + $0xd4] sm:$0x1] }
 0x1f9   : > { %v1530_v58 = vpop.f32.mrf.mxu3 }
 0x1fa   : > { %v11796_v12 = vadd.f32 %v1530_v58, %v1430_v32  ;;  %9222 = vmatmul.msk.bf16.gmra.mxu2 %vm716_vm3, %v11421_v48  ;;  %v1751_v19 = vpop.f32.mrf.mxu1 }
 0x1fb   : > { %v1830_v37 = vadd.f32 %v1751_v19, %v14776_v60  ;;  %v14780_v60 = vld [vmem:[#allocation24_spill] sm:$0xff] }
 0x1fd   : > { %v1883_v14 = vpop.f32.mrf.mxu2  ;;  %v2184_v17 = vpop.f32.mrf.mxu0 }
 0x1fe   : > { %9239 = vmatmul.msk.bf16.gmra.mxu3 %vm716_vm3, %v14775_v8  ;;  %v1963_v47 = vadd.f32 %v1883_v14, %v1829_v61  ;;  %v14779_v8 = vld [vmem:[#allocation12_spill] sm:$0xff] }
 0x200   : > { %9258 = vmatmul.msk.bf16.gmra.mxu0 %vm716_vm3, %v11468_v34 }
 0x201   : > { %v2039_v48 = vpop.f32.mrf.mxu3 }
 0x202   : > { %v2119_v26 = vadd.f32 %v2039_v48, %v1963_v47  ;;  %v1754_v22 = vpop.f32.mrf.mxu1 }
 0x203   : > { %v1831_v47 = vadd.f32 %v1754_v22, %v14779_v8  ;;  %v11844_v22 = vadd.f32 %v11736_v42, %v11780_v33  ;;  %v14785_v8 = vld [vmem:[#allocation20_spill] sm:$0xff] }
 0x204   : > { %v2259_v39 = vadd.f32 %v2179_v9, %v2119_v26  ;;  %v14778_v9 = vld [vmem:[#allocation9_spill] sm:$0xff] }
 0x205   : > { %v1885_v29 = vpop.f32.mrf.mxu2  ;;  %9202 = vmatmul.msk.bf16.gmra.mxu1 %vm716_vm3, %v11441_v40  ;;  %v11820_v56 = vpop.f32.mrf.mxu0  ;;  %v2411_v40 = vsel %vm11763_vm10, 0, %v2410_v24  ;;  %14781 = vst [vmem:[#allocation28_spill] sm:$0xff] %v11844_v22  ;;  %v10306_v24 = vld [vmem:[%s14604_s3 + $0x1d0] sm:$0xff] }
 0x206   : > { %v2295_v6 = vadd.f32 %v11813_v43, %v2259_v39  ;;  %v1964_v20 = vadd.f32 %v1885_v29, %v1830_v37  ;;  %2412 = vst [vmem:[#allocation2 + $0x24] sm:$0x1] %v2411_v40  ;;  %v2836_v29 = vld [vmem:[#allocation2 + $0xc] sm:$0xf]  ;;  %v10338_v40 = vld [vmem:[%s14604_s3 + $0x3d0] sm:$0xff]  ;;  %3563 = vmatpush.bf16.msrb.mxu1 %v10306_v24  ;;  %v14789_v24 = vld [vmem:[#allocation18_spill] sm:$0xff] }
 0x207   : > { %4728 = vmatpush.bf16.msrb.mxu0 %v10338_v40 }
 0x208   : > { %v2327_v44 = vmax.f32 %v2295_v6, 0.0 }
 0x209   : > { %v2041_v32 = vpop.f32.mrf.mxu3 }
 0x20a   : > { %v2359_v58 = vpack.c.bf16 %v2327_v44, %v2327_v44  ;;  %v2120_v16 = vadd.f32 %v2041_v32, %v1964_v20  ;;  %9223 = vmatmul.msk.bf16.gmra.mxu2 %vm716_vm3, %v14778_v9  ;;  %v1756_v19 = vpop.f32.mrf.mxu1  ;;  %v14784_v44 = vld [vmem:[#allocation43_spill] sm:$0xff]  ;;  %v2466_v9 = vld [vmem:[#allocation2 + $0x2c] sm:$0x1] }
 0x20b   : > { %v2467_v3 = vsel %vm11776_vm12, 0, %v2466_v9 }
 0x20c   : > { %v2514_v61 = vshrl.u32 %v2359_v58, 16  ;;  %v2260_v14 = vadd.f32 %v2181_v2, %v2120_v16  ;;  %v2517_v48 = vshll.u32 %v2359_v58, 16  ;;  %2468 = vst [vmem:[#allocation2 + $0x2c] sm:$0x1] %v2467_v3 }
 0x20d   : > { %v1888_v26 = vpop.f32.mrf.mxu2  ;;  %v11837_v21 = vpop.f32.mrf.mxu0 }
 0x20e   : > { %v2516_v36 = vrot.slane %v2514_v61, 7  ;;  %v2296_v39 = vadd.f32 %v11813_v43, %v2260_v14  ;;  %9240 = vmatmul.msk.bf16.gmra.mxu3 %vm716_vm3, %v14780_v60  ;;  %v1965_v2 = vadd.f32 %v1888_v26, %v1831_v47  ;;  %v1832_v47 = vadd.f32 %v1756_v19, %v14785_v8  ;;  %v14790_v8 = vld [vmem:[#allocation21_spill] sm:$0xff] }
 0x210   : > { %v2519_v6 = vor.u32 %v2517_v48, %v2516_v36  ;;  %v2328_v20 = vmax.f32 %v2296_v39, 0.0  ;;  %9259 = vmatmul.msk.bf16.gmra.mxu0 %vm716_vm3, %v14784_v44 }
 0x211   : > { %v2044_v32 = vpop.f32.mrf.mxu3 }
 0x212   : > { %v2837_v58 = vsel %vm11848_vm14, %v2519_v6, %v2836_v29  ;;  %v2360_v16 = vpack.c.bf16 %v2328_v20, %v2328_v20  ;;  %v2121_v42 = vadd.f32 %v2044_v32, %v1965_v2  ;;  %v1759_v33 = vpop.f32.mrf.mxu1  ;;  %v2840_v29 = vld [vmem:[#allocation2 + $0x14] sm:$0x1]  ;;  %v11878_v32 = vadd.f32 %v11754_v54, %v11796_v12 }
 0x213   : > { %2838 = vst [vmem:[#allocation2 + $0xc] sm:$0xf] %v2837_v58 }
 0x214   : > { %v2522_v61 = vshrl.u32 %v2360_v16, 16  ;;  %v2261_v14 = vadd.f32 %v2184_v17, %v2121_v42  ;;  %v2525_v39 = vshll.u32 %v2360_v16, 16  ;;  %v2520_v17 = vrot.slane %v2516_v36, 4  ;;  %14788 = vst [vmem:[#allocation26_spill] sm:$0xff] %v11878_v32 }
 0x215   : > { %v1890_v50 = vpop.f32.mrf.mxu2  ;;  %9203 = vmatmul.msk.bf16.gmra.mxu1 %vm716_vm3, %v11468_v34  ;;  %v11867_v48 = vpop.f32.mrf.mxu0 }
 0x216   : > { %v2524_v26 = vrot.slane %v2522_v61, 7  ;;  %v2297_v60 = vadd.f32 %v11813_v43, %v2261_v14  ;;  %v1966_v2 = vadd.f32 %v1890_v50, %v1832_v47  ;;  %v2413_v61 = vld [vmem:[#allocation2 + $0x30] sm:$0x1]  ;;  %v1833_v47 = vadd.f32 %v1759_v33, %v14790_v8 }
 0x217   : > { %v2414_v14 = vsel %vm11763_vm10, 0, %v2413_v61 }
 0x218   : > { %v2527_v6 = vor.u32 %v2525_v39, %v2524_v26  ;;  %v2529_v34 = vrot.slane %v2524_v26, 4  ;;  %v2329_v20 = vmax.f32 %v2297_v60, 0.0  ;;  %2415 = vst [vmem:[#allocation2 + $0x30] sm:$0x1] %v2414_v14  ;;  %v14793_v14 = vld [vmem:[#allocation41_spill] sm:$0xff] }
 0x219   : > { %v2046_v58 = vpop.f32.mrf.mxu3 }
 0x21a   : > { %v2528_v16 = vsel %vm11872_vm0, %v2520_v17, %v2527_v6  ;;  %v2841_v36 = vsel %vm11763_vm10, %v2529_v34, %v2840_v29  ;;  %v2361_v42 = vpack.c.bf16 %v2329_v20, %v2329_v20  ;;  %v2122_v9 = vadd.f32 %v2046_v58, %v1966_v2  ;;  %9224 = vmatmul.msk.bf16.gmra.mxu2 %vm716_vm3, %v14789_v24  ;;  %v1761_v40 = vpop.f32.mrf.mxu1  ;;  %v14791_v2 = vld [vmem:[#allocation7_spill] sm:$0xff]  ;;  %v2843_v29 = vld [vmem:[#allocation2 + $0x18] sm:$0xf] }
 0x21b   : > { %2839 = vst [vmem:[#allocation2 + $0x10] sm:$0xf] %v2528_v16  ;;  %v14792_v20 = vld [vmem:[#allocation47_spill] sm:$0xff] }
 0x21c   : > { %2842 = vst [vmem:[#allocation2 + $0x14] sm:$0x1] %v2841_v36  ;;  %v2531_v54 = vshrl.u32 %v2361_v42, 16  ;;  %v2262_v12 = vadd.f32 %v11820_v56, %v2122_v9  ;;  %v2534_v39 = vshll.u32 %v2361_v42, 16  ;;  %v2469_v42 = vld [vmem:[#allocation2 + $0x38] sm:$0x1] }
 0x21d   : > { %v1893_v3 = vpop.f32.mrf.mxu2  ;;  %v11890_v50 = vpop.f32.mrf.mxu0  ;;  %v2470_v9 = vsel %vm11776_vm12, 0, %v2469_v42  ;;  %v2416_v42 = vld [vmem:[#allocation2 + $0x3c] sm:$0x1] }
 0x21e   : > { %v2533_v26 = vrot.slane %v2531_v54, 7  ;;  %v2298_v60 = vadd.f32 %v11813_v43, %v2262_v12  ;;  %9241 = vmatmul.msk.bf16.gmra.mxu3 %vm716_vm3, %v14791_v2  ;;  %v1967_v17 = vadd.f32 %v1893_v3, %v1833_v47  ;;  %v1834_v54 = vadd.f32 %v1761_v40, %v14793_v14  ;;  %2471 = vst [vmem:[#allocation2 + $0x38] sm:$0x1] %v2470_v9  ;;  %v2847_v2 = vld [vmem:[#allocation2 + $0x20] sm:$0x1] }
 0x220   : > { %v2536_v6 = vor.u32 %v2534_v39, %v2533_v26  ;;  %v2330_v34 = vmax.f32 %v2298_v60, 0.0  ;;  %9260 = vmatmul.msk.bf16.gmra.mxu0 %vm716_vm3, %v14792_v20 }
 0x221   : > { %v2049_v56 = vpop.f32.mrf.mxu3 }
 0x222   : > { %v2844_v33 = vsel %vm11848_vm14, %v2536_v6, %v2843_v29  ;;  %v2362_v58 = vpack.c.bf16 %v2330_v34, %v2330_v34  ;;  %v2123_v16 = vadd.f32 %v2049_v56, %v1967_v17  ;;  %v1764_v36 = vpop.f32.mrf.mxu1  ;;  %v2537_v17 = vrot.slane %v2533_v26, 4 }
 0x223   : > { %2845 = vst [vmem:[#allocation2 + $0x18] sm:$0xf] %v2844_v33  ;;  %v2417_v26 = vsel %vm11763_vm10, 0, %v2416_v42  ;;  %v10305_v42 = vld [vmem:[%s14604_s3 + $0x1c8] sm:$0xff]  ;;  %v12069_v5 = vld [vmem:[#allocation2 + $0x14] sm:$0x1] }
 0x224   : > { %v2539_v24 = vshrl.u32 %v2362_v58, 16  ;;  %v2263_v61 = vadd.f32 %v11837_v21, %v2123_v16  ;;  %v2542_v3 = vshll.u32 %v2362_v58, 16  ;;  %v14794_v16 = vld [vmem:[#allocation44_spill] sm:$0xff]  ;;  %2418 = vst [vmem:[#allocation2 + $0x3c] sm:$0x1] %v2417_v26  ;;  %3564 = vmatpush.bf16.msrb.mxu1 %v10305_v42 }
 0x225   : > { %v1895_v12 = vpop.f32.mrf.mxu2  ;;  %9204 = vmatmul.msk.bf16.gmra.mxu1 %vm716_vm3, %v14784_v44  ;;  %v11905_v8 = vpop.f32.mrf.mxu0  ;;  %v10337_v26 = vld [vmem:[%s14604_s3 + $0x3c8] sm:$0xff] }
 0x226   : > { %v2541_v47 = vrot.slane %v2539_v24, 7  ;;  %v2299_v39 = vadd.f32 %v11813_v43, %v2263_v61  ;;  %v1968_v60 = vadd.f32 %v1895_v12, %v1834_v54  ;;  %v14795_v61 = vld [vmem:[#allocation42_spill] sm:$0xff]  ;;  %v10297_v54 = vld [vmem:[%s14604_s3 + $0x148] sm:$0xff]  ;;  %4729 = vmatpush.bf16.msrb.mxu0 %v10337_v26 }
 0x227   : > { %v1835_v14 = vadd.f32 %v1764_v36, %v14795_v61  ;;  %v10313_v12 = vld [vmem:[%s14604_s3 + $0x348] sm:$0xff]  ;;  %3765 = vmatpush.bf16.msrb.mxu2 %v10297_v54  ;;  %v2850_v36 = vld [vmem:[#allocation2 + $0x24] sm:$0xf] }
 0x228   : > { %v2544_v29 = vor.u32 %v2542_v3, %v2541_v47  ;;  %v2546_v6 = vrot.slane %v2541_v47, 4  ;;  %v2331_v34 = vmax.f32 %v2299_v39, 0.0  ;;  %4415 = vmatpush.bf16.msrb.mxu3 %v10313_v12  ;;  %v3851_v12 = vld [vmem:[#allocation2 + $0xc] sm:$0xf] }
 0x229   : > { %v2051_v21 = vpop.f32.mrf.mxu3  ;;  %v3924_v32 = vshll.u32 %v3851_v12, 16 }
 0x22a   : > { %v2545_v40 = vsel %vm11872_vm0, %v2537_v17, %v2544_v29  ;;  %v2848_v56 = vsel %vm11763_vm10, %v2546_v6, %v2847_v2  ;;  %v2363_v44 = vpack.c.bf16 %v2331_v34, %v2331_v34  ;;  %v2124_v33 = vadd.f32 %v2051_v21, %v1968_v60  ;;  %9225 = vmatmul.msk.bf16.gmra.mxu2 %vm716_vm3, %v14794_v16  ;;  %v1766_v58 = vpop.f32.mrf.mxu1  ;;  %v14796_v17 = vld [vmem:[#allocation10_spill] sm:$0xff]  ;;  %v2948_v16 = vld [vmem:[#allocation2 + $0xc] sm:$0xf] }
 0x22b   : > { %2846 = vst [vmem:[#allocation2 + $0x1c] sm:$0xf] %v2545_v40 }
 0x22c   : > { %2849 = vst [vmem:[#allocation2 + $0x20] sm:$0x1] %v2848_v56  ;;  %v2548_v9 = vshrl.u32 %v2363_v44, 16  ;;  %v2264_v24 = vadd.f32 %v11867_v48, %v2124_v33  ;;  %v2551_v60 = vshll.u32 %v2363_v44, 16  ;;  %v2472_v33 = vld [vmem:[#allocation2 + $0x44] sm:$0x1] }
 0x22d   : > { %v1898_v47 = vpop.f32.mrf.mxu2  ;;  %v11924_v3 = vpop.f32.mrf.mxu0 }
 0x22e   : > { %v2550_v39 = vrot.slane %v2548_v9, 7  ;;  %v2300_v2 = vadd.f32 %v11813_v43, %v2264_v24  ;;  %9242 = vmatmul.msk.bf16.gmra.mxu3 %vm716_vm3, %v14796_v17  ;;  %v1969_v48 = vadd.f32 %v1898_v47, %v1835_v14  ;;  %v2473_v9 = vsel %vm11776_vm12, 0, %v2472_v33  ;;  %v14797_v14 = vld [vmem:[#allocation45_spill] sm:$0xff] }
 0x22f   : > { %v1836_v54 = vadd.f32 %v1766_v58, %v14797_v14  ;;  %2474 = vst [vmem:[#allocation2 + $0x44] sm:$0x1] %v2473_v9  ;;  %v3921_v58 = vshrl.u32 %v3851_v12, 16 }
 0x230   : > { %v2553_v29 = vor.u32 %v2551_v60, %v2550_v39  ;;  %v2332_v6 = vmax.f32 %v2300_v2, 0.0  ;;  %9261 = vmatmul.msk.bf16.gmra.mxu0 %vm716_vm3, %v11554_v1 }
 0x231   : > { %v2054_v34 = vpop.f32.mrf.mxu3 }
 0x232   : > { %v2851_v21 = vsel %vm11848_vm14, %v2553_v29, %v2850_v36  ;;  %v2364_v40 = vpack.c.bf16 %v2332_v6, %v2332_v6  ;;  %v2125_v56 = vadd.f32 %v2054_v34, %v1969_v48  ;;  %v1769_v44 = vpop.f32.mrf.mxu1  ;;  %v2854_v29 = vld [vmem:[#allocation2 + $0x2c] sm:$0x1]  ;;  %v3000_v6 = vshll.u32 %v2948_v16, 16 }
 0x233   : > { %2852 = vst [vmem:[#allocation2 + $0x24] sm:$0xf] %v2851_v21  ;;  %v2554_v34 = vrot.slane %v2550_v39, 4 }
 0x234   : > { %v2556_v24 = vshrl.u32 %v2364_v40, 16  ;;  %v2265_v61 = vadd.f32 %v11890_v50, %v2125_v56  ;;  %v2559_v17 = vshll.u32 %v2364_v40, 16  ;;  %v2997_v50 = vshrl.u32 %v2948_v16, 16  ;;  %v2419_v16 = vld [vmem:[#allocation2 + $0x48] sm:$0x1] }
 0x235   : > { %v1900_v47 = vpop.f32.mrf.mxu2  ;;  %9205 = vmatmul.msk.bf16.gmra.mxu1 %vm716_vm3, %v14792_v20  ;;  %v11945_v60 = vpop.f32.mrf.mxu0  ;;  %v10514_v20 = vld [vmem:[%s10808_s25 + $0xc4] sm:$0xf]  ;;  %v3002_v12 = vrot.slane %v3000_v6, 5 }
 0x236   : > { %v2558_v2 = vrot.slane %v2556_v24, 7  ;;  %v2301_v48 = vadd.f32 %v11813_v43, %v2265_v61  ;;  %v1970_v36 = vadd.f32 %v1900_v47, %v1836_v54  ;;  %v1724_v14 = vrot.slane %v10514_v20, 5 }
 0x237   : > { %v2420_v61 = vsel %vm11763_vm10, 0, %v2419_v16  ;;  %v2999_v54 = vrot.slane %v2997_v50, 4  ;;  %v3926_v50 = vrot.slane %v3924_v32, 5 }
 0x238   : > { %v2561_v21 = vor.u32 %v2559_v17, %v2558_v2  ;;  %v2563_v56 = vrot.slane %v2558_v2, 4  ;;  %v2333_v33 = vmax.f32 %v2301_v48, 0.0  ;;  %v14798_v17 = vld [vmem:[#allocation46_spill] sm:$0xff]  ;;  %2421 = vst [vmem:[#allocation2 + $0x48] sm:$0x1] %v2420_v61 }
 0x239   : > { %v2056_v9 = vpop.f32.mrf.mxu3  ;;  %v1837_v48 = vadd.f32 %v1769_v44, %v14798_v17 }
 0x23a   : > { %v2562_v26 = vsel %vm11872_vm0, %v2554_v34, %v2561_v21  ;;  %v2855_v40 = vsel %vm11763_vm10, %v2563_v56, %v2854_v29  ;;  %v2365_v24 = vpack.c.bf16 %v2333_v33, %v2333_v33  ;;  %v2126_v42 = vadd.f32 %v2056_v9, %v1970_v36  ;;  %9226 = vmatmul.msk.bf16.gmra.mxu2 %vm716_vm3, %v11529_v52  ;;  %v1771_v39 = vpop.f32.mrf.mxu1  ;;  %v11959_v36 = vld [vmem:[#allocation2 + $0x10] sm:$0xf]  ;;  %v10515_v21 = vld [vmem:[%s10808_s25 + $0xc0] sm:$0xf]  ;;  %v10516_v9 = vld [vmem:[%s10808_s25 + $0xc8] sm:$0x1] }
 0x23b   : > { %2853 = vst [vmem:[#allocation2 + $0x28] sm:$0xf] %v2562_v26  ;;  %v3923_v29 = vrot.slane %v3921_v58, 4  ;;  %v9191_v56 = vrot.slane %v10515_v21, 9  ;;  %v1726_v33 = vrot.slane %v1724_v14, 4  ;;  %v1727_v20 = vrot.slane %v10516_v9, 5 }
 0x23c   : > { %2856 = vst [vmem:[#allocation2 + $0x2c] sm:$0x1] %v2855_v40  ;;  %v2565_v47 = vshrl.u32 %v2365_v24, 16  ;;  %v2266_v2 = vadd.f32 %v11905_v8, %v2126_v42  ;;  %v2568_v26 = vshll.u32 %v2365_v24, 16  ;;  %v14799_v40 = vld [vmem:[#allocation19_spill] sm:$0xff]  ;;  %v3003_v42 = vor.u32 %v3002_v12, %v2999_v54 }
 0x23d   : > { %v1903_v52 = vpop.f32.mrf.mxu2  ;;  %v11961_v34 = vpop.f32.mrf.mxu0  ;;  %v2857_v58 = vld [vmem:[#allocation2 + $0x30] sm:$0xf]  ;;  %v3006_v16 = vshll.u32 %v11959_v36, 16  ;;  %v1725_v24 = vsel %vm11159_vm7, %v9191_v56, %v1724_v14  ;;  %v1728_v9 = vsel %vm11159_vm7, %v1726_v33, %v1727_v20 }
 0x23e   : > { %v11965_v6 = vrot.slane %v2565_v47, 7  ;;  %v2302_v8 = vadd.f32 %v11813_v43, %v2266_v2  ;;  %9243 = vmatmul.msk.bf16.gmra.mxu3 %vm716_vm3, %v14799_v40  ;;  %v1971_v44 = vadd.f32 %v1903_v52, %v1837_v48  ;;  %v14646_v47 = vmov 0   ;;  %v2475_v21 = vld [vmem:[#allocation2 + $0x50] sm:$0x1] }
 0x23f   : > { %2391 = vst [vmem:[#allocation2] sm:$0xf] %v14646_v47  ;;  %v3927_v2 = vor.u32 %v3926_v50, %v3923_v29  ;;  %v2476_v14 = vsel %vm11776_vm12, 0, %v2475_v21  ;;  %v11984_v56 = vrot.slane %v3003_v42, 4  ;;  %v11986_v29 = vrot.slane %v3006_v16, 5 }
 0x240   : > { %v2570_v61 = vor.u32 %v2568_v26, %v11965_v6  ;;  %v2334_v17 = vmax.f32 %v2302_v8, 0.0  ;;  %9262 = vmatmul.msk.bf16.gmra.mxu0 %vm716_vm3, %v11591_v46  ;;  %v2950_v26 = vld [vmem:[#allocation2 + $0x14] sm:$0x1]  ;;  %2392 = vst [vmem:[#allocation2 + $0x4] sm:$0xf] %v14646_v47  ;;  %v1838_v40 = vadd.f32 %v1771_v39, %v11535_v55  ;;  %v1731_v42 = vunpack.c.l.b16 %v1725_v24 }
 0x241   : > { %v2059_v32 = vpop.f32.mrf.mxu3  ;;  %2477 = vst [vmem:[#allocation2 + $0x50] sm:$0x1] %v2476_v14  ;;  %v11991_v33 = vld [vmem:[#allocation2 + $0x10] sm:$0xf]  ;;  %v1732_v16 = vunpack.c.l.b16 %v1728_v9 }
 0x242   : > { %v2858_v48 = vsel %vm11848_vm14, %v2570_v61, %v2857_v58  ;;  %v2366_v54 = vpack.c.bf16 %v2334_v17, %v2334_v17  ;;  %v2127_v12 = vadd.f32 %v2059_v32, %v1971_v44  ;;  %v1774_v52 = vpop.f32.mrf.mxu1  ;;  %v3010_v44 = vshrl.u32 %v11959_v36, 16  ;;  %2393 = vst [vmem:[#allocation2 + $0x8] sm:$0x1] %v14646_v47  ;;  %v12008_v9 = vld [vmem:[%s10808_s25 + $0xd0] sm:$0xf] }
 0x243   : > { %2859 = vst [vmem:[#allocation2 + $0x30] sm:$0xf] %v2858_v48  ;;  %v3016_v61 = vshll.u32 %v2950_v26, 16  ;;  %v11997_v17 = vrot.slane %v3927_v2, 4  ;;  %v2571_v32 = vrot.slane %v11965_v6, 4  ;;  %v12010_v26 = vpack.c.b16 %v1732_v16, %v1731_v42 }
 0x244   : > { %v2573_v50 = vshrl.u32 %v2366_v54, 16  ;;  %v2267_v8 = vadd.f32 %v11924_v3, %v2127_v12  ;;  %v2576_v55 = vshll.u32 %v2366_v54, 16  ;;  %v2861_v48 = vld [vmem:[#allocation2 + $0x38] sm:$0x1]  ;;  %2395 = vst [vmem:[#allocation2 + $0xcc] sm:$0xf] %v14646_v47 }
 0x245   : > { %v1905_v20 = vpop.f32.mrf.mxu2  ;;  %9206 = vmatmul.msk.bf16.gmra.mxu1 %vm716_vm3, %v11554_v1  ;;  %v11995_v58 = vpop.f32.mrf.mxu0  ;;  %v3930_v1 = vshll.u32 %v11991_v33, 16  ;;  %v12005_v2 = vld [vmem:[%s10808_s25 + $0xcc] sm:$0xf]  ;;  %v12012_v14 = vrot.slane %v3010_v44, 4  ;;  %2396 = vst [vmem:[#allocation2 + $0xd0] sm:$0xf] %v14646_v47 }
 0x246   : > { %v2575_v3 = vrot.slane %v2573_v50, 7  ;;  %v2303_v39 = vadd.f32 %v11813_v43, %v2267_v8  ;;  %v1972_v36 = vadd.f32 %v1905_v20, %v1838_v40  ;;  %v12014_v50 = vrot.slane %v3016_v61, 5  ;;  %v2422_v44 = vld [vmem:[#allocation2 + $0x54] sm:$0x1]  ;;  %v2401_v16 = vld [vmem:[#allocation2] sm:$0x1] }
 0x247   : > { %v3934_v6 = vshrl.u32 %v11991_v33, 16  ;;  %v2423_v61 = vsel %vm11763_vm10, 0, %v2422_v44  ;;  %v1996_v33 = vshrl.u32 %v12005_v2, 16  ;;  %v2864_v44 = vld [vmem:[#allocation2 + $0x3c] sm:$0xf] }
 0x248   : > { %v2578_v24 = vor.u32 %v2576_v55, %v2575_v3  ;;  %v2580_v12 = vrot.slane %v2575_v3, 4  ;;  %v2335_v21 = vmax.f32 %v2303_v39, 0.0  ;;  %v10517_v55 = vld [vmem:[%s10808_s25 + $0xb4] sm:$0xff]  ;;  %v1999_v39 = vshll.u32 %v12005_v2, 16  ;;  %2424 = vst [vmem:[#allocation2 + $0x54] sm:$0x1] %v2423_v61 }
 0x249   : > { %v2061_v54 = vpop.f32.mrf.mxu3 }
 0x24a   : > { %v2579_v8 = vsel %vm11872_vm0, %v2571_v32, %v2578_v24  ;;  %v2862_v40 = vsel %vm11763_vm10, %v2580_v12, %v2861_v48  ;;  %v2367_v20 = vpack.c.bf16 %v2335_v21, %v2335_v21  ;;  %v2128_v3 = vadd.f32 %v2061_v54, %v1972_v36  ;;  %9227 = vmatmul.msk.bf16.gmra.mxu2 %vm716_vm3, %v10517_v55  ;;  %v1776_v42 = vpop.f32.mrf.mxu1  ;;  %v10296_v12 = vld [vmem:[%s14604_s3 + $0x140] sm:$0xff] }
 0x24b   : > { %2860 = vst [vmem:[#allocation2 + $0x34] sm:$0xf] %v2579_v8  ;;  %v2005_v32 = vshll.u32 %v12008_v9, 16  ;;  %v1839_v24 = vadd.f32 %v1774_v52, %v11546_v10  ;;  %v10312_v21 = vld [vmem:[%s14604_s3 + $0x340] sm:$0xff]  ;;  %v2154_v54 = vrot.slane %v12008_v9, 5  ;;  %v2402_v10 = vsel %vm11763_vm10, 0, %v2401_v16  ;;  %3766 = vmatpush.bf16.msrb.mxu2 %v10296_v12 }
 0x24c   : > { %2863 = vst [vmem:[#allocation2 + $0x38] sm:$0x1] %v2862_v40  ;;  %v2582_v48 = vshrl.u32 %v2367_v20, 16  ;;  %v2268_v36 = vadd.f32 %v11945_v60, %v2128_v3  ;;  %v2009_v40 = vshrl.u32 %v12008_v9, 16  ;;  %v2457_v60 = vld [vmem:[#allocation2 + $0x8] sm:$0x1]  ;;  %4416 = vmatpush.bf16.msrb.mxu3 %v10312_v21  ;;  %v3013_v16 = vor.u32 %v12012_v14, %v11986_v29 }
 0x24d   : > { %v1908_v8 = vpop.f32.mrf.mxu2  ;;  %v12038_v55 = vpop.f32.mrf.mxu0  ;;  %v2585_v3 = vshll.u32 %v2367_v20, 16  ;;  %v9247_v9 = vrot.slane %v12005_v2, 9  ;;  %2403 = vst [vmem:[#allocation2] sm:$0x1] %v2402_v10  ;;  %v2458_v20 = vsel %vm11776_vm12, 0, %v2457_v60  ;;  %v1998_v12 = vrot.slane %v1996_v33, 4 }
 0x24e   : > { %v12043_v52 = vrot.slane %v2582_v48, 7  ;;  %v2304_v47 = vadd.f32 %v11813_v43, %v2268_v36  ;;  %9244 = vmatmul.msk.bf16.gmra.mxu3 %vm716_vm3, %v11165_v41  ;;  %v1973_v22 = vadd.f32 %v1908_v8, %v1839_v24  ;;  %v2156_v41 = vrot.slane %v2154_v54, 4  ;;  %2459 = vst [vmem:[#allocation2 + $0x8] sm:$0x1] %v2458_v20  ;;  %v10304_v33 = vld [vmem:[%s14604_s3 + $0x1c0] sm:$0xff] }
 0x24f   : > { %v2157_v36 = vrot.slane %v12049_v45, 5  ;;  %v2001_v2 = vrot.slane %v1999_v39, 5  ;;  %v14800_v21 = vmov 0   ;;  %v12061_v14 = vrot.slane %v3930_v1, 5  ;;  %v10336_v1 = vld [vmem:[%s14604_s3 + $0x3c0] sm:$0xff]  ;;  %3565 = vmatpush.bf16.msrb.mxu1 %v10304_v33 }
 0x250   : > { %v2587_v61 = vor.u32 %v2585_v3, %v12043_v52  ;;  %v2336_v48 = vmax.f32 %v2304_v47, 0.0  ;;  %9263 = vmatmul.msk.bf16.gmra.mxu0 %vm716_vm3, %v12010_v26  ;;  %2397 = vst [vmem:[#allocation2 + $0xd4] sm:$0x1] %v14800_v21  ;;  %v12063_v8 = vrot.slane %v3934_v6, 4  ;;  %v12067_v4 = vrot.slane %v2005_v32, 5 }
 0x251   : > { %v2064_v24 = vpop.f32.mrf.mxu3  ;;  %v2479_v6 = vsel %vm11776_vm12, 0, %v2478_v49  ;;  %v2011_v39 = vrot.slane %v2009_v40, 4  ;;  %v3009_v32 = vsel %vm10846_vm4, %v11984_v56, %v11986_v29  ;;  %4730 = vmatpush.bf16.msrb.mxu0 %v10336_v1  ;;  %v3014_v40 = vrot.slane %v3013_v16, 4 }
 0x252   : > { %v2865_v10 = vsel %vm11848_vm14, %v2587_v61, %v2864_v44  ;;  %v2368_v47 = vpack.c.bf16 %v2336_v48, %v2336_v48  ;;  %v2129_v60 = vadd.f32 %v2064_v24, %v1973_v22  ;;  %v1779_v3 = vpop.f32.mrf.mxu1  ;;  %v2155_v22 = vsel %vm11159_vm7, %v9247_v9, %v2154_v54  ;;  %2480 = vst [vmem:[#allocation2 + $0x5c] sm:$0x1] %v2479_v6 }
 0x253   : > { %2866 = vst [vmem:[#allocation2 + $0x3c] sm:$0xf] %v2865_v10  ;;  %v1840_v61 = vadd.f32 %v1776_v42, %v11566_v63  ;;  %v2158_v48 = vsel %vm11159_vm7, %v2156_v41, %v2157_v36  ;;  %v2002_v54 = vor.u32 %v2001_v2, %v1998_v12  ;;  %v3940_v63 = vshll.u32 %v12069_v5, 16  ;;  %v2951_v41 = vld [vmem:[#allocation2 + $0x18] sm:$0xf] }
 0x254   : > { %v2590_v44 = vshrl.u32 %v2368_v47, 16  ;;  %v2269_v20 = vadd.f32 %v11961_v34, %v2129_v60  ;;  %v3933_v34 = vsel %vm10846_vm4, %v11997_v17, %v12061_v14  ;;  %v2593_v29 = vshll.u32 %v2368_v47, 16 }
 0x255   : > { %v1910_v24 = vpop.f32.mrf.mxu2  ;;  %9207 = vmatmul.msk.bf16.gmra.mxu1 %vm716_vm3, %v11591_v46  ;;  %v12091_v49 = vpop.f32.mrf.mxu0  ;;  %v2868_v46 = vld [vmem:[#allocation2 + $0x44] sm:$0x1]  ;;  %v2012_v36 = vor.u32 %v2011_v39, %v12067_v4  ;;  %v2015_v12 = vshll.u32 %v12049_v45, 16  ;;  %v2161_v16 = vunpack.c.l.b16 %v2155_v22  ;;  %v2162_v2 = vunpack.c.l.b16 %v2158_v48 }
 0x256   : > { %v2592_v56 = vrot.slane %v2590_v44, 7  ;;  %v2305_v42 = vadd.f32 %v11813_v43, %v2269_v20  ;;  %v1974_v9 = vadd.f32 %v1910_v24, %v1840_v61  ;;  %v2588_v21 = vrot.slane %v12043_v52, 4  ;;  %v10518_v44 = vld [vmem:[%s10808_s25 + $0xc0] sm:$0xff] }
 0x257   : > { %v3019_v47 = vsel %vm10846_vm4, %v3014_v40, %v12014_v50  ;;  %v3021_v33 = vshrl.u32 %v2951_v41, 16  ;;  %v3024_v1 = vshll.u32 %v2951_v41, 16  ;;  %v3937_v6 = vor.u32 %v12063_v8, %v12061_v14  ;;  %v2425_v61 = vld [vmem:[#allocation2 + $0x60] sm:$0x1] }
 0x258   : > { %v2595_v17 = vor.u32 %v2593_v29, %v2592_v56  ;;  %v2597_v10 = vrot.slane %v2592_v56, 4  ;;  %v2337_v5 = vmax.f32 %v2305_v42, 0.0  ;;  %v2003_v50 = vrot.slane %v2002_v54, 4 }
 0x259   : > { %v2066_v60 = vpop.f32.mrf.mxu3  ;;  %v2013_v48 = vrot.slane %v2012_v36, 4  ;;  %v2017_v24 = vrot.slane %v2015_v12, 5  ;;  %v2426_v14 = vsel %vm11763_vm10, 0, %v2425_v61  ;;  %v1841_v56 = vadd.f32 %v1779_v3, %v11588_v13  ;;  %v12125_v36 = vld [vmem:[#allocation2 + $0x18] sm:$0xf] }
 0x25a   : > { %v2596_v45 = vsel %vm11872_vm0, %v2588_v21, %v2595_v17  ;;  %v2869_v39 = vsel %vm11763_vm10, %v2597_v10, %v2868_v46  ;;  %v2369_v52 = vpack.c.bf16 %v2337_v5, %v2337_v5  ;;  %v2130_v22 = vadd.f32 %v2066_v60, %v1974_v9  ;;  %9228 = vmatmul.msk.bf16.gmra.mxu2 %vm716_vm3, %v10518_v44  ;;  %v1781_v20 = vpop.f32.mrf.mxu1  ;;  %v3848_v3 = vld [vmem:[#allocation2] sm:$0xf] }
 0x25b   : > { %2867 = vst [vmem:[#allocation2 + $0x40] sm:$0xf] %v2596_v45  ;;  %v2163_v29 = vpack.c.b16 %v2162_v2, %v2161_v16  ;;  %v12119_v41 = vunpack.c.l.b16 %v3009_v32  ;;  %v12121_v46 = vunpack.c.l.b16 %v3019_v47  ;;  %v12123_v54 = vrot.slane %v3940_v63, 5  ;;  %v3849_v16 = vld [vmem:[#allocation2 + $0x4] sm:$0xf] }
 0x25c   : > { %2870 = vst [vmem:[#allocation2 + $0x44] sm:$0x1] %v2869_v39  ;;  %v2599_v8 = vshrl.u32 %v2369_v52, 16  ;;  %v2270_v40 = vadd.f32 %v11995_v58, %v2130_v22  ;;  %v2602_v21 = vshll.u32 %v2369_v52, 16  ;;  %v2871_v2 = vld [vmem:[#allocation2 + $0x48] sm:$0xf]  ;;  %v12138_v10 = vunpack.c.l.b16 %v3933_v34 }
 0x25d   : > { %v1913_v42 = vpop.f32.mrf.mxu2  ;;  %v12117_v9 = vpop.f32.mrf.mxu0  ;;  %2427 = vst [vmem:[#allocation2 + $0x60] sm:$0x1] %v2426_v14  ;;  %v12132_v32 = vrot.slane %v3021_v33, 4  ;;  %v12134_v17 = vrot.slane %v3024_v1, 5  ;;  %v12136_v63 = vrot.slane %v3937_v6, 4  ;;  %v2008_v47 = vsel %vm10846_vm4, %v2003_v50, %v12067_v4 }
 0x25e   : > { %v12127_v12 = vrot.slane %v2599_v8, 7  ;;  %v2306_v58 = vadd.f32 %v11813_v43, %v2270_v40  ;;  %9245 = vmatmul.msk.bf16.gmra.mxu3 %vm716_vm3, %v11563_v53  ;;  %v1975_v13 = vadd.f32 %v1913_v42, %v1841_v56  ;;  %v2018_v53 = vsel %vm10846_vm4, %v2013_v48, %v2017_v24  ;;  %v2952_v33 = vld [vmem:[#allocation2 + $0x1c] sm:$0xf]  ;;  %v2481_v14 = vld [vmem:[#allocation2 + $0x68] sm:$0x1] }
 0x25f   : > { %v3897_v1 = vshrl.u32 %v3848_v3, 16  ;;  %v3900_v39 = vshll.u32 %v3848_v3, 16  ;;  %v3906_v6 = vshll.u32 %v3849_v16, 16  ;;  %v3910_v52 = vshrl.u32 %v3849_v16, 16 }
 0x260   : > { %v2604_v5 = vor.u32 %v2602_v21, %v12127_v12  ;;  %v2338_v60 = vmax.f32 %v2306_v58, 0.0  ;;  %9264 = vmatmul.msk.bf16.gmra.mxu0 %vm716_vm3, %v2163_v29  ;;  %v3945_v4 = vshrl.u32 %v12125_v36, 16  ;;  %v12150_v50 = vunpack.c.l.b16 %v2008_v47 }
 0x261   : > { %v2069_v45 = vpop.f32.mrf.mxu3  ;;  %v2482_v48 = vsel %vm11776_vm12, 0, %v2481_v14  ;;  %v3030_v24 = vshll.u32 %v2952_v33, 16  ;;  %v3034_v8 = vshrl.u32 %v2952_v33, 16  ;;  %v1842_v29 = vadd.f32 %v1781_v20, %v11597_v7  ;;  %v10279_v33 = vld [vmem:[%s10808_s25 + $0xcc] sm:$0xff]  ;;  %v3850_v7 = vld [vmem:[#allocation2 + $0x8] sm:$0x1] }
 0x262   : > { %v2872_v34 = vsel %vm11848_vm14, %v2604_v5, %v2871_v2  ;;  %v2370_v22 = vpack.c.bf16 %v2338_v60, %v2338_v60  ;;  %v2131_v44 = vadd.f32 %v2069_v45, %v1975_v13  ;;  %v1784_v61 = vpop.f32.mrf.mxu1  ;;  %v2022_v42 = vunpack.c.l.b16 %v2018_v53  ;;  %2483 = vst [vmem:[#allocation2 + $0x68] sm:$0x1] %v2482_v48  ;;  %v2875_v20 = vld [vmem:[#allocation2 + $0x50] sm:$0x1]  ;;  %v2953_v53 = vld [vmem:[#allocation2 + $0x20] sm:$0x1] }
 0x263   : > { %2873 = vst [vmem:[#allocation2 + $0x48] sm:$0xf] %v2872_v34  ;;  %v3899_v13 = vrot.slane %v3897_v1, 4  ;;  %v3902_v3 = vrot.slane %v3900_v39, 5  ;;  %v12160_v16 = vrot.slane %v3906_v6, 5  ;;  %v3912_v2 = vrot.slane %v3910_v52, 4 }
 0x264   : > { %v2607_v40 = vshrl.u32 %v2370_v22, 16  ;;  %v2271_v56 = vadd.f32 %v12038_v55, %v2131_v44  ;;  %v2610_v60 = vshll.u32 %v2370_v22, 16  ;;  %v3027_v45 = vor.u32 %v12134_v17, %v12132_v32  ;;  %v2954_v44 = vld [vmem:[#allocation2 + $0x24] sm:$0xf]  ;;  %s10702_s25 = smov 96  }
 0x265   : > { %v1915_v21 = vpop.f32.mrf.mxu2  ;;  %9208 = vmatmul.msk.bf16.gmra.mxu1 %vm716_vm3, %v12010_v26  ;;  %v12158_v58 = vpop.f32.mrf.mxu0  ;;  %v12166_v26 = vrot.slane %v3030_v24, 5  ;;  %v3036_v34 = vrot.slane %v3034_v8, 4  ;;  %v3943_v1 = vsel %vm10846_vm4, %v12136_v63, %v12123_v54  ;;  %v2605_v39 = vrot.slane %v12127_v12, 4 }
 0x266   : > { %v2609_v5 = vrot.slane %v2607_v40, 7  ;;  %v2307_v47 = vadd.f32 %v11813_v43, %v2271_v56  ;;  %v1976_v55 = vadd.f32 %v1915_v21, %v1842_v29  ;;  %v2023_v48 = vpack.c.b16 %v2022_v42, %v12150_v50  ;;  %v2428_v56 = vld [vmem:[#allocation2 + $0x6c] sm:$0x1] }
 0x267   : > { %v3903_v40 = vor.u32 %v3902_v3, %v3899_v13  ;;  %v3913_v32 = vor.u32 %v3912_v2, %v12160_v16  ;;  %v3916_v17 = vshll.u32 %v3850_v7, 16  ;;  %v2429_v50 = vsel %vm11763_vm10, 0, %v2428_v56 }
 0x268   : > { %v2612_v6 = vor.u32 %v2610_v60, %v2609_v5  ;;  %v2614_v52 = vrot.slane %v2609_v5, 4  ;;  %v2339_v22 = vmax.f32 %v2307_v47, 0.0  ;;  %v3028_v29 = vrot.slane %v3027_v45, 4  ;;  %v10320_v5 = vld [vmem:[#allocation2] sm:$0xff]  ;;  %v10351_v60 = vld [vmem:[%s14604_s3 + $0x138] sm:$0xff] }
 0x269   : > { %v2071_v14 = vpop.f32.mrf.mxu3  ;;  %v3040_v42 = vshll.u32 %v2953_v53, 16  ;;  %v3045_v21 = vshrl.u32 %v2954_v44, 16  ;;  %v1843_v2 = vadd.f32 %v1784_v61, %v11603_v31  ;;  %v10367_v47 = vld [vmem:[%s14604_s3 + $0x338] sm:$0xff]  ;;  %v3914_v53 = vrot.slane %v3913_v32, 4  ;;  %2430 = vst [vmem:[#allocation2 + $0x6c] sm:$0x1] %v2429_v50  ;;  %5355 = vmatpush.bf16.msra.mxu2 %v10351_v60 }
 0x26a   : > { %v2613_v24 = vsel %vm11872_vm0, %v2605_v39, %v2612_v6  ;;  %v2876_v8 = vsel %vm11763_vm10, %v2614_v52, %v2875_v20  ;;  %v2371_v54 = vpack.c.bf16 %v2339_v22, %v2339_v22  ;;  %v2132_v63 = vadd.f32 %v2071_v14, %v1976_v55  ;;  %9229 = vmatmul.msk.bf16.gmra.mxu2 %vm716_vm3, %v10279_v33  ;;  %v1786_v12 = vpop.f32.mrf.mxu1  ;;  %v2955_v52 = vld [vmem:[#allocation2 + $0x28] sm:$0xf]  ;;  %v2878_v22 = vld [vmem:[#allocation2 + $0x54] sm:$0xf] }
 0x26b   : > { %2874 = vst [vmem:[#allocation2 + $0x4c] sm:$0xf] %v2613_v24  ;;  %v3037_v55 = vor.u32 %v3036_v34, %v12166_v26  ;;  %v3904_v20 = vrot.slane %v3903_v40, 4  ;;  %v3918_v45 = vrot.slane %v3916_v17, 5  ;;  %5749 = vmatpush.bf16.msra.mxu3 %v10367_v47  ;;  %v3033_v34 = vsel %vm10846_vm4, %v3028_v29, %v12166_v26 }
 0x26c   : > { %2877 = vst [vmem:[#allocation2 + $0x50] sm:$0x1] %v2876_v8  ;;  %v2616_v13 = vshrl.u32 %v2371_v54, 16  ;;  %v2272_v3 = vadd.f32 %v12091_v49, %v2132_v63  ;;  %v3048_v49 = vshll.u32 %v2954_v44, 16  ;;  %v2619_v61 = vshll.u32 %v2371_v54, 16 }
 0x26d   : > { %v1918_v33 = vpop.f32.mrf.mxu2  ;;  %v12191_v7 = vpop.f32.mrf.mxu0  ;;  %v4300_v14 = vunpack.c.l.b16 %v3943_v1  ;;  %v12202_v44 = vrot.slane %v3945_v4, 4  ;;  %v3948_v40 = vshll.u32 %v12125_v36, 16  ;;  %v3042_v17 = vrot.slane %v3040_v42, 5  ;;  %v10280_v36 = vld [vmem:[#allocation2 + $0xc] sm:$0xff] }
 0x26e   : > { %v12193_v31 = vrot.slane %v2616_v13, 7  ;;  %v2308_v39 = vadd.f32 %v11813_v43, %v2272_v3  ;;  %9246 = vmatmul.msk.bf16.gmra.mxu3 %vm716_vm3, %v2023_v48  ;;  %v1977_v6 = vadd.f32 %v1918_v33, %v1843_v2  ;;  %v3038_v48 = vrot.slane %v3037_v55, 4  ;;  %v2484_v13 = vld [vmem:[#allocation2 + $0x74] sm:$0x1]  ;;  %v10375_v3 = vld [vmem:[%s14604_s3 + $0x3b8] sm:$0xff] }
 0x26f   : > { %v3919_v8 = vsel %vm10846_vm4, %v3914_v53, %v3918_v45  ;;  %v3047_v54 = vrot.slane %v3045_v21, 4  ;;  %v3050_v63 = vrot.slane %v3048_v49, 5  ;;  %v3054_v26 = vshll.u32 %v2955_v52, 16  ;;  %v10359_v21 = vld [vmem:[%s14604_s3 + $0x1b8] sm:$0xff]  ;;  %5935 = vmatpush.bf16.msra.mxu0 %v10375_v3 }
 0x270   : > { %v2621_v43 = vor.u32 %v2619_v61, %v12193_v31  ;;  %v2340_v32 = vmax.f32 %v2308_v39, 0.0  ;;  %4731 = vmatmul.bf16.vlgmr.msrb.gmra.mxu0 %v10320_v5  ;;  %v3909_v29 = vsel %vm10846_vm4, %v3904_v20, %v12160_v16  ;;  %v12215_v42 = vpack.c.b16 %v12121_v46, %v12119_v41  ;;  %v3855_v55 = vld [vmem:[#allocation2 + $0x1c] sm:$0xf]  ;;  %5154 = vmatpush.bf16.msra.mxu1 %v10359_v21 }
 0x271   : > { %v2074_v24 = vpop.f32.mrf.mxu3  ;;  %v2485_v2 = vsel %vm11776_vm12, 0, %v2484_v13  ;;  %v12226_v5 = vpack.c.b16 %v4300_v14, %v12138_v10  ;;  %v3058_v16 = vshrl.u32 %v2955_v52, 16  ;;  %v1844_v41 = vadd.f32 %v1786_v12, %v11610_v18  ;;  %v12239_v18 = vld [vmem:[%s14603_s2] ss:$0 sm:$0xff] }
 0x272   : > { %v2879_v1 = vsel %vm11848_vm14, %v2621_v43, %v2878_v22  ;;  %v2372_v4 = vpack.c.bf16 %v2340_v32, %v2340_v32  ;;  %v2133_v56 = vadd.f32 %v2074_v24, %v1977_v6  ;;  %v1789_v50 = vpop.f32.mrf.mxu1  ;;  %14801 = vst [vmem:[#allocation16_spill] sm:$0xff] %v12215_v42  ;;  %v12230_v46 = vunpack.c.l.b16 %v3033_v34  ;;  %v2882_v6 = vld [vmem:[#allocation2 + $0x5c] sm:$0x1]  ;;  %v2956_v24 = vld [vmem:[#allocation2 + $0x2c] sm:$0x1] }
 0x273   : > { %2880 = vst [vmem:[#allocation2 + $0x54] sm:$0xf] %v2879_v1  ;;  %v4297_v20 = vunpack.c.l.b16 %v3909_v29  ;;  %v4298_v53 = vunpack.c.l.b16 %v3919_v8  ;;  %v3043_v10 = vsel %vm10846_vm4, %v3038_v48, %v3042_v17  ;;  %v3051_v49 = vor.u32 %v3050_v63, %v3047_v54  ;;  %v2957_v29 = vld [vmem:[#allocation2 + $0x30] sm:$0xf] }
 0x274   : > { %v2624_v60 = vshrl.u32 %v2372_v4, 16  ;;  %v2273_v47 = vadd.f32 %v12117_v9, %v2133_v56  ;;  %2486 = vst [vmem:[#allocation2 + $0x74] sm:$0x1] %v2485_v2  ;;  %v2627_v39 = vshll.u32 %v2372_v4, 16  ;;  %v3056_v52 = vrot.slane %v3054_v26, 5 }
 0x275   : > { %v1920_v33 = vpop.f32.mrf.mxu2  ;;  %3566 = vmatmul.bf16.vlgmr.msrb.gmra.mxu1 %v10280_v36  ;;  %v12232_v45 = vpop.f32.mrf.mxu0  ;;  %v3060_v22 = vrot.slane %v3058_v16, 4  ;;  %v3950_v34 = vrot.slane %v3948_v40, 5  ;;  %v3954_v14 = vshll.u32 %v3855_v55, 16  ;;  %v2622_v43 = vrot.slane %v12193_v31, 4  ;;  %v2958_v16 = vld [vmem:[#allocation2 + $0x34] sm:$0xf] }
 0x276   : > { %v2626_v61 = vrot.slane %v2624_v60, 7  ;;  %v2309_v9 = vadd.f32 %v12239_v18, %v2273_v47  ;;  %v1978_v12 = vadd.f32 %v1920_v33, %v1844_v41  ;;  %v12243_v54 = vpack.c.b16 %v4298_v53, %v4297_v20 }
 0x277   : > { %v3650_v63 = vunpack.c.l.b16 %v3043_v10  ;;  %v3052_v1 = vrot.slane %v3051_v49, 4  ;;  %v3958_v4 = vshrl.u32 %v3855_v55, 16  ;;  %v3061_v21 = vor.u32 %v3060_v22, %v3056_v52  ;;  %v2431_v55 = vld [vmem:[#allocation2 + $0x78] sm:$0x1]  ;;  %v10321_v10 = vld [vmem:[#allocation2 + $0xc] sm:$0xff] }
 0x278   : > { %v2629_v32 = vor.u32 %v2627_v39, %v2626_v61  ;;  %v2631_v48 = vrot.slane %v2626_v61, 4  ;;  %v2341_v17 = vmax.f32 %v2309_v9, 0.0  ;;  %v3064_v3 = vshll.u32 %v2956_v24, 16 }
 0x279   : > { %v2076_v8 = vpop.f32.mrf.mxu3  ;;  %v3057_v13 = vsel %vm10846_vm4, %v3052_v1, %v3056_v52  ;;  %v3951_v2 = vor.u32 %v3950_v34, %v12202_v44  ;;  %v1845_v41 = vadd.f32 %v1789_v50, %v11629_v28  ;;  %v12255_v33 = vrot.slane %v3954_v14, 5  ;;  %v3856_v50 = vld [vmem:[#allocation2 + $0x20] sm:$0x1] }
 0x27a   : > { %v2630_v56 = vsel %vm11872_vm0, %v2622_v43, %v2629_v32  ;;  %v2883_v26 = vsel %vm11763_vm10, %v2631_v48, %v2882_v6  ;;  %v2373_v40 = vpack.c.bf16 %v2341_v17, %v2341_v17  ;;  %v2134_v36 = vadd.f32 %v2076_v8, %v1978_v12  ;;  %3767 = vmatmul.bf16.vlgmr.msrb.gmra.mxu2 %v12215_v42  ;;  %v1791_v31 = vpop.f32.mrf.mxu1  ;;  %v2885_v6 = vld [vmem:[#allocation2 + $0x60] sm:$0xf] }
 0x27b   : > { %2881 = vst [vmem:[#allocation2 + $0x58] sm:$0xf] %v2630_v56  ;;  %v2432_v49 = vsel %vm11763_vm10, 0, %v2431_v55  ;;  %v3960_v61 = vrot.slane %v3958_v4, 4  ;;  %v3069_v39 = vshrl.u32 %v2957_v29, 16  ;;  %v3072_v44 = vshll.u32 %v2957_v29, 16 }
 0x27c   : > { %2884 = vst [vmem:[#allocation2 + $0x5c] sm:$0x1] %v2883_v26  ;;  %v2633_v60 = vshrl.u32 %v2373_v40, 16  ;;  %v2274_v47 = vadd.f32 %v12158_v58, %v2134_v36  ;;  %v2636_v12 = vshll.u32 %v2373_v40, 16  ;;  %v12266_v52 = vpack.c.b16 %v3650_v63, %v12230_v46  ;;  %v10281_v36 = vld [vmem:[#allocation2 + $0x18] sm:$0xff] }
 0x27d   : > { %v1923_v20 = vpop.f32.mrf.mxu2  ;;  %v12257_v53 = vpop.f32.mrf.mxu0  ;;  %2433 = vst [vmem:[#allocation2 + $0x78] sm:$0x1] %v2432_v49  ;;  %v12268_v22 = vrot.slane %v3061_v21, 4  ;;  %v3078_v34 = vshll.u32 %v2958_v16, 16  ;;  %v3082_v14 = vshrl.u32 %v2958_v16, 16  ;;  %v12271_v48 = vunpack.c.l.b16 %v3057_v13 }
 0x27e   : > { %v12261_v9 = vrot.slane %v2633_v60, 7  ;;  %v2310_v58 = vadd.f32 %v12239_v18, %v2274_v47  ;;  %4417 = vmatmul.bf16.vlgmr.msrb.gmra.mxu3 %v12243_v54  ;;  %v1979_v28 = vadd.f32 %v1923_v20, %v1845_v41  ;;  %v12273_v17 = vrot.slane %v3951_v2, 4  ;;  %v3858_v21 = vld [vmem:[#allocation2 + $0x28] sm:$0xf]  ;;  %v2487_v13 = vld [vmem:[#allocation2 + $0x80] sm:$0x1] }
 0x27f   : > { %v12275_v8 = vrot.slane %v3064_v3, 5  ;;  %v3961_v1 = vor.u32 %v3960_v61, %v12255_v33  ;;  %v3964_v4 = vshll.u32 %v3856_v50, 16  ;;  %v3071_v46 = vrot.slane %v3069_v39, 4 }
 0x280   : > { %v2638_v43 = vor.u32 %v2636_v12, %v12261_v9  ;;  %v2342_v32 = vmax.f32 %v2310_v58, 0.0  ;;  %4736 = vmatmul.bf16.gmra.mxu0 %v10321_v10  ;;  %v3074_v29 = vrot.slane %v3072_v44, 5  ;;  %v3957_v2 = vsel %vm10846_vm4, %v12273_v17, %v12255_v33  ;;  %v3857_v10 = vld [vmem:[#allocation2 + $0x24] sm:$0xf] }
 0x281   : > { %v2079_v24 = vpop.f32.mrf.mxu3  ;;  %v3067_v3 = vsel %vm10846_vm4, %v12268_v22, %v12275_v8  ;;  %v12288_v16 = vrot.slane %v3078_v34, 5  ;;  %v3084_v60 = vrot.slane %v3082_v14, 4  ;;  %v1846_v55 = vadd.f32 %v1791_v31, %v11636_v62  ;;  %v2959_v22 = vld [vmem:[#allocation2 + $0x38] sm:$0x1]  ;;  %v2889_v62 = vld [vmem:[#allocation2 + $0x68] sm:$0x1] }
 0x282   : > { %v2886_v63 = vsel %vm11848_vm14, %v2638_v43, %v2885_v6  ;;  %v2374_v56 = vpack.c.bf16 %v2342_v32, %v2342_v32  ;;  %v2135_v26 = vadd.f32 %v2079_v24, %v1979_v28  ;;  %v1794_v40 = vpop.f32.mrf.mxu1  ;;  %v2488_v20 = vsel %vm11776_vm12, 0, %v2487_v13 }
 0x283   : > { %2887 = vst [vmem:[#allocation2 + $0x60] sm:$0xf] %v2886_v63  ;;  %v3962_v39 = vrot.slane %v3961_v1, 4  ;;  %v3966_v44 = vrot.slane %v3964_v4, 5  ;;  %v3978_v12 = vshll.u32 %v3858_v21, 16  ;;  %v3982_v58 = vshrl.u32 %v3858_v21, 16 }
 0x284   : > { %v2641_v47 = vshrl.u32 %v2374_v56, 16  ;;  %v2275_v41 = vadd.f32 %v12191_v7, %v2135_v26  ;;  %2489 = vst [vmem:[#allocation2 + $0x80] sm:$0x1] %v2488_v20  ;;  %v2644_v50 = vshll.u32 %v2374_v56, 16  ;;  %v3075_v31 = vor.u32 %v3074_v29, %v3071_v46  ;;  %v3859_v26 = vld [vmem:[#allocation2 + $0x2c] sm:$0x1] }
 0x285   : > { %v1925_v49 = vpop.f32.mrf.mxu2  ;;  %3571 = vmatmul.bf16.gmra.mxu1 %v10281_v36  ;;  %v12294_v61 = vpop.f32.mrf.mxu0  ;;  %v3085_v34 = vor.u32 %v3084_v60, %v12288_v16  ;;  %v3969_v14 = vshrl.u32 %v3857_v10, 16  ;;  %v3972_v43 = vshll.u32 %v3857_v10, 16  ;;  %v2639_v32 = vrot.slane %v12261_v9, 4 }
 0x286   : > { %v2643_v28 = vrot.slane %v2641_v47, 7  ;;  %v2311_v6 = vadd.f32 %v12239_v18, %v2275_v41  ;;  %v1980_v7 = vadd.f32 %v1925_v49, %v1846_v55  ;;  %v3967_v63 = vsel %vm10846_vm4, %v3962_v39, %v3966_v44  ;;  %v10322_v44 = vld [vmem:[#allocation2 + $0x18] sm:$0xff] }
 0x287   : > { %v3088_v56 = vshll.u32 %v2959_v22, 16  ;;  %v12301_v36 = vrot.slane %v3978_v12, 5  ;;  %v3984_v21 = vrot.slane %v3982_v58, 4  ;;  %v3076_v47 = vrot.slane %v3075_v31, 4  ;;  %v10366_v22 = vld [vmem:[%s14604_s3 + $0x330] sm:$0xff] }
 0x288   : > { %v2646_v24 = vor.u32 %v2644_v50, %v2643_v28  ;;  %v2648_v8 = vrot.slane %v2643_v28, 4  ;;  %v2343_v1 = vmax.f32 %v2311_v6, 0.0  ;;  %v12308_v41 = vrot.slane %v3085_v34, 4  ;;  %5750 = vmatpush.bf16.msra.mxu3 %v10366_v22 }
 0x289   : > { %v2081_v4 = vpop.f32.mrf.mxu3  ;;  %v12310_v55 = vrot.slane %v3969_v14, 4  ;;  %v12312_v20 = vrot.slane %v3972_v43, 5  ;;  %v1847_v39 = vadd.f32 %v1794_v40, %v11643_v57  ;;  %v3988_v12 = vshll.u32 %v3859_v26, 16  ;;  %v2960_v14 = vld [vmem:[#allocation2 + $0x3c] sm:$0xf] }
 0x28a   : > { %v2647_v46 = vsel %vm11872_vm0, %v2639_v32, %v2646_v24  ;;  %v2890_v29 = vsel %vm11763_vm10, %v2648_v8, %v2889_v62  ;;  %v2375_v13 = vpack.c.bf16 %v2343_v1, %v2343_v1  ;;  %v2136_v9 = vadd.f32 %v2081_v4, %v1980_v7  ;;  %3772 = vmatmul.bf16.gmra.mxu2 %v12266_v52  ;;  %v1796_v60 = vpop.f32.mrf.mxu1  ;;  %v10350_v7 = vld [vmem:[%s14604_s3 + $0x130] sm:$0xff]  ;;  %v2434_v62 = vld [vmem:[#allocation2 + $0x84] sm:$0x1]  ;;  %v2961_v43 = vld [vmem:[#allocation2 + $0x40] sm:$0xf] }
 0x28b   : > { %2888 = vst [vmem:[#allocation2 + $0x64] sm:$0xf] %v2647_v46  ;;  %v3652_v6 = vunpack.c.l.b16 %v3067_v3  ;;  %v3090_v31 = vrot.slane %v3088_v56, 5  ;;  %v2435_v3 = vsel %vm11763_vm10, 0, %v2434_v62  ;;  %v2892_v32 = vld [vmem:[#allocation2 + $0x6c] sm:$0xf]  ;;  %v4301_v24 = vunpack.c.l.b16 %v3957_v2  ;;  %5356 = vmatpush.bf16.msra.mxu2 %v10350_v7 }
 0x28c   : > { %2891 = vst [vmem:[#allocation2 + $0x68] sm:$0x1] %v2890_v29  ;;  %v2650_v10 = vshrl.u32 %v2375_v13, 16  ;;  %v2276_v49 = vadd.f32 %v12232_v45, %v2136_v9  ;;  %v2653_v58 = vshll.u32 %v2375_v13, 16  ;;  %v3985_v45 = vor.u32 %v3984_v21, %v12301_v36 }
 0x28d   : > { %v1928_v28 = vpop.f32.mrf.mxu2  ;;  %v12316_v50 = vpop.f32.mrf.mxu0  ;;  %v4302_v8 = vunpack.c.l.b16 %v3967_v63  ;;  %2436 = vst [vmem:[#allocation2 + $0x84] sm:$0x1] %v2435_v3  ;;  %v3081_v1 = vsel %vm10846_vm4, %v3076_v47, %v12288_v16  ;;  %v3091_v4 = vsel %vm10846_vm4, %v12308_v41, %v3090_v31  ;;  %v3975_v33 = vor.u32 %v12312_v20, %v12310_v55  ;;  %v10282_v41 = vld [vmem:[#allocation2 + $0x24] sm:$0xff]  ;;  %v10358_v55 = vld [vmem:[%s14604_s3 + $0x1b0] sm:$0xff] }
 0x28e   : > { %v12325_v57 = vrot.slane %v2650_v10, 7  ;;  %v2312_v40 = vadd.f32 %v12239_v18, %v2276_v49  ;;  %4422 = vmatmul.bf16.gmra.mxu3 %v12226_v5  ;;  %v1981_v34 = vadd.f32 %v1928_v28, %v1847_v39  ;;  %v3990_v17 = vrot.slane %v3988_v12, 5  ;;  %v10374_v20 = vld [vmem:[%s14604_s3 + $0x3b0] sm:$0xff]  ;;  %5155 = vmatpush.bf16.msra.mxu1 %v10358_v55 }
 0x28f   : > { %v3986_v63 = vrot.slane %v3985_v45, 4  ;;  %v3093_v21 = vshrl.u32 %v2960_v14, 16  ;;  %v3096_v46 = vshll.u32 %v2960_v14, 16  ;;  %v3102_v29 = vshll.u32 %v2961_v43, 16  ;;  %5936 = vmatpush.bf16.msra.mxu0 %v10374_v20  ;;  %v3861_v14 = vld [vmem:[#allocation2 + $0x34] sm:$0xf] }
 0x290   : > { %v2655_v56 = vor.u32 %v2653_v58, %v12325_v57  ;;  %v2344_v26 = vmax.f32 %v2312_v40, 0.0  ;;  %4741 = vmatmul.bf16.gmra.mxu0 %v10322_v44  ;;  %v3106_v10 = vshrl.u32 %v2961_v43, 16  ;;  %v12348_v49 = vpack.c.b16 %v3652_v6, %v12271_v48  ;;  %v2490_v44 = vld [vmem:[#allocation2 + $0x8c] sm:$0x1]  ;;  %v3860_v6 = vld [vmem:[#allocation2 + $0x30] sm:$0xf] }
 0x291   : > { %v2084_v2 = vpop.f32.mrf.mxu3  ;;  %v12350_v39 = vpack.c.b16 %v4302_v8, %v4301_v24  ;;  %v12358_v12 = vunpack.c.l.b16 %v3081_v1  ;;  %v1848_v7 = vadd.f32 %v1796_v60, %v11650_v51  ;;  %v2491_v48 = vsel %vm11776_vm12, 0, %v2490_v44  ;;  %v2896_v43 = vld [vmem:[#allocation2 + $0x74] sm:$0x1] }
 0x292   : > { %v2893_v16 = vsel %vm11848_vm14, %v2655_v56, %v2892_v32  ;;  %v2376_v13 = vpack.c.bf16 %v2344_v26, %v2344_v26  ;;  %v2137_v9 = vadd.f32 %v2084_v2, %v1981_v34  ;;  %v1799_v47 = vpop.f32.mrf.mxu1  ;;  %2492 = vst [vmem:[#allocation2 + $0x8c] sm:$0x1] %v2491_v48  ;;  %v3654_v31 = vunpack.c.l.b16 %v3091_v4 }
 0x293   : > { %2894 = vst [vmem:[#allocation2 + $0x6c] sm:$0xf] %v2893_v16  ;;  %v3976_v45 = vrot.slane %v3975_v33, 4  ;;  %v3991_v40 = vsel %vm10846_vm4, %v3986_v63, %v3990_v17  ;;  %v3095_v34 = vrot.slane %v3093_v21, 4  ;;  %v3098_v32 = vrot.slane %v3096_v46, 5 }
 0x294   : > { %v2658_v58 = vshrl.u32 %v2376_v13, 16  ;;  %v2277_v28 = vadd.f32 %v12257_v53, %v2137_v9  ;;  %v2661_v53 = vshll.u32 %v2376_v13, 16  ;;  %v12369_v24 = vrot.slane %v3102_v29, 5  ;;  %v2962_v17 = vld [vmem:[#allocation2 + $0x44] sm:$0x1] }
 0x295   : > { %v1930_v22 = vpop.f32.mrf.mxu2  ;;  %3576 = vmatmul.bf16.gmra.mxu1 %v10282_v41  ;;  %v12364_v62 = vpop.f32.mrf.mxu0  ;;  %v3108_v8 = vrot.slane %v3106_v10, 4  ;;  %v3993_v1 = vshrl.u32 %v3860_v6, 16  ;;  %v2656_v4 = vrot.slane %v12325_v57, 4  ;;  %v3981_v63 = vsel %vm10846_vm4, %v3976_v45, %v12301_v36  ;;  %v2437_v45 = vld [vmem:[#allocation2 + $0x90] sm:$0x1] }
 0x296   : > { %v2660_v3 = vrot.slane %v2658_v58, 7  ;;  %v2313_v51 = vadd.f32 %v12239_v18, %v2277_v28  ;;  %v1982_v60 = vadd.f32 %v1930_v22, %v1848_v7  ;;  %v3996_v21 = vshll.u32 %v3860_v6, 16 }
 0x297   : > { %v4002_v16 = vshll.u32 %v3861_v14, 16  ;;  %v4006_v13 = vshrl.u32 %v3861_v14, 16  ;;  %v4304_v10 = vunpack.c.l.b16 %v3991_v40  ;;  %v3099_v55 = vor.u32 %v3098_v32, %v3095_v34 }
 0x298   : > { %v2663_v56 = vor.u32 %v2661_v53, %v2660_v3  ;;  %v2665_v26 = vrot.slane %v2660_v3, 4  ;;  %v2345_v33 = vmax.f32 %v2313_v51, 0.0  ;;  %v3109_v20 = vor.u32 %v3108_v8, %v12369_v24 }
 0x299   : > { %v2086_v2 = vpop.f32.mrf.mxu3  ;;  %v3112_v36 = vshll.u32 %v2962_v17, 16  ;;  %v1849_v28 = vadd.f32 %v1799_v47, %v11669_v23  ;;  %v3995_v7 = vrot.slane %v3993_v1, 4  ;;  %v3998_v3 = vrot.slane %v3996_v21, 5  ;;  %v2899_v47 = vld [vmem:[#allocation2 + $0x78] sm:$0xf] }
 0x29a   : > { %v2664_v46 = vsel %vm11872_vm0, %v2656_v4, %v2663_v56  ;;  %v2897_v29 = vsel %vm11763_vm10, %v2665_v26, %v2896_v43  ;;  %v2377_v9 = vpack.c.bf16 %v2345_v33, %v2345_v33  ;;  %v2138_v57 = vadd.f32 %v2086_v2, %v1982_v60  ;;  %3777 = vmatmul.bf16.gmra.mxu2 %v12348_v49  ;;  %v1801_v41 = vpop.f32.mrf.mxu1  ;;  %v3862_v4 = vld [vmem:[#allocation2 + $0x38] sm:$0x1]  ;;  %v2963_v56 = vld [vmem:[#allocation2 + $0x48] sm:$0xf] }
 0x29b   : > { %2895 = vst [vmem:[#allocation2 + $0x70] sm:$0xf] %v2664_v46  ;;  %v12385_v53 = vrot.slane %v4002_v16, 5  ;;  %v4008_v40 = vrot.slane %v4006_v13, 4  ;;  %v2438_v23 = vsel %vm11763_vm10, 0, %v2437_v45  ;;  %v12393_v14 = vrot.slane %v3109_v20, 4 }
 0x29c   : > { %2898 = vst [vmem:[#allocation2 + $0x74] sm:$0x1] %v2897_v29  ;;  %v2667_v44 = vshrl.u32 %v2377_v9, 16  ;;  %v2278_v58 = vadd.f32 %v12294_v61, %v2138_v57  ;;  %v2670_v48 = vshll.u32 %v2377_v9, 16  ;;  %v10323_v61 = vld [vmem:[#allocation2 + $0x24] sm:$0xff]  ;;  %v12397_v8 = vpack.c.b16 %v3654_v31, %v12358_v12  ;;  %v10283_v12 = vld [vmem:[#allocation2 + $0x30] sm:$0xff] }
 0x29d   : > { %v1933_v6 = vpop.f32.mrf.mxu2  ;;  %v12383_v22 = vpop.f32.mrf.mxu0  ;;  %2439 = vst [vmem:[#allocation2 + $0x90] sm:$0x1] %v2438_v23  ;;  %v4303_v1 = vunpack.c.l.b16 %v3981_v63  ;;  %v12399_v33 = vrot.slane %v3099_v55, 4  ;;  %v12401_v17 = vrot.slane %v3112_v36, 5  ;;  %v3999_v2 = vor.u32 %v3998_v3, %v3995_v7  ;;  %v2964_v63 = vld [vmem:[#allocation2 + $0x4c] sm:$0xf] }
 0x29e   : > { %v12387_v34 = vrot.slane %v2667_v44, 7  ;;  %v2314_v51 = vadd.f32 %v12239_v18, %v2278_v58  ;;  %4427 = vmatmul.bf16.gmra.mxu3 %v12350_v39  ;;  %v1983_v60 = vadd.f32 %v1933_v6, %v1849_v28  ;;  %v4009_v21 = vor.u32 %v4008_v40, %v12385_v53  ;;  %v2493_v9 = vld [vmem:[#allocation2 + $0x98] sm:$0x1]  ;;  %v3863_v7 = vld [vmem:[#allocation2 + $0x3c] sm:$0xf] }
 0x29f   : > { %v12406_v31 = vpack.c.b16 %v4304_v10, %v4303_v1  ;;  %v3105_v57 = vsel %vm10846_vm4, %v12399_v33, %v12369_v24  ;;  %v3115_v55 = vsel %vm10846_vm4, %v12393_v14, %v12401_v17  ;;  %v4012_v20 = vshll.u32 %v3862_v4, 16  ;;  %v3865_v24 = vld [vmem:[#allocation2 + $0x44] sm:$0x1]  ;;  %v2966_v33 = vld [vmem:[#allocation2 + $0x54] sm:$0xf] }
 0x2a0   : > { %v2672_v43 = vor.u32 %v2670_v48, %v12387_v34  ;;  %v2346_v32 = vmax.f32 %v2314_v51, 0.0  ;;  %4746 = vmatmul.bf16.gmra.mxu0 %v10323_v61  ;;  %v3117_v36 = vshrl.u32 %v2963_v56, 16  ;;  %v1850_v10 = vadd.f32 %v1801_v41, %v11688_v11  ;;  %v3864_v11 = vld [vmem:[#allocation2 + $0x40] sm:$0xf] }
 0x2a1   : > { %v2089_v26 = vpop.f32.mrf.mxu3  ;;  %v2494_v28 = vsel %vm11776_vm12, 0, %v2493_v9  ;;  %v12422_v45 = vrot.slane %v3999_v2, 4  ;;  %v4010_v3 = vrot.slane %v4009_v21, 4  ;;  %v3120_v40 = vshll.u32 %v2963_v56, 16  ;;  %v2903_v41 = vld [vmem:[#allocation2 + $0x80] sm:$0x1] }
 0x2a2   : > { %v2900_v16 = vsel %vm11848_vm14, %v2672_v43, %v2899_v47  ;;  %v2378_v13 = vpack.c.bf16 %v2346_v32, %v2346_v32  ;;  %v2139_v46 = vadd.f32 %v2089_v26, %v1983_v60  ;;  %v1804_v29 = vpop.f32.mrf.mxu1  ;;  %2495 = vst [vmem:[#allocation2 + $0x98] sm:$0x1] %v2494_v28  ;;  %v3126_v51 = vshll.u32 %v2964_v63, 16 }
 0x2a3   : > { %2901 = vst [vmem:[#allocation2 + $0x78] sm:$0xf] %v2900_v16  ;;  %v4014_v47 = vrot.slane %v4012_v20, 5  ;;  %v3119_v43 = vrot.slane %v3117_v36, 4  ;;  %v3130_v32 = vshrl.u32 %v2964_v63, 16  ;;  %v4017_v1 = vshrl.u32 %v3863_v7, 16 }
 0x2a4   : > { %v2675_v44 = vshrl.u32 %v2378_v13, 16  ;;  %v2279_v58 = vadd.f32 %v12316_v50, %v2139_v46  ;;  %v2678_v61 = vshll.u32 %v2378_v13, 16  ;;  %v2673_v4 = vrot.slane %v12387_v34, 4  ;;  %v2965_v46 = vld [vmem:[#allocation2 + $0x50] sm:$0x1] }
 0x2a5   : > { %v1935_v48 = vpop.f32.mrf.mxu2  ;;  %3581 = vmatmul.bf16.gmra.mxu1 %v10283_v12  ;;  %v12420_v6 = vpop.f32.mrf.mxu0  ;;  %v4015_v56 = vsel %vm10846_vm4, %v4010_v3, %v4014_v47  ;;  %v3122_v13 = vrot.slane %v3120_v40, 5  ;;  %v12428_v12 = vrot.slane %v3126_v51, 5  ;;  %v4020_v9 = vshll.u32 %v3863_v7, 16 }
 0x2a6   : > { %v2677_v60 = vrot.slane %v2675_v44, 7  ;;  %v2315_v50 = vadd.f32 %v12239_v18, %v2279_v58  ;;  %v1984_v23 = vadd.f32 %v1935_v48, %v1850_v10  ;;  %v12435_v58 = vrot.slane %v3130_v32, 4 }
 0x2a7   : > { %v3136_v10 = vshll.u32 %v2965_v46, 16  ;;  %v4026_v28 = vshll.u32 %v3864_v11, 16  ;;  %v4030_v48 = vshrl.u32 %v3864_v11, 16  ;;  %v1851_v40 = vadd.f32 %v1804_v29, %v11709_v0  ;;  %v10349_v11 = vld [vmem:[%s14604_s3 + $0x128] sm:$0xff] }
 0x2a8   : > { %v2680_v26 = vor.u32 %v2678_v61, %v2677_v60  ;;  %v2682_v16 = vrot.slane %v2677_v60, 4  ;;  %v2347_v2 = vmax.f32 %v2315_v50, 0.0  ;;  %v4019_v51 = vrot.slane %v4017_v1, 4  ;;  %5357 = vmatpush.bf16.msra.mxu2 %v10349_v11 }
 0x2a9   : > { %v2091_v21 = vpop.f32.mrf.mxu3  ;;  %v3123_v0 = vor.u32 %v3122_v13, %v3119_v43  ;;  %v4022_v29 = vrot.slane %v4020_v9, 5  ;;  %v4306_v43 = vunpack.c.l.b16 %v4015_v56  ;;  %v3655_v13 = vunpack.c.l.b16 %v3105_v57 }
 0x2aa   : > { %v2681_v20 = vsel %vm11872_vm0, %v2673_v4, %v2680_v26  ;;  %v2904_v63 = vsel %vm11763_vm10, %v2682_v16, %v2903_v41  ;;  %v2379_v36 = vpack.c.bf16 %v2347_v2, %v2347_v2  ;;  %v2140_v34 = vadd.f32 %v2091_v21, %v1984_v23  ;;  %3782 = vmatmul.bf16.gmra.mxu2 %v12397_v8  ;;  %v1806_v44 = vpop.f32.mrf.mxu1  ;;  %v2440_v41 = vld [vmem:[#allocation2 + $0x9c] sm:$0x1]  ;;  %v10324_v4 = vld [vmem:[#allocation2 + $0x30] sm:$0xff] }
 0x2ab   : > { %2902 = vst [vmem:[#allocation2 + $0x7c] sm:$0xf] %v2681_v20  ;;  %v4005_v23 = vsel %vm10846_vm4, %v12422_v45, %v12385_v53  ;;  %v2441_v53 = vsel %vm11763_vm10, 0, %v2440_v41  ;;  %v2906_v45 = vld [vmem:[#allocation2 + $0x84] sm:$0xf]  ;;  %v3656_v26 = vunpack.c.l.b16 %v3115_v55  ;;  %v12462_v16 = vrot.slane %v4026_v28, 5 }
 0x2ac   : > { %2905 = vst [vmem:[#allocation2 + $0x80] sm:$0x1] %v2904_v63  ;;  %v2684_v3 = vshrl.u32 %v2379_v36, 16  ;;  %v2280_v7 = vadd.f32 %v12364_v62, %v2140_v34  ;;  %v2687_v60 = vshll.u32 %v2379_v36, 16  ;;  %v10365_v62 = vld [vmem:[%s14604_s3 + $0x328] sm:$0xff]  ;;  %v4032_v2 = vrot.slane %v4030_v48, 4 }
 0x2ad   : > { %v1938_v61 = vpop.f32.mrf.mxu2  ;;  %v12439_v50 = vpop.f32.mrf.mxu0  ;;  %5751 = vmatpush.bf16.msra.mxu3 %v10365_v62  ;;  %2442 = vst [vmem:[#allocation2 + $0x9c] sm:$0x1] %v2441_v53  ;;  %v4305_v14 = vunpack.c.l.b16 %v4005_v23  ;;  %v12470_v17 = vrot.slane %v3123_v0, 4  ;;  %v3133_v55 = vor.u32 %v12435_v58, %v12428_v12  ;;  %v4023_v56 = vor.u32 %v4022_v29, %v4019_v51  ;;  %v10284_v28 = vld [vmem:[#allocation2 + $0x3c] sm:$0xff]  ;;  %v10357_v58 = vld [vmem:[%s14604_s3 + $0x1a8] sm:$0xff] }
 0x2ae   : > { %v12451_v47 = vrot.slane %v2684_v3, 7  ;;  %v2316_v32 = vadd.f32 %v12239_v18, %v2280_v7  ;;  %4432 = vmatmul.bf16.gmra.mxu3 %v12406_v31  ;;  %v1985_v1 = vadd.f32 %v1938_v61, %v1851_v40  ;;  %v12476_v48 = vrot.slane %v3136_v10, 5  ;;  %v10373_v7 = vld [vmem:[%s14604_s3 + $0x3a8] sm:$0xff]  ;;  %v2496_v40 = vld [vmem:[#allocation2 + $0xa4] sm:$0x1]  ;;  %5156 = vmatpush.bf16.msra.mxu1 %v10357_v58 }
 0x2af   : > { %v12478_v57 = vpack.c.b16 %v3656_v26, %v3655_v13  ;;  %v12480_v3 = vpack.c.b16 %v4306_v43, %v4305_v14  ;;  %v3129_v10 = vsel %vm10846_vm4, %v12470_v17, %v12428_v12  ;;  %v4033_v51 = vor.u32 %v4032_v2, %v12462_v16  ;;  %v2967_v62 = vld [vmem:[#allocation2 + $0x58] sm:$0xf]  ;;  %5937 = vmatpush.bf16.msra.mxu0 %v10373_v7 }
 0x2b0   : > { %v2689_v46 = vor.u32 %v2687_v60, %v12451_v47  ;;  %v2348_v21 = vmax.f32 %v2316_v32, 0.0  ;;  %4751 = vmatmul.bf16.gmra.mxu0 %v10324_v4  ;;  %v1852_v23 = vadd.f32 %v1806_v44, %v11722_v25  ;;  %v2497_v11 = vsel %vm11776_vm12, 0, %v2496_v40  ;;  %v2910_v25 = vld [vmem:[#allocation2 + $0x8c] sm:$0x1] }
 0x2b1   : > { %v2094_v9 = vpop.f32.mrf.mxu3  ;;  %2498 = vst [vmem:[#allocation2 + $0xa4] sm:$0x1] %v2497_v11  ;;  %v3134_v29 = vrot.slane %v3133_v55, 4  ;;  %v4024_v32 = vrot.slane %v4023_v56, 4  ;;  %v3141_v4 = vshrl.u32 %v2966_v33, 16  ;;  %v4034_v44 = vrot.slane %v4033_v51, 4 }
 0x2b2   : > { %v2907_v20 = vsel %vm11848_vm14, %v2689_v46, %v2906_v45  ;;  %v2380_v63 = vpack.c.bf16 %v2348_v21, %v2348_v21  ;;  %v2141_v36 = vadd.f32 %v2094_v9, %v1985_v1  ;;  %v1809_v34 = vpop.f32.mrf.mxu1  ;;  %v4036_v1 = vshll.u32 %v3865_v24, 16  ;;  %v3867_v40 = vld [vmem:[#allocation2 + $0x4c] sm:$0xf] }
 0x2b3   : > { %2908 = vst [vmem:[#allocation2 + $0x84] sm:$0xf] %v2907_v20  ;;  %v3144_v43 = vshll.u32 %v2966_v33, 16  ;;  %v3150_v2 = vshll.u32 %v2967_v62, 16  ;;  %v3154_v46 = vshrl.u32 %v2967_v62, 16  ;;  %v2690_v21 = vrot.slane %v12451_v47, 4 }
 0x2b4   : > { %v2692_v60 = vshrl.u32 %v2380_v63, 16  ;;  %v2281_v61 = vadd.f32 %v12383_v22, %v2141_v36  ;;  %v2695_v45 = vshll.u32 %v2380_v63, 16  ;;  %v3139_v56 = vsel %vm10846_vm4, %v3134_v29, %v12476_v48 }
 0x2b5   : > { %v1940_v41 = vpop.f32.mrf.mxu2  ;;  %3586 = vmatmul.bf16.gmra.mxu1 %v10284_v28  ;;  %v12497_v0 = vpop.f32.mrf.mxu0  ;;  %v4029_v20 = vsel %vm10846_vm4, %v4024_v32, %v12462_v16  ;;  %v4038_v63 = vrot.slane %v4036_v1, 5  ;;  %v3143_v36 = vrot.slane %v3141_v4, 4  ;;  %v3866_v28 = vld [vmem:[#allocation2 + $0x48] sm:$0xf]  ;;  %v3146_v16 = vrot.slane %v3144_v43, 5 }
 0x2b6   : > { %v2694_v53 = vrot.slane %v2692_v60, 7  ;;  %v2317_v22 = vadd.f32 %v12239_v18, %v2281_v61  ;;  %v1986_v26 = vadd.f32 %v1940_v41, %v1852_v23  ;;  %v12514_v51 = vrot.slane %v3150_v2, 5  ;;  %v2443_v1 = vld [vmem:[#allocation2 + $0xa8] sm:$0x1] }
 0x2b7   : > { %v4039_v48 = vsel %vm10846_vm4, %v4034_v44, %v4038_v63  ;;  %v3156_v60 = vrot.slane %v3154_v46, 4  ;;  %v1853_v11 = vadd.f32 %v1809_v34, %v11731_v27  ;;  %v4041_v62 = vshrl.u32 %v3866_v28, 16  ;;  %v10325_v44 = vld [vmem:[#allocation2 + $0x3c] sm:$0xff] }
 0x2b8   : > { %v2697_v13 = vor.u32 %v2695_v45, %v2694_v53  ;;  %v2699_v9 = vrot.slane %v2694_v53, 4  ;;  %v2349_v14 = vmax.f32 %v2317_v22, 0.0  ;;  %v4044_v4 = vshll.u32 %v3866_v28, 16 }
 0x2b9   : > { %v2096_v55 = vpop.f32.mrf.mxu3  ;;  %v4050_v53 = vshll.u32 %v3867_v40, 16  ;;  %v4054_v45 = vshrl.u32 %v3867_v40, 16  ;;  %v2444_v27 = vsel %vm11763_vm10, 0, %v2443_v1  ;;  %v3657_v34 = vunpack.c.l.b16 %v3129_v10 }
 0x2ba   : > { %v2698_v24 = vsel %vm11872_vm0, %v2690_v21, %v2697_v13  ;;  %v2911_v47 = vsel %vm11763_vm10, %v2699_v9, %v2910_v25  ;;  %v2381_v33 = vpack.c.bf16 %v2349_v14, %v2349_v14  ;;  %v2142_v58 = vadd.f32 %v2096_v55, %v1986_v26  ;;  %3787 = vmatmul.bf16.gmra.mxu2 %v12478_v57  ;;  %v1811_v7 = vpop.f32.mrf.mxu1  ;;  %v2968_v14 = vld [vmem:[#allocation2 + $0x5c] sm:$0x1] }
 0x2bb   : > { %2909 = vst [vmem:[#allocation2 + $0x88] sm:$0xf] %v2698_v24  ;;  %v3658_v43 = vunpack.c.l.b16 %v3139_v56  ;;  %v4308_v2 = vunpack.c.l.b16 %v4039_v48  ;;  %v3147_v46 = vor.u32 %v3146_v16, %v3143_v36  ;;  %v4307_v9 = vunpack.c.l.b16 %v4029_v20  ;;  %v10285_v36 = vld [vmem:[#allocation2 + $0x48] sm:$0xff]  ;;  %v2499_v48 = vld [vmem:[#allocation2 + $0xb0] sm:$0x1] }
 0x2bc   : > { %2912 = vst [vmem:[#allocation2 + $0x8c] sm:$0x1] %v2911_v47  ;;  %v2701_v61 = vshrl.u32 %v2381_v33, 16  ;;  %v2282_v23 = vadd.f32 %v12420_v6, %v2142_v58  ;;  %v2704_v41 = vshll.u32 %v2381_v33, 16  ;;  %v2913_v6 = vld [vmem:[#allocation2 + $0x90] sm:$0xf]  ;;  %v3157_v55 = vor.u32 %v3156_v60, %v12514_v51 }
 0x2bd   : > { %v1943_v29 = vpop.f32.mrf.mxu2  ;;  %v12518_v32 = vpop.f32.mrf.mxu0  ;;  %2445 = vst [vmem:[#allocation2 + $0xa8] sm:$0x1] %v2444_v27  ;;  %v4043_v28 = vrot.slane %v4041_v62, 4  ;;  %v4046_v24 = vrot.slane %v4044_v4, 5  ;;  %v12533_v47 = vrot.slane %v4050_v53, 5  ;;  %v4056_v33 = vrot.slane %v4054_v45, 4 }
 0x2be   : > { %v12520_v22 = vrot.slane %v2701_v61, 7  ;;  %v2318_v26 = vadd.f32 %v12239_v18, %v2282_v23  ;;  %4437 = vmatmul.bf16.gmra.mxu3 %v12480_v3  ;;  %v1987_v25 = vadd.f32 %v1943_v29, %v1853_v11  ;;  %v3868_v58 = vld [vmem:[#allocation2 + $0x50] sm:$0x1]  ;;  %v12537_v20 = vpack.c.b16 %v3658_v43, %v3657_v34 }
 0x2bf   : > { %v12539_v40 = vpack.c.b16 %v4308_v2, %v4307_v9  ;;  %v12541_v16 = vrot.slane %v3147_v46, 4  ;;  %v3160_v60 = vshll.u32 %v2968_v14, 16  ;;  %v1854_v11 = vadd.f32 %v1811_v7, %v11749_v38  ;;  %v2917_v38 = vld [vmem:[#allocation2 + $0x98] sm:$0x1]  ;;  %v2970_v9 = vld [vmem:[#allocation2 + $0x64] sm:$0xf] }
 0x2c0   : > { %v2706_v21 = vor.u32 %v2704_v41, %v12520_v22  ;;  %v2350_v13 = vmax.f32 %v2318_v26, 0.0  ;;  %4756 = vmatmul.bf16.gmra.mxu0 %v10325_v44  ;;  %14802 = vst [vmem:[#allocation34_spill] sm:$0xff] %v12537_v20  ;;  %v2500_v62 = vsel %vm11776_vm12, 0, %v2499_v48  ;;  %v2969_v41 = vld [vmem:[#allocation2 + $0x60] sm:$0xf]  ;;  %v3158_v4 = vrot.slane %v3157_v55, 4 }
 0x2c1   : > { %v2099_v63 = vpop.f32.mrf.mxu3  ;;  %2501 = vst [vmem:[#allocation2 + $0xb0] sm:$0x1] %v2500_v62  ;;  %v4047_v53 = vor.u32 %v4046_v24, %v4043_v28  ;;  %v4057_v45 = vor.u32 %v4056_v33, %v12533_v47  ;;  %v4060_v26 = vshll.u32 %v3868_v58, 16  ;;  %v3153_v7 = vsel %vm10846_vm4, %v12541_v16, %v12514_v51  ;;  %v3869_v24 = vld [vmem:[#allocation2 + $0x54] sm:$0xf] }
 0x2c2   : > { %v2914_v12 = vsel %vm11848_vm14, %v2706_v21, %v2913_v6  ;;  %v2382_v17 = vpack.c.bf16 %v2350_v13, %v2350_v13  ;;  %v2143_v10 = vadd.f32 %v2099_v63, %v1987_v25  ;;  %v1814_v56 = vpop.f32.mrf.mxu1  ;;  %v3162_v6 = vrot.slane %v3160_v60, 5 }
 0x2c3   : > { %2915 = vst [vmem:[#allocation2 + $0x90] sm:$0xf] %v2914_v12  ;;  %v3165_v34 = vshrl.u32 %v2969_v41, 16  ;;  %v3168_v43 = vshll.u32 %v2969_v41, 16  ;;  %v2707_v2 = vrot.slane %v12520_v22, 4  ;;  %v4048_v55 = vrot.slane %v4047_v53, 4 }
 0x2c4   : > { %v2709_v61 = vshrl.u32 %v2382_v17, 16  ;;  %v2283_v23 = vadd.f32 %v12439_v50, %v2143_v10  ;;  %v2712_v44 = vshll.u32 %v2382_v17, 16  ;;  %v4058_v63 = vrot.slane %v4057_v45, 4  ;;  %v10364_v53 = vld [vmem:[%s14604_s3 + $0x320] sm:$0xff]  ;;  %v2446_v45 = vld [vmem:[#allocation2 + $0xb4] sm:$0x1] }
 0x2c5   : > { %v1945_v29 = vpop.f32.mrf.mxu2  ;;  %3591 = vmatmul.bf16.gmra.mxu1 %v10285_v36  ;;  %v12547_v1 = vpop.f32.mrf.mxu0  ;;  %v4062_v28 = vrot.slane %v4060_v26, 5  ;;  %v12563_v10 = vrot.slane %v3165_v34, 4  ;;  %v12565_v36 = vrot.slane %v3168_v43, 5  ;;  %v3174_v58 = vshll.u32 %v2970_v9, 16  ;;  %5752 = vmatpush.bf16.msra.mxu3 %v10364_v53 }
 0x2c6   : > { %v2711_v25 = vrot.slane %v2709_v61, 7  ;;  %v2319_v50 = vadd.f32 %v12239_v18, %v2283_v23  ;;  %v1988_v27 = vadd.f32 %v1945_v29, %v1854_v11  ;;  %v3163_v18 = vsel %vm10846_vm4, %v3158_v4, %v3162_v6  ;;  %v14803_v61 = vld [vmem:[#allocation14_spill] sm:$0xff]  ;;  %v10348_v4 = vld [vmem:[%s14604_s3 + $0x120] sm:$0xff] }
 0x2c7   : > { %v3178_v48 = vshrl.u32 %v2970_v9, 16  ;;  %v1855_v23 = vadd.f32 %v1814_v56, %v14803_v61  ;;  %v4065_v11 = vshrl.u32 %v3869_v24, 16  ;;  %v4068_v26 = vshll.u32 %v3869_v24, 16  ;;  %v2920_v6 = vld [vmem:[#allocation2 + $0x9c] sm:$0xf]  ;;  %5358 = vmatpush.bf16.msra.mxu2 %v10348_v4 }
 0x2c8   : > { %v2714_v46 = vor.u32 %v2712_v44, %v2711_v25  ;;  %v2716_v21 = vrot.slane %v2711_v25, 4  ;;  %v2351_v13 = vmax.f32 %v2319_v50, 0.0  ;;  %v10326_v50 = vld [vmem:[#allocation2 + $0x48] sm:$0xff]  ;;  %v3659_v34 = vunpack.c.l.b16 %v3153_v7  ;;  %v2502_v61 = vld [vmem:[#allocation2 + $0xbc] sm:$0x1] }
 0x2c9   : > { %v2101_v14 = vpop.f32.mrf.mxu3  ;;  %v3660_v43 = vunpack.c.l.b16 %v3163_v18  ;;  %v4053_v9 = vsel %vm10846_vm4, %v4048_v55, %v12533_v47  ;;  %v3171_v7 = vor.u32 %v12565_v36, %v12563_v10  ;;  %v4067_v18 = vrot.slane %v4065_v11, 4  ;;  %v10356_v10 = vld [vmem:[%s14604_s3 + $0x1a0] sm:$0xff] }
 0x2ca   : > { %v2715_v51 = vsel %vm11872_vm0, %v2707_v2, %v2714_v46  ;;  %v2918_v33 = vsel %vm11763_vm10, %v2716_v21, %v2917_v38  ;;  %v2383_v12 = vpack.c.bf16 %v2351_v13, %v2351_v13  ;;  %v2144_v22 = vadd.f32 %v2101_v14, %v1988_v27  ;;  %3792 = vmatmul.bf16.gmra.mxu2 %v12537_v20  ;;  %v1816_v17 = vpop.f32.mrf.mxu1  ;;  %v3870_v38 = vld [vmem:[#allocation2 + $0x58] sm:$0xf]  ;;  %v10372_v36 = vld [vmem:[%s14604_s3 + $0x3a0] sm:$0xff] }
 0x2cb   : > { %2916 = vst [vmem:[#allocation2 + $0x94] sm:$0xf] %v2715_v51  ;;  %v2447_v27 = vsel %vm11763_vm10, 0, %v2446_v45  ;;  %v12588_v2 = vrot.slane %v3174_v58, 5  ;;  %v3180_v46 = vrot.slane %v3178_v48, 4  ;;  %v4063_v14 = vsel %vm10846_vm4, %v4058_v63, %v4062_v28  ;;  %5938 = vmatpush.bf16.msra.mxu0 %v10372_v36  ;;  %5157 = vmatpush.bf16.msra.mxu1 %v10356_v10 }
 0x2cc   : > { %2919 = vst [vmem:[#allocation2 + $0x98] sm:$0x1] %v2918_v33  ;;  %v2718_v16 = vshrl.u32 %v2383_v12, 16  ;;  %v2284_v60 = vadd.f32 %v12497_v0, %v2144_v22  ;;  %v2721_v62 = vshll.u32 %v2383_v12, 16  ;;  %v12582_v0 = vld [vmem:[%s14603_s2] ss:$0 sm:$0xff]  ;;  %v12600_v55 = vpack.c.b16 %v3660_v43, %v3659_v34 }
 0x2cd   : > { %v1948_v41 = vpop.f32.mrf.mxu2  ;;  %v12569_v29 = vpop.f32.mrf.mxu0  ;;  %2448 = vst [vmem:[#allocation2 + $0xb4] sm:$0x1] %v2447_v27  ;;  %v4074_v51 = vshll.u32 %v3870_v38, 16  ;;  %v4078_v33 = vshrl.u32 %v3870_v38, 16  ;;  %v4070_v47 = vrot.slane %v4068_v26, 5  ;;  %v4309_v63 = vunpack.c.l.b16 %v4053_v9 }
 0x2ce   : > { %v12577_v25 = vrot.slane %v2718_v16, 7  ;;  %v2320_v56 = vadd.f32 %v12582_v0, %v2284_v60  ;;  %4442 = vmatmul.bf16.gmra.mxu3 %v12539_v40  ;;  %v1989_v44 = vadd.f32 %v1948_v41, %v1855_v23  ;;  %v10286_v16 = vld [vmem:[#allocation2 + $0x54] sm:$0xff]  ;;  %v2971_v60 = vld [vmem:[#allocation2 + $0x68] sm:$0x1]  ;;  %v4310_v28 = vunpack.c.l.b16 %v4063_v14  ;;  %v2924_v43 = vld [vmem:[#allocation2 + $0xa4] sm:$0x1] }
 0x2cf   : > { %v3181_v23 = vor.u32 %v3180_v46, %v12588_v2  ;;  %v14804_v41 = vld [vmem:[#allocation22_spill] sm:$0xff]  ;;  %v2503_v53 = vsel %vm11776_vm12, 0, %v2502_v61  ;;  %v4080_v27 = vrot.slane %v4078_v33, 4  ;;  %v4071_v14 = vor.u32 %v4070_v47, %v4067_v18 }
 0x2d0   : > { %v2723_v21 = vor.u32 %v2721_v62, %v12577_v25  ;;  %v2352_v13 = vmax.f32 %v2320_v56, 0.0  ;;  %4761 = vmatmul.bf16.gmra.mxu0 %v10326_v50  ;;  %v1856_v4 = vadd.f32 %v1816_v17, %v14804_v41  ;;  %2504 = vst [vmem:[#allocation2 + $0xbc] sm:$0x1] %v2503_v53  ;;  %v3172_v56 = vrot.slane %v3171_v7, 4  ;;  %v2973_v17 = vld [vmem:[#allocation2 + $0x70] sm:$0xf] }
 0x2d1   : > { %v2104_v24 = vpop.f32.mrf.mxu3  ;;  %v12615_v50 = vrot.slane %v4074_v51, 5  ;;  %v12618_v46 = vpack.c.b16 %v4310_v28, %v4309_v63  ;;  %v3871_v9 = vld [vmem:[#allocation2 + $0x5c] sm:$0x1]  ;;  %v3202_v63 = vshrl.u32 %v2973_v17, 16  ;;  %v4072_v36 = vrot.slane %v4071_v14, 4  ;;  %v14805_v41 = vld [vmem:[#allocation31_spill] sm:$0xff] }
 0x2d2   : > { %v2921_v12 = vsel %vm11848_vm14, %v2723_v21, %v2920_v6  ;;  %v2384_v22 = vpack.c.bf16 %v2352_v13, %v2352_v13  ;;  %v2145_v58 = vadd.f32 %v2104_v24, %v1989_v44  ;;  %v1819_v48 = vpop.f32.mrf.mxu1  ;;  %v3184_v44 = vshll.u32 %v2971_v60, 16 }
 0x2d3   : > { %2922 = vst [vmem:[#allocation2 + $0x9c] sm:$0xf] %v2921_v12  ;;  %v3177_v21 = vsel %vm10846_vm4, %v3172_v56, %v12588_v2  ;;  %v3182_v13 = vrot.slane %v3181_v23, 4  ;;  %v2724_v24 = vrot.slane %v12577_v25, 4  ;;  %v2972_v12 = vld [vmem:[#allocation2 + $0x6c] sm:$0xf] }
 0x2d4   : > { %v2726_v11 = vshrl.u32 %v2384_v22, 16  ;;  %v2285_v62 = vadd.f32 %v12518_v32, %v2145_v58  ;;  %v2729_v6 = vshll.u32 %v2384_v22, 16  ;;  %v3186_v58 = vrot.slane %v3184_v44, 5 }
 0x2d5   : > { %v1950_v45 = vpop.f32.mrf.mxu2  ;;  %3596 = vmatmul.bf16.gmra.mxu1 %v10286_v16  ;;  %v12613_v26 = vpop.f32.mrf.mxu0  ;;  %v4081_v16 = vor.u32 %v4080_v27, %v12615_v50  ;;  %v3198_v60 = vshll.u32 %v2973_v17, 16  ;;  %v4084_v61 = vshll.u32 %v3871_v9, 16  ;;  %v3189_v23 = vshrl.u32 %v2972_v12, 16  ;;  %v2927_v9 = vld [vmem:[#allocation2 + $0xa8] sm:$0xf] }
 0x2d6   : > { %v2728_v38 = vrot.slane %v2726_v11, 7  ;;  %v2321_v32 = vadd.f32 %v12582_v0, %v2285_v62  ;;  %v1990_v34 = vadd.f32 %v1950_v45, %v1856_v4  ;;  %v3187_v47 = vsel %vm10846_vm4, %v3182_v13, %v3186_v58  ;;  %v3872_v13 = vld [vmem:[#allocation2 + $0x60] sm:$0xf]  ;;  %v3873_v58 = vld [vmem:[#allocation2 + $0x64] sm:$0xf] }
 0x2d7   : > { %v1857_v4 = vadd.f32 %v1819_v48, %v14805_v41  ;;  %v3192_v53 = vshll.u32 %v2972_v12, 16  ;;  %v4082_v27 = vrot.slane %v4081_v16, 4  ;;  %v3661_v14 = vunpack.c.l.b16 %v3177_v21 }
 0x2d8   : > { %v2731_v7 = vor.u32 %v2729_v6, %v2728_v38  ;;  %v2733_v51 = vrot.slane %v2728_v38, 4  ;;  %v2353_v33 = vmax.f32 %v2321_v32, 0.0  ;;  %v2449_v38 = vld [vmem:[#allocation2 + $0xc0] sm:$0x1]  ;;  %v12636_v6 = vrot.slane %v3198_v60, 5 }
 0x2d9   : > { %v2106_v22 = vpop.f32.mrf.mxu3  ;;  %v3204_v32 = vrot.slane %v3202_v63, 4  ;;  %v2450_v48 = vsel %vm11763_vm10, 0, %v2449_v38  ;;  %v4077_v12 = vsel %vm10846_vm4, %v4072_v36, %v12615_v50  ;;  %v3194_v63 = vrot.slane %v3192_v53, 5 }
 0x2da   : > { %v2732_v28 = vsel %vm11872_vm0, %v2724_v24, %v2731_v7  ;;  %v2925_v2 = vsel %vm11763_vm10, %v2733_v51, %v2924_v43  ;;  %v2385_v10 = vpack.c.bf16 %v2353_v33, %v2353_v33  ;;  %v2146_v18 = vadd.f32 %v2106_v22, %v1990_v34  ;;  %3797 = vmatmul.bf16.gmra.mxu2 %v12600_v55  ;;  %v1821_v25 = vpop.f32.mrf.mxu1 }
 0x2db   : > { %2923 = vst [vmem:[#allocation2 + $0xa0] sm:$0xf] %v2732_v28  ;;  %v3662_v24 = vunpack.c.l.b16 %v3187_v47  ;;  %v4086_v7 = vrot.slane %v4084_v61, 5  ;;  %v3191_v22 = vrot.slane %v3189_v23, 4  ;;  %v3205_v21 = vor.u32 %v3204_v32, %v12636_v6  ;;  %v10287_v61 = vld [vmem:[#allocation2 + $0x60] sm:$0xff] }
 0x2dc   : > { %2926 = vst [vmem:[#allocation2 + $0xa4] sm:$0x1] %v2925_v2  ;;  %v2735_v11 = vshrl.u32 %v2385_v10, 16  ;;  %v2286_v62 = vadd.f32 %v12547_v1, %v2146_v18  ;;  %v2738_v45 = vshll.u32 %v2385_v10, 16  ;;  %v10327_v1 = vld [vmem:[#allocation2 + $0x54] sm:$0xff]  ;;  %v4089_v28 = vshrl.u32 %v3872_v13, 16 }
 0x2dd   : > { %v1953_v56 = vpop.f32.mrf.mxu2  ;;  %v12634_v44 = vpop.f32.mrf.mxu0  ;;  %2451 = vst [vmem:[#allocation2 + $0xc0] sm:$0x1] %v2450_v48  ;;  %v4087_v60 = vsel %vm10846_vm4, %v4082_v27, %v4086_v7  ;;  %v4092_v50 = vshll.u32 %v3872_v13, 16  ;;  %v12653_v36 = vpack.c.b16 %v3662_v24, %v3661_v14  ;;  %v4311_v23 = vunpack.c.l.b16 %v4077_v12 }
 0x2de   : > { %v12638_v34 = vrot.slane %v2735_v11, 7  ;;  %v2322_v17 = vadd.f32 %v12582_v0, %v2286_v62  ;;  %4447 = vmatmul.bf16.gmra.mxu3 %v12618_v46  ;;  %v1991_v43 = vadd.f32 %v1953_v56, %v1857_v4  ;;  %v2974_v11 = vld [vmem:[#allocation2 + $0x74] sm:$0x1]  ;;  %v2505_v62 = vld [vmem:[#allocation2 + $0xc8] sm:$0x1]  ;;  %v4098_v41 = vshll.u32 %v3873_v58, 16 }
 0x2df   : > { %14806 = vst [vmem:[#allocation27_spill] sm:$0xff] %v12653_v36  ;;  %v4102_v4 = vshrl.u32 %v3873_v58, 16  ;;  %v14807_v56 = vld [vmem:[#allocation38_spill] sm:$0xff]  ;;  %v2506_v38 = vsel %vm11776_vm12, 0, %v2505_v62  ;;  %v3206_v48 = vrot.slane %v3205_v21, 4  ;;  %v3208_v13 = vshll.u32 %v2974_v11, 16 }
 0x2e0   : > { %v2740_v51 = vor.u32 %v2738_v45, %v12638_v34  ;;  %v2354_v33 = vmax.f32 %v2322_v17, 0.0  ;;  %4766 = vmatmul.bf16.gmra.mxu0 %v10327_v1  ;;  %v1858_v27 = vadd.f32 %v1821_v25, %v14807_v56  ;;  %v4312_v17 = vunpack.c.l.b16 %v4087_v60  ;;  %2507 = vst [vmem:[#allocation2 + $0xc8] sm:$0x1] %v2506_v38  ;;  %v2975_v62 = vld [vmem:[#allocation2 + $0x78] sm:$0xf]  ;;  %v14808_v38 = vld [vmem:[#allocation28_spill] sm:$0xff] }
 0x2e1   : > { %v2109_v16 = vpop.f32.mrf.mxu3  ;;  %v3195_v1 = vor.u32 %v3194_v63, %v3191_v22  ;;  %v4094_v25 = vrot.slane %v4092_v50, 5  ;;  %v4104_v12 = vrot.slane %v4102_v4, 4  ;;  %v2741_v58 = vrot.slane %v12638_v34, 4 }
 0x2e2   : > { %v2928_v2 = vsel %vm11848_vm14, %v2740_v51, %v2927_v9  ;;  %v2386_v10 = vpack.c.bf16 %v2354_v33, %v2354_v33  ;;  %v2147_v18 = vadd.f32 %v2109_v16, %v1991_v43  ;;  %v1824_v47 = vpop.f32.mrf.mxu1  ;;  %v4091_v51 = vrot.slane %v4089_v28, 4  ;;  %v10292_v59 = vld [vmem:[#allocation2 + $0x9c] sm:$0xff] }
 0x2e3   : > { %2929 = vst [vmem:[#allocation2 + $0xa8] sm:$0xf] %v2928_v2  ;;  %v12662_v33 = vrot.slane %v4098_v41, 5  ;;  %v12665_v63 = vpack.c.b16 %v4312_v17, %v4311_v23  ;;  %v3196_v21 = vrot.slane %v3195_v1, 4  ;;  %v2976_v41 = vld [vmem:[#allocation2 + $0x7c] sm:$0xf] }
 0x2e4   : > { %v2743_v53 = vshrl.u32 %v2386_v10, 16  ;;  %v2287_v45 = vadd.f32 %v12569_v29, %v2147_v18  ;;  %v2746_v14 = vshll.u32 %v2386_v10, 16  ;;  %v2931_v29 = vld [vmem:[#allocation2 + $0xb0] sm:$0x1]  ;;  %v3874_v18 = vld [vmem:[#allocation2 + $0x68] sm:$0x1] }
 0x2e5   : > { %v1955_v32 = vpop.f32.mrf.mxu2  ;;  %3601 = vmatmul.bf16.gmra.mxu1 %v10287_v61  ;;  %v12659_v43 = vpop.f32.mrf.mxu0  ;;  %v3210_v10 = vrot.slane %v3208_v13, 5  ;;  %v3201_v23 = vsel %vm10846_vm4, %v3196_v21, %v12636_v6  ;;  %v4105_v17 = vor.u32 %v4104_v12, %v12662_v33  ;;  %v10347_v6 = vld [vmem:[%s14604_s3 + $0x118] sm:$0xff]  ;;  %vm8874_vm3 = vcmask 785408  }
 0x2e6   : > { %v2745_v9 = vrot.slane %v2743_v53, 7  ;;  %v2323_v24 = vadd.f32 %v12582_v0, %v2287_v45  ;;  %v1992_v7 = vadd.f32 %v1955_v32, %v1858_v27  ;;  %v4095_v53 = vor.u32 %v4094_v25, %v4091_v51  ;;  %v10328_v25 = vld [vmem:[#allocation2 + $0x60] sm:$0xff]  ;;  %v10355_v12 = vld [vmem:[%s14604_s3 + $0x198] sm:$0xff]  ;;  %5359 = vmatpush.bf16.msra.mxu2 %v10347_v6 }
 0x2e7   : > { %v3211_v4 = vsel %vm10846_vm4, %v3206_v48, %v3210_v10  ;;  %v4108_v45 = vshll.u32 %v3874_v18, 16  ;;  %v1859_v32 = vadd.f32 %v1824_v47, %v14808_v38  ;;  %v10363_v48 = vld [vmem:[%s14604_s3 + $0x318] sm:$0xff]  ;;  %v4106_v10 = vrot.slane %v4105_v17, 4  ;;  %5158 = vmatpush.bf16.msra.mxu1 %v10355_v12 }
 0x2e8   : > { %v2748_v16 = vor.u32 %v2746_v14, %v2745_v9  ;;  %v2750_v60 = vrot.slane %v2745_v9, 4  ;;  %v2355_v2 = vmax.f32 %v2323_v24, 0.0  ;;  %v3213_v9 = vshrl.u32 %v2975_v62, 16  ;;  %5753 = vmatpush.bf16.msra.mxu3 %v10363_v48 }
 0x2e9   : > { %v2111_v22 = vpop.f32.mrf.mxu3  ;;  %v3216_v14 = vshll.u32 %v2975_v62, 16  ;;  %v3222_v24 = vshll.u32 %v2976_v41, 16  ;;  %v4096_v21 = vrot.slane %v4095_v53, 4  ;;  %v4110_v38 = vrot.slane %v4108_v45, 5  ;;  %v3875_v53 = vld [vmem:[#allocation2 + $0x6c] sm:$0xf] }
 0x2ea   : > { %v2749_v61 = vsel %vm11872_vm0, %v2741_v58, %v2748_v16  ;;  %v2932_v28 = vsel %vm11763_vm10, %v2750_v60, %v2931_v29  ;;  %v2387_v11 = vpack.c.bf16 %v2355_v2, %v2355_v2  ;;  %v2148_v50 = vadd.f32 %v2111_v22, %v1992_v7  ;;  %3802 = vmatmul.bf16.gmra.mxu2 %v12653_v36  ;;  %v1826_v34 = vpop.f32.mrf.mxu1  ;;  %v10371_v58 = vld [vmem:[%s14604_s3 + $0x398] sm:$0xff]  ;;  %v2934_v16 = vld [vmem:[#allocation2 + $0xb4] sm:$0xf]  ;;  %v2977_v45 = vld [vmem:[#allocation2 + $0x80] sm:$0x1] }
 0x2eb   : > { %2930 = vst [vmem:[#allocation2 + $0xac] sm:$0xf] %v2749_v61  ;;  %v3226_v7 = vshrl.u32 %v2976_v41, 16  ;;  %v3663_v60 = vunpack.c.l.b16 %v3201_v23  ;;  %v3664_v2 = vunpack.c.l.b16 %v3211_v4  ;;  %v3876_v61 = vld [vmem:[#allocation2 + $0x70] sm:$0xf]  ;;  %5939 = vmatpush.bf16.msra.mxu0 %v10371_v58  ;;  %v12699_v62 = vrot.slane %v3222_v24, 5 }
 0x2ec   : > { %2933 = vst [vmem:[#allocation2 + $0xb0] sm:$0x1] %v2932_v28  ;;  %v2752_v56 = vshrl.u32 %v2387_v11, 16  ;;  %v2288_v27 = vadd.f32 %v12613_v26, %v2148_v50  ;;  %v2755_v47 = vshll.u32 %v2387_v11, 16  ;;  %v3215_v11 = vrot.slane %v3213_v9, 4  ;;  %v14809_v24 = vld [vmem:[#allocation26_spill] sm:$0xff] }
 0x2ed   : > { %v1958_v1 = vpop.f32.mrf.mxu2  ;;  %v12680_v13 = vpop.f32.mrf.mxu0  ;;  %v3218_v50 = vrot.slane %v3216_v14, 5  ;;  %v3228_v41 = vrot.slane %v3226_v7, 4  ;;  %v12705_v17 = vpack.c.b16 %v3664_v2, %v3663_v60  ;;  %v4122_v6 = vshll.u32 %v3876_v61, 16 }
 0x2ee   : > { %v12688_v26 = vrot.slane %v2752_v56, 7  ;;  %v2324_v29 = vadd.f32 %v12582_v0, %v2288_v27  ;;  %4452 = vmatmul.bf16.gmra.mxu3 %v12665_v63  ;;  %v1993_v51 = vadd.f32 %v1958_v1, %v1859_v32  ;;  %v10288_v32 = vld [vmem:[#allocation2 + $0x6c] sm:$0xff]  ;;  %v4101_v1 = vsel %vm10846_vm4, %v4096_v21, %v12662_v33 }
 0x2ef   : > { %v4126_v48 = vshrl.u32 %v3876_v61, 16  ;;  %v1860_v7 = vadd.f32 %v1826_v34, %v14809_v24  ;;  %v3229_v12 = vor.u32 %v3228_v41, %v12699_v62  ;;  %v4113_v58 = vshrl.u32 %v3875_v53, 16 }
 0x2f0   : > { %v2757_v18 = vor.u32 %v2755_v47, %v12688_v26  ;;  %v2356_v22 = vmax.f32 %v2324_v29, 0.0  ;;  %4771 = vmatmul.bf16.gmra.mxu0 %v10328_v25  ;;  %v4111_v47 = vsel %vm10846_vm4, %v4106_v10, %v4110_v38  ;;  %v3219_v25 = vor.u32 %v3218_v50, %v3215_v11 }
 0x2f1   : > { %v2114_v28 = vpop.f32.mrf.mxu3  ;;  %v4116_v33 = vshll.u32 %v3875_v53, 16  ;;  %v4314_v34 = vunpack.c.l.b16 %v4111_v47  ;;  %v12718_v21 = vrot.slane %v4122_v6, 5  ;;  %v4128_v10 = vrot.slane %v4126_v48, 4 }
 0x2f2   : > { %v2935_v23 = vsel %vm11848_vm14, %v2757_v18, %v2934_v16  ;;  %v2388_v4 = vpack.c.bf16 %v2356_v22, %v2356_v22  ;;  %v2149_v56 = vadd.f32 %v2114_v28, %v1993_v51  ;;  %v12703_v27 = vpop.f32.mrf.mxu1  ;;  %v2938_v18 = vld [vmem:[#allocation2 + $0xbc] sm:$0x1]  ;;  %v3232_v22 = vshll.u32 %v2977_v45, 16 }
 0x2f3   : > { %2936 = vst [vmem:[#allocation2 + $0xb4] sm:$0xf] %v2935_v23  ;;  %v2758_v61 = vrot.slane %v12688_v26, 4  ;;  %v4313_v41 = vunpack.c.l.b16 %v4101_v1  ;;  %v4115_v38 = vrot.slane %v4113_v58, 4  ;;  %v4118_v53 = vrot.slane %v4116_v33, 5 }
 0x2f4   : > { %v2760_v9 = vshrl.u32 %v2388_v4, 16  ;;  %v2289_v14 = vadd.f32 %v12634_v44, %v2149_v56  ;;  %v2763_v60 = vshll.u32 %v2388_v4, 16  ;;  %v3230_v56 = vrot.slane %v3229_v12, 4  ;;  %v3877_v26 = vld [vmem:[#allocation2 + $0x74] sm:$0x1] }
 0x2f5   : > { %v1960_v29 = vpop.f32.mrf.mxu2  ;;  %3606 = vmatmul.bf16.gmra.mxu1 %v10288_v32  ;;  %v12714_v51 = vpop.f32.mrf.mxu0  ;;  %v3234_v24 = vrot.slane %v3232_v22, 5  ;;  %v4129_v1 = vor.u32 %v4128_v10, %v12718_v21  ;;  %v12730_v45 = vpack.c.b16 %v4314_v34, %v4313_v41  ;;  %v2978_v22 = vld [vmem:[#allocation2 + $0x84] sm:$0xf]  ;;  %v10362_v10 = vld [vmem:[%s14604_s3 + $0x310] sm:$0xff] }
 0x2f6   : > { %v2762_v16 = vrot.slane %v2760_v9, 7  ;;  %v2325_v2 = vadd.f32 %v12582_v0, %v2289_v14  ;;  %v1994_v44 = vadd.f32 %v1960_v29, %v1860_v7  ;;  %v3220_v14 = vrot.slane %v3219_v25, 4  ;;  %v2979_v29 = vld [vmem:[#allocation2 + $0x88] sm:$0xf]  ;;  %5754 = vmatpush.bf16.msra.mxu3 %v10362_v10 }
 0x2f7   : > { %v3235_v25 = vsel %vm10846_vm4, %v3230_v56, %v3234_v24  ;;  %v3879_v56 = vld [vmem:[#allocation2 + $0x7c] sm:$0xf] }
 0x2f8   : > { %v2765_v28 = vor.u32 %v2763_v60, %v2762_v16  ;;  %v2767_v23 = vrot.slane %v2762_v16, 4  ;;  %v2357_v11 = vmax.f32 %v2325_v2, 0.0  ;;  %v3225_v33 = vsel %vm10846_vm4, %v3220_v14, %v12699_v62  ;;  %v10329_v2 = vld [vmem:[#allocation2 + $0x6c] sm:$0xff] }
 0x2f9   : > { %v2116_v50 = vpop.f32.mrf.mxu3  ;;  %v4119_v16 = vor.u32 %v4118_v53, %v4115_v38  ;;  %v4132_v60 = vshll.u32 %v3877_v26, 16  ;;  %v10346_v62 = vld [vmem:[%s14604_s3 + $0x110] sm:$0xff]  ;;  %v3665_v41 = vunpack.c.l.b16 %v3225_v33  ;;  %v3666_v38 = vunpack.c.l.b16 %v3235_v25 }
 0x2fa   : > { %v2766_v4 = vsel %vm11872_vm0, %v2758_v61, %v2765_v28  ;;  %v2939_v32 = vsel %vm11763_vm10, %v2767_v23, %v2938_v18  ;;  %v2389_v9 = vpack.c.bf16 %v2357_v11, %v2357_v11  ;;  %v2150_v6 = vadd.f32 %v2116_v50, %v1994_v44  ;;  %3807 = vmatmul.bf16.gmra.mxu2 %v12705_v17  ;;  %v12726_v48 = vpop.f32.mrf.mxu1  ;;  %v2941_v61 = vld [vmem:[#allocation2 + $0xc0] sm:$0xf] }
 0x2fb   : > { %2937 = vst [vmem:[#allocation2 + $0xb8] sm:$0xf] %v2766_v4  ;;  %v4130_v28 = vrot.slane %v4129_v1, 4  ;;  %v3246_v23 = vshll.u32 %v2979_v29, 16  ;;  %v3250_v11 = vshrl.u32 %v2979_v29, 16  ;;  %5360 = vmatpush.bf16.msra.mxu2 %v10346_v62  ;;  %v4134_v53 = vrot.slane %v4132_v60, 5 }
 0x2fc   : > { %2940 = vst [vmem:[#allocation2 + $0xbc] sm:$0x1] %v2939_v32  ;;  %v2769_v7 = vshrl.u32 %v2389_v9, 16  ;;  %v2290_v47 = vadd.f32 %v12659_v43, %v2150_v6  ;;  %v2772_v18 = vshll.u32 %v2389_v9, 16  ;;  %v3237_v4 = vshrl.u32 %v2978_v22, 16  ;;  %v10289_v1 = vld [vmem:[#allocation2 + $0x78] sm:$0xff] }
 0x2fd   : > { %v3768_v12 = vpop.f32.mrf.mxu2  ;;  %v12732_v58 = vpop.f32.mrf.mxu0  ;;  %v3240_v32 = vshll.u32 %v2978_v22, 16  ;;  %v4120_v24 = vrot.slane %v4119_v16, 4  ;;  %v3252_v29 = vrot.slane %v3250_v11, 4  ;;  %v3878_v60 = vld [vmem:[#allocation2 + $0x78] sm:$0xf]  ;;  %v4150_v37 = vshrl.u32 %v3879_v56, 16 }
 0x2fe   : > { %v12739_v44 = vrot.slane %v2769_v7, 7  ;;  %v2326_v43 = vadd.f32 %v12582_v0, %v2290_v47  ;;  %4457 = vmatmul.bf16.gmra.mxu3 %v12730_v45  ;;  %v3769_v34 = vadd.f32 %v3768_v12, %v12703_v27  ;;  %v4135_v7 = vsel %vm10846_vm4, %v4130_v28, %v4134_v53  ;;  %v2980_v28 = vld [vmem:[#allocation2 + $0x8c] sm:$0x1]  ;;  %v10354_v53 = vld [vmem:[%s14604_s3 + $0x190] sm:$0xff] }
 0x2ff   : > { %v12755_v47 = vrot.slane %v3246_v23, 5  ;;  %v4146_v12 = vshll.u32 %v3879_v56, 16  ;;  %v4125_v16 = vsel %vm10846_vm4, %v4120_v24, %v12718_v21  ;;  %v3242_v22 = vrot.slane %v3240_v32, 5  ;;  %v2945_v23 = vld [vmem:[#allocation2 + $0xc8] sm:$0x1]  ;;  %5159 = vmatpush.bf16.msra.mxu1 %v10354_v53 }
 0x300   : > { %v2774_v50 = vor.u32 %v2772_v18, %v12739_v44  ;;  %v2358_v0 = vmax.f32 %v2326_v43, 0.0  ;;  %4776 = vmatmul.bf16.gmra.mxu0 %v10329_v2  ;;  %v12760_v18 = vpack.c.b16 %v3666_v38, %v3665_v41  ;;  %v2775_v56 = vrot.slane %v12739_v44, 4  ;;  %v2981_v53 = vld [vmem:[#allocation2 + $0x90] sm:$0xf] }
 0x301   : > { %v4418_v27 = vpop.f32.mrf.mxu3  ;;  %v3253_v11 = vor.u32 %v3252_v29, %v12755_v47  ;;  %v12769_v41 = vrot.slane %v4146_v12, 5  ;;  %v4152_v38 = vrot.slane %v4150_v37, 4  ;;  %v4315_v32 = vunpack.c.l.b16 %v4125_v16 }
 0x302   : > { %v2942_v9 = vsel %vm11848_vm14, %v2774_v50, %v2941_v61  ;;  %v2390_v6 = vpack.c.bf16 %v2358_v0, %v2358_v0  ;;  %v4498_v26 = vadd.f32 %v4418_v27, %v3769_v34  ;;  %v3572_v14 = vpop.f32.mrf.mxu1  ;;  %v3239_v34 = vrot.slane %v3237_v4, 4 }
 0x303   : > { %2943 = vst [vmem:[#allocation2 + $0xc0] sm:$0xf] %v2942_v9  ;;  %v4137_v50 = vshrl.u32 %v3878_v60, 16  ;;  %v4140_v0 = vshll.u32 %v3878_v60, 16  ;;  %v3256_v24 = vshll.u32 %v2980_v28, 16  ;;  %v3254_v60 = vrot.slane %v3253_v11, 4 }
 0x304   : > { %v2777_v33 = vshrl.u32 %v2390_v6, 16  ;;  %v12758_v25 = vadd.f32 %v12680_v13, %v4498_v26  ;;  %v2780_v10 = vshll.u32 %v2390_v6, 16  ;;  %v4316_v13 = vunpack.c.l.b16 %v4135_v7  ;;  %v3880_v7 = vld [vmem:[#allocation2 + $0x80] sm:$0x1] }
 0x305   : > { %v3770_v2 = vpop.f32.mrf.mxu2  ;;  %3611 = vmatmul.bf16.gmra.mxu1 %v10289_v1  ;;  %v12765_v43 = vpop.f32.mrf.mxu0  ;;  %v3243_v1 = vor.u32 %v3242_v22, %v3239_v34  ;;  %v4139_v29 = vrot.slane %v4137_v50, 4  ;;  %v4142_v12 = vrot.slane %v4140_v0, 5  ;;  %v4153_v37 = vor.u32 %v4152_v38, %v12769_v41 }
 0x306   : > { %v2779_v62 = vrot.slane %v2777_v33, 7  ;;  %v3771_v61 = vadd.f32 %v3770_v2, %v12726_v48  ;;  %v10370_v48 = vld [vmem:[%s14604_s3 + $0x390] sm:$0xff]  ;;  %v12786_v19 = vpack.c.b16 %v4316_v13, %v4315_v32  ;;  %v3258_v22 = vrot.slane %v3256_v24, 5 }
 0x307   : > { %5940 = vmatpush.bf16.msra.mxu0 %v10370_v48  ;;  %v2982_v2 = vld [vmem:[#allocation2 + $0x94] sm:$0xf]  ;;  %v4143_v28 = vor.u32 %v4142_v12, %v4139_v29  ;;  %v4154_v11 = vrot.slane %v4153_v37, 4  ;;  %v10290_v48 = vld [vmem:[#allocation2 + $0x84] sm:$0xff]  ;;  %v3264_v37 = vshll.u32 %v2981_v53, 16 }
 0x308   : > { %v2782_v21 = vor.u32 %v2780_v10, %v2779_v62  ;;  %v2784_v27 = vrot.slane %v2779_v62, 4  ;;  %v4156_v10 = vshll.u32 %v3880_v7, 16  ;;  %v3274_v50 = vshrl.u32 %v2982_v2, 16 }
 0x309   : > { %v4420_v4 = vpop.f32.mrf.mxu3  ;;  %v3259_v13 = vsel %vm10846_vm4, %v3254_v60, %v3258_v22  ;;  %v4144_v32 = vrot.slane %v4143_v28, 4  ;;  %v3261_v60 = vshrl.u32 %v2981_v53, 16  ;;  %v3883_v53 = vld [vmem:[#allocation2 + $0x8c] sm:$0x1] }
 0x30a   : > { %v2783_v9 = vsel %vm11872_vm0, %v2775_v56, %v2782_v21  ;;  %v2946_v6 = vsel %vm11763_vm10, %v2784_v27, %v2945_v23  ;;  %v4499_v44 = vadd.f32 %v4420_v4, %v3771_v61  ;;  %3812 = vmatmul.bf16.gmra.mxu2 %v12760_v18  ;;  %v3574_v26 = vpop.f32.mrf.mxu1  ;;  %v10330_v61 = vld [vmem:[#allocation2 + $0x78] sm:$0xff]  ;;  %v3270_v23 = vshll.u32 %v2982_v2, 16  ;;  %v3882_v56 = vld [vmem:[#allocation2 + $0x88] sm:$0xf]  ;;  %v3881_v2 = vld [vmem:[#allocation2 + $0x84] sm:$0xf] }
 0x30b   : > { %2944 = vst [vmem:[#allocation2 + $0xc4] sm:$0xf] %v2783_v9  ;;  %v4158_v38 = vrot.slane %v4156_v10, 5  ;;  %v3668_v4 = vunpack.c.l.b16 %v3259_v13  ;;  %v4174_v7 = vshrl.u32 %v3882_v56, 16  ;;  %v2983_v10 = vld [vmem:[#allocation2 + $0x98] sm:$0x1] }
 0x30c   : > { %2947 = vst [vmem:[#allocation2 + $0xc8] sm:$0x1] %v2946_v6  ;;  %v12784_v33 = vadd.f32 %v12714_v51, %v4499_v44  ;;  %v3244_v51 = vrot.slane %v3243_v1, 4  ;;  %v12797_v9 = vrot.slane %v3270_v23, 5  ;;  %v3276_v6 = vrot.slane %v3274_v50, 4 }
 0x30d   : > { %v3773_v16 = vpop.f32.mrf.mxu2  ;;  %v12789_v62 = vpop.f32.mrf.mxu0  ;;  %v4159_v24 = vsel %vm10846_vm4, %v4154_v11, %v4158_v38  ;;  %v4170_v1 = vshll.u32 %v3882_v56, 16  ;;  %v4161_v28 = vshrl.u32 %v3881_v2, 16  ;;  %v4164_v23 = vshll.u32 %v3881_v2, 16  ;;  %v2985_v2 = vld [vmem:[#allocation2 + $0xa0] sm:$0xf] }
 0x30e   : > { %14810 = vst [vmem:[#allocation32_spill] sm:$0xff] %v12784_v33  ;;  %4462 = vmatmul.bf16.gmra.mxu3 %v12786_v19  ;;  %v3774_v34 = vadd.f32 %v3773_v16, %v3572_v14  ;;  %v3249_v14 = vsel %vm10846_vm4, %v3244_v51, %v12755_v47  ;;  %v4318_v22 = vunpack.c.l.b16 %v4159_v24  ;;  %v4176_v51 = vrot.slane %v4174_v7, 4 }
 0x30f   : > { %v3667_v12 = vunpack.c.l.b16 %v3249_v14  ;;  %v12812_v50 = vrot.slane %v4170_v1, 5  ;;  %v3266_v56 = vrot.slane %v3264_v37, 5  ;;  %v4180_v37 = vshll.u32 %v3883_v53, 16 }
 0x310   : > { %4781 = vmatmul.bf16.gmra.mxu0 %v10330_v61  ;;  %v3277_v61 = vor.u32 %v3276_v6, %v12797_v9 }
 0x311   : > { %v4423_v0 = vpop.f32.mrf.mxu3  ;;  %v4177_v6 = vor.u32 %v4176_v51, %v12812_v50  ;;  %v3298_v51 = vshrl.u32 %v2985_v2, 16 }
 0x312   : > { %v4500_v21 = vadd.f32 %v4423_v0, %v3774_v34  ;;  %v3577_v27 = vpop.f32.mrf.mxu1  ;;  %v4149_v34 = vsel %vm10846_vm4, %v4144_v32, %v12769_v41  ;;  %v3263_v0 = vrot.slane %v3261_v60, 4  ;;  %v3280_v41 = vshll.u32 %v2983_v10, 16 }
 0x313   : > { %v4317_v11 = vunpack.c.l.b16 %v4149_v34  ;;  %v3278_v38 = vrot.slane %v3277_v61, 4  ;;  %v4166_v32 = vrot.slane %v4164_v23, 5  ;;  %v4178_v10 = vrot.slane %v4177_v6, 4  ;;  %v2984_v61 = vld [vmem:[#allocation2 + $0x9c] sm:$0xf] }
 0x314   : > { %v12800_v44 = vadd.f32 %v12732_v58, %v4500_v21  ;;  %v12809_v58 = vpack.c.b16 %v3668_v4, %v3667_v12  ;;  %v4163_v4 = vrot.slane %v4161_v28, 4  ;;  %v3267_v7 = vor.u32 %v3266_v56, %v3263_v0  ;;  %v3885_v56 = vld [vmem:[#allocation2 + $0x94] sm:$0xf] }
 0x315   : > { %v3775_v29 = vpop.f32.mrf.mxu2  ;;  %3616 = vmatmul.bf16.gmra.mxu1 %v10290_v48  ;;  %v12804_v47 = vpop.f32.mrf.mxu0  ;;  %v12815_v14 = vpack.c.b16 %v4318_v22, %v4317_v11  ;;  %v3282_v60 = vrot.slane %v3280_v41, 5  ;;  %v3294_v23 = vshll.u32 %v2985_v2, 16  ;;  %v4182_v0 = vrot.slane %v4180_v37, 5 }
 0x316   : > { %14811 = vst [vmem:[#allocation29_spill] sm:$0xff] %v12800_v44  ;;  %v3776_v16 = vadd.f32 %v3775_v29, %v3574_v26  ;;  %v10331_v29 = vld [vmem:[#allocation2 + $0x84] sm:$0xff]  ;;  %v4167_v22 = vor.u32 %v4166_v32, %v4163_v4  ;;  %v3268_v28 = vrot.slane %v3267_v7, 4  ;;  %v3285_v53 = vshrl.u32 %v2984_v61, 16  ;;  %v3884_v7 = vld [vmem:[#allocation2 + $0x90] sm:$0xf] }
 0x317   : > { %v3283_v34 = vsel %vm10846_vm4, %v3278_v38, %v3282_v60  ;;  %v4183_v6 = vsel %vm10846_vm4, %v4178_v10, %v4182_v0  ;;  %v12842_v60 = vrot.slane %v3294_v23, 5  ;;  %v3300_v37 = vrot.slane %v3298_v51, 4  ;;  %v10353_v23 = vld [vmem:[%s14604_s3 + $0x188] sm:$0xff] }
 0x318   : > { %v3273_v41 = vsel %vm10846_vm4, %v3268_v28, %v12797_v9  ;;  %v3670_v38 = vunpack.c.l.b16 %v3283_v34  ;;  %v4168_v32 = vrot.slane %v4167_v22, 4  ;;  %v4194_v2 = vshll.u32 %v3885_v56, 16  ;;  %5160 = vmatpush.bf16.msra.mxu1 %v10353_v23 }
 0x319   : > { %v4425_v13 = vpop.f32.mrf.mxu3  ;;  %v4198_v9 = vshrl.u32 %v3885_v56, 16  ;;  %v4185_v34 = vshrl.u32 %v3884_v7, 16  ;;  %v4188_v22 = vshll.u32 %v3884_v7, 16  ;;  %v3287_v28 = vrot.slane %v3285_v53, 4 }
 0x31a   : > { %v4501_v26 = vadd.f32 %v4425_v13, %v3776_v16  ;;  %3817 = vmatmul.bf16.gmra.mxu2 %v12809_v58  ;;  %v3579_v21 = vpop.f32.mrf.mxu1  ;;  %v10361_v16 = vld [vmem:[%s14604_s3 + $0x308] sm:$0xff]  ;;  %v3301_v0 = vor.u32 %v3300_v37, %v12842_v60  ;;  %v3886_v37 = vld [vmem:[#allocation2 + $0x98] sm:$0x1] }
 0x31b   : > { %5755 = vmatpush.bf16.msra.mxu3 %v10361_v16  ;;  %v3669_v16 = vunpack.c.l.b16 %v3273_v41  ;;  %v4200_v56 = vrot.slane %v4198_v9, 4 }
 0x31c   : > { %v12818_v48 = vadd.f32 %v12765_v43, %v4501_v26  ;;  %v10345_v43 = vld [vmem:[%s14604_s3 + $0x108] sm:$0xff]  ;;  %v10291_v26 = vld [vmem:[#allocation2 + $0x90] sm:$0xff]  ;;  %v3302_v9 = vrot.slane %v3301_v0, 4 }
 0x31d   : > { %v3778_v24 = vpop.f32.mrf.mxu2  ;;  %v12821_v1 = vpop.f32.mrf.mxu0  ;;  %5361 = vmatpush.bf16.msra.mxu2 %v10345_v43  ;;  %v12847_v10 = vpack.c.b16 %v3670_v38, %v3669_v16 }
 0x31e   : > { %14812 = vst [vmem:[#allocation23_spill] sm:$0xff] %v12818_v48  ;;  %4467 = vmatmul.bf16.gmra.mxu3 %v12815_v14  ;;  %v3779_v12 = vadd.f32 %v3778_v24, %v3577_v27  ;;  %v3288_v24 = vshll.u32 %v2984_v61, 16  ;;  %v4320_v61 = vunpack.c.l.b16 %v4183_v6  ;;  %v4190_v6 = vrot.slane %v4188_v22, 5  ;;  %v2990_v48 = vld [vmem:[#allocation2 + $0xb4] sm:$0xf] }
 0x320   : > { %4786 = vmatmul.bf16.gmra.mxu0 %v10331_v29 }
 0x321   : > { %v4428_v27 = vpop.f32.mrf.mxu3 }
 0x322   : > { %v4502_v13 = vadd.f32 %v4428_v27, %v3779_v12  ;;  %v3582_v11 = vpop.f32.mrf.mxu1  ;;  %v2986_v27 = vld [vmem:[#allocation2 + $0xa4] sm:$0x1] }
 0x323   : > { %v3304_v53 = vshll.u32 %v2986_v27, 16  ;;  %v10332_v27 = vld [vmem:[#allocation2 + $0x90] sm:$0xff] }
 0x324   : > { %v12836_v4 = vadd.f32 %v12789_v62, %v4502_v13  ;;  %v4173_v62 = vsel %vm10846_vm4, %v4168_v32, %v12812_v50  ;;  %v3290_v13 = vrot.slane %v3288_v24, 5  ;;  %v12856_v50 = vrot.slane %v4194_v2, 5 }
 0x325   : > { %v3780_v29 = vpop.f32.mrf.mxu2  ;;  %3621 = vmatmul.bf16.gmra.mxu1 %v10291_v26  ;;  %v12840_v12 = vpop.f32.mrf.mxu0  ;;  %v4319_v41 = vunpack.c.l.b16 %v4173_v62  ;;  %v4187_v32 = vrot.slane %v4185_v34, 4  ;;  %v2988_v34 = vld [vmem:[#allocation2 + $0xac] sm:$0xf]  ;;  %v3306_v22 = vrot.slane %v3304_v53, 5 }
 0x326   : > { %14813 = vst [vmem:[#allocation39_spill] sm:$0xff] %v12836_v4  ;;  %v3781_v43 = vadd.f32 %v3780_v29, %v3579_v21  ;;  %v10369_v21 = vld [vmem:[%s14604_s3 + $0x388] sm:$0xff]  ;;  %v3291_v29 = vor.u32 %v3290_v13, %v3287_v28  ;;  %v3322_v0 = vshrl.u32 %v2988_v34, 16  ;;  %v10294_v4 = vld [vmem:[#allocation2 + $0xb4] sm:$0xff] }
 0x327   : > { %5941 = vmatpush.bf16.msra.mxu0 %v10369_v21  ;;  %v12862_v7 = vpack.c.b16 %v4320_v61, %v4319_v41  ;;  %v4191_v23 = vor.u32 %v4190_v6, %v4187_v32  ;;  %v4204_v21 = vshll.u32 %v3886_v37, 16  ;;  %v2987_v61 = vld [vmem:[#allocation2 + $0xa8] sm:$0xf]  ;;  %v3307_v28 = vsel %vm10846_vm4, %v3302_v9, %v3306_v22  ;;  %v3888_v41 = vld [vmem:[#allocation2 + $0xa0] sm:$0xf] }
 0x328   : > { %v3309_v6 = vshrl.u32 %v2987_v61, 16  ;;  %v3672_v37 = vunpack.c.l.b16 %v3307_v28  ;;  %v4218_v9 = vshll.u32 %v3888_v41, 16  ;;  %v3312_v22 = vshll.u32 %v2987_v61, 16 }
 0x329   : > { %v4430_v51 = vpop.f32.mrf.mxu3  ;;  %v4192_v53 = vrot.slane %v4191_v23, 4  ;;  %v4206_v32 = vrot.slane %v4204_v21, 5 }
 0x32a   : > { %v4503_v26 = vadd.f32 %v4430_v51, %v3781_v43  ;;  %3822 = vmatmul.bf16.gmra.mxu2 %v12847_v10  ;;  %v3584_v38 = vpop.f32.mrf.mxu1  ;;  %v4201_v43 = vor.u32 %v4200_v56, %v12856_v50  ;;  %v3311_v61 = vrot.slane %v3309_v6, 4 }
 0x32c   : > { %v12860_v24 = vadd.f32 %v12804_v47, %v4503_v26  ;;  %v3292_v47 = vrot.slane %v3291_v29, 4  ;;  %v4202_v13 = vrot.slane %v4201_v43, 4  ;;  %v3318_v26 = vshll.u32 %v2988_v34, 16 }
 0x32d   : > { %v3783_v2 = vpop.f32.mrf.mxu2  ;;  %v12864_v16 = vpop.f32.mrf.mxu0  ;;  %v4222_v43 = vshrl.u32 %v3888_v41, 16 }
 0x32e   : > { %14814 = vst [vmem:[#allocation30_spill] sm:$0xff] %v12860_v24  ;;  %4472 = vmatmul.bf16.gmra.mxu3 %v12862_v7  ;;  %v3784_v62 = vadd.f32 %v3783_v2, %v3582_v11  ;;  %v3297_v11 = vsel %vm10846_vm4, %v3292_v47, %v12842_v60  ;;  %v3887_v2 = vld [vmem:[#allocation2 + $0x9c] sm:$0xf]  ;;  %v3324_v60 = vrot.slane %v3322_v0, 4  ;;  %v10293_v24 = vld [vmem:[#allocation2 + $0xa8] sm:$0xff] }
 0x32f   : > { %v3671_v21 = vunpack.c.l.b16 %v3297_v11  ;;  %v4209_v47 = vshrl.u32 %v3887_v2, 16  ;;  %v4212_v28 = vshll.u32 %v3887_v2, 16 }
 0x330   : > { %4791 = vmatmul.bf16.gmra.mxu0 %v10332_v27 }
 0x331   : > { %v4433_v51 = vpop.f32.mrf.mxu3  ;;  %v12885_v41 = vpack.c.b16 %v3672_v37, %v3671_v21  ;;  %v4211_v2 = vrot.slane %v4209_v47, 4  ;;  %v10333_v21 = vld [vmem:[#allocation2 + $0x9c] sm:$0xff] }
 0x332   : > { %v4504_v56 = vadd.f32 %v4433_v51, %v3784_v62  ;;  %v3587_v30 = vpop.f32.mrf.mxu1  ;;  %v4207_v62 = vsel %vm10846_vm4, %v4202_v13, %v4206_v32  ;;  %v12880_v51 = vrot.slane %v3318_v26, 5  ;;  %v4224_v13 = vrot.slane %v4222_v43, 4  ;;  %v10360_v47 = vld [vmem:[%s14604_s3 + $0x300] sm:$0xff] }
 0x333   : > { %v3314_v26 = vrot.slane %v3312_v22, 5  ;;  %5756 = vmatpush.bf16.msra.mxu3 %v10360_v47  ;;  %v3336_v47 = vshll.u32 %v2990_v48, 16 }
 0x334   : > { %v12874_v29 = vadd.f32 %v12821_v1, %v4504_v56  ;;  %v4197_v1 = vsel %vm10846_vm4, %v4192_v53, %v12856_v50  ;;  %v2989_v56 = vld [vmem:[#allocation2 + $0xb0] sm:$0x1]  ;;  %v3325_v0 = vor.u32 %v3324_v60, %v12880_v51  ;;  %v3889_v53 = vld [vmem:[#allocation2 + $0xa4] sm:$0x1] }
 0x335   : > { %v3785_v27 = vpop.f32.mrf.mxu2  ;;  %3626 = vmatmul.bf16.gmra.mxu1 %v10292_v59  ;;  %v12878_v34 = vpop.f32.mrf.mxu0  ;;  %v4322_v59 = vunpack.c.l.b16 %v4207_v62  ;;  %v4321_v11 = vunpack.c.l.b16 %v4197_v1  ;;  %v3328_v50 = vshll.u32 %v2989_v56, 16  ;;  %v3315_v60 = vor.u32 %v3314_v26, %v3311_v61  ;;  %v3891_v61 = vld [vmem:[#allocation2 + $0xac] sm:$0xf] }
 0x336   : > { %14815 = vst [vmem:[#allocation36_spill] sm:$0xff] %v12874_v29  ;;  %v3786_v23 = vadd.f32 %v3785_v27, %v3584_v38  ;;  %v12887_v29 = vrot.slane %v4218_v9, 5  ;;  %v4214_v9 = vrot.slane %v4212_v28, 5  ;;  %v4228_v56 = vshll.u32 %v3889_v53, 16 }
 0x337   : > { %v12894_v62 = vpack.c.b16 %v4322_v59, %v4321_v11  ;;  %v3330_v28 = vrot.slane %v3328_v50, 5 }
 0x338   : > { %v4225_v43 = vor.u32 %v4224_v13, %v12887_v29  ;;  %v4215_v59 = vor.u32 %v4214_v9, %v4211_v2  ;;  %v3890_v2 = vld [vmem:[#allocation2 + $0xa8] sm:$0xf]  ;;  %v4242_v9 = vshll.u32 %v3891_v61, 16 }
 0x339   : > { %v4435_v32 = vpop.f32.mrf.mxu3 }
 0x33a   : > { %v4505_v38 = vadd.f32 %v4435_v32, %v3786_v23  ;;  %3827 = vmatmul.bf16.gmra.mxu2 %v12885_v41  ;;  %v3589_v27 = vpop.f32.mrf.mxu1  ;;  %v3326_v23 = vrot.slane %v3325_v0, 4  ;;  %v2991_v32 = vld [vmem:[#allocation2 + $0xb8] sm:$0xf]  ;;  %v4226_v13 = vrot.slane %v4225_v43, 4  ;;  %v3316_v0 = vrot.slane %v3315_v60, 4 }
 0x33b   : > { %v3346_v11 = vshrl.u32 %v2991_v32, 16  ;;  %v4246_v43 = vshrl.u32 %v3891_v61, 16  ;;  %v4233_v61 = vshrl.u32 %v3890_v2, 16 }
 0x33c   : > { %v12892_v37 = vadd.f32 %v12840_v12, %v4505_v38  ;;  %v10344_v12 = vld [vmem:[%s14604_s3 + $0x100] sm:$0xff]  ;;  %v3342_v38 = vshll.u32 %v2991_v32, 16  ;;  %v3321_v50 = vsel %vm10846_vm4, %v3316_v0, %v12880_v51 }
 0x33d   : > { %v3788_v6 = vpop.f32.mrf.mxu2  ;;  %v12897_v22 = vpop.f32.mrf.mxu0  ;;  %5362 = vmatpush.bf16.msra.mxu2 %v10344_v12  ;;  %v3333_v12 = vshrl.u32 %v2990_v48, 16  ;;  %v3348_v51 = vrot.slane %v3346_v11, 4  ;;  %v3673_v0 = vunpack.c.l.b16 %v3321_v50  ;;  %v10352_v48 = vld [vmem:[%s14604_s3 + $0x180] sm:$0xff]  ;;  %v3338_v50 = vrot.slane %v3336_v47, 5 }
 0x33e   : > { %14816 = vst [vmem:[#allocation33_spill] sm:$0xff] %v12892_v37  ;;  %4477 = vmatmul.bf16.gmra.mxu3 %v12894_v62  ;;  %v3789_v1 = vadd.f32 %v3788_v6, %v3587_v30  ;;  %v3331_v30 = vsel %vm10846_vm4, %v3326_v23, %v3330_v28  ;;  %v4230_v37 = vrot.slane %v4228_v56, 5  ;;  %v4216_v23 = vrot.slane %v4215_v59, 4  ;;  %5161 = vmatpush.bf16.msra.mxu1 %v10352_v48 }
 0x33f   : > { %v12918_v28 = vrot.slane %v3342_v38, 5  ;;  %v4236_v59 = vshll.u32 %v3890_v2, 16  ;;  %v3335_v11 = vrot.slane %v3333_v12, 4  ;;  %v3892_v2 = vld [vmem:[#allocation2 + $0xb0] sm:$0x1] }
 0x340   : > { %4796 = vmatmul.bf16.gmra.mxu0 %v10333_v21  ;;  %v3674_v21 = vunpack.c.l.b16 %v3331_v30  ;;  %v4231_v32 = vsel %vm10846_vm4, %v4226_v13, %v4230_v37  ;;  %v12923_v30 = vrot.slane %v4242_v9, 5  ;;  %v4248_v37 = vrot.slane %v4246_v43, 4 }
 0x341   : > { %v4438_v26 = vpop.f32.mrf.mxu3  ;;  %v4252_v47 = vshll.u32 %v3892_v2, 16 }
 0x342   : > { %v4506_v53 = vadd.f32 %v4438_v26, %v3789_v1  ;;  %v3592_v6 = vpop.f32.mrf.mxu1  ;;  %v12925_v13 = vpack.c.b16 %v3674_v21, %v3673_v0  ;;  %v4249_v0 = vor.u32 %v4248_v37, %v12923_v30 }
 0x344   : > { %v12912_v60 = vadd.f32 %v12864_v16, %v4506_v53  ;;  %v4221_v16 = vsel %vm10846_vm4, %v4216_v23, %v12887_v29  ;;  %14818 = vst [vmem:[#allocation35_spill] sm:$0xff] %v12925_v13  ;;  %v2992_v53 = vld [vmem:[#allocation2 + $0xbc] sm:$0x1]  ;;  %v3349_v29 = vor.u32 %v3348_v51, %v12918_v28  ;;  %v4250_v37 = vrot.slane %v4249_v0, 4 }
 0x345   : > { %v3790_v1 = vpop.f32.mrf.mxu2  ;;  %3631 = vmatmul.bf16.gmra.mxu1 %v10293_v24  ;;  %v12916_v56 = vpop.f32.mrf.mxu0  ;;  %v4324_v24 = vunpack.c.l.b16 %v4231_v32  ;;  %v4323_v43 = vunpack.c.l.b16 %v4221_v16  ;;  %v3352_v23 = vshll.u32 %v2992_v53, 16  ;;  %v4235_v32 = vrot.slane %v4233_v61, 4  ;;  %v10334_v53 = vld [vmem:[#allocation2 + $0xa8] sm:$0xff]  ;;  %v2994_v61 = vld [vmem:[#allocation2 + $0xc4] sm:$0xf] }
 0x346   : > { %14817 = vst [vmem:[#allocation6_spill] sm:$0xff] %v12912_v60  ;;  %v3791_v26 = vadd.f32 %v3790_v1, %v3589_v27  ;;  %v10368_v27 = vld [vmem:[%s14604_s3 + $0x380] sm:$0xff]  ;;  %v4238_v1 = vrot.slane %v4236_v59, 5  ;;  %v3366_v2 = vshll.u32 %v2994_v61, 16 }
 0x347   : > { %5942 = vmatpush.bf16.msra.mxu0 %v10368_v27  ;;  %v12939_v12 = vpack.c.b16 %v4324_v24, %v4323_v43  ;;  %v3354_v59 = vrot.slane %v3352_v23, 5  ;;  %v4254_v27 = vrot.slane %v4252_v47, 5  ;;  %v3370_v43 = vshrl.u32 %v2994_v61, 16  ;;  %v3893_v47 = vld [vmem:[#allocation2 + $0xb4] sm:$0xf] }
 0x348   : > { %v4239_v48 = vor.u32 %v4238_v1, %v4235_v32 }
 0x349   : > { %v4440_v38 = vpop.f32.mrf.mxu3  ;;  %v4255_v32 = vsel %vm10846_vm4, %v4250_v37, %v4254_v27 }
 0x34a   : > { %v4507_v9 = vadd.f32 %v4440_v38, %v3791_v26  ;;  %3832 = vmatmul.bf16.gmra.mxu2 %v12925_v13  ;;  %v3594_v21 = vpop.f32.mrf.mxu1  ;;  %v3339_v26 = vor.u32 %v3338_v50, %v3335_v11  ;;  %v3350_v38 = vrot.slane %v3349_v29, 4  ;;  %v2993_v29 = vld [vmem:[#allocation2 + $0xc0] sm:$0xf]  ;;  %v4240_v23 = vrot.slane %v4239_v48, 4 }
 0x34b   : > { %v3360_v61 = vshll.u32 %v2993_v29, 16 }
 0x34c   : > { %v12937_v60 = vadd.f32 %v12878_v34, %v4507_v9  ;;  %v3340_v9 = vrot.slane %v3339_v26, 4  ;;  %v3355_v24 = vsel %vm10846_vm4, %v3350_v38, %v3354_v59  ;;  %v3368_v59 = vrot.slane %v3366_v2, 5 }
 0x34d   : > { %v3793_v51 = vpop.f32.mrf.mxu2  ;;  %v12941_v44 = vpop.f32.mrf.mxu0  ;;  %v3676_v0 = vunpack.c.l.b16 %v3355_v24  ;;  %v4245_v37 = vsel %vm10846_vm4, %v4240_v23, %v12923_v30  ;;  %v2995_v24 = vld [vmem:[#allocation2 + $0xc8] sm:$0x1]  ;;  %v3362_v33 = vrot.slane %v3360_v61, 5 }
 0x34e   : > { %14819 = vst [vmem:[#allocation37_spill] sm:$0xff] %v12937_v60  ;;  %4482 = vmatmul.bf16.gmra.mxu3 %v12939_v12  ;;  %v3794_v16 = vadd.f32 %v3793_v51, %v3592_v6  ;;  %v3894_v60 = vld [vmem:[#allocation2 + $0xb8] sm:$0xf]  ;;  %v3345_v6 = vsel %vm10846_vm4, %v3340_v9, %v12918_v28  ;;  %v4326_v9 = vunpack.c.l.b16 %v4255_v32  ;;  %v3895_v32 = vld [vmem:[#allocation2 + $0xbc] sm:$0x1] }
 0x34f   : > { %v4266_v51 = vshll.u32 %v3894_v60, 16  ;;  %v4270_v26 = vshrl.u32 %v3894_v60, 16  ;;  %v3675_v48 = vunpack.c.l.b16 %v3345_v6  ;;  %v4260_v60 = vshll.u32 %v3893_v47, 16 }
 0x350   : > { %4801 = vmatmul.bf16.gmra.mxu0 %v10334_v53  ;;  %v3357_v53 = vshrl.u32 %v2993_v29, 16 }
 0x351   : > { %v4443_v34 = vpop.f32.mrf.mxu3  ;;  %v12959_v27 = vpack.c.b16 %v3676_v0, %v3675_v48  ;;  %v4272_v2 = vrot.slane %v4270_v26, 4  ;;  %v10335_v48 = vld [vmem:[#allocation2 + $0xb4] sm:$0xff] }
 0x352   : > { %v4508_v11 = vadd.f32 %v4443_v34, %v3794_v16  ;;  %v3597_v50 = vpop.f32.mrf.mxu1  ;;  %v3372_v34 = vrot.slane %v3370_v43, 4 }
 0x354   : > { %v12952_v1 = vadd.f32 %v12897_v22, %v4508_v11  ;;  %v4257_v22 = vshrl.u32 %v3893_v47, 16  ;;  %v12961_v11 = vrot.slane %v4266_v51, 5  ;;  %v3373_v29 = vor.u32 %v3372_v34, %v3368_v59 }
 0x355   : > { %v3795_v38 = vpop.f32.mrf.mxu2  ;;  %3636 = vmatmul.bf16.gmra.mxu1 %v10294_v4  ;;  %v12954_v16 = vpop.f32.mrf.mxu0  ;;  %v4262_v34 = vrot.slane %v4260_v60, 5 }
 0x356   : > { %14820 = vst [vmem:[#allocation8_spill] sm:$0xff] %v12952_v1  ;;  %v3796_v28 = vadd.f32 %v3795_v38, %v3594_v21  ;;  %v3359_v1 = vrot.slane %v3357_v53, 4  ;;  %v4325_v21 = vunpack.c.l.b16 %v4245_v37  ;;  %v3376_v38 = vshll.u32 %v2995_v24, 16  ;;  %v10415_v37 = vld [vmem:[%s14604_s3 + $0x278] sm:$0xff] }
 0x357   : > { %v4259_v0 = vrot.slane %v4257_v22, 4  ;;  %v3374_v61 = vrot.slane %v3373_v29, 4  ;;  %v4273_v26 = vor.u32 %v4272_v2, %v12961_v11  ;;  %7086 = vmatpush.bf16.msrb.mxu3 %v10415_v37  ;;  %v10295_v2 = vld [vmem:[#allocation2 + $0xc0] sm:$0xff]  ;;  %v10407_v37 = vld [vmem:[%s14604_s3 + $0xf8] sm:$0xff] }
 0x358   : > { %v12967_v23 = vpack.c.b16 %v4326_v9, %v4325_v21  ;;  %v3363_v53 = vor.u32 %v3362_v33, %v3359_v1  ;;  %v3378_v22 = vrot.slane %v3376_v38, 5  ;;  %v4276_v9 = vshll.u32 %v3895_v32, 16  ;;  %6731 = vmatpush.bf16.msrb.mxu1 %v10407_v37  ;;  %v7457_v37 = vld [vmem:[#allocation2 + $0x18] sm:$0xe] }
 0x359   : > { %v4445_v4 = vpop.f32.mrf.mxu3  ;;  %v4263_v60 = vor.u32 %v4262_v34, %v4259_v0 }
 0x35a   : > { %v4509_v43 = vadd.f32 %v4445_v4, %v3796_v28  ;;  %3837 = vmatmul.bf16.gmra.mxu2 %v12959_v27  ;;  %v3599_v6 = vpop.f32.mrf.mxu1  ;;  %v3364_v1 = vrot.slane %v3363_v53, 4  ;;  %v3379_v24 = vsel %vm10846_vm4, %v3374_v61, %v3378_v22  ;;  %v4278_v21 = vrot.slane %v4276_v9, 5  ;;  %v10423_v22 = vld [vmem:[%s14604_s3 + $0x2f8] sm:$0xff]  ;;  %v6123_v9 = vld [vmem:[#allocation2 + $0x20] sm:$0x1] }
 0x35b   : > { %v3678_v32 = vunpack.c.l.b16 %v3379_v24  ;;  %v4264_v53 = vrot.slane %v4263_v60, 4  ;;  %7272 = vmatpush.bf16.msrb.mxu0 %v10423_v22  ;;  %v10523_v22 = vld [vmem:[#allocation2 + $0x14] sm:$0x1] }
 0x35c   : > { %v12965_v30 = vadd.f32 %v12916_v56, %v4509_v43  ;;  %v10399_v56 = vld [vmem:[%s14604_s3 + $0x78] sm:$0xff]  ;;  %v3369_v43 = vsel %vm10846_vm4, %v3364_v1, %v3368_v59 }
 0x35d   : > { %v3798_v47 = vpop.f32.mrf.mxu2  ;;  %v12969_v51 = vpop.f32.mrf.mxu0  ;;  %6932 = vmatpush.bf16.msrb.mxu2 %v10399_v56  ;;  %v4269_v59 = vsel %vm10846_vm4, %v4264_v53, %v12961_v11 }
 0x35e   : > { %14821 = vst [vmem:[#allocation40_spill] sm:$0xff] %v12965_v30  ;;  %4487 = vmatmul.bf16.gmra.mxu3 %v12967_v23  ;;  %v3799_v28 = vadd.f32 %v3798_v47, %v3597_v50  ;;  %v4274_v50 = vrot.slane %v4273_v26, 4  ;;  %v6122_v47 = vld [vmem:[#allocation2 + $0x1c] sm:$0xf]  ;;  %v3677_v26 = vunpack.c.l.b16 %v3369_v43  ;;  %v4327_v11 = vunpack.c.l.b16 %v4269_v59 }
 0x35f   : > { %v7510_v43 = vrot.slane %v6123_v9, 5  ;;  %v4965_v9 = vrot.slane %v10523_v22, 5 }
 0x360   : > { %4806 = vmatmul.bf16.gmra.mxu0 %v10335_v48  ;;  %v4279_v0 = vsel %vm10846_vm4, %v4274_v50, %v4278_v21  ;;  %v12993_v56 = vpack.c.b16 %v3678_v32, %v3677_v26  ;;  %v10522_v50 = vld [vmem:[#allocation2 + $0x4] sm:$0xf] }
 0x361   : > { %v4448_v33 = vpop.f32.mrf.mxu3 }
 0x362   : > { %v4510_v4 = vadd.f32 %v4448_v33, %v3799_v28  ;;  %v3602_v29 = vpop.f32.mrf.mxu1  ;;  %v7507_v28 = vrot.slane %v6122_v47, 5  ;;  %v5444_v47 = vld [vmem:[#allocation2] sm:$0xe] }
 0x364   : > { %v12984_v38 = vadd.f32 %v12941_v44, %v4510_v4  ;;  %v4328_v44 = vunpack.c.l.b16 %v4279_v0  ;;  %v5510_v4 = vrot.slane %v10522_v50, 5  ;;  %v4912_v0 = vld [vmem:[#allocation2 + $0xc] sm:$0xe] }
 0x365   : > { %v3800_v48 = vpop.f32.mrf.mxu2  ;;  %3641 = vmatmul.bf16.gmra.mxu1 %v10295_v2  ;;  %v12988_v61 = vpop.f32.mrf.mxu0  ;;  %v7509_v2 = vrot.slane %v7507_v28, 4 }
 0x366   : > { %14822 = vst [vmem:[#allocation17_spill] sm:$0xff] %v12984_v38  ;;  %v3801_v34 = vadd.f32 %v3800_v48, %v3599_v6  ;;  %v10521_v6 = vld [vmem:[#allocation2 + $0x10] sm:$0xf]  ;;  %v13005_v32 = vpack.c.b16 %v4328_v44, %v4327_v11 }
 0x367   : > { %v4962_v1 = vrot.slane %v10521_v6, 5  ;;  %v7511_v26 = vsel %vm11159_vm7, %v7509_v2, %v7510_v43  ;;  %v10524_v6 = vld [vmem:[#allocation2 + $0x8] sm:$0x1] }
 0x368   : > { %v5513_v44 = vrot.slane %v10524_v6, 5 }
 0x369   : > { %v4450_v33 = vpop.f32.mrf.mxu3 }
 0x36a   : > { %v4511_v24 = vadd.f32 %v4450_v33, %v3801_v34  ;;  %3842 = vmatmul.bf16.gmra.mxu2 %v12993_v56  ;;  %v3604_v60 = vpop.f32.mrf.mxu1  ;;  %v4964_v34 = vrot.slane %v4962_v1, 4  ;;  %v9697_v33 = vrot.slane %v5444_v47, 9 }
 0x36c   : > { %v13003_v21 = vadd.f32 %v12954_v16, %v4511_v24  ;;  %v5512_v16 = vrot.slane %v5510_v4, 4  ;;  %v9585_v24 = vrot.slane %v4912_v0, 9  ;;  %v4966_v50 = vsel %vm11159_vm7, %v4964_v34, %v4965_v9 }
 0x36d   : > { %v3803_v48 = vpop.f32.mrf.mxu2  ;;  %v13007_v53 = vpop.f32.mrf.mxu0  ;;  %v5511_v43 = vsel %vm11159_vm7, %v9697_v33, %v5510_v4  ;;  %v5244_v0 = vunpack.c.l.b16 %v4966_v50  ;;  %v6125_v33 = vld [vmem:[#allocation2 + $0x28] sm:$0xf] }
 0x36e   : > { %14823 = vst [vmem:[#allocation11_spill] sm:$0xff] %v13003_v21  ;;  %4492 = vmatmul.bf16.gmra.mxu3 %v13005_v32  ;;  %v3804_v59 = vadd.f32 %v3803_v48, %v3602_v29  ;;  %v10065_v21 = vrot.slane %v7457_v37, 9  ;;  %v4963_v29 = vsel %vm11159_vm7, %v9585_v24, %v4962_v1  ;;  %v5514_v47 = vsel %vm11159_vm7, %v5512_v16, %v5513_v44  ;;  %v10525_v44 = vld [vmem:[#allocation2 + $0x1c] sm:$0xf] }
 0x36f   : > { %v7788_v1 = vunpack.c.l.b16 %v7511_v26  ;;  %v5637_v9 = vunpack.c.l.b16 %v5511_v43  ;;  %v5638_v4 = vunpack.c.l.b16 %v5514_v47  ;;  %v7514_v24 = vrot.slane %v6125_v33, 5  ;;  %v6128_v26 = vld [vmem:[#allocation2 + $0x34] sm:$0xf] }
 0x370   : > { %5943 = vmatmul.bf16.vlgmr.msra.gmra.mxu0 %v12243_v54  ;;  %v7508_v48 = vsel %vm11159_vm7, %v10065_v21, %v7507_v28  ;;  %v4969_v28 = vrot.slane %v10525_v44, 5  ;;  %v6126_v21 = vld [vmem:[#allocation2 + $0x2c] sm:$0x1]  ;;  %v7521_v33 = vrot.slane %v6128_v26, 5 }
 0x371   : > { %v4453_v11 = vpop.f32.mrf.mxu3  ;;  %v7787_v6 = vunpack.c.l.b16 %v7508_v48  ;;  %v5669_v50 = vpack.c.b16 %v5638_v4, %v5637_v9  ;;  %v7517_v43 = vrot.slane %v6126_v21, 5  ;;  %v4913_v48 = vld [vmem:[#allocation2 + $0x18] sm:$0xe]  ;;  %v10527_v4 = vld [vmem:[#allocation2 + $0x20] sm:$0x1]  ;;  %v10414_v21 = vld [vmem:[%s14604_s3 + $0x270] sm:$0xff] }
 0x372   : > { %v4512_v38 = vadd.f32 %v4453_v11, %v3804_v59  ;;  %v3607_v2 = vpop.f32.mrf.mxu1  ;;  %v5243_v59 = vunpack.c.l.b16 %v4963_v29  ;;  %v4972_v44 = vrot.slane %v10527_v4, 5  ;;  %7087 = vmatpush.bf16.msrb.mxu3 %v10414_v21 }
 0x374   : > { %v13024_v54 = vadd.f32 %v12969_v51, %v4512_v38  ;;  %v13029_v16 = vpack.c.b16 %v5244_v0, %v5243_v59  ;;  %v13031_v51 = vpack.c.b16 %v7788_v1, %v7787_v6  ;;  %v4971_v0 = vrot.slane %v4969_v28, 4  ;;  %v10526_v1 = vld [vmem:[#allocation2 + $0x10] sm:$0xf] }
 0x375   : > { %v3805_v34 = vpop.f32.mrf.mxu2  ;;  %5162 = vmatmul.bf16.vlgmr.msra.gmra.mxu1 %v12215_v42  ;;  %v13027_v37 = vpop.f32.mrf.mxu0  ;;  %v5517_v6 = vrot.slane %v10526_v1, 5 }
 0x376   : > { %14824 = vst [vmem:[#allocation9_spill] sm:$0xff] %v13024_v54  ;;  %v3806_v22 = vadd.f32 %v3805_v34, %v3604_v60  ;;  %v7516_v60 = vrot.slane %v7514_v24, 4  ;;  %v4973_v1 = vsel %vm11159_vm7, %v4971_v0, %v4972_v44 }
 0x377   : > { %14825 = vst [vmem:[#allocation12_spill] sm:$0xff] %v13029_v16  ;;  %v5246_v30 = vunpack.c.l.b16 %v4973_v1 }
 0x378   : > { %14826 = vst [vmem:[#allocation24_spill] sm:$0xff] %v13031_v51 }
 0x379   : > { %v4455_v38 = vpop.f32.mrf.mxu3 }
 0x37a   : > { %v4513_v11 = vadd.f32 %v4455_v38, %v3806_v22  ;;  %5363 = vmatmul.bf16.vlgmr.msra.gmra.mxu2 %v13029_v16  ;;  %v3609_v29 = vpop.f32.mrf.mxu1  ;;  %v7518_v22 = vsel %vm11159_vm7, %v7516_v60, %v7517_v43  ;;  %v7458_v38 = vld [vmem:[#allocation2 + $0x24] sm:$0xe]  ;;  %v5445_v43 = vld [vmem:[#allocation2 + $0xc] sm:$0xe]  ;;  %v7523_v16 = vrot.slane %v7521_v33, 4 }
 0x37b   : > { %v10066_v4 = vrot.slane %v7458_v38, 9  ;;  %v7790_v38 = vunpack.c.l.b16 %v7518_v22  ;;  %v10422_v22 = vld [vmem:[%s14604_s3 + $0x2f0] sm:$0xff] }
 0x37c   : > { %v13035_v47 = vadd.f32 %v12988_v61, %v4513_v11  ;;  %v10398_v61 = vld [vmem:[%s14604_s3 + $0x70] sm:$0xff]  ;;  %v9586_v11 = vrot.slane %v4913_v48, 9  ;;  %7273 = vmatpush.bf16.msrb.mxu0 %v10422_v22 }
 0x37d   : > { %v3808_v34 = vpop.f32.mrf.mxu2  ;;  %v13037_v59 = vpop.f32.mrf.mxu0  ;;  %6933 = vmatpush.bf16.msrb.mxu2 %v10398_v61  ;;  %v10528_v48 = vld [vmem:[#allocation2 + $0x14] sm:$0x1] }
 0x37e   : > { %14827 = vst [vmem:[#allocation43_spill] sm:$0xff] %v13035_v47  ;;  %5757 = vmatmul.bf16.vlgmr.msra.gmra.mxu3 %v5669_v50  ;;  %v3809_v9 = vadd.f32 %v3808_v34, %v3607_v2  ;;  %v6129_v50 = vld [vmem:[#allocation2 + $0x38] sm:$0x1]  ;;  %v7459_v2 = vld [vmem:[#allocation2 + $0x30] sm:$0xe]  ;;  %v4970_v60 = vsel %vm11159_vm7, %v9586_v11, %v4969_v28  ;;  %v5519_v34 = vrot.slane %v5517_v6, 4 }
 0x37f   : > { %v5520_v54 = vrot.slane %v10528_v48, 5  ;;  %v10067_v0 = vrot.slane %v7459_v2, 9  ;;  %v7524_v44 = vrot.slane %v6129_v50, 5  ;;  %v5245_v42 = vunpack.c.l.b16 %v4970_v60 }
 0x380   : > { %5948 = vmatmul.bf16.gmra.mxu0 %v12226_v5  ;;  %v7515_v5 = vsel %vm11159_vm7, %v10066_v4, %v7514_v24  ;;  %v9698_v28 = vrot.slane %v5445_v43, 9 }
 0x381   : > { %v4458_v26 = vpop.f32.mrf.mxu3  ;;  %v7522_v1 = vsel %vm11159_vm7, %v10067_v0, %v7521_v33  ;;  %v7525_v24 = vsel %vm11159_vm7, %v7523_v16, %v7524_v44  ;;  %v13066_v2 = vpack.c.b16 %v5246_v30, %v5245_v42  ;;  %v6132_v33 = vld [vmem:[#allocation2 + $0x44] sm:$0x1]  ;;  %v10529_v42 = vld [vmem:[#allocation2 + $0x28] sm:$0xf]  ;;  %v7460_v44 = vld [vmem:[#allocation2 + $0x3c] sm:$0xe] }
 0x382   : > { %v4514_v51 = vadd.f32 %v4458_v26, %v3809_v9  ;;  %v3612_v47 = vpop.f32.mrf.mxu1  ;;  %v5521_v9 = vsel %vm11159_vm7, %v5519_v34, %v5520_v54  ;;  %v5518_v26 = vsel %vm11159_vm7, %v9698_v28, %v5517_v6  ;;  %v10406_v54 = vld [vmem:[%s14604_s3 + $0xf0] sm:$0xff]  ;;  %v7791_v16 = vunpack.c.l.b16 %v7522_v1 }
 0x383   : > { %14828 = vst [vmem:[#allocation20_spill] sm:$0xff] %v13066_v2  ;;  %v5640_v60 = vunpack.c.l.b16 %v5521_v9  ;;  %v4976_v30 = vrot.slane %v10529_v42, 5  ;;  %v5639_v6 = vunpack.c.l.b16 %v5518_v26  ;;  %6732 = vmatpush.bf16.msrb.mxu1 %v10406_v54  ;;  %v10068_v22 = vrot.slane %v7460_v44, 9  ;;  %v10532_v44 = vld [vmem:[#allocation2 + $0x20] sm:$0x1] }
 0x384   : > { %v13055_v61 = vadd.f32 %v13007_v53, %v4514_v51  ;;  %v6131_v53 = vld [vmem:[#allocation2 + $0x40] sm:$0xf]  ;;  %v7789_v51 = vunpack.c.l.b16 %v7515_v5 }
 0x385   : > { %v3810_v11 = vpop.f32.mrf.mxu2  ;;  %5167 = vmatmul.bf16.gmra.mxu1 %v12266_v52  ;;  %v13060_v21 = vpop.f32.mrf.mxu0  ;;  %v7528_v4 = vrot.slane %v6131_v53, 5  ;;  %v4978_v53 = vrot.slane %v4976_v30, 4 }
 0x386   : > { %v3811_v50 = vadd.f32 %v3810_v11, %v3609_v29  ;;  %v13076_v43 = vpack.c.b16 %v7790_v38, %v7789_v51  ;;  %v7792_v29 = vunpack.c.l.b16 %v7525_v24  ;;  %v7531_v11 = vrot.slane %v6132_v33, 5 }
 0x387   : > { %v7530_v28 = vrot.slane %v7528_v4, 4  ;;  %v5670_v38 = vpack.c.b16 %v5640_v60, %v5639_v6 }
 0x388   : > { %14829 = vst [vmem:[#allocation18_spill] sm:$0xff] %v13076_v43  ;;  %v13079_v0 = vpack.c.b16 %v7792_v29, %v7791_v16  ;;  %v4914_v16 = vld [vmem:[#allocation2 + $0x24] sm:$0xe]  ;;  %v10531_v29 = vld [vmem:[#allocation2 + $0x2c] sm:$0x1] }
 0x389   : > { %v4460_v34 = vpop.f32.mrf.mxu3  ;;  %v7532_v26 = vsel %vm11159_vm7, %v7530_v28, %v7531_v11  ;;  %v9587_v33 = vrot.slane %v4914_v16, 9  ;;  %v5446_v11 = vld [vmem:[#allocation2 + $0x18] sm:$0xe]  ;;  %v10547_v43 = vld [vmem:[#allocation2 + $0x5c] sm:$0x1] }
 0x38a   : > { %v4515_v48 = vadd.f32 %v4460_v34, %v3811_v50  ;;  %5368 = vmatmul.bf16.gmra.mxu2 %v13066_v2  ;;  %v3614_v5 = vpop.f32.mrf.mxu1  ;;  %14830 = vst [vmem:[#allocation21_spill] sm:$0xff] %v13079_v0  ;;  %v10530_v50 = vld [vmem:[#allocation2 + $0x1c] sm:$0xf]  ;;  %v4979_v34 = vrot.slane %v10531_v29, 5  ;;  %v7794_v6 = vunpack.c.l.b16 %v7532_v26  ;;  %v9699_v16 = vrot.slane %v5446_v11, 9 }
 0x38b   : > { %v5524_v51 = vrot.slane %v10530_v50, 5 }
 0x38c   : > { %v13082_v9 = vadd.f32 %v13027_v37, %v4515_v48  ;;  %v7529_v37 = vsel %vm11159_vm7, %v10068_v22, %v7528_v4  ;;  %v4980_v42 = vsel %vm11159_vm7, %v4978_v53, %v4979_v34 }
 0x38d   : > { %v3813_v1 = vpop.f32.mrf.mxu2  ;;  %v13084_v24 = vpop.f32.mrf.mxu0  ;;  %v5526_v48 = vrot.slane %v5524_v51, 4  ;;  %v5248_v4 = vunpack.c.l.b16 %v4980_v42 }
 0x38e   : > { %5762 = vmatmul.bf16.gmra.mxu3 %v5670_v38  ;;  %v3814_v54 = vadd.f32 %v3813_v1, %v3612_v47  ;;  %v4977_v47 = vsel %vm11159_vm7, %v9587_v33, %v4976_v30  ;;  %v5527_v38 = vrot.slane %v10532_v44, 5  ;;  %v7793_v1 = vunpack.c.l.b16 %v7529_v37  ;;  %v6135_v37 = vld [vmem:[#allocation2 + $0x50] sm:$0x1]  ;;  %v10533_v44 = vld [vmem:[#allocation2 + $0x34] sm:$0xf] }
 0x38f   : > { %v5247_v34 = vunpack.c.l.b16 %v4977_v47  ;;  %v4983_v0 = vrot.slane %v10533_v44, 5  ;;  %v7538_v47 = vrot.slane %v6135_v37, 5  ;;  %v4915_v37 = vld [vmem:[#allocation2 + $0x30] sm:$0xe]  ;;  %v10535_v44 = vld [vmem:[#allocation2 + $0x38] sm:$0x1] }
 0x390   : > { %5953 = vmatmul.bf16.gmra.mxu0 %v12350_v39  ;;  %v5528_v53 = vsel %vm11159_vm7, %v5526_v48, %v5527_v38  ;;  %v13103_v29 = vpack.c.b16 %v7794_v6, %v7793_v1 }
 0x391   : > { %v4463_v60 = vpop.f32.mrf.mxu3  ;;  %v13107_v33 = vpack.c.b16 %v5248_v4, %v5247_v34  ;;  %v5642_v42 = vunpack.c.l.b16 %v5528_v53  ;;  %v10534_v34 = vld [vmem:[#allocation2 + $0x28] sm:$0xf] }
 0x392   : > { %v4516_v50 = vadd.f32 %v4463_v60, %v3814_v54  ;;  %v3617_v28 = vpop.f32.mrf.mxu1  ;;  %v6134_v54 = vld [vmem:[#allocation2 + $0x4c] sm:$0xf]  ;;  %14831 = vst [vmem:[#allocation7_spill] sm:$0xff] %v13103_v29  ;;  %v7461_v60 = vld [vmem:[#allocation2 + $0x48] sm:$0xe] }
 0x393   : > { %14832 = vst [vmem:[#allocation47_spill] sm:$0xff] %v13107_v33  ;;  %v10069_v48 = vrot.slane %v7461_v60, 9  ;;  %v5531_v60 = vrot.slane %v10534_v34, 5  ;;  %v10536_v34 = vld [vmem:[#allocation2 + $0x2c] sm:$0x1] }
 0x394   : > { %v13096_v39 = vadd.f32 %v13037_v59, %v4516_v50  ;;  %v5525_v59 = vsel %vm11159_vm7, %v9699_v16, %v5524_v51  ;;  %v7535_v50 = vrot.slane %v6134_v54, 5 }
 0x395   : > { %v3815_v22 = vpop.f32.mrf.mxu2  ;;  %5172 = vmatmul.bf16.gmra.mxu1 %v12348_v49  ;;  %v13101_v26 = vpop.f32.mrf.mxu0  ;;  %v5641_v6 = vunpack.c.l.b16 %v5525_v59 }
 0x396   : > { %v3816_v30 = vadd.f32 %v3815_v22, %v3614_v5  ;;  %v7537_v5 = vrot.slane %v7535_v50, 4  ;;  %v7536_v22 = vsel %vm11159_vm7, %v10069_v48, %v7535_v50  ;;  %v10397_v50 = vld [vmem:[%s14604_s3 + $0x68] sm:$0xff]  ;;  %v4986_v48 = vrot.slane %v10535_v44, 5 }
 0x397   : > { %v5671_v4 = vpack.c.b16 %v5642_v42, %v5641_v6  ;;  %v7795_v42 = vunpack.c.l.b16 %v7536_v22  ;;  %6934 = vmatpush.bf16.msrb.mxu2 %v10397_v50  ;;  %v5534_v44 = vrot.slane %v10536_v34, 5 }
 0x398   : > { %v7539_v16 = vsel %vm11159_vm7, %v7537_v5, %v7538_v47  ;;  %v9588_v5 = vrot.slane %v4915_v37, 9  ;;  %v5533_v47 = vrot.slane %v5531_v60, 4 }
 0x399   : > { %v4465_v11 = vpop.f32.mrf.mxu3  ;;  %v7796_v59 = vunpack.c.l.b16 %v7539_v16 }
 0x39a   : > { %v4517_v38 = vadd.f32 %v4465_v11, %v3816_v30  ;;  %5373 = vmatmul.bf16.gmra.mxu2 %v13107_v33  ;;  %v3619_v1 = vpop.f32.mrf.mxu1  ;;  %v4985_v30 = vrot.slane %v4983_v0, 4  ;;  %v4984_v22 = vsel %vm11159_vm7, %v9588_v5, %v4983_v0  ;;  %v6138_v5 = vld [vmem:[#allocation2 + $0x5c] sm:$0x1]  ;;  %v10539_v33 = vld [vmem:[#allocation2 + $0x44] sm:$0x1] }
 0x39c   : > { %v13113_v51 = vadd.f32 %v13060_v21, %v4517_v38  ;;  %v10413_v21 = vld [vmem:[%s14604_s3 + $0x268] sm:$0xff]  ;;  %v13126_v38 = vpack.c.b16 %v7796_v59, %v7795_v42 }
 0x39d   : > { %v3818_v53 = vpop.f32.mrf.mxu2  ;;  %v13117_v54 = vpop.f32.mrf.mxu0  ;;  %7088 = vmatpush.bf16.msrb.mxu3 %v10413_v21 }
 0x39e   : > { %5767 = vmatmul.bf16.gmra.mxu3 %v5671_v4  ;;  %v3819_v11 = vadd.f32 %v3818_v53, %v3617_v28  ;;  %14833 = vst [vmem:[#allocation41_spill] sm:$0xff] %v13126_v38  ;;  %v4987_v28 = vsel %vm11159_vm7, %v4985_v30, %v4986_v48  ;;  %v5447_v53 = vld [vmem:[#allocation2 + $0x24] sm:$0xe]  ;;  %v5535_v30 = vsel %vm11159_vm7, %v5533_v47, %v5534_v44  ;;  %v5249_v48 = vunpack.c.l.b16 %v4984_v22  ;;  %v10421_v47 = vld [vmem:[%s14604_s3 + $0x2e8] sm:$0xff] }
 0x39f   : > { %v5250_v59 = vunpack.c.l.b16 %v4987_v28  ;;  %v9700_v37 = vrot.slane %v5447_v53, 9  ;;  %v5644_v28 = vunpack.c.l.b16 %v5535_v30  ;;  %v7545_v30 = vrot.slane %v6138_v5, 5  ;;  %7274 = vmatpush.bf16.msrb.mxu0 %v10421_v47  ;;  %v4916_v47 = vld [vmem:[#allocation2 + $0x3c] sm:$0xe] }
 0x3a0   : > { %5958 = vmatmul.bf16.gmra.mxu0 %v12406_v31 }
 0x3a1   : > { %v4468_v6 = vpop.f32.mrf.mxu3  ;;  %v5532_v0 = vsel %vm11159_vm7, %v9700_v37, %v5531_v60 }
 0x3a2   : > { %v4518_v4 = vadd.f32 %v4468_v6, %v3819_v11  ;;  %v3622_v16 = vpop.f32.mrf.mxu1  ;;  %v6137_v11 = vld [vmem:[#allocation2 + $0x58] sm:$0xf]  ;;  %v7462_v6 = vld [vmem:[#allocation2 + $0x54] sm:$0xe]  ;;  %v5643_v60 = vunpack.c.l.b16 %v5532_v0 }
 0x3a3   : > { %v7542_v53 = vrot.slane %v6137_v11, 5  ;;  %v10070_v44 = vrot.slane %v7462_v6, 9  ;;  %v10538_v0 = vld [vmem:[#allocation2 + $0x34] sm:$0xf] }
 0x3a4   : > { %v13133_v31 = vadd.f32 %v13084_v24, %v4518_v4  ;;  %v13142_v24 = vpack.c.b16 %v5250_v59, %v5249_v48  ;;  %v10405_v4 = vld [vmem:[%s14604_s3 + $0xe8] sm:$0xff]  ;;  %v5672_v11 = vpack.c.b16 %v5644_v28, %v5643_v60 }
 0x3a5   : > { %v3820_v50 = vpop.f32.mrf.mxu2  ;;  %5177 = vmatmul.bf16.gmra.mxu1 %v12397_v8  ;;  %v13138_v21 = vpop.f32.mrf.mxu0  ;;  %v7544_v37 = vrot.slane %v7542_v53, 4  ;;  %v7543_v48 = vsel %vm11159_vm7, %v10070_v44, %v7542_v53  ;;  %v4993_v53 = vrot.slane %v10539_v33, 5  ;;  %v9589_v44 = vrot.slane %v4916_v47, 9 }
 0x3a6   : > { %v3821_v42 = vadd.f32 %v3820_v50, %v3619_v1  ;;  %14834 = vst [vmem:[#allocation44_spill] sm:$0xff] %v13142_v24  ;;  %v10537_v1 = vld [vmem:[#allocation2 + $0x40] sm:$0xf]  ;;  %6733 = vmatpush.bf16.msrb.mxu1 %v10405_v4  ;;  %v7797_v29 = vunpack.c.l.b16 %v7543_v48 }
 0x3a7   : > { %v4990_v22 = vrot.slane %v10537_v1, 5  ;;  %v7546_v1 = vsel %vm11159_vm7, %v7544_v37, %v7545_v30 }
 0x3a8   : > { %v7798_v4 = vunpack.c.l.b16 %v7546_v1 }
 0x3a9   : > { %v4470_v34 = vpop.f32.mrf.mxu3 }
 0x3aa   : > { %v4519_v50 = vadd.f32 %v4470_v34, %v3821_v42  ;;  %5378 = vmatmul.bf16.gmra.mxu2 %v13142_v24  ;;  %v3624_v59 = vpop.f32.mrf.mxu1  ;;  %v4992_v34 = vrot.slane %v4990_v22, 4  ;;  %v5538_v24 = vrot.slane %v10538_v0, 5  ;;  %v5448_v0 = vld [vmem:[#allocation2 + $0x30] sm:$0xe] }
 0x3ab   : > { %v9701_v1 = vrot.slane %v5448_v0, 9 }
 0x3ac   : > { %v13154_v38 = vadd.f32 %v13101_v26, %v4519_v50  ;;  %v13161_v26 = vpack.c.b16 %v7798_v4, %v7797_v29  ;;  %v4994_v50 = vsel %vm11159_vm7, %v4992_v34, %v4993_v53  ;;  %v5540_v60 = vrot.slane %v5538_v24, 4  ;;  %v6140_v4 = vld [vmem:[#allocation2 + $0x64] sm:$0xf]  ;;  %v7463_v53 = vld [vmem:[#allocation2 + $0x60] sm:$0xe] }
 0x3ad   : > { %v3823_v6 = vpop.f32.mrf.mxu2  ;;  %v13158_v42 = vpop.f32.mrf.mxu0 }
 0x3ae   : > { %5772 = vmatmul.bf16.gmra.mxu3 %v5672_v11  ;;  %v3824_v5 = vadd.f32 %v3823_v6, %v3622_v16  ;;  %14835 = vst [vmem:[#allocation42_spill] sm:$0xff] %v13161_v26  ;;  %v4991_v16 = vsel %vm11159_vm7, %v9589_v44, %v4990_v22  ;;  %v10540_v11 = vld [vmem:[#allocation2 + $0x38] sm:$0x1]  ;;  %v5539_v22 = vsel %vm11159_vm7, %v9701_v1, %v5538_v24  ;;  %v10071_v26 = vrot.slane %v7463_v53, 9 }
 0x3af   : > { %v5541_v48 = vrot.slane %v10540_v11, 5  ;;  %v5251_v47 = vunpack.c.l.b16 %v4991_v16  ;;  %v10541_v11 = vld [vmem:[#allocation2 + $0x4c] sm:$0xf] }
 0x3b0   : > { %5963 = vmatmul.bf16.gmra.mxu0 %v12480_v3  ;;  %v5252_v3 = vunpack.c.l.b16 %v4994_v50  ;;  %v7549_v50 = vrot.slane %v6140_v4, 5  ;;  %v4997_v0 = vrot.slane %v10541_v11, 5 }
 0x3b1   : > { %v4473_v28 = vpop.f32.mrf.mxu3  ;;  %v5542_v6 = vsel %vm11159_vm7, %v5540_v60, %v5541_v48  ;;  %v5645_v60 = vunpack.c.l.b16 %v5539_v22 }
 0x3b2   : > { %v4520_v37 = vadd.f32 %v4473_v28, %v3824_v5  ;;  %v3627_v30 = vpop.f32.mrf.mxu1  ;;  %v6141_v28 = vld [vmem:[#allocation2 + $0x68] sm:$0x1]  ;;  %v5646_v44 = vunpack.c.l.b16 %v5542_v6 }
 0x3b3   : > { %v7552_v16 = vrot.slane %v6141_v28, 5  ;;  %v4917_v28 = vld [vmem:[#allocation2 + $0x48] sm:$0xe] }
 0x3b4   : > { %v13168_v33 = vadd.f32 %v13117_v54, %v4520_v37  ;;  %v13177_v54 = vpack.c.b16 %v5252_v3, %v5251_v47  ;;  %v5673_v3 = vpack.c.b16 %v5646_v44, %v5645_v60  ;;  %v10542_v47 = vld [vmem:[#allocation2 + $0x40] sm:$0xf]  ;;  %v10543_v44 = vld [vmem:[#allocation2 + $0x50] sm:$0x1] }
 0x3b5   : > { %v3825_v29 = vpop.f32.mrf.mxu2  ;;  %5182 = vmatmul.bf16.gmra.mxu1 %v12478_v57  ;;  %v13173_v34 = vpop.f32.mrf.mxu0  ;;  %v5545_v53 = vrot.slane %v10542_v47, 5  ;;  %v10544_v47 = vld [vmem:[#allocation2 + $0x44] sm:$0x1] }
 0x3b6   : > { %v3826_v5 = vadd.f32 %v3825_v29, %v3624_v59  ;;  %14836 = vst [vmem:[#allocation10_spill] sm:$0xff] %v13177_v54  ;;  %v7551_v59 = vrot.slane %v7549_v50, 4  ;;  %v7550_v29 = vsel %vm11159_vm7, %v10071_v26, %v7549_v50  ;;  %v10396_v26 = vld [vmem:[%s14604_s3 + $0x60] sm:$0xff]  ;;  %v5000_v50 = vrot.slane %v10543_v44, 5 }
 0x3b7   : > { %6935 = vmatpush.bf16.msrb.mxu2 %v10396_v26  ;;  %v5548_v44 = vrot.slane %v10544_v47, 5 }
 0x3b8   : > { %v7553_v1 = vsel %vm11159_vm7, %v7551_v59, %v7552_v16  ;;  %v9590_v59 = vrot.slane %v4917_v28, 9  ;;  %v5547_v16 = vrot.slane %v5545_v53, 4 }
 0x3b9   : > { %v4475_v37 = vpop.f32.mrf.mxu3  ;;  %v7800_v22 = vunpack.c.l.b16 %v7553_v1 }
 0x3ba   : > { %v4521_v2 = vadd.f32 %v4475_v37, %v3826_v5  ;;  %5383 = vmatmul.bf16.gmra.mxu2 %v13177_v54  ;;  %v3629_v48 = vpop.f32.mrf.mxu1  ;;  %v4999_v5 = vrot.slane %v4997_v0, 4 }
 0x3bc   : > { %v13183_v24 = vadd.f32 %v13138_v21, %v4521_v2  ;;  %v10412_v2 = vld [vmem:[%s14604_s3 + $0x260] sm:$0xff]  ;;  %v7799_v21 = vunpack.c.l.b16 %v7550_v29  ;;  %v4998_v29 = vsel %vm11159_vm7, %v9590_v59, %v4997_v0  ;;  %v6144_v59 = vld [vmem:[#allocation2 + $0x74] sm:$0x1] }
 0x3bd   : > { %v3828_v6 = vpop.f32.mrf.mxu2  ;;  %v13187_v4 = vpop.f32.mrf.mxu0  ;;  %7089 = vmatpush.bf16.msrb.mxu3 %v10412_v2 }
 0x3be   : > { %5777 = vmatmul.bf16.gmra.mxu3 %v5673_v3  ;;  %v3829_v37 = vadd.f32 %v3828_v6, %v3627_v30  ;;  %v13196_v11 = vpack.c.b16 %v7800_v22, %v7799_v21  ;;  %v5001_v30 = vsel %vm11159_vm7, %v4999_v5, %v5000_v50  ;;  %v5449_v6 = vld [vmem:[#allocation2 + $0x3c] sm:$0xe]  ;;  %v5549_v5 = vsel %vm11159_vm7, %v5547_v16, %v5548_v44  ;;  %v10420_v16 = vld [vmem:[%s14604_s3 + $0x2e0] sm:$0xff] }
 0x3bf   : > { %v5254_v22 = vunpack.c.l.b16 %v5001_v30  ;;  %v9702_v28 = vrot.slane %v5449_v6, 9  ;;  %v5253_v50 = vunpack.c.l.b16 %v4998_v29  ;;  %v5648_v30 = vunpack.c.l.b16 %v5549_v5  ;;  %7275 = vmatpush.bf16.msrb.mxu0 %v10420_v16  ;;  %v4918_v16 = vld [vmem:[#allocation2 + $0x54] sm:$0xe] }
 0x3c0   : > { %5968 = vmatmul.bf16.gmra.mxu0 %v12539_v40  ;;  %14837 = vst [vmem:[#allocation45_spill] sm:$0xff] %v13196_v11  ;;  %v7559_v5 = vrot.slane %v6144_v59, 5 }
 0x3c1   : > { %v4478_v60 = vpop.f32.mrf.mxu3  ;;  %v5546_v0 = vsel %vm11159_vm7, %v9702_v28, %v5545_v53 }
 0x3c2   : > { %v4522_v3 = vadd.f32 %v4478_v60, %v3829_v37  ;;  %v3632_v1 = vpop.f32.mrf.mxu1  ;;  %v6143_v37 = vld [vmem:[#allocation2 + $0x70] sm:$0xf]  ;;  %v7464_v60 = vld [vmem:[#allocation2 + $0x6c] sm:$0xe]  ;;  %v5647_v53 = vunpack.c.l.b16 %v5546_v0 }
 0x3c3   : > { %v7556_v6 = vrot.slane %v6143_v37, 5  ;;  %v10072_v44 = vrot.slane %v7464_v60, 9  ;;  %v10546_v0 = vld [vmem:[#allocation2 + $0x4c] sm:$0xf] }
 0x3c4   : > { %v13203_v40 = vadd.f32 %v13158_v42, %v4522_v3  ;;  %v13212_v42 = vpack.c.b16 %v5254_v22, %v5253_v50  ;;  %v10404_v3 = vld [vmem:[%s14604_s3 + $0xe0] sm:$0xff]  ;;  %v5674_v37 = vpack.c.b16 %v5648_v30, %v5647_v53 }
 0x3c5   : > { %v3830_v26 = vpop.f32.mrf.mxu2  ;;  %5187 = vmatmul.bf16.gmra.mxu1 %v12537_v20  ;;  %v13208_v2 = vpop.f32.mrf.mxu0  ;;  %v7558_v28 = vrot.slane %v7556_v6, 4  ;;  %v7557_v50 = vsel %vm11159_vm7, %v10072_v44, %v7556_v6  ;;  %v5007_v6 = vrot.slane %v10547_v43, 5  ;;  %v9591_v44 = vrot.slane %v4918_v16, 9 }
 0x3c6   : > { %v3831_v21 = vadd.f32 %v3830_v26, %v3629_v48  ;;  %14838 = vst [vmem:[#allocation46_spill] sm:$0xff] %v13212_v42  ;;  %v10545_v48 = vld [vmem:[#allocation2 + $0x58] sm:$0xf]  ;;  %6734 = vmatpush.bf16.msrb.mxu1 %v10404_v3  ;;  %v7801_v54 = vunpack.c.l.b16 %v7557_v50 }
 0x3c7   : > { %v5004_v29 = vrot.slane %v10545_v48, 5  ;;  %v7560_v48 = vsel %vm11159_vm7, %v7558_v28, %v7559_v5 }
 0x3c8   : > { %v7802_v3 = vunpack.c.l.b16 %v7560_v48 }
 0x3c9   : > { %v4480_v47 = vpop.f32.mrf.mxu3 }
 0x3ca   : > { %v4523_v26 = vadd.f32 %v4480_v47, %v3831_v21  ;;  %5388 = vmatmul.bf16.gmra.mxu2 %v13212_v42  ;;  %v3634_v22 = vpop.f32.mrf.mxu1  ;;  %v5006_v47 = vrot.slane %v5004_v29, 4  ;;  %v5552_v42 = vrot.slane %v10546_v0, 5  ;;  %v5450_v0 = vld [vmem:[#allocation2 + $0x48] sm:$0xe] }
 0x3cb   : > { %v9703_v48 = vrot.slane %v5450_v0, 9 }
 0x3cc   : > { %v13224_v11 = vadd.f32 %v13173_v34, %v4523_v26  ;;  %v13231_v34 = vpack.c.b16 %v7802_v3, %v7801_v54  ;;  %v5008_v26 = vsel %vm11159_vm7, %v5006_v47, %v5007_v6  ;;  %v5554_v53 = vrot.slane %v5552_v42, 4  ;;  %v6146_v3 = vld [vmem:[#allocation2 + $0x7c] sm:$0xf]  ;;  %v7465_v6 = vld [vmem:[#allocation2 + $0x78] sm:$0xe] }
 0x3cd   : > { %v3833_v60 = vpop.f32.mrf.mxu2  ;;  %v13228_v21 = vpop.f32.mrf.mxu0 }
 0x3ce   : > { %14839 = vst [vmem:[#allocation19_spill] sm:$0xff] %v13224_v11  ;;  %5782 = vmatmul.bf16.gmra.mxu3 %v5674_v37  ;;  %v3834_v59 = vadd.f32 %v3833_v60, %v3632_v1  ;;  %v5005_v1 = vsel %vm11159_vm7, %v9591_v44, %v5004_v29  ;;  %v10548_v37 = vld [vmem:[#allocation2 + $0x50] sm:$0x1]  ;;  %v5553_v29 = vsel %vm11159_vm7, %v9703_v48, %v5552_v42 }
 0x3cf   : > { %14840 = vst [vmem:[#allocation14_spill] sm:$0xff] %v13231_v34  ;;  %v5555_v50 = vrot.slane %v10548_v37, 5  ;;  %v5255_v16 = vunpack.c.l.b16 %v5005_v1  ;;  %v10549_v37 = vld [vmem:[#allocation2 + $0x64] sm:$0xf]  ;;  %v10073_v34 = vrot.slane %v7465_v6, 9 }
 0x3d0   : > { %5973 = vmatmul.bf16.gmra.mxu0 %v12618_v46  ;;  %v5256_v46 = vunpack.c.l.b16 %v5008_v26  ;;  %v7563_v26 = vrot.slane %v6146_v3, 5  ;;  %v5011_v0 = vrot.slane %v10549_v37, 5 }
 0x3d1   : > { %v4483_v30 = vpop.f32.mrf.mxu3  ;;  %v5556_v60 = vsel %vm11159_vm7, %v5554_v53, %v5555_v50  ;;  %v5649_v53 = vunpack.c.l.b16 %v5553_v29 }
 0x3d2   : > { %v4524_v28 = vadd.f32 %v4483_v30, %v3834_v59  ;;  %v3637_v5 = vpop.f32.mrf.mxu1  ;;  %v6147_v30 = vld [vmem:[#allocation2 + $0x80] sm:$0x1]  ;;  %v5650_v44 = vunpack.c.l.b16 %v5556_v60 }
 0x3d3   : > { %v7566_v1 = vrot.slane %v6147_v30, 5  ;;  %v4919_v30 = vld [vmem:[#allocation2 + $0x60] sm:$0xe] }
 0x3d4   : > { %v13238_v43 = vadd.f32 %v13187_v4, %v4524_v28  ;;  %v13247_v4 = vpack.c.b16 %v5256_v46, %v5255_v16  ;;  %v5675_v46 = vpack.c.b16 %v5650_v44, %v5649_v53  ;;  %v10550_v16 = vld [vmem:[#allocation2 + $0x58] sm:$0xf]  ;;  %v10551_v44 = vld [vmem:[#allocation2 + $0x68] sm:$0x1] }
 0x3d5   : > { %v3835_v54 = vpop.f32.mrf.mxu2  ;;  %5192 = vmatmul.bf16.gmra.mxu1 %v12600_v55  ;;  %v13243_v47 = vpop.f32.mrf.mxu0  ;;  %v5559_v6 = vrot.slane %v10550_v16, 5  ;;  %v10552_v16 = vld [vmem:[#allocation2 + $0x5c] sm:$0x1] }
 0x3d6   : > { %v3836_v59 = vadd.f32 %v3835_v54, %v3634_v22  ;;  %14841 = vst [vmem:[#allocation22_spill] sm:$0xff] %v13247_v4  ;;  %v7565_v22 = vrot.slane %v7563_v26, 4  ;;  %v7564_v54 = vsel %vm11159_vm7, %v10073_v34, %v7563_v26  ;;  %v10395_v34 = vld [vmem:[%s14604_s3 + $0x58] sm:$0xff]  ;;  %v5014_v26 = vrot.slane %v10551_v44, 5 }
 0x3d7   : > { %6936 = vmatpush.bf16.msrb.mxu2 %v10395_v34  ;;  %v5562_v44 = vrot.slane %v10552_v16, 5 }
 0x3d8   : > { %v7567_v48 = vsel %vm11159_vm7, %v7565_v22, %v7566_v1  ;;  %v9592_v22 = vrot.slane %v4919_v30, 9  ;;  %v5561_v1 = vrot.slane %v5559_v6, 4  ;;  %v10403_v30 = vld [vmem:[%s14604_s3 + $0xd8] sm:$0xff] }
 0x3d9   : > { %v4485_v28 = vpop.f32.mrf.mxu3  ;;  %v7804_v29 = vunpack.c.l.b16 %v7567_v48  ;;  %6735 = vmatpush.bf16.msrb.mxu1 %v10403_v30 }
 0x3da   : > { %v4525_v11 = vadd.f32 %v4485_v28, %v3836_v59  ;;  %5393 = vmatmul.bf16.gmra.mxu2 %v13247_v4  ;;  %v3639_v50 = vpop.f32.mrf.mxu1  ;;  %v5013_v59 = vrot.slane %v5011_v0, 4  ;;  %v10553_v4 = vld [vmem:[#allocation2 + $0x70] sm:$0xf] }
 0x3dc   : > { %v13253_v42 = vadd.f32 %v13208_v2, %v4525_v11  ;;  %v10411_v11 = vld [vmem:[%s14604_s3 + $0x258] sm:$0xff]  ;;  %v7803_v2 = vunpack.c.l.b16 %v7564_v54  ;;  %v5012_v54 = vsel %vm11159_vm7, %v9592_v22, %v5011_v0  ;;  %v5563_v0 = vsel %vm11159_vm7, %v5561_v1, %v5562_v44 }
 0x3dd   : > { %v3838_v60 = vpop.f32.mrf.mxu2  ;;  %v13257_v3 = vpop.f32.mrf.mxu0  ;;  %7090 = vmatpush.bf16.msrb.mxu3 %v10411_v11  ;;  %v5652_v16 = vunpack.c.l.b16 %v5563_v0 }
 0x3de   : > { %14842 = vst [vmem:[#allocation31_spill] sm:$0xff] %v13253_v42  ;;  %5787 = vmatmul.bf16.gmra.mxu3 %v5675_v46  ;;  %v3839_v28 = vadd.f32 %v3838_v60, %v3637_v5  ;;  %v13266_v37 = vpack.c.b16 %v7804_v29, %v7803_v2  ;;  %v5015_v5 = vsel %vm11159_vm7, %v5013_v59, %v5014_v26  ;;  %v5451_v60 = vld [vmem:[#allocation2 + $0x54] sm:$0xe]  ;;  %v10419_v59 = vld [vmem:[%s14604_s3 + $0x2d8] sm:$0xff]  ;;  %v5257_v26 = vunpack.c.l.b16 %v5012_v54 }
 0x3df   : > { %v5258_v29 = vunpack.c.l.b16 %v5015_v5  ;;  %v9704_v34 = vrot.slane %v5451_v60, 9  ;;  %7276 = vmatpush.bf16.msrb.mxu0 %v10419_v59  ;;  %v6150_v5 = vld [vmem:[#allocation2 + $0x8c] sm:$0x1] }
 0x3e0   : > { %5978 = vmatmul.bf16.gmra.mxu0 %v12665_v63  ;;  %14843 = vst [vmem:[#allocation38_spill] sm:$0xff] %v13266_v37  ;;  %v7573_v59 = vrot.slane %v6150_v5, 5  ;;  %v4920_v5 = vld [vmem:[#allocation2 + $0x6c] sm:$0xe] }
 0x3e1   : > { %v4488_v53 = vpop.f32.mrf.mxu3  ;;  %v5560_v22 = vsel %vm11159_vm7, %v9704_v34, %v5559_v6  ;;  %v10554_v34 = vld [vmem:[#allocation2 + $0x64] sm:$0xf] }
 0x3e2   : > { %v4526_v46 = vadd.f32 %v4488_v53, %v3839_v28  ;;  %v3642_v48 = vpop.f32.mrf.mxu1  ;;  %v7466_v53 = vld [vmem:[#allocation2 + $0x84] sm:$0xe]  ;;  %v5566_v0 = vrot.slane %v10554_v34, 5 }
 0x3e3   : > { %v10074_v1 = vrot.slane %v7466_v53, 9 }
 0x3e4   : > { %v13273_v63 = vadd.f32 %v13228_v21, %v4526_v46  ;;  %v6149_v21 = vld [vmem:[#allocation2 + $0x88] sm:$0xf]  ;;  %v13288_v46 = vpack.c.b16 %v5258_v29, %v5257_v26 }
 0x3e5   : > { %v3840_v28 = vpop.f32.mrf.mxu2  ;;  %5197 = vmatmul.bf16.gmra.mxu1 %v12653_v36  ;;  %v13284_v11 = vpop.f32.mrf.mxu0  ;;  %v7570_v37 = vrot.slane %v6149_v21, 5 }
 0x3e6   : > { %14844 = vst [vmem:[#allocation28_spill] sm:$0xff] %v13273_v63  ;;  %v3841_v2 = vadd.f32 %v3840_v28, %v3639_v50  ;;  %v5018_v63 = vrot.slane %v10553_v4, 5  ;;  %v5651_v50 = vunpack.c.l.b16 %v5560_v22 }
 0x3e7   : > { %14845 = vst [vmem:[#allocation26_spill] sm:$0xff] %v13288_v46  ;;  %v7572_v30 = vrot.slane %v7570_v37, 4  ;;  %v7571_v28 = vsel %vm11159_vm7, %v10074_v1, %v7570_v37  ;;  %v5568_v1 = vrot.slane %v5566_v0, 4 }
 0x3e8   : > { %v5676_v29 = vpack.c.b16 %v5652_v16, %v5651_v50  ;;  %v5020_v26 = vrot.slane %v5018_v63, 4 }
 0x3e9   : > { %v4490_v60 = vpop.f32.mrf.mxu3  ;;  %v7574_v4 = vsel %vm11159_vm7, %v7572_v30, %v7573_v59  ;;  %v5452_v30 = vld [vmem:[#allocation2 + $0x60] sm:$0xe] }
 0x3ea   : > { %v4527_v44 = vadd.f32 %v4490_v60, %v3841_v2  ;;  %5398 = vmatmul.bf16.gmra.mxu2 %v13288_v46  ;;  %v3644_v54 = vpop.f32.mrf.mxu1  ;;  %v7806_v53 = vunpack.c.l.b16 %v7574_v4  ;;  %v7805_v60 = vunpack.c.l.b16 %v7571_v28  ;;  %v10555_v46 = vld [vmem:[#allocation2 + $0x74] sm:$0x1]  ;;  %v10556_v4 = vld [vmem:[#allocation2 + $0x68] sm:$0x1] }
 0x3eb   : > { %v5021_v37 = vrot.slane %v10555_v46, 5 }
 0x3ec   : > { %v13294_v6 = vadd.f32 %v13243_v47, %v4527_v44  ;;  %v13301_v47 = vpack.c.b16 %v7806_v53, %v7805_v60  ;;  %v9593_v44 = vrot.slane %v4920_v5, 9 }
 0x3ed   : > { %v3843_v21 = vpop.f32.mrf.mxu2  ;;  %v13298_v2 = vpop.f32.mrf.mxu0  ;;  %v5022_v50 = vsel %vm11159_vm7, %v5020_v26, %v5021_v37 }
 0x3ee   : > { %14846 = vst [vmem:[#allocation48_spill] sm:$0xff] %v13294_v6  ;;  %5792 = vmatmul.bf16.gmra.mxu3 %v5676_v29  ;;  %v3844_v22 = vadd.f32 %v3843_v21, %v3642_v48  ;;  %v5569_v29 = vrot.slane %v10556_v4, 5  ;;  %v5019_v48 = vsel %vm11159_vm7, %v9593_v44, %v5018_v63  ;;  %v5260_v28 = vunpack.c.l.b16 %v5022_v50  ;;  %v7467_v63 = vld [vmem:[#allocation2 + $0x90] sm:$0xe]  ;;  %v10557_v50 = vld [vmem:[#allocation2 + $0x7c] sm:$0xf] }
 0x3ef   : > { %14847 = vst [vmem:[#allocation49_spill] sm:$0xff] %v13301_v47  ;;  %v5259_v60 = vunpack.c.l.b16 %v5019_v48 }
 0x3f0   : > { %5983 = vmatmul.bf16.gmra.mxu0 %v12730_v45  ;;  %v9705_v45 = vrot.slane %v5452_v30, 9  ;;  %v5570_v21 = vsel %vm11159_vm7, %v5568_v1, %v5569_v29  ;;  %v5025_v30 = vrot.slane %v10557_v50, 5  ;;  %v10075_v29 = vrot.slane %v7467_v63, 9  ;;  %v4921_v63 = vld [vmem:[#allocation2 + $0x78] sm:$0xe] }
 0x3f1   : > { %v4493_v16 = vpop.f32.mrf.mxu3  ;;  %v13317_v44 = vpack.c.b16 %v5260_v28, %v5259_v60 }
 0x3f2   : > { %v4528_v59 = vadd.f32 %v4493_v16, %v3844_v22  ;;  %v5163_v34 = vpop.f32.mrf.mxu1  ;;  %v6152_v22 = vld [vmem:[#allocation2 + $0x94] sm:$0xf]  ;;  %v5567_v37 = vsel %vm11159_vm7, %v9705_v45, %v5566_v0  ;;  %v5654_v16 = vunpack.c.l.b16 %v5570_v21  ;;  %v5027_v28 = vrot.slane %v5025_v30, 4  ;;  %v10558_v21 = vld [vmem:[#allocation2 + $0x70] sm:$0xf] }
 0x3f3   : > { %14849 = vst [vmem:[#allocation51_spill] sm:$0xff] %v13317_v44  ;;  %v5653_v4 = vunpack.c.l.b16 %v5567_v37  ;;  %v5573_v60 = vrot.slane %v10558_v21, 5 }
 0x3f4   : > { %v13308_v46 = vadd.f32 %v13257_v3, %v4528_v59  ;;  %v6153_v3 = vld [vmem:[#allocation2 + $0x98] sm:$0x1]  ;;  %v7577_v59 = vrot.slane %v6152_v22, 5 }
 0x3f5   : > { %v3845_v53 = vpop.f32.mrf.mxu2  ;;  %5202 = vmatmul.bf16.gmra.mxu1 %v12705_v17  ;;  %v13313_v26 = vpop.f32.mrf.mxu0  ;;  %v7580_v48 = vrot.slane %v6153_v3, 5 }
 0x3f6   : > { %14848 = vst [vmem:[#allocation50_spill] sm:$0xff] %v13308_v46  ;;  %v3846_v5 = vadd.f32 %v3845_v53, %v3644_v54  ;;  %v7579_v54 = vrot.slane %v7577_v59, 4  ;;  %v5677_v53 = vpack.c.b16 %v5654_v16, %v5653_v4  ;;  %v7578_v0 = vsel %vm11159_vm7, %v10075_v29, %v7577_v59  ;;  %v10559_v16 = vld [vmem:[#allocation2 + $0x80] sm:$0x1] }
 0x3f7   : > { %v7807_v59 = vunpack.c.l.b16 %v7578_v0  ;;  %v9594_v4 = vrot.slane %v4921_v63, 9  ;;  %v6155_v63 = vld [vmem:[#allocation2 + $0xa0] sm:$0xf] }
 0x3f8   : > { %v7581_v22 = vsel %vm11159_vm7, %v7579_v54, %v7580_v48  ;;  %v5575_v54 = vrot.slane %v5573_v60, 4 }
 0x3f9   : > { %v4495_v1 = vpop.f32.mrf.mxu3  ;;  %v7808_v50 = vunpack.c.l.b16 %v7581_v22  ;;  %v5026_v22 = vsel %vm11159_vm7, %v9594_v4, %v5025_v30  ;;  %v10402_v30 = vld [vmem:[%s14604_s3 + $0xd0] sm:$0xff]  ;;  %v6156_v4 = vld [vmem:[#allocation2 + $0xa4] sm:$0x1] }
 0x3fa   : > { %v4529_v47 = vadd.f32 %v4495_v1, %v3846_v5  ;;  %5403 = vmatmul.bf16.gmra.mxu2 %v13317_v44  ;;  %v5165_v46 = vpop.f32.mrf.mxu1  ;;  %v5028_v1 = vrot.slane %v10559_v16, 5  ;;  %v10560_v16 = vld [vmem:[#allocation2 + $0x74] sm:$0x1]  ;;  %6736 = vmatpush.bf16.msrb.mxu1 %v10402_v30 }
 0x3fb   : > { %v5576_v0 = vrot.slane %v10560_v16, 5 }
 0x3fc   : > { %v13323_v45 = vadd.f32 %v13284_v11, %v4529_v47  ;;  %v10394_v11 = vld [vmem:[%s14604_s3 + $0x50] sm:$0xff]  ;;  %v5029_v29 = vsel %vm11159_vm7, %v5027_v28, %v5028_v1 }
 0x3fd   : > { %v5364_v37 = vpop.f32.mrf.mxu2  ;;  %v13327_v5 = vpop.f32.mrf.mxu0  ;;  %v10410_v47 = vld [vmem:[%s14604_s3 + $0x250] sm:$0xff]  ;;  %6937 = vmatpush.bf16.msrb.mxu2 %v10394_v11  ;;  %v5262_v44 = vunpack.c.l.b16 %v5029_v29  ;;  %v5261_v11 = vunpack.c.l.b16 %v5026_v22 }
 0x3fe   : > { %14850 = vst [vmem:[#allocation52_spill] sm:$0xff] %v13323_v45  ;;  %5797 = vmatmul.bf16.gmra.mxu3 %v5677_v53  ;;  %v5365_v3 = vadd.f32 %v5364_v37, %v5163_v34  ;;  %v13338_v34 = vpack.c.b16 %v7808_v50, %v7807_v59  ;;  %v5453_v37 = vld [vmem:[#allocation2 + $0x6c] sm:$0xe]  ;;  %v7468_v45 = vld [vmem:[#allocation2 + $0x9c] sm:$0xe]  ;;  %v5577_v50 = vsel %vm11159_vm7, %v5575_v54, %v5576_v0 }
 0x3ff   : > { %7091 = vmatpush.bf16.msrb.mxu3 %v10410_v47  ;;  %v9706_v47 = vrot.slane %v5453_v37, 9  ;;  %v5656_v0 = vunpack.c.l.b16 %v5577_v50 }
 0x400   : > { %5988 = vmatmul.bf16.gmra.mxu0 %v12786_v19  ;;  %14851 = vst [vmem:[#allocation53_spill] sm:$0xff] %v13338_v34  ;;  %v13345_v19 = vld [vmem:[%s14605_s4] ss:$0 sm:$0xff]  ;;  %v10561_v34 = vld [vmem:[#allocation2 + $0x88] sm:$0xf] }
 0x401   : > { %v5758_v48 = vpop.f32.mrf.mxu3  ;;  %v5574_v16 = vsel %vm11159_vm7, %v9706_v47, %v5573_v60  ;;  %v5032_v42 = vrot.slane %v10561_v34, 5 }
 0x402   : > { %v5838_v53 = vadd.f32 %v5758_v48, %v5365_v3  ;;  %v5168_v21 = vpop.f32.mrf.mxu1  ;;  %v10418_v3 = vld [vmem:[%s14604_s3 + $0x2d0] sm:$0xff]  ;;  %v10076_v48 = vrot.slane %v7468_v45, 9 }
 0x403   : > { %7277 = vmatpush.bf16.msrb.mxu0 %v10418_v3  ;;  %v5034_v3 = vrot.slane %v5032_v42, 4 }
 0x404   : > { %v6024_v28 = vadd.f32 %v13298_v2, %v5838_v53  ;;  %v7584_v2 = vrot.slane %v6155_v63, 5  ;;  %v13360_v53 = vpack.c.b16 %v5262_v44, %v5261_v11  ;;  %v7587_v63 = vrot.slane %v6156_v4, 5  ;;  %v10562_v4 = vld [vmem:[#allocation2 + $0x7c] sm:$0xf] }
 0x405   : > { %v5366_v1 = vpop.f32.mrf.mxu2  ;;  %5207 = vmatmul.bf16.gmra.mxu1 %v12760_v18  ;;  %v13357_v59 = vpop.f32.mrf.mxu0  ;;  %v5655_v44 = vunpack.c.l.b16 %v5574_v16  ;;  %v4922_v16 = vld [vmem:[#allocation2 + $0x84] sm:$0xe] }
 0x406   : > { %v5367_v29 = vadd.f32 %v5366_v1, %v5165_v46  ;;  %v6056_v54 = vadd.f32 %v13345_v19, %v6024_v28  ;;  %14852 = vst [vmem:[#allocation54_spill] sm:$0xff] %v13360_v53  ;;  %v7585_v37 = vsel %vm11159_vm7, %v10076_v48, %v7584_v2  ;;  %v7586_v6 = vrot.slane %v7584_v2, 4 }
 0x407   : > { %v7809_v28 = vunpack.c.l.b16 %v7585_v37  ;;  %v5678_v30 = vpack.c.b16 %v5656_v0, %v5655_v44  ;;  %v5580_v2 = vrot.slane %v10562_v4, 5  ;;  %v6158_v37 = vld [vmem:[#allocation2 + $0xac] sm:$0xf] }
 0x408   : > { %v6088_v22 = vmax.f32 %v6056_v54, 0.0  ;;  %v7588_v60 = vsel %vm11159_vm7, %v7586_v6, %v7587_v63  ;;  %v7469_v63 = vld [vmem:[#allocation2 + $0xa8] sm:$0xe] }
 0x409   : > { %v5760_v46 = vpop.f32.mrf.mxu3  ;;  %v7810_v34 = vunpack.c.l.b16 %v7588_v60  ;;  %v5582_v44 = vrot.slane %v5580_v2, 4  ;;  %v6159_v60 = vld [vmem:[#allocation2 + $0xb0] sm:$0x1] }
 0x40a   : > { %v5839_v1 = vadd.f32 %v5760_v46, %v5367_v29  ;;  %8456 = vrot.lane.b32.xlu0 %v6088_v22, %s10700_s8  ;;  %5408 = vmatmul.bf16.gmra.mxu2 %v13360_v53  ;;  %v5170_v45 = vpop.f32.mrf.mxu1  ;;  %v10563_v22 = vld [vmem:[#allocation2 + $0x8c] sm:$0x1] }
 0x40b   : > { %v13373_v29 = vpack.c.b16 %v7810_v34, %v7809_v28  ;;  %v5035_v6 = vrot.slane %v10563_v22, 5  ;;  %v5454_v34 = vld [vmem:[#allocation2 + $0x78] sm:$0xe] }
 0x40c   : > { %v6025_v50 = vadd.f32 %v13313_v26, %v5839_v1  ;;  %v9595_v1 = vrot.slane %v4922_v16, 9 }
 0x40d   : > { %v5369_v11 = vpop.f32.mrf.mxu2  ;;  %v13371_v47 = vpop.f32.mrf.mxu0  ;;  %14853 = vst [vmem:[#allocation55_spill] sm:$0xff] %v13373_v29  ;;  %v5036_v26 = vsel %vm11159_vm7, %v5034_v3, %v5035_v6  ;;  %v7594_v6 = vrot.slane %v6159_v60, 5 }
 0x40e   : > { %5802 = vmatmul.bf16.gmra.mxu3 %v5678_v30  ;;  %v5370_v54 = vadd.f32 %v5369_v11, %v5168_v21  ;;  %v6057_v48 = vadd.f32 %v13345_v19, %v6025_v50  ;;  %v10077_v50 = vrot.slane %v7469_v63, 9  ;;  %v7591_v30 = vrot.slane %v6158_v37, 5 }
 0x40f   : > { %v5033_v11 = vsel %vm11159_vm7, %v9595_v1, %v5032_v42  ;;  %v5264_v4 = vunpack.c.l.b16 %v5036_v26 }
 0x410   : > { %v6089_v46 = vmax.f32 %v6057_v48, 0.0  ;;  %5993 = vmatmul.bf16.gmra.mxu0 %v12815_v14  ;;  %v10564_v48 = vld [vmem:[#allocation2 + $0x80] sm:$0x1]  ;;  %v7592_v14 = vsel %vm11159_vm7, %v10077_v50, %v7591_v30  ;;  %v7593_v16 = vrot.slane %v7591_v30, 4 }
 0x411   : > { %v5763_v0 = vpop.f32.mrf.mxu3  ;;  %v5583_v22 = vrot.slane %v10564_v48, 5  ;;  %v7811_v60 = vunpack.c.l.b16 %v7592_v14 }
 0x412   : > { %v5840_v28 = vadd.f32 %v5763_v0, %v5370_v54  ;;  %8458 = vrot.lane.b32.xlu0 %v6089_v46, %s10700_s8  ;;  %v5173_v21 = vpop.f32.mrf.mxu1  ;;  %v9707_v46 = vrot.slane %v5454_v34, 9  ;;  %v5263_v0 = vunpack.c.l.b16 %v5033_v11 }
 0x413   : > { %v5584_v37 = vsel %vm11159_vm7, %v5582_v44, %v5583_v22  ;;  %v10565_v44 = vld [vmem:[#allocation2 + $0x94] sm:$0xf] }
 0x414   : > { %v6026_v3 = vadd.f32 %v13327_v5, %v5840_v28  ;;  %v7595_v5 = vsel %vm11159_vm7, %v7593_v16, %v7594_v6  ;;  %v5581_v1 = vsel %vm11159_vm7, %v9707_v46, %v5580_v2  ;;  %v13395_v30 = vpack.c.b16 %v5264_v4, %v5263_v0  ;;  %v4923_v4 = vld [vmem:[#allocation2 + $0x90] sm:$0xe]  ;;  %v10566_v46 = vld [vmem:[#allocation2 + $0x88] sm:$0xf] }
 0x415   : > { %v5371_v54 = vpop.f32.mrf.mxu2  ;;  %5212 = vmatmul.bf16.gmra.mxu1 %v12809_v58  ;;  %v13388_v63 = vpop.f32.mrf.mxu0  ;;  %v7812_v28 = vunpack.c.l.b16 %v7595_v5  ;;  %v5658_v34 = vunpack.c.l.b16 %v5584_v37  ;;  %v5039_v22 = vrot.slane %v10565_v44, 5  ;;  %v5657_v11 = vunpack.c.l.b16 %v5581_v1  ;;  %v10393_v5 = vld [vmem:[%s14604_s3 + $0x48] sm:$0xff]  ;;  %v7470_v1 = vld [vmem:[#allocation2 + $0xb4] sm:$0xe] }
 0x416   : > { %v5372_v42 = vadd.f32 %v5371_v54, %v5170_v45  ;;  %v6058_v26 = vadd.f32 %v13345_v19, %v6026_v3  ;;  %14854 = vst [vmem:[#allocation56_spill] sm:$0xff] %v13395_v30  ;;  %v5587_v37 = vrot.slane %v10566_v46, 5  ;;  %6938 = vmatpush.bf16.msrb.mxu2 %v10393_v5 }
 0x417   : > { %v13397_v29 = vpack.c.b16 %v7812_v28, %v7811_v60  ;;  %v5679_v14 = vpack.c.b16 %v5658_v34, %v5657_v11  ;;  %v5041_v54 = vrot.slane %v5039_v22, 4  ;;  %v10567_v60 = vld [vmem:[#allocation2 + $0x98] sm:$0x1]  ;;  %v9596_v34 = vrot.slane %v4923_v4, 9  ;;  %v5455_v4 = vld [vmem:[#allocation2 + $0x84] sm:$0xe] }
 0x418   : > { %v6090_v50 = vmax.f32 %v6058_v26, 0.0  ;;  %v6161_v26 = vld [vmem:[#allocation2 + $0xb8] sm:$0xf]  ;;  %v5042_v28 = vrot.slane %v10567_v60, 5  ;;  %v10078_v11 = vrot.slane %v7470_v1, 9 }
 0x419   : > { %v5765_v48 = vpop.f32.mrf.mxu3  ;;  %14855 = vst [vmem:[#allocation57_spill] sm:$0xff] %v13397_v29  ;;  %v5040_v46 = vsel %vm11159_vm7, %v9596_v34, %v5039_v22 }
 0x41a   : > { %v5841_v45 = vadd.f32 %v5765_v48, %v5372_v42  ;;  %8460 = vrot.lane.b32.xlu1 %v6090_v50, %s10700_s8  ;;  %5413 = vmatmul.bf16.gmra.mxu2 %v13395_v30  ;;  %v5175_v3 = vpop.f32.mrf.mxu1  ;;  %v6162_v48 = vld [vmem:[#allocation2 + $0xbc] sm:$0x1]  ;;  %v5043_v44 = vsel %vm11159_vm7, %v5041_v54, %v5042_v28  ;;  %v5265_v1 = vunpack.c.l.b16 %v5040_v46  ;;  %v9708_v28 = vrot.slane %v5455_v4, 9 }
 0x41b   : > { %v7601_v29 = vrot.slane %v6162_v48, 5 }
 0x41c   : > { %v6027_v2 = vadd.f32 %v13357_v59, %v5841_v45  ;;  %v10409_v59 = vld [vmem:[%s14604_s3 + $0x248] sm:$0xff]  ;;  %v5589_v45 = vrot.slane %v5587_v37, 4 }
 0x41d   : > { %v5374_v16 = vpop.f32.mrf.mxu2  ;;  %v13402_v6 = vpop.f32.mrf.mxu0  ;;  %7092 = vmatpush.bf16.msrb.mxu3 %v10409_v59  ;;  %v5266_v59 = vunpack.c.l.b16 %v5043_v44 }
 0x41e   : > { %5807 = vmatmul.bf16.gmra.mxu3 %v5679_v14  ;;  %v5375_v0 = vadd.f32 %v5374_v16, %v5173_v21  ;;  %v6059_v42 = vadd.f32 %v13345_v19, %v6027_v2  ;;  %v7598_v2 = vrot.slane %v6161_v26, 5  ;;  %v10401_v26 = vld [vmem:[%s14604_s3 + $0xc8] sm:$0xff] }
 0x41f   : > { %6737 = vmatpush.bf16.msrb.mxu1 %v10401_v26  ;;  %v13436_v46 = vpack.c.b16 %v5266_v59, %v5265_v1  ;;  %v4924_v59 = vld [vmem:[#allocation2 + $0x9c] sm:$0xe] }
 0x420   : > { %v6091_v50 = vmax.f32 %v6059_v42, 0.0  ;;  %5998 = vmatmul.bf16.gmra.mxu0 %v12862_v7  ;;  %v10568_v42 = vld [vmem:[#allocation2 + $0x8c] sm:$0x1]  ;;  %v7599_v5 = vsel %vm11159_vm7, %v10078_v11, %v7598_v2  ;;  %v7600_v60 = vrot.slane %v7598_v2, 4  ;;  %v5588_v2 = vsel %vm11159_vm7, %v9708_v28, %v5587_v37 }
 0x421   : > { %v5768_v21 = vpop.f32.mrf.mxu3  ;;  %v5590_v7 = vrot.slane %v10568_v42, 5  ;;  %v7813_v44 = vunpack.c.l.b16 %v7599_v5  ;;  %14856 = vst [vmem:[#allocation58_spill] sm:$0xff] %v13436_v46 }
 0x422   : > { %v5842_v14 = vadd.f32 %v5768_v21, %v5375_v0  ;;  %8462 = vrot.lane.b32.xlu1 %v6091_v50, %s10700_s8  ;;  %v5178_v16 = vpop.f32.mrf.mxu1  ;;  %v10417_v0 = vld [vmem:[%s14604_s3 + $0x2c8] sm:$0xff] }
 0x423   : > { %v5591_v50 = vsel %vm11159_vm7, %v5589_v45, %v5590_v7  ;;  %7278 = vmatpush.bf16.msrb.mxu0 %v10417_v0  ;;  %v10569_v7 = vld [vmem:[#allocation2 + $0xa0] sm:$0xf] }
 0x424   : > { %v6028_v54 = vadd.f32 %v13371_v47, %v5842_v14  ;;  %v7602_v47 = vsel %vm11159_vm7, %v7600_v60, %v7601_v29  ;;  %v5660_v4 = vunpack.c.l.b16 %v5591_v50  ;;  %v5046_v30 = vrot.slane %v10569_v7, 5 }
 0x425   : > { %v5376_v22 = vpop.f32.mrf.mxu2  ;;  %5217 = vmatmul.bf16.gmra.mxu1 %v12847_v10  ;;  %v13429_v34 = vpop.f32.mrf.mxu0  ;;  %v7814_v11 = vunpack.c.l.b16 %v7602_v47  ;;  %v6164_v47 = vld [vmem:[#allocation2 + $0xc4] sm:$0xf] }
 0x426   : > { %v5377_v48 = vadd.f32 %v5376_v22, %v5175_v3  ;;  %v6060_v21 = vadd.f32 %v13345_v19, %v6028_v54  ;;  %v5659_v3 = vunpack.c.l.b16 %v5588_v2  ;;  %v5048_v0 = vrot.slane %v5046_v30, 4  ;;  %v10570_v22 = vld [vmem:[#allocation2 + $0x94] sm:$0xf] }
 0x427   : > { %v13438_v45 = vpack.c.b16 %v7814_v11, %v7813_v44  ;;  %v5594_v1 = vrot.slane %v10570_v22, 5  ;;  %v9597_v2 = vrot.slane %v4924_v59, 9 }
 0x428   : > { %v6092_v14 = vmax.f32 %v6060_v21, 0.0  ;;  %v5680_v54 = vpack.c.b16 %v5660_v4, %v5659_v3  ;;  %v10571_v21 = vld [vmem:[#allocation2 + $0xa4] sm:$0x1] }
 0x429   : > { %14857 = vst [vmem:[#allocation59_spill] sm:$0xff] %v13438_v45  ;;  %v5770_v42 = vpop.f32.mrf.mxu3  ;;  %v5049_v44 = vrot.slane %v10571_v21, 5 }
 0x42a   : > { %v5843_v29 = vadd.f32 %v5770_v42, %v5377_v48  ;;  %8464 = vrot.lane.b32.xlu2 %v6092_v14, %s10700_s8  ;;  %5418 = vmatmul.bf16.gmra.mxu2 %v13436_v46  ;;  %v5180_v5 = vpop.f32.mrf.mxu1  ;;  %v7471_v48 = vld [vmem:[#allocation2 + $0xc0] sm:$0xe]  ;;  %v5596_v42 = vrot.slane %v5594_v1, 4 }
 0x42b   : > { %v5050_v4 = vsel %vm11159_vm7, %v5048_v0, %v5049_v44  ;;  %v10079_v7 = vrot.slane %v7471_v48, 9 }
 0x42c   : > { %v6029_v60 = vadd.f32 %v13388_v63, %v5843_v29  ;;  %v6165_v63 = vld [vmem:[#allocation2 + $0xc8] sm:$0x1]  ;;  %v7605_v29 = vrot.slane %v6164_v47, 5  ;;  %v5268_v21 = vunpack.c.l.b16 %v5050_v4 }
 0x42d   : > { %v5379_v37 = vpop.f32.mrf.mxu2  ;;  %v13443_v26 = vpop.f32.mrf.mxu0 }
 0x42e   : > { %5812 = vmatmul.bf16.gmra.mxu3 %v5680_v54  ;;  %v5380_v28 = vadd.f32 %v5379_v37, %v5178_v16  ;;  %v6061_v50 = vadd.f32 %v13345_v19, %v6029_v60  ;;  %v5047_v60 = vsel %vm11159_vm7, %v9597_v2, %v5046_v30  ;;  %v5456_v54 = vld [vmem:[#allocation2 + $0x90] sm:$0xe]  ;;  %v10572_v37 = vld [vmem:[#allocation2 + $0x98] sm:$0x1]  ;;  %v7607_v22 = vrot.slane %v7605_v29, 4 }
 0x42f   : > { %v5597_v59 = vrot.slane %v10572_v37, 5  ;;  %v9709_v47 = vrot.slane %v5456_v54, 9  ;;  %v10573_v54 = vld [vmem:[#allocation2 + $0xac] sm:$0xf] }
 0x430   : > { %v6093_v11 = vmax.f32 %v6061_v50, 0.0  ;;  %6003 = vmatmul.bf16.gmra.mxu0 %v12894_v62  ;;  %v7606_v62 = vsel %vm11159_vm7, %v10079_v7, %v7605_v29  ;;  %v7608_v50 = vrot.slane %v6165_v63, 5  ;;  %v5053_v37 = vrot.slane %v10573_v54, 5 }
 0x431   : > { %v5773_v14 = vpop.f32.mrf.mxu3  ;;  %v5598_v44 = vsel %vm11159_vm7, %v5596_v42, %v5597_v59  ;;  %v7815_v63 = vunpack.c.l.b16 %v7606_v62 }
 0x432   : > { %v5844_v3 = vadd.f32 %v5773_v14, %v5380_v28  ;;  %8466 = vrot.lane.b32.xlu2 %v6093_v11, %s10700_s8  ;;  %v5183_v16 = vpop.f32.mrf.mxu1  ;;  %v5267_v28 = vunpack.c.l.b16 %v5047_v60  ;;  %v7609_v11 = vsel %vm11159_vm7, %v7607_v22, %v7608_v50 }
 0x433   : > { %v7816_v7 = vunpack.c.l.b16 %v7609_v11  ;;  %v4925_v11 = vld [vmem:[#allocation2 + $0xa8] sm:$0xe] }
 0x434   : > { %v6030_v0 = vadd.f32 %v13402_v6, %v5844_v3  ;;  %v5595_v6 = vsel %vm11159_vm7, %v9709_v47, %v5594_v1  ;;  %v13465_v29 = vpack.c.b16 %v5268_v21, %v5267_v28  ;;  %v5662_v3 = vunpack.c.l.b16 %v5598_v44 }
 0x435   : > { %v5381_v48 = vpop.f32.mrf.mxu2  ;;  %5222 = vmatmul.bf16.gmra.mxu1 %v12885_v41  ;;  %v13458_v30 = vpop.f32.mrf.mxu0  ;;  %v13467_v60 = vpack.c.b16 %v7816_v7, %v7815_v63  ;;  %v5055_v21 = vrot.slane %v5053_v37, 4 }
 0x436   : > { %v5382_v2 = vadd.f32 %v5381_v48, %v5180_v5  ;;  %v6062_v14 = vadd.f32 %v13345_v19, %v6030_v0  ;;  %14858 = vst [vmem:[#allocation60_spill] sm:$0xff] %v13465_v29  ;;  %v5661_v5 = vunpack.c.l.b16 %v5595_v6  ;;  %v10574_v48 = vld [vmem:[#allocation2 + $0xa0] sm:$0xf] }
 0x437   : > { %14859 = vst [vmem:[#allocation61_spill] sm:$0xff] %v13467_v60  ;;  %v5601_v28 = vrot.slane %v10574_v48, 5  ;;  %v10400_v48 = vld [vmem:[%s14604_s3 + $0xc0] sm:$0xff] }
 0x438   : > { %v6094_v4 = vmax.f32 %v6062_v14, 0.0  ;;  %v5681_v50 = vpack.c.b16 %v5662_v3, %v5661_v5  ;;  %v10575_v14 = vld [vmem:[#allocation2 + $0xb0] sm:$0x1]  ;;  %6738 = vmatpush.bf16.msrb.mxu1 %v10400_v48 }
 0x439   : > { %v5775_v42 = vpop.f32.mrf.mxu3  ;;  %v5056_v63 = vrot.slane %v10575_v14, 5  ;;  %v5603_v3 = vrot.slane %v5601_v28, 4 }
 0x43a   : > { %v5845_v59 = vadd.f32 %v5775_v42, %v5382_v2  ;;  %8468 = vrot.lane.b32.xlu0 %v6094_v4, %s10700_s8  ;;  %5423 = vmatmul.bf16.gmra.mxu2 %v13465_v29  ;;  %v5185_v62 = vpop.f32.mrf.mxu1  ;;  %v10392_v2 = vld [vmem:[%s14604_s3 + $0x40] sm:$0xff]  ;;  %v9598_v4 = vrot.slane %v4925_v11, 9 }
 0x43b   : > { %6939 = vmatpush.bf16.msrb.mxu2 %v10392_v2 }
 0x43c   : > { %v6031_v22 = vadd.f32 %v13429_v34, %v5845_v59  ;;  %v10408_v34 = vld [vmem:[%s14604_s3 + $0x240] sm:$0xff]  ;;  %v5457_v59 = vld [vmem:[#allocation2 + $0x9c] sm:$0xe]  ;;  %v5054_v5 = vsel %vm11159_vm7, %v9598_v4, %v5053_v37 }
 0x43d   : > { %v5384_v1 = vpop.f32.mrf.mxu2  ;;  %v13472_v0 = vpop.f32.mrf.mxu0  ;;  %7093 = vmatpush.bf16.msrb.mxu3 %v10408_v34  ;;  %v5269_v34 = vunpack.c.l.b16 %v5054_v5 }
 0x43e   : > { %5817 = vmatmul.bf16.gmra.mxu3 %v5681_v50  ;;  %v5385_v47 = vadd.f32 %v5384_v1, %v5183_v16  ;;  %v6063_v44 = vadd.f32 %v13345_v19, %v6031_v22  ;;  %v5057_v16 = vsel %vm11159_vm7, %v5055_v21, %v5056_v63  ;;  %v10576_v22 = vld [vmem:[#allocation2 + $0xa4] sm:$0x1] }
 0x43f   : > { %v5604_v50 = vrot.slane %v10576_v22, 5  ;;  %v5270_v1 = vunpack.c.l.b16 %v5057_v16  ;;  %v10416_v21 = vld [vmem:[%s14604_s3 + $0x2c0] sm:$0xff]  ;;  %v10577_v16 = vld [vmem:[#allocation2 + $0xb8] sm:$0xf] }
 0x440   : > { %v6095_v7 = vmax.f32 %v6063_v44, 0.0  ;;  %6008 = vmatmul.bf16.gmra.mxu0 %v12939_v12  ;;  %v9710_v44 = vrot.slane %v5457_v59, 9 }
 0x441   : > { %v5778_v6 = vpop.f32.mrf.mxu3  ;;  %v5605_v37 = vsel %vm11159_vm7, %v5603_v3, %v5604_v50  ;;  %7279 = vmatpush.bf16.msrb.mxu0 %v10416_v21 }
 0x442   : > { %v5846_v42 = vadd.f32 %v5778_v6, %v5385_v47  ;;  %8470 = vrot.lane.b32.xlu1 %v6095_v7, %s10700_s8  ;;  %v5188_v54 = vpop.f32.mrf.mxu1  ;;  %v5602_v14 = vsel %vm11159_vm7, %v9710_v44, %v5601_v28  ;;  %v13502_v7 = vpack.c.b16 %v5270_v1, %v5269_v34  ;;  %v5664_v6 = vunpack.c.l.b16 %v5605_v37  ;;  %v10578_v1 = vld [vmem:[#allocation2 + $0xac] sm:$0xf]  ;;  %v4926_v44 = vld [vmem:[#allocation2 + $0xb4] sm:$0xe]  ;;  %v10579_v37 = vld [vmem:[#allocation2 + $0xbc] sm:$0x1] }
 0x443   : > { %v5608_v48 = vrot.slane %v10578_v1, 5 }
 0x444   : > { %v6032_v12 = vadd.f32 %v13443_v26, %v5846_v42  ;;  %14860 = vst [vmem:[#allocation62_spill] sm:$0xff] %v13502_v7  ;;  %v5060_v42 = vrot.slane %v10577_v16, 5  ;;  %v5458_v16 = vld [vmem:[#allocation2 + $0xa8] sm:$0xe] }
 0x445   : > { %v5386_v47 = vpop.f32.mrf.mxu2  ;;  %5227 = vmatmul.bf16.gmra.mxu1 %v12925_v13  ;;  %v13497_v11 = vpop.f32.mrf.mxu0 }
 0x446   : > { %v5387_v2 = vadd.f32 %v5386_v47, %v5185_v62  ;;  %v6064_v26 = vadd.f32 %v13345_v19, %v6032_v12  ;;  %v5663_v62 = vunpack.c.l.b16 %v5602_v14  ;;  %v5062_v28 = vrot.slane %v5060_v42, 4 }
 0x447   : > { %v9599_v14 = vrot.slane %v4926_v44, 9 }
 0x448   : > { %v6096_v63 = vmax.f32 %v6064_v26, 0.0  ;;  %v5682_v22 = vpack.c.b16 %v5664_v6, %v5663_v62 }
 0x449   : > { %v5780_v4 = vpop.f32.mrf.mxu3 }
 0x44a   : > { %v5847_v59 = vadd.f32 %v5780_v4, %v5387_v2  ;;  %8472 = vrot.lane.b32.xlu2 %v6096_v63, %s10700_s8  ;;  %5428 = vmatmul.bf16.gmra.mxu2 %v13502_v7  ;;  %v5190_v3 = vpop.f32.mrf.mxu1  ;;  %v5063_v2 = vrot.slane %v10579_v37, 5  ;;  %v5610_v63 = vrot.slane %v5608_v48, 4 }
 0x44c   : > { %v6033_v5 = vadd.f32 %v13458_v30, %v5847_v59  ;;  %v5064_v30 = vsel %vm11159_vm7, %v5062_v28, %v5063_v2  ;;  %v10580_v59 = vld [vmem:[#allocation2 + $0xb0] sm:$0x1] }
 0x44d   : > { %v5389_v50 = vpop.f32.mrf.mxu2  ;;  %v13507_v12 = vpop.f32.mrf.mxu0  ;;  %v5611_v62 = vrot.slane %v10580_v59, 5 }
 0x44e   : > { %5822 = vmatmul.bf16.gmra.mxu3 %v5682_v22  ;;  %v5390_v21 = vadd.f32 %v5389_v50, %v5188_v54  ;;  %v6065_v47 = vadd.f32 %v13345_v19, %v6033_v5  ;;  %v5061_v54 = vsel %vm11159_vm7, %v9599_v14, %v5060_v42  ;;  %v5272_v22 = vunpack.c.l.b16 %v5064_v30 }
 0x44f   : > { %v9711_v50 = vrot.slane %v5458_v16, 9  ;;  %v5612_v28 = vsel %vm11159_vm7, %v5610_v63, %v5611_v62  ;;  %v5271_v44 = vunpack.c.l.b16 %v5061_v54  ;;  %v10582_v62 = vld [vmem:[#allocation2 + $0xb8] sm:$0xf] }
 0x450   : > { %v6097_v26 = vmax.f32 %v6065_v47, 0.0  ;;  %6013 = vmatmul.bf16.gmra.mxu0 %v12967_v23 }
 0x451   : > { %v5783_v34 = vpop.f32.mrf.mxu3  ;;  %v5609_v42 = vsel %vm11159_vm7, %v9711_v50, %v5608_v48  ;;  %v13525_v2 = vpack.c.b16 %v5272_v22, %v5271_v44  ;;  %v4927_v50 = vld [vmem:[#allocation2 + $0xc0] sm:$0xe] }
 0x452   : > { %v5848_v6 = vadd.f32 %v5783_v34, %v5390_v21  ;;  %8474 = vrot.lane.b32.xlu0 %v6097_v26, %s10700_s8  ;;  %v5193_v4 = vpop.f32.mrf.mxu1  ;;  %v10581_v34 = vld [vmem:[#allocation2 + $0xc4] sm:$0xf]  ;;  %v5665_v63 = vunpack.c.l.b16 %v5609_v42  ;;  %v10584_v42 = vld [vmem:[#allocation2 + $0x1c] sm:$0xf] }
 0x453   : > { %14861 = vst [vmem:[#allocation63_spill] sm:$0xff] %v13525_v2  ;;  %v5067_v14 = vrot.slane %v10581_v34, 5 }
 0x454   : > { %v6034_v5 = vadd.f32 %v13472_v0, %v5848_v6  ;;  %v5666_v0 = vunpack.c.l.b16 %v5612_v28  ;;  %v10431_v28 = vld [vmem:[%s14604_s3 + $0x38] sm:$0xff] }
 0x455   : > { %v5391_v23 = vpop.f32.mrf.mxu2  ;;  %5232 = vmatmul.bf16.gmra.mxu1 %v12959_v27  ;;  %v13520_v1 = vpop.f32.mrf.mxu0  ;;  %v5069_v48 = vrot.slane %v5067_v14, 4  ;;  %7899 = vmatpush.bf16.msra.mxu2 %v10431_v28 }
 0x456   : > { %v5392_v21 = vadd.f32 %v5391_v23, %v5190_v3  ;;  %v6066_v47 = vadd.f32 %v13345_v19, %v6034_v5  ;;  %v5683_v16 = vpack.c.b16 %v5666_v0, %v5665_v63  ;;  %v5615_v5 = vrot.slane %v10582_v62, 5  ;;  %v10585_v62 = vld [vmem:[#allocation2 + $0xbc] sm:$0x1] }
 0x457   : > { %v9600_v0 = vrot.slane %v4927_v50, 9  ;;  %v6183_v63 = vshrl.u32 %v10584_v42, 16 }
 0x458   : > { %v6098_v37 = vmax.f32 %v6066_v47, 0.0  ;;  %v5617_v34 = vrot.slane %v5615_v5, 4 }
 0x459   : > { %v5785_v26 = vpop.f32.mrf.mxu3 }
 0x45a   : > { %v5849_v30 = vadd.f32 %v5785_v26, %v5392_v21  ;;  %8476 = vrot.lane.b32.xlu1 %v6098_v37, %s10700_s8  ;;  %5433 = vmatmul.bf16.gmra.mxu2 %v13525_v2  ;;  %v5195_v3 = vpop.f32.mrf.mxu1  ;;  %v10583_v21 = vld [vmem:[#allocation2 + $0xc8] sm:$0x1]  ;;  %v6179_v37 = vshll.u32 %v10584_v42, 16  ;;  %v6185_v42 = vrot.slane %v6183_v63, 4 }
 0x45b   : > { %v5070_v47 = vrot.slane %v10583_v21, 5 }
 0x45c   : > { %v6035_v6 = vadd.f32 %v13497_v11, %v5849_v30  ;;  %v10447_v11 = vld [vmem:[%s14604_s3 + $0x238] sm:$0xff] }
 0x45d   : > { %v5394_v54 = vpop.f32.mrf.mxu2  ;;  %v13530_v59 = vpop.f32.mrf.mxu0  ;;  %v5071_v26 = vsel %vm11159_vm7, %v5069_v48, %v5070_v47  ;;  %v6121_v30 = vld [vmem:[#allocation2 + $0x18] sm:$0xf]  ;;  %8053 = vmatpush.bf16.msra.mxu3 %v10447_v11 }
 0x45e   : > { %5827 = vmatmul.bf16.gmra.mxu3 %v5683_v16  ;;  %v5395_v22 = vadd.f32 %v5394_v54, %v5193_v4  ;;  %v6067_v23 = vadd.f32 %v13345_v19, %v6035_v6  ;;  %v5459_v54 = vld [vmem:[#allocation2 + $0xb4] sm:$0xe]  ;;  %v5274_v50 = vunpack.c.l.b16 %v5071_v26  ;;  %v6170_v21 = vshrl.u32 %v6121_v30, 16  ;;  %v10439_v48 = vld [vmem:[%s14604_s3 + $0xb8] sm:$0xff] }
 0x45f   : > { %v6173_v2 = vshll.u32 %v6121_v30, 16  ;;  %7698 = vmatpush.bf16.msra.mxu1 %v10439_v48 }
 0x460   : > { %v6099_v44 = vmax.f32 %v6067_v23, 0.0  ;;  %6018 = vmatmul.bf16.gmra.mxu0 %v13005_v32  ;;  %v5068_v32 = vsel %vm11159_vm7, %v9600_v0, %v5067_v14  ;;  %v5618_v23 = vrot.slane %v10585_v62, 5  ;;  %v6181_v14 = vrot.slane %v6179_v37, 5 }
 0x461   : > { %v5788_v4 = vpop.f32.mrf.mxu3  ;;  %v5273_v26 = vunpack.c.l.b16 %v5068_v32  ;;  %v6172_v37 = vrot.slane %v6170_v21, 4  ;;  %v6175_v63 = vrot.slane %v6173_v2, 5 }
 0x462   : > { %v5850_v6 = vadd.f32 %v5788_v4, %v5395_v22  ;;  %8478 = vrot.lane.b32.xlu2 %v6099_v44, %s10700_s8  ;;  %v5198_v16 = vpop.f32.mrf.mxu1  ;;  %v9712_v22 = vrot.slane %v5459_v54, 9  ;;  %v5619_v47 = vsel %vm11159_vm7, %v5617_v34, %v5618_v23  ;;  %v6186_v23 = vor.u32 %v6185_v42, %v6181_v14 }
 0x463   : > { %v13560_v54 = vpack.c.b16 %v5274_v50, %v5273_v26  ;;  %v5668_v34 = vunpack.c.l.b16 %v5619_v47  ;;  %v6176_v47 = vor.u32 %v6175_v63, %v6172_v37  ;;  %v6124_v63 = vld [vmem:[#allocation2 + $0x24] sm:$0xf] }
 0x464   : > { %v6036_v28 = vadd.f32 %v13507_v12, %v5850_v6  ;;  %v10455_v12 = vld [vmem:[%s14604_s3 + $0x2b8] sm:$0xff]  ;;  %v5616_v30 = vsel %vm11159_vm7, %v9712_v22, %v5615_v5 }
 0x465   : > { %v5396_v11 = vpop.f32.mrf.mxu2  ;;  %5237 = vmatmul.bf16.gmra.mxu1 %v12993_v56  ;;  %v13552_v44 = vpop.f32.mrf.mxu0  ;;  %8239 = vmatpush.bf16.msra.mxu0 %v10455_v12  ;;  %14862 = vst [vmem:[#allocation64_spill] sm:$0xff] %v13560_v54  ;;  %v6187_v12 = vrot.slane %v6186_v23, 4 }
 0x466   : > { %v5397_v4 = vadd.f32 %v5396_v11, %v5195_v3  ;;  %v6068_v0 = vadd.f32 %v13345_v19, %v6036_v28  ;;  %v5667_v3 = vunpack.c.l.b16 %v5616_v30  ;;  %v10586_v28 = vld [vmem:[#allocation2 + $0x20] sm:$0x1]  ;;  %v6177_v30 = vrot.slane %v6176_v47, 4 }
 0x467   : > { %v6189_v48 = vshll.u32 %v10586_v28, 16 }
 0x468   : > { %v6100_v6 = vmax.f32 %v6068_v0, 0.0  ;;  %v5684_v11 = vpack.c.b16 %v5668_v34, %v5667_v3  ;;  %v10587_v0 = vld [vmem:[#allocation2 + $0xc] sm:$0xff]  ;;  %v6182_v23 = vsel %vm10846_vm4, %v6177_v30, %v6181_v14 }
 0x469   : > { %v5790_v62 = vpop.f32.mrf.mxu3  ;;  %v6191_v42 = vrot.slane %v6189_v48, 5 }
 0x46a   : > { %v5851_v60 = vadd.f32 %v5790_v62, %v5397_v4  ;;  %8480 = vrot.lane.b32.xlu0 %v6100_v6, %s10700_s8  ;;  %5438 = vmatmul.bf16.gmra.mxu2 %v13560_v54  ;;  %v5200_v32 = vpop.f32.mrf.mxu1 }
 0x46b   : > { %v6192_v6 = vsel %vm10846_vm4, %v6187_v12, %v6191_v42  ;;  %v6820_v42 = vunpack.c.l.b16 %v6182_v23 }
 0x46c   : > { %v6037_v5 = vadd.f32 %v13520_v1, %v5851_v60  ;;  %v10588_v60 = vld [vmem:[#allocation2 + $0x28] sm:$0xf]  ;;  %v6821_v28 = vunpack.c.l.b16 %v6192_v6 }
 0x46d   : > { %v5399_v22 = vpop.f32.mrf.mxu2  ;;  %v13565_v50 = vpop.f32.mrf.mxu0  ;;  %v6203_v1 = vshll.u32 %v10588_v60, 16  ;;  %v6207_v34 = vshrl.u32 %v10588_v60, 16 }
 0x46e   : > { %5832 = vmatmul.bf16.gmra.mxu3 %v5684_v11  ;;  %v5400_v2 = vadd.f32 %v5399_v22, %v5198_v16  ;;  %v6069_v21 = vadd.f32 %v13345_v19, %v6037_v5  ;;  %v10376_v16 = vld [vmem:[#allocation2 + $0x18] sm:$0xff]  ;;  %v6194_v11 = vshrl.u32 %v6124_v63, 16  ;;  %v6197_v22 = vshll.u32 %v6124_v63, 16 }
 0x46f   : > { %v13576_v47 = vrot.slane %v6203_v1, 5  ;;  %v6209_v12 = vrot.slane %v6207_v34, 4  ;;  %v10589_v34 = vld [vmem:[#allocation2 + $0x2c] sm:$0x1] }
 0x470   : > { %v6101_v4 = vmax.f32 %v6069_v21, 0.0  ;;  %7280 = vmatmul.bf16.vlgmr.msrb.gmra.mxu0 %v10587_v0  ;;  %v13581_v0 = vpack.c.b16 %v6821_v28, %v6820_v42  ;;  %v6199_v30 = vrot.slane %v6197_v22, 5 }
 0x471   : > { %v5793_v26 = vpop.f32.mrf.mxu3  ;;  %v6210_v6 = vor.u32 %v6209_v12, %v13576_v47 }
 0x472   : > { %v5852_v62 = vadd.f32 %v5793_v26, %v5400_v2  ;;  %8482 = vrot.lane.b32.xlu1 %v6101_v4, %s10700_s8  ;;  %v5203_v37 = vpop.f32.mrf.mxu1  ;;  %v4848_v4 = vadd.f32 %v13345_v19, %v12758_v25  ;;  %v6196_v26 = vrot.slane %v6194_v11, 4  ;;  %v14863_v11 = vld [vmem:[#allocation16_spill] sm:$0xff] }
 0x474   : > { %v6038_v3 = vadd.f32 %v13530_v59, %v5852_v62  ;;  %v4880_v1 = vmax.f32 %v4848_v4, 0.0  ;;  %v6213_v62 = vshll.u32 %v10589_v34, 16  ;;  %v6200_v28 = vor.u32 %v6199_v30, %v6196_v26  ;;  %v14865_v4 = vld [vmem:[#allocation39_spill] sm:$0xff]  ;;  %v10590_v30 = vld [vmem:[#allocation2 + $0x18] sm:$0xff]  ;;  %v10591_v34 = vld [vmem:[#allocation2 + $0x34] sm:$0xf] }
 0x475   : > { %v5401_v48 = vpop.f32.mrf.mxu2  ;;  %6739 = vmatmul.bf16.vlgmr.msrb.gmra.mxu1 %v10376_v16  ;;  %v13574_v5 = vpop.f32.mrf.mxu0 }
 0x476   : > { %v5402_v2 = vadd.f32 %v5401_v48, %v5200_v32  ;;  %v6070_v21 = vadd.f32 %v13345_v19, %v6038_v3  ;;  %v6211_v48 = vrot.slane %v6210_v6, 4  ;;  %v6201_v6 = vrot.slane %v6200_v28, 4 }
 0x478   : > { %v6102_v14 = vmax.f32 %v6070_v21, 0.0  ;;  %v14864_v21 = vld [vmem:[#allocation32_spill] sm:$0xff] }
 0x479   : > { %v5795_v59 = vpop.f32.mrf.mxu3  ;;  %v4849_v42 = vadd.f32 %v13345_v19, %v14864_v21 }
 0x47a   : > { %v5853_v60 = vadd.f32 %v5795_v59, %v5402_v2  ;;  %8484 = vrot.lane.b32.xlu2 %v6102_v14, %s10700_s8  ;;  %6940 = vmatmul.bf16.vlgmr.msrb.gmra.mxu2 %v13581_v0  ;;  %v5205_v32 = vpop.f32.mrf.mxu1  ;;  %v10430_v2 = vld [vmem:[%s14604_s3 + $0x30] sm:$0xff]  ;;  %v4852_v14 = vadd.f32 %v13345_v19, %v14865_v4  ;;  %v6215_v59 = vrot.slane %v6213_v62, 5 }
 0x47b   : > { %7900 = vmatpush.bf16.msra.mxu2 %v10430_v2  ;;  %v4881_v62 = vmax.f32 %v4849_v42, 0.0  ;;  %v6206_v2 = vsel %vm10846_vm4, %v6201_v6, %v13576_v47 }
 0x47c   : > { %v6039_v25 = vadd.f32 %v13552_v44, %v5853_v60  ;;  %v8457_v63 = vpop.permute.xlu0 %8456  ;;  %v10446_v44 = vld [vmem:[%s14604_s3 + $0x230] sm:$0xff]  ;;  %v6216_v60 = vsel %vm10846_vm4, %v6211_v48, %v6215_v59  ;;  %v4884_v4 = vmax.f32 %v4852_v14, 0.0 }
 0x47d   : > { %v13588_v16 = vsel %vm8808_vm1, %v4880_v1, %v8457_v63  ;;  %v5404_v23 = vpop.f32.mrf.mxu2  ;;  %v13590_v3 = vpop.f32.mrf.mxu0  ;;  %v6127_v1 = vld [vmem:[#allocation2 + $0x30] sm:$0xf]  ;;  %v6231_v63 = vshrl.u32 %v10591_v34, 16  ;;  %8054 = vmatpush.bf16.msra.mxu3 %v10446_v44  ;;  %v6823_v59 = vunpack.c.l.b16 %v6216_v60 }
 0x47e   : > { %7094 = vmatmul.bf16.vlgmr.msrb.gmra.mxu3 %v14863_v11  ;;  %v5405_v22 = vadd.f32 %v5404_v23, %v5203_v37  ;;  %v6071_v12 = vadd.f32 %v13345_v19, %v6039_v25  ;;  %v6227_v25 = vshll.u32 %v10591_v34, 16  ;;  %v6218_v54 = vshrl.u32 %v6127_v1, 16  ;;  %v14867_v34 = vld [vmem:[#allocation29_spill] sm:$0xff] }
 0x47f   : > { %v6221_v15 = vshll.u32 %v6127_v1, 16  ;;  %v6822_v1 = vunpack.c.l.b16 %v6206_v2 }
 0x480   : > { %v6103_v26 = vmax.f32 %v6071_v12, 0.0  ;;  %7285 = vmatmul.bf16.gmra.mxu0 %v10590_v30  ;;  %v10377_v12 = vld [vmem:[#allocation2 + $0x24] sm:$0xff] }
 0x481   : > { %v5798_v37 = vpop.f32.mrf.mxu3 }
 0x482   : > { %v5854_v23 = vadd.f32 %v5798_v37, %v5405_v22  ;;  %8486 = vrot.lane.b32.xlu0 %v6103_v26, %s10700_s8  ;;  %v5208_v21 = vpop.f32.mrf.mxu1  ;;  %v10438_v22 = vld [vmem:[%s14604_s3 + $0xb0] sm:$0xff]  ;;  %v6233_v26 = vrot.slane %v6231_v63, 4 }
 0x483   : > { %v10454_v37 = vld [vmem:[%s14604_s3 + $0x2b0] sm:$0xff]  ;;  %7699 = vmatpush.bf16.msra.mxu1 %v10438_v22 }
 0x484   : > { %v6040_v28 = vadd.f32 %v13565_v50, %v5854_v23  ;;  %v8465_v30 = vpop.permute.xlu2 %8464  ;;  %v8459_v48 = vpop.permute.xlu0 %8458  ;;  %v13622_v50 = vrot.slane %v6227_v25, 5  ;;  %v4850_v23 = vadd.f32 %v13345_v19, %v14867_v34  ;;  %8240 = vmatpush.bf16.msra.mxu0 %v10454_v37  ;;  %v13632_v25 = vpack.c.b16 %v6823_v59, %v6822_v1 }
 0x485   : > { %v13615_v44 = vsel %vm8808_vm1, %v4884_v4, %v8465_v30  ;;  %v13618_v42 = vsel %vm8808_vm1, %v4881_v62, %v8459_v48  ;;  %v5406_v14 = vpop.f32.mrf.mxu2  ;;  %6744 = vmatmul.bf16.gmra.mxu1 %v10377_v12  ;;  %v13620_v47 = vpop.f32.mrf.mxu0  ;;  %v14868_v4 = vld [vmem:[#allocation30_spill] sm:$0xff]  ;;  %v6220_v30 = vrot.slane %v6218_v54, 4  ;;  %v6223_v48 = vrot.slane %v6221_v15, 5 }
 0x486   : > { %14866 = vst [vmem:[#allocation16_spill] sm:$0xff] %v13618_v42  ;;  %v5407_v6 = vadd.f32 %v5406_v14, %v5205_v32  ;;  %v6072_v60 = vadd.f32 %v13345_v19, %v6040_v28  ;;  %v4853_v62 = vadd.f32 %v13345_v19, %v14868_v4  ;;  %v6234_v42 = vor.u32 %v6233_v26, %v13622_v50  ;;  %v10592_v14 = vld [vmem:[#allocation2 + $0x38] sm:$0x1] }
 0x487   : > { %v4882_v28 = vmax.f32 %v4850_v23, 0.0  ;;  %v6237_v34 = vshll.u32 %v10592_v14, 16 }
 0x488   : > { %v6104_v12 = vmax.f32 %v6072_v60, 0.0  ;;  %v4885_v22 = vmax.f32 %v4853_v62, 0.0  ;;  %v6235_v4 = vrot.slane %v6234_v42, 4 }
 0x489   : > { %v5800_v63 = vpop.f32.mrf.mxu3 }
 0x48a   : > { %v5855_v32 = vadd.f32 %v5800_v63, %v5407_v6  ;;  %8488 = vrot.lane.b32.xlu1 %v6104_v12, %s10700_s8  ;;  %6945 = vmatmul.bf16.gmra.mxu2 %v13632_v25  ;;  %v5210_v2 = vpop.f32.mrf.mxu1  ;;  %v6224_v6 = vor.u32 %v6223_v48, %v6220_v30  ;;  %v14870_v12 = vld [vmem:[#allocation23_spill] sm:$0xff]  ;;  %v6239_v63 = vrot.slane %v6237_v34, 5 }
 0x48b   : > { %v10594_v30 = vld [vmem:[#allocation2 + $0x40] sm:$0xf] }
 0x48c   : > { %v6041_v37 = vadd.f32 %v13574_v5, %v5855_v32  ;;  %v8467_v60 = vpop.permute.xlu2 %8466  ;;  %v8461_v59 = vpop.permute.xlu1 %8460  ;;  %v4851_v5 = vadd.f32 %v13345_v19, %v14870_v12  ;;  %v6251_v42 = vshll.u32 %v10594_v30, 16  ;;  %v6255_v48 = vshrl.u32 %v10594_v30, 16 }
 0x48d   : > { %v13639_v1 = vsel %vm8808_vm1, %v4885_v22, %v8467_v60  ;;  %v13642_v15 = vsel %vm8808_vm1, %v4882_v28, %v8461_v59  ;;  %v5409_v54 = vpop.f32.mrf.mxu2  ;;  %v13644_v26 = vpop.f32.mrf.mxu0  ;;  %v10593_v22 = vld [vmem:[#allocation2 + $0x24] sm:$0xff]  ;;  %v6225_v28 = vrot.slane %v6224_v6, 4  ;;  %v6240_v60 = vsel %vm10846_vm4, %v6235_v4, %v6239_v63  ;;  %v6130_v59 = vld [vmem:[#allocation2 + $0x3c] sm:$0xf] }
 0x48e   : > { %14869 = vst [vmem:[#allocation32_spill] sm:$0xff] %v13639_v1  ;;  %7099 = vmatmul.bf16.gmra.mxu3 %v12266_v52  ;;  %v5410_v23 = vadd.f32 %v5409_v54, %v5208_v21  ;;  %v6073_v62 = vadd.f32 %v13345_v19, %v6041_v37  ;;  %v4883_v37 = vmax.f32 %v4851_v5, 0.0  ;;  %v10378_v54 = vld [vmem:[#allocation2 + $0x30] sm:$0xff]  ;;  %v6242_v12 = vshrl.u32 %v6130_v59, 16 }
 0x48f   : > { %v6230_v19 = vsel %vm10846_vm4, %v6225_v28, %v13622_v50  ;;  %v6257_v5 = vrot.slane %v6255_v48, 4  ;;  %v13667_v50 = vld [vmem:[%s14605_s4] ss:$0 sm:$0xff]  ;;  %v10596_v48 = vld [vmem:[#allocation2 + $0x44] sm:$0x1] }
 0x490   : > { %v6105_v32 = vmax.f32 %v6073_v62, 0.0  ;;  %7290 = vmatmul.bf16.gmra.mxu0 %v10593_v22  ;;  %v6825_v62 = vunpack.c.l.b16 %v6240_v60  ;;  %v13662_v22 = vrot.slane %v6251_v42, 5 }
 0x491   : > { %v5803_v14 = vpop.f32.mrf.mxu3 }
 0x492   : > { %v5856_v7 = vadd.f32 %v5803_v14, %v5410_v23  ;;  %8490 = vrot.lane.b32.xlu2 %v6105_v32, %s10700_s8  ;;  %v5213_v21 = vpop.f32.mrf.mxu1  ;;  %v6245_v32 = vshll.u32 %v6130_v59, 16  ;;  %v6258_v59 = vor.u32 %v6257_v5, %v13662_v22  ;;  %v10429_v5 = vld [vmem:[%s14604_s3 + $0x28] sm:$0xff] }
 0x493   : > { %7901 = vmatpush.bf16.msra.mxu2 %v10429_v5 }
 0x494   : > { %v6042_v34 = vadd.f32 %v13590_v3, %v5856_v7  ;;  %v8463_v6 = vpop.permute.xlu1 %8462  ;;  %v6824_v3 = vunpack.c.l.b16 %v6230_v19 }
 0x495   : > { %v13658_v4 = vsel %vm8808_vm1, %v4883_v37, %v8463_v6  ;;  %v5411_v63 = vpop.f32.mrf.mxu2  ;;  %6749 = vmatmul.bf16.gmra.mxu1 %v10378_v54  ;;  %v13660_v23 = vpop.f32.mrf.mxu0  ;;  %v6244_v37 = vrot.slane %v6242_v12, 4  ;;  %v6247_v54 = vrot.slane %v6245_v32, 5  ;;  %v6261_v6 = vshll.u32 %v10596_v48, 16  ;;  %v10598_v48 = vld [vmem:[#allocation2 + $0x4c] sm:$0xf] }
 0x496   : > { %v5412_v14 = vadd.f32 %v5411_v63, %v5210_v2  ;;  %v6074_v7 = vadd.f32 %v13667_v50, %v6042_v34  ;;  %v13670_v60 = vpack.c.b16 %v6825_v62, %v6824_v3  ;;  %v14871_v3 = vld [vmem:[#allocation6_spill] sm:$0xff] }
 0x497   : > { %v6248_v62 = vor.u32 %v6247_v54, %v6244_v37  ;;  %v10597_v37 = vld [vmem:[#allocation2 + $0x30] sm:$0xff] }
 0x498   : > { %v6106_v28 = vmax.f32 %v6074_v7, 0.0  ;;  %v6259_v7 = vrot.slane %v6258_v59, 4 }
 0x499   : > { %v5805_v30 = vpop.f32.mrf.mxu3 }
 0x49a   : > { %v5857_v42 = vadd.f32 %v5805_v30, %v5412_v14  ;;  %8492 = vrot.lane.b32.xlu0 %v6106_v28, %s10700_s8  ;;  %6950 = vmatmul.bf16.gmra.mxu2 %v13670_v60  ;;  %v5215_v2 = vpop.f32.mrf.mxu1  ;;  %v10445_v14 = vld [vmem:[%s14604_s3 + $0x228] sm:$0xff]  ;;  %v6263_v28 = vrot.slane %v6261_v6, 5  ;;  %v10379_v6 = vld [vmem:[#allocation2 + $0x3c] sm:$0xff] }
 0x49b   : > { %8055 = vmatpush.bf16.msra.mxu3 %v10445_v14 }
 0x49c   : > { %v6043_v63 = vadd.f32 %v13620_v47, %v5857_v42  ;;  %v4856_v47 = vadd.f32 %v13667_v50, %v14871_v3  ;;  %v6264_v59 = vsel %vm10846_vm4, %v6259_v7, %v6263_v28  ;;  %v6133_v42 = vld [vmem:[#allocation2 + $0x48] sm:$0xf] }
 0x49d   : > { %v5414_v34 = vpop.f32.mrf.mxu2  ;;  %v13676_v19 = vpop.f32.mrf.mxu0  ;;  %v6266_v7 = vshrl.u32 %v6133_v42, 16  ;;  %v10437_v28 = vld [vmem:[%s14604_s3 + $0xa8] sm:$0xff] }
 0x49e   : > { %7104 = vmatmul.bf16.gmra.mxu3 %v12348_v49  ;;  %v5415_v12 = vadd.f32 %v5414_v34, %v5213_v21  ;;  %v6075_v32 = vadd.f32 %v13667_v50, %v6043_v63  ;;  %v6249_v21 = vrot.slane %v6248_v62, 4  ;;  %v6275_v63 = vshll.u32 %v10598_v48, 16  ;;  %7700 = vmatpush.bf16.msra.mxu1 %v10437_v28 }
 0x49f   : > { %v6279_v34 = vshrl.u32 %v10598_v48, 16  ;;  %v4888_v3 = vmax.f32 %v4856_v47, 0.0  ;;  %v14873_v48 = vld [vmem:[#allocation36_spill] sm:$0xff] }
 0x4a0   : > { %v6107_v30 = vmax.f32 %v6075_v32, 0.0  ;;  %7295 = vmatmul.bf16.gmra.mxu0 %v10597_v37  ;;  %v6254_v32 = vsel %vm10846_vm4, %v6249_v21, %v13662_v22  ;;  %v6827_v37 = vunpack.c.l.b16 %v6264_v59 }
 0x4a1   : > { %v5808_v54 = vpop.f32.mrf.mxu3  ;;  %v6281_v22 = vrot.slane %v6279_v34, 4  ;;  %v6826_v59 = vunpack.c.l.b16 %v6254_v32 }
 0x4a2   : > { %v5858_v45 = vadd.f32 %v5808_v54, %v5415_v12  ;;  %8494 = vrot.lane.b32.xlu1 %v6107_v30, %s10700_s8  ;;  %v5218_v29 = vpop.f32.mrf.mxu1  ;;  %v6269_v30 = vshll.u32 %v6133_v42, 16  ;;  %v13703_v54 = vrot.slane %v6275_v63, 5  ;;  %v6268_v63 = vrot.slane %v6266_v7, 4 }
 0x4a4   : > { %v6044_v62 = vadd.f32 %v13644_v26, %v5858_v45  ;;  %v8473_v5 = vpop.permute.xlu2 %8472  ;;  %v10453_v45 = vld [vmem:[%s14604_s3 + $0x2a8] sm:$0xff]  ;;  %v6271_v46 = vrot.slane %v6269_v30, 5  ;;  %v6282_v34 = vor.u32 %v6281_v22, %v13703_v54 }
 0x4a5   : > { %v13699_v12 = vsel %vm8808_vm1, %v4888_v3, %v8473_v5  ;;  %v5416_v14 = vpop.f32.mrf.mxu2  ;;  %6754 = vmatmul.bf16.gmra.mxu1 %v10379_v6  ;;  %v13701_v47 = vpop.f32.mrf.mxu0  ;;  %v4854_v3 = vadd.f32 %v13667_v50, %v14873_v48  ;;  %8241 = vmatpush.bf16.msra.mxu0 %v10453_v45  ;;  %v13711_v5 = vpack.c.b16 %v6827_v37, %v6826_v59  ;;  %v14875_v48 = vld [vmem:[#allocation33_spill] sm:$0xff] }
 0x4a6   : > { %14872 = vst [vmem:[#allocation39_spill] sm:$0xff] %v13699_v12  ;;  %v5417_v26 = vadd.f32 %v5416_v14, %v5215_v2  ;;  %v6076_v21 = vadd.f32 %v13667_v50, %v6044_v62  ;;  %v10599_v62 = vld [vmem:[#allocation2 + $0x50] sm:$0x1]  ;;  %v6272_v30 = vor.u32 %v6271_v46, %v6268_v63  ;;  %v6283_v22 = vrot.slane %v6282_v34, 4  ;;  %v10601_v46 = vld [vmem:[#allocation2 + $0x58] sm:$0xf] }
 0x4a7   : > { %14874 = vst [vmem:[#allocation29_spill] sm:$0xff] %v13711_v5  ;;  %v4886_v32 = vmax.f32 %v4854_v3, 0.0  ;;  %v6285_v28 = vshll.u32 %v10599_v62, 16  ;;  %v4855_v3 = vadd.f32 %v13667_v50, %v14875_v48  ;;  %v6299_v63 = vshll.u32 %v10601_v46, 16 }
 0x4a8   : > { %v6108_v6 = vmax.f32 %v6076_v21, 0.0  ;;  %v6303_v34 = vshrl.u32 %v10601_v46, 16 }
 0x4a9   : > { %v5810_v42 = vpop.f32.mrf.mxu3 }
 0x4aa   : > { %v5859_v53 = vadd.f32 %v5810_v42, %v5417_v26  ;;  %8496 = vrot.lane.b32.xlu2 %v6108_v6, %s10700_s8  ;;  %6955 = vmatmul.bf16.gmra.mxu2 %v13711_v5  ;;  %v5220_v2 = vpop.f32.mrf.mxu1  ;;  %v6287_v6 = vrot.slane %v6285_v28, 5 }
 0x4ac   : > { %v6045_v14 = vadd.f32 %v13660_v23, %v5859_v53  ;;  %v8469_v45 = vpop.permute.xlu0 %8468  ;;  %v10600_v53 = vld [vmem:[#allocation2 + $0x3c] sm:$0xff]  ;;  %v6288_v62 = vsel %vm10846_vm4, %v6283_v22, %v6287_v6 }
 0x4ad   : > { %v13718_v37 = vsel %vm8808_vm1, %v4886_v32, %v8469_v45  ;;  %v5419_v21 = vpop.f32.mrf.mxu2  ;;  %v13720_v7 = vpop.f32.mrf.mxu0  ;;  %v6273_v32 = vrot.slane %v6272_v30, 4  ;;  %v6136_v45 = vld [vmem:[#allocation2 + $0x54] sm:$0xf]  ;;  %v6829_v48 = vunpack.c.l.b16 %v6288_v62 }
 0x4ae   : > { %7109 = vmatmul.bf16.gmra.mxu3 %v12397_v8  ;;  %v5420_v26 = vadd.f32 %v5419_v21, %v5218_v29  ;;  %v6077_v59 = vadd.f32 %v13667_v50, %v6045_v14  ;;  %v4887_v14 = vmax.f32 %v4855_v3, 0.0  ;;  %v10380_v21 = vld [vmem:[#allocation2 + $0x48] sm:$0xff]  ;;  %v6305_v3 = vrot.slane %v6303_v34, 4 }
 0x4af   : > { %v6278_v28 = vsel %vm10846_vm4, %v6273_v32, %v13703_v54  ;;  %v14877_v32 = vld [vmem:[#allocation40_spill] sm:$0xff] }
 0x4b0   : > { %v6109_v42 = vmax.f32 %v6077_v59, 0.0  ;;  %7300 = vmatmul.bf16.gmra.mxu0 %v10600_v53  ;;  %v6290_v53 = vshrl.u32 %v6136_v45, 16  ;;  %v6828_v54 = vunpack.c.l.b16 %v6278_v28 }
 0x4b1   : > { %v5813_v23 = vpop.f32.mrf.mxu3 }
 0x4b2   : > { %v5860_v12 = vadd.f32 %v5813_v23, %v5420_v26  ;;  %8498 = vrot.lane.b32.xlu0 %v6109_v42, %s10700_s8  ;;  %v5223_v29 = vpop.f32.mrf.mxu1  ;;  %v6293_v42 = vshll.u32 %v6136_v45, 16  ;;  %v13738_v23 = vrot.slane %v6299_v63, 5  ;;  %v13743_v62 = vpack.c.b16 %v6829_v48, %v6828_v54  ;;  %v10602_v63 = vld [vmem:[#allocation2 + $0x5c] sm:$0x1]  ;;  %v10428_v54 = vld [vmem:[%s14604_s3 + $0x20] sm:$0xff] }
 0x4b3   : > { %v6309_v34 = vshll.u32 %v10602_v63, 16  ;;  %7902 = vmatpush.bf16.msra.mxu2 %v10428_v54 }
 0x4b4   : > { %v6046_v59 = vadd.f32 %v13676_v19, %v5860_v12  ;;  %v8471_v30 = vpop.permute.xlu1 %8470  ;;  %v4859_v19 = vadd.f32 %v13667_v50, %v14877_v32  ;;  %14878 = vst [vmem:[#allocation23_spill] sm:$0xff] %v13743_v62 }
 0x4b5   : > { %v13734_v22 = vsel %vm8808_vm1, %v4887_v14, %v8471_v30  ;;  %v5421_v6 = vpop.f32.mrf.mxu2  ;;  %6759 = vmatmul.bf16.gmra.mxu1 %v10380_v21  ;;  %v13736_v26 = vpop.f32.mrf.mxu0  ;;  %v6292_v30 = vrot.slane %v6290_v53, 4  ;;  %v6306_v21 = vor.u32 %v6305_v3, %v13738_v23 }
 0x4b6   : > { %14876 = vst [vmem:[#allocation30_spill] sm:$0xff] %v13734_v22  ;;  %v5422_v46 = vadd.f32 %v5421_v6, %v5220_v2  ;;  %v6078_v5 = vadd.f32 %v13667_v50, %v6046_v59  ;;  %v6295_v22 = vrot.slane %v6293_v42, 5  ;;  %v4891_v45 = vmax.f32 %v4859_v19, 0.0 }
 0x4b7   : > { %v6307_v42 = vrot.slane %v6306_v21, 4  ;;  %v6311_v19 = vrot.slane %v6309_v34, 5  ;;  %v6139_v21 = vld [vmem:[#allocation2 + $0x60] sm:$0xf]  ;;  %v10381_v34 = vld [vmem:[#allocation2 + $0x54] sm:$0xff] }
 0x4b8   : > { %v6110_v12 = vmax.f32 %v6078_v5, 0.0  ;;  %v6296_v6 = vor.u32 %v6295_v22, %v6292_v30  ;;  %v10603_v22 = vld [vmem:[#allocation2 + $0x48] sm:$0xff] }
 0x4b9   : > { %v5815_v14 = vpop.f32.mrf.mxu3  ;;  %v6312_v30 = vsel %vm10846_vm4, %v6307_v42, %v6311_v19  ;;  %v6314_v42 = vshrl.u32 %v6139_v21, 16  ;;  %v10436_v19 = vld [vmem:[%s14604_s3 + $0xa0] sm:$0xff] }
 0x4ba   : > { %v5861_v1 = vadd.f32 %v5815_v14, %v5422_v46  ;;  %8500 = vrot.lane.b32.xlu1 %v6110_v12, %s10700_s8  ;;  %6960 = vmatmul.bf16.gmra.mxu2 %v13743_v62  ;;  %v5225_v2 = vpop.f32.mrf.mxu1 }
 0x4bb   : > { %7701 = vmatpush.bf16.msra.mxu1 %v10436_v19 }
 0x4bc   : > { %v6047_v28 = vadd.f32 %v13701_v47, %v5861_v1  ;;  %v8479_v59 = vpop.permute.xlu2 %8478  ;;  %v10444_v1 = vld [vmem:[%s14604_s3 + $0x220] sm:$0xff]  ;;  %v14880_v47 = vld [vmem:[#allocation37_spill] sm:$0xff] }
 0x4bd   : > { %v13750_v5 = vsel %vm8808_vm1, %v4891_v45, %v8479_v59  ;;  %v5424_v48 = vpop.f32.mrf.mxu2  ;;  %v13752_v53 = vpop.f32.mrf.mxu0  ;;  %v4857_v32 = vadd.f32 %v13667_v50, %v14880_v47  ;;  %v10604_v45 = vld [vmem:[#allocation2 + $0x64] sm:$0xf]  ;;  %8056 = vmatpush.bf16.msra.mxu3 %v10444_v1 }
 0x4be   : > { %14879 = vst [vmem:[#allocation6_spill] sm:$0xff] %v13750_v5  ;;  %7114 = vmatmul.bf16.gmra.mxu3 %v12478_v57  ;;  %v5425_v3 = vadd.f32 %v5424_v48, %v5223_v29  ;;  %v6079_v46 = vadd.f32 %v13667_v50, %v6047_v28  ;;  %v6297_v29 = vrot.slane %v6296_v6, 4  ;;  %v6323_v63 = vshll.u32 %v10604_v45, 16 }
 0x4bf   : > { %v6327_v28 = vshrl.u32 %v10604_v45, 16  ;;  %v4889_v47 = vmax.f32 %v4857_v32, 0.0 }
 0x4c0   : > { %v6111_v12 = vmax.f32 %v6079_v46, 0.0  ;;  %7305 = vmatmul.bf16.gmra.mxu0 %v10603_v22  ;;  %v6302_v46 = vsel %vm10846_vm4, %v6297_v29, %v13738_v23  ;;  %v6831_v22 = vunpack.c.l.b16 %v6312_v30 }
 0x4c1   : > { %v5818_v14 = vpop.f32.mrf.mxu3  ;;  %v6329_v23 = vrot.slane %v6327_v28, 4  ;;  %v6830_v45 = vunpack.c.l.b16 %v6302_v46 }
 0x4c2   : > { %v5862_v59 = vadd.f32 %v5818_v14, %v5425_v3  ;;  %8502 = vrot.lane.b32.xlu2 %v6111_v12, %s10700_s8  ;;  %v5228_v48 = vpop.f32.mrf.mxu1  ;;  %v6317_v12 = vshll.u32 %v6139_v21, 16  ;;  %v13779_v14 = vrot.slane %v6323_v63, 5  ;;  %v6316_v63 = vrot.slane %v6314_v42, 4 }
 0x4c4   : > { %v6048_v6 = vadd.f32 %v13720_v7, %v5862_v59  ;;  %v8475_v54 = vpop.permute.xlu0 %8474  ;;  %v10452_v7 = vld [vmem:[%s14604_s3 + $0x2a0] sm:$0xff]  ;;  %v14881_v59 = vld [vmem:[#allocation8_spill] sm:$0xff]  ;;  %v6319_v5 = vrot.slane %v6317_v12, 5  ;;  %v6330_v28 = vor.u32 %v6329_v23, %v13779_v14 }
 0x4c5   : > { %v13775_v3 = vsel %vm8808_vm1, %v4889_v47, %v8475_v54  ;;  %v5426_v1 = vpop.f32.mrf.mxu2  ;;  %6764 = vmatmul.bf16.gmra.mxu1 %v10381_v34  ;;  %v13777_v32 = vpop.f32.mrf.mxu0  ;;  %v4858_v47 = vadd.f32 %v13667_v50, %v14881_v59  ;;  %8242 = vmatpush.bf16.msra.mxu0 %v10452_v7  ;;  %v13787_v54 = vpack.c.b16 %v6831_v22, %v6830_v45  ;;  %v14884_v59 = vld [vmem:[#allocation9_spill] sm:$0xff] }
 0x4c6   : > { %v5427_v29 = vadd.f32 %v5426_v1, %v5225_v2  ;;  %v6080_v30 = vadd.f32 %v13667_v50, %v6048_v6  ;;  %v10605_v6 = vld [vmem:[#allocation2 + $0x68] sm:$0x1]  ;;  %v6320_v12 = vor.u32 %v6319_v5, %v6316_v63  ;;  %v6331_v23 = vrot.slane %v6330_v28, 4  ;;  %v10607_v5 = vld [vmem:[#allocation2 + $0x70] sm:$0xf] }
 0x4c7   : > { %14882 = vst [vmem:[#allocation36_spill] sm:$0xff] %v13787_v54  ;;  %v4890_v46 = vmax.f32 %v4858_v47, 0.0  ;;  %v6333_v19 = vshll.u32 %v10605_v6, 16  ;;  %v4862_v47 = vadd.f32 %v13667_v50, %v14884_v59  ;;  %v6347_v63 = vshll.u32 %v10607_v5, 16 }
 0x4c8   : > { %v6112_v34 = vmax.f32 %v6080_v30, 0.0  ;;  %v6351_v28 = vshrl.u32 %v10607_v5, 16 }
 0x4c9   : > { %v5820_v21 = vpop.f32.mrf.mxu3 }
 0x4ca   : > { %v5863_v62 = vadd.f32 %v5820_v21, %v5427_v29  ;;  %8504 = vrot.lane.b32.xlu0 %v6112_v34, %s10700_s8  ;;  %6965 = vmatmul.bf16.gmra.mxu2 %v13787_v54  ;;  %v5230_v2 = vpop.f32.mrf.mxu1  ;;  %v6335_v34 = vrot.slane %v6333_v19, 5 }
 0x4cc   : > { %v6049_v1 = vadd.f32 %v13736_v26, %v5863_v62  ;;  %v8477_v7 = vpop.permute.xlu1 %8476  ;;  %v10606_v26 = vld [vmem:[#allocation2 + $0x54] sm:$0xff]  ;;  %v6336_v6 = vsel %vm10846_vm4, %v6331_v23, %v6335_v34 }
 0x4cd   : > { %v13794_v22 = vsel %vm8808_vm1, %v4890_v46, %v8477_v7  ;;  %v5429_v30 = vpop.f32.mrf.mxu2  ;;  %v13796_v42 = vpop.f32.mrf.mxu0  ;;  %v6321_v46 = vrot.slane %v6320_v12, 4  ;;  %v6142_v7 = vld [vmem:[#allocation2 + $0x6c] sm:$0xf]  ;;  %v6833_v59 = vunpack.c.l.b16 %v6336_v6 }
 0x4ce   : > { %14883 = vst [vmem:[#allocation33_spill] sm:$0xff] %v13794_v22  ;;  %7119 = vmatmul.bf16.gmra.mxu3 %v12537_v20  ;;  %v5430_v29 = vadd.f32 %v5429_v30, %v5228_v48  ;;  %v6081_v45 = vadd.f32 %v13667_v50, %v6049_v1  ;;  %v4894_v1 = vmax.f32 %v4862_v47, 0.0  ;;  %v10382_v30 = vld [vmem:[#allocation2 + $0x60] sm:$0xff]  ;;  %v6353_v47 = vrot.slane %v6351_v28, 4 }
 0x4cf   : > { %v6326_v19 = vsel %vm10846_vm4, %v6321_v46, %v13779_v14  ;;  %v14886_v46 = vld [vmem:[#allocation17_spill] sm:$0xff] }
 0x4d0   : > { %v6113_v21 = vmax.f32 %v6081_v45, 0.0  ;;  %7310 = vmatmul.bf16.gmra.mxu0 %v10606_v26  ;;  %v6338_v26 = vshrl.u32 %v6142_v7, 16  ;;  %v6832_v14 = vunpack.c.l.b16 %v6326_v19 }
 0x4d1   : > { %v5823_v62 = vpop.f32.mrf.mxu3 }
 0x4d2   : > { %v5864_v22 = vadd.f32 %v5823_v62, %v5430_v29  ;;  %8506 = vrot.lane.b32.xlu1 %v6113_v21, %s10700_s8  ;;  %v5233_v48 = vpop.f32.mrf.mxu1  ;;  %v6341_v21 = vshll.u32 %v6142_v7, 16  ;;  %v13814_v62 = vrot.slane %v6347_v63, 5  ;;  %v13819_v6 = vpack.c.b16 %v6833_v59, %v6832_v14  ;;  %v10608_v63 = vld [vmem:[#allocation2 + $0x74] sm:$0x1]  ;;  %v10427_v14 = vld [vmem:[%s14604_s3 + $0x18] sm:$0xff] }
 0x4d3   : > { %v6357_v28 = vshll.u32 %v10608_v63, 16  ;;  %7903 = vmatpush.bf16.msra.mxu2 %v10427_v14 }
 0x4d4   : > { %v6050_v45 = vadd.f32 %v13752_v53, %v5864_v22  ;;  %v8485_v12 = vpop.permute.xlu2 %8484  ;;  %v4860_v53 = vadd.f32 %v13667_v50, %v14886_v46 }
 0x4d5   : > { %v13810_v23 = vsel %vm8808_vm1, %v4894_v1, %v8485_v12  ;;  %v5431_v34 = vpop.f32.mrf.mxu2  ;;  %6769 = vmatmul.bf16.gmra.mxu1 %v10382_v30  ;;  %v13812_v29 = vpop.f32.mrf.mxu0  ;;  %v6340_v12 = vrot.slane %v6338_v26, 4  ;;  %v6354_v30 = vor.u32 %v6353_v47, %v13814_v62 }
 0x4d6   : > { %14885 = vst [vmem:[#allocation40_spill] sm:$0xff] %v13810_v23  ;;  %v5432_v5 = vadd.f32 %v5431_v34, %v5230_v2  ;;  %v6082_v54 = vadd.f32 %v13667_v50, %v6050_v45  ;;  %v6343_v23 = vrot.slane %v6341_v21, 5  ;;  %v4892_v7 = vmax.f32 %v4860_v53, 0.0 }
 0x4d7   : > { %v6355_v21 = vrot.slane %v6354_v30, 4  ;;  %v6359_v53 = vrot.slane %v6357_v28, 5  ;;  %v6145_v30 = vld [vmem:[#allocation2 + $0x78] sm:$0xf]  ;;  %v10383_v28 = vld [vmem:[#allocation2 + $0x6c] sm:$0xff] }
 0x4d8   : > { %v6114_v22 = vmax.f32 %v6082_v54, 0.0  ;;  %v6344_v34 = vor.u32 %v6343_v23, %v6340_v12  ;;  %v10609_v23 = vld [vmem:[#allocation2 + $0x60] sm:$0xff] }
 0x4d9   : > { %v5825_v1 = vpop.f32.mrf.mxu3  ;;  %v6360_v12 = vsel %vm10846_vm4, %v6355_v21, %v6359_v53  ;;  %v6362_v21 = vshrl.u32 %v6145_v30, 16  ;;  %v10435_v53 = vld [vmem:[%s14604_s3 + $0x98] sm:$0xff] }
 0x4da   : > { %v5865_v20 = vadd.f32 %v5825_v1, %v5432_v5  ;;  %8508 = vrot.lane.b32.xlu2 %v6114_v22, %s10700_s8  ;;  %6970 = vmatmul.bf16.gmra.mxu2 %v13819_v6  ;;  %v5235_v2 = vpop.f32.mrf.mxu1 }
 0x4db   : > { %7702 = vmatpush.bf16.msra.mxu1 %v10435_v53 }
 0x4dc   : > { %v6051_v19 = vadd.f32 %v13777_v32, %v5865_v20  ;;  %v8481_v45 = vpop.permute.xlu0 %8480  ;;  %v10443_v20 = vld [vmem:[%s14604_s3 + $0x218] sm:$0xff]  ;;  %v14887_v32 = vld [vmem:[#allocation11_spill] sm:$0xff] }
 0x4dd   : > { %v13826_v54 = vsel %vm8808_vm1, %v4892_v7, %v8481_v45  ;;  %v5434_v59 = vpop.f32.mrf.mxu2  ;;  %v13828_v26 = vpop.f32.mrf.mxu0  ;;  %v4861_v46 = vadd.f32 %v13667_v50, %v14887_v32  ;;  %v10610_v7 = vld [vmem:[#allocation2 + $0x7c] sm:$0xf]  ;;  %8057 = vmatpush.bf16.msra.mxu3 %v10443_v20 }
 0x4de   : > { %7124 = vmatmul.bf16.gmra.mxu3 %v12600_v55  ;;  %v5435_v47 = vadd.f32 %v5434_v59, %v5233_v48  ;;  %v6083_v5 = vadd.f32 %v13667_v50, %v6051_v19  ;;  %v6345_v48 = vrot.slane %v6344_v34, 4  ;;  %v6371_v63 = vshll.u32 %v10610_v7, 16 }
 0x4df   : > { %v6375_v19 = vshrl.u32 %v10610_v7, 16  ;;  %v4893_v32 = vmax.f32 %v4861_v46, 0.0 }
 0x4e0   : > { %v6115_v22 = vmax.f32 %v6083_v5, 0.0  ;;  %7315 = vmatmul.bf16.gmra.mxu0 %v10609_v23  ;;  %v6350_v5 = vsel %vm10846_vm4, %v6345_v48, %v13814_v62  ;;  %v6835_v23 = vunpack.c.l.b16 %v6360_v12 }
 0x4e1   : > { %v5828_v1 = vpop.f32.mrf.mxu3  ;;  %v6377_v62 = vrot.slane %v6375_v19, 4  ;;  %v6834_v7 = vunpack.c.l.b16 %v6350_v5 }
 0x4e2   : > { %v5866_v45 = vadd.f32 %v5828_v1, %v5435_v47  ;;  %8510 = vrot.lane.b32.xlu0 %v6115_v22, %s10700_s8  ;;  %v5238_v59 = vpop.f32.mrf.mxu1  ;;  %v6365_v22 = vshll.u32 %v6145_v30, 16  ;;  %v13855_v1 = vrot.slane %v6371_v63, 5  ;;  %v6364_v63 = vrot.slane %v6362_v21, 4 }
 0x4e4   : > { %v6052_v34 = vadd.f32 %v13796_v42, %v5866_v45  ;;  %v8483_v14 = vpop.permute.xlu1 %8482  ;;  %v10451_v42 = vld [vmem:[%s14604_s3 + $0x298] sm:$0xff]  ;;  %v4865_v45 = vadd.f32 %v13667_v50, %v13082_v9  ;;  %v6378_v19 = vor.u32 %v6377_v62, %v13855_v1 }
 0x4e5   : > { %v13851_v47 = vsel %vm8808_vm1, %v4893_v32, %v8483_v14  ;;  %v5436_v20 = vpop.f32.mrf.mxu2  ;;  %6774 = vmatmul.bf16.gmra.mxu1 %v10383_v28  ;;  %v13853_v46 = vpop.f32.mrf.mxu0  ;;  %8243 = vmatpush.bf16.msra.mxu0 %v10451_v42  ;;  %v13863_v28 = vpack.c.b16 %v6835_v23, %v6834_v7  ;;  %v6367_v14 = vrot.slane %v6365_v22, 5  ;;  %v14891_v7 = vld [vmem:[#allocation43_spill] sm:$0xff] }
 0x4e6   : > { %14888 = vst [vmem:[#allocation37_spill] sm:$0xff] %v13851_v47  ;;  %v5437_v48 = vadd.f32 %v5436_v20, %v5235_v2  ;;  %v6084_v12 = vadd.f32 %v13667_v50, %v6052_v34  ;;  %v4897_v5 = vmax.f32 %v4865_v45, 0.0  ;;  %v10611_v34 = vld [vmem:[#allocation2 + $0x80] sm:$0x1]  ;;  %v6379_v62 = vrot.slane %v6378_v19, 4 }
 0x4e7   : > { %14889 = vst [vmem:[#allocation8_spill] sm:$0xff] %v13863_v28  ;;  %v6381_v53 = vshll.u32 %v10611_v34, 16  ;;  %v6368_v22 = vor.u32 %v6367_v14, %v6364_v63  ;;  %v4863_v45 = vadd.f32 %v13667_v50, %v14891_v7  ;;  %v10613_v63 = vld [vmem:[#allocation2 + $0x88] sm:$0xf] }
 0x4e8   : > { %v6116_v32 = vmax.f32 %v6084_v12, 0.0  ;;  %v6395_v14 = vshll.u32 %v10613_v63, 16  ;;  %v6399_v19 = vshrl.u32 %v10613_v63, 16 }
 0x4e9   : > { %v5830_v30 = vpop.f32.mrf.mxu3 }
 0x4ea   : > { %v5867_v47 = vadd.f32 %v5830_v30, %v5437_v48  ;;  %8512 = vrot.lane.b32.xlu1 %v6116_v32, %s10700_s8  ;;  %6975 = vmatmul.bf16.gmra.mxu2 %v13863_v28  ;;  %v5240_v2 = vpop.f32.mrf.mxu1  ;;  %v6383_v32 = vrot.slane %v6381_v53, 5 }
 0x4ec   : > { %v6053_v9 = vadd.f32 %v13812_v29, %v5867_v47  ;;  %v8491_v20 = vpop.permute.xlu2 %8490  ;;  %v10612_v29 = vld [vmem:[#allocation2 + $0x6c] sm:$0xff]  ;;  %v6384_v34 = vsel %vm10846_vm4, %v6379_v62, %v6383_v32 }
 0x4ed   : > { %v13870_v23 = vsel %vm8808_vm1, %v4897_v5, %v8491_v20  ;;  %v5439_v42 = vpop.f32.mrf.mxu2  ;;  %v13872_v21 = vpop.f32.mrf.mxu0  ;;  %v6369_v5 = vrot.slane %v6368_v22, 4  ;;  %v6148_v20 = vld [vmem:[#allocation2 + $0x84] sm:$0xf]  ;;  %v6837_v7 = vunpack.c.l.b16 %v6384_v34 }
 0x4ee   : > { %14890 = vst [vmem:[#allocation9_spill] sm:$0xff] %v13870_v23  ;;  %7129 = vmatmul.bf16.gmra.mxu3 %v12653_v36  ;;  %v5440_v48 = vadd.f32 %v5439_v42, %v5238_v59  ;;  %v6085_v12 = vadd.f32 %v13667_v50, %v6053_v9  ;;  %v4895_v9 = vmax.f32 %v4863_v45, 0.0  ;;  %v10384_v42 = vld [vmem:[#allocation2 + $0x78] sm:$0xff]  ;;  %v6401_v45 = vrot.slane %v6399_v19, 4 }
 0x4ef   : > { %v6374_v53 = vsel %vm10846_vm4, %v6369_v5, %v13855_v1 }
 0x4f0   : > { %v6117_v30 = vmax.f32 %v6085_v12, 0.0  ;;  %7320 = vmatmul.bf16.gmra.mxu0 %v10612_v29  ;;  %v6386_v29 = vshrl.u32 %v6148_v20, 16  ;;  %v6836_v1 = vunpack.c.l.b16 %v6374_v53 }
 0x4f1   : > { %v5833_v47 = vpop.f32.mrf.mxu3 }
 0x4f2   : > { %v5868_v23 = vadd.f32 %v5833_v47, %v5440_v48  ;;  %8514 = vrot.lane.b32.xlu2 %v6117_v30, %s10700_s8  ;;  %v6740_v59 = vpop.f32.mrf.mxu1  ;;  %v6389_v30 = vshll.u32 %v6148_v20, 16  ;;  %v13890_v47 = vrot.slane %v6395_v14, 5  ;;  %v13895_v5 = vpack.c.b16 %v6837_v7, %v6836_v1  ;;  %v10614_v14 = vld [vmem:[#allocation2 + $0x8c] sm:$0x1] }
 0x4f3   : > { %v6405_v19 = vshll.u32 %v10614_v14, 16 }
 0x4f4   : > { %v6054_v12 = vadd.f32 %v13828_v26, %v5868_v23  ;;  %v8487_v22 = vpop.permute.xlu0 %8486  ;;  %v4864_v26 = vadd.f32 %v13667_v50, %v13055_v61 }
 0x4f5   : > { %v13886_v62 = vsel %vm8808_vm1, %v4895_v9, %v8487_v22  ;;  %v5441_v32 = vpop.f32.mrf.mxu2  ;;  %6779 = vmatmul.bf16.gmra.mxu1 %v10384_v42  ;;  %v13888_v48 = vpop.f32.mrf.mxu0  ;;  %v6388_v9 = vrot.slane %v6386_v29, 4  ;;  %v6391_v22 = vrot.slane %v6389_v30, 5  ;;  %v6402_v42 = vor.u32 %v6401_v45, %v13890_v47 }
 0x4f6   : > { %v5442_v63 = vadd.f32 %v5441_v32, %v5240_v2  ;;  %v6086_v28 = vadd.f32 %v13667_v50, %v6054_v12  ;;  %v4896_v20 = vmax.f32 %v4864_v26, 0.0  ;;  %v6407_v1 = vrot.slane %v6405_v19, 5  ;;  %v10385_v19 = vld [vmem:[#allocation2 + $0x84] sm:$0xff] }
 0x4f7   : > { %v6392_v29 = vor.u32 %v6391_v22, %v6388_v9  ;;  %v6403_v32 = vrot.slane %v6402_v42, 4  ;;  %v6151_v22 = vld [vmem:[#allocation2 + $0x90] sm:$0xf]  ;;  %v10616_v42 = vld [vmem:[#allocation2 + $0x94] sm:$0xf] }
 0x4f8   : > { %v6118_v23 = vmax.f32 %v6086_v28, 0.0  ;;  %v6423_v14 = vshrl.u32 %v10616_v42, 16 }
 0x4f9   : > { %v5835_v34 = vpop.f32.mrf.mxu3  ;;  %v6408_v9 = vsel %vm10846_vm4, %v6403_v32, %v6407_v1  ;;  %v6410_v32 = vshrl.u32 %v6151_v22, 16  ;;  %v10434_v1 = vld [vmem:[%s14604_s3 + $0x90] sm:$0xff] }
 0x4fa   : > { %v5869_v36 = vadd.f32 %v5835_v34, %v5442_v63  ;;  %8516 = vrot.lane.b32.xlu0 %v6118_v23, %s10700_s8  ;;  %6980 = vmatmul.bf16.gmra.mxu2 %v13895_v5  ;;  %v6742_v2 = vpop.f32.mrf.mxu1  ;;  %v10426_v63 = vld [vmem:[%s14604_s3 + $0x10] sm:$0xff]  ;;  %v10615_v23 = vld [vmem:[#allocation2 + $0x78] sm:$0xff] }
 0x4fb   : > { %7904 = vmatpush.bf16.msra.mxu2 %v10426_v63  ;;  %v6839_v63 = vunpack.c.l.b16 %v6408_v9  ;;  %7703 = vmatpush.bf16.msra.mxu1 %v10434_v1 }
 0x4fc   : > { %v6055_v53 = vadd.f32 %v13853_v46, %v5869_v36  ;;  %v8489_v61 = vpop.permute.xlu1 %8488  ;;  %v10442_v36 = vld [vmem:[%s14604_s3 + $0x210] sm:$0xff]  ;;  %v4868_v46 = vadd.f32 %v13667_v50, %v13133_v31 }
 0x4fd   : > { %v13902_v28 = vsel %vm8808_vm1, %v4896_v20, %v8489_v61  ;;  %v6941_v12 = vpop.f32.mrf.mxu2  ;;  %v13904_v7 = vpop.f32.mrf.mxu0  ;;  %v6419_v20 = vshll.u32 %v10616_v42, 16  ;;  %8058 = vmatpush.bf16.msra.mxu3 %v10442_v36  ;;  %v4866_v42 = vadd.f32 %v13667_v50, %v13096_v39 }
 0x4fe   : > { %7134 = vmatmul.bf16.gmra.mxu3 %v12705_v17  ;;  %v6942_v30 = vadd.f32 %v6941_v12, %v6740_v59  ;;  %v6087_v45 = vadd.f32 %v13667_v50, %v6055_v53  ;;  %v6393_v59 = vrot.slane %v6392_v29, 4  ;;  %v4900_v31 = vmax.f32 %v4868_v46, 0.0 }
 0x500   : > { %v6119_v26 = vmax.f32 %v6087_v45, 0.0  ;;  %7325 = vmatmul.bf16.gmra.mxu0 %v10615_v23  ;;  %v6398_v12 = vsel %vm10846_vm4, %v6393_v59, %v13890_v47  ;;  %v13931_v23 = vrot.slane %v6419_v20, 5  ;;  %v6425_v47 = vrot.slane %v6423_v14, 4 }
 0x501   : > { %v7095_v34 = vpop.f32.mrf.mxu3  ;;  %v6838_v9 = vunpack.c.l.b16 %v6398_v12  ;;  %v6412_v20 = vrot.slane %v6410_v32, 4  ;;  %v4898_v12 = vmax.f32 %v4866_v42, 0.0 }
 0x502   : > { %v7175_v53 = vadd.f32 %v7095_v34, %v6942_v30  ;;  %8518 = vrot.lane.b32.xlu1 %v6119_v26, %s10700_s8  ;;  %v6745_v61 = vpop.f32.mrf.mxu1  ;;  %v6413_v26 = vshll.u32 %v6151_v22, 16  ;;  %v6426_v14 = vor.u32 %v6425_v47, %v13931_v23  ;;  %s8954_s8 = sshll.u32 %s8951_s11, 4  ;;  %s8955_s8 = int_to_ptr.hbm [resolvable:$true] %s8954_s8 }
 0x503   : > { %s10649_s13 = sshra.s32 %s8955_s8, 4  ;;  %s10650_s13 = int_to_ptr.hbm [resolvable:$true] %s10649_s13 }
 0x504   : > { %v7361_v29 = vadd.f32 %v13872_v21, %v7175_v53  ;;  %v8497_v45 = vpop.permute.xlu2 %8496  ;;  %v10450_v21 = vld [vmem:[%s14604_s3 + $0x290] sm:$0xff]  ;;  %s10651_s15 = scalar_lea.hbm %s10650_s13, 256  ;;  %p10656_p0 = scmp.lt.s32.totalorder %s10650_s13, %s14606_s5 }
 0x505   : > { %v13927_v30 = vsel %vm8808_vm1, %v4900_v31, %v8497_v45  ;;  %v6943_v36 = vpop.f32.mrf.mxu2  ;;  %6784 = vmatmul.bf16.gmra.mxu1 %v10385_v19  ;;  %v13929_v46 = vpop.f32.mrf.mxu0  ;;  %8244 = vmatpush.bf16.msra.mxu0 %v10450_v21  ;;  %v13939_v31 = vpack.c.b16 %v6839_v63, %v6838_v9  ;;  %v6415_v19 = vrot.slane %v6413_v26, 5  ;;  %v6427_v21 = vrot.slane %v6426_v14, 4  ;;  %p10652_p11 = scmp.ne.s32.totalorder %s10650_s13, %s10651_s15 }
 0x506   : > { %14892 = vst [vmem:[#allocation17_spill] sm:$0xff] %v13927_v30  ;;  %v6944_v34 = vadd.f32 %v6943_v36, %v6742_v2  ;;  %v7393_v59 = vadd.f32 %v13667_v50, %v7361_v29  ;;  %v10617_v29 = vld [vmem:[#allocation2 + $0x98] sm:$0x1]  ;;  %v4867_v9 = vadd.f32 %v13667_v50, %v13113_v51 }
 0x507   : > { %v6429_v1 = vshll.u32 %v10617_v29, 16  ;;  %v6416_v47 = vor.u32 %v6415_v19, %v6412_v20  ;;  %v6154_v29 = vld [vmem:[#allocation2 + $0x9c] sm:$0xf]  ;;  %v10619_v20 = vld [vmem:[#allocation2 + $0xa0] sm:$0xf]  ;;  %p10653_p12 = pnand %p10652_p11, %p10773_p5 }
 0x508   : > { %v7425_v53 = vmax.f32 %v7393_v59, 0.0  ;;  %v6443_v19 = vshll.u32 %v10619_v20, 16  ;;  %v6447_v14 = vshrl.u32 %v10619_v20, 16 }
 0x509   : > { %v7097_v22 = vpop.f32.mrf.mxu3  ;;  %v6431_v42 = vrot.slane %v6429_v1, 5  ;;  %p10654_p13 = pneg %p10653_p12 }
 0x50a   : > { %v7176_v45 = vadd.f32 %v7097_v22, %v6944_v34  ;;  %8584 = vrot.lane.b32.xlu2 %v7425_v53, %s10701_s14  ;;  %6985 = vmatmul.bf16.gmra.mxu2 %v13939_v31  ;;  %v6747_v2 = vpop.f32.mrf.mxu1 }
 0x50c   : > { %v7362_v39 = vadd.f32 %v13888_v48, %v7176_v45  ;;  %v8493_v36 = vpop.permute.xlu0 %8492  ;;  %v10618_v48 = vld [vmem:[#allocation2 + $0x84] sm:$0xff]  ;;  %v6417_v45 = vrot.slane %v6416_v47, 4 }
 0x50d   : > { %v13946_v63 = vsel %vm8808_vm1, %v4898_v12, %v8493_v36  ;;  %v6946_v32 = vpop.f32.mrf.mxu2  ;;  %v13948_v26 = vpop.f32.mrf.mxu0  ;;  %v6432_v12 = vsel %vm10846_vm4, %v6427_v21, %v6431_v42 }
 0x50e   : > { %7139 = vmatmul.bf16.gmra.mxu3 %v12760_v18  ;;  %v6947_v34 = vadd.f32 %v6946_v32, %v6745_v61  ;;  %v7394_v59 = vadd.f32 %v13667_v50, %v7362_v39  ;;  %v4899_v39 = vmax.f32 %v4867_v9, 0.0  ;;  %v10386_v32 = vld [vmem:[#allocation2 + $0x90] sm:$0xff]  ;;  %v6422_v51 = vsel %vm10846_vm4, %v6417_v45, %v13931_v23 }
 0x50f   : > { %v6449_v9 = vrot.slane %v6447_v14, 4  ;;  %v6840_v23 = vunpack.c.l.b16 %v6422_v51 }
 0x510   : > { %v7426_v53 = vmax.f32 %v7394_v59, 0.0  ;;  %7330 = vmatmul.bf16.gmra.mxu0 %v10618_v48  ;;  %v6841_v59 = vunpack.c.l.b16 %v6432_v12  ;;  %v6434_v48 = vshrl.u32 %v6154_v29, 16 }
 0x511   : > { %v7100_v22 = vpop.f32.mrf.mxu3 }
 0x512   : > { %v7177_v36 = vadd.f32 %v7100_v22, %v6947_v34  ;;  %8586 = vrot.lane.b32.xlu0 %v7426_v53, %s10701_s14  ;;  %v6750_v61 = vpop.f32.mrf.mxu1  ;;  %v6437_v53 = vshll.u32 %v6154_v29, 16  ;;  %v13966_v22 = vrot.slane %v6443_v19, 5  ;;  %v13971_v12 = vpack.c.b16 %v6841_v59, %v6840_v23  ;;  %v10620_v19 = vld [vmem:[#allocation2 + $0xa4] sm:$0x1] }
 0x513   : > { %v6453_v14 = vshll.u32 %v10620_v19, 16 }
 0x514   : > { %v7363_v1 = vadd.f32 %v13904_v7, %v7177_v36  ;;  %v8495_v47 = vpop.permute.xlu1 %8494  ;;  %v4871_v7 = vadd.f32 %v13667_v50, %v13183_v24 }
 0x515   : > { %v13962_v21 = vsel %vm8808_vm1, %v4899_v39, %v8495_v47  ;;  %v6948_v42 = vpop.f32.mrf.mxu2  ;;  %6789 = vmatmul.bf16.gmra.mxu1 %v10386_v32  ;;  %v13964_v34 = vpop.f32.mrf.mxu0  ;;  %v6436_v39 = vrot.slane %v6434_v48, 4  ;;  %v6439_v47 = vrot.slane %v6437_v53, 5  ;;  %v6450_v32 = vor.u32 %v6449_v9, %v13966_v22 }
 0x516   : > { %14893 = vst [vmem:[#allocation11_spill] sm:$0xff] %v13962_v21  ;;  %v6949_v20 = vadd.f32 %v6948_v42, %v6747_v2  ;;  %v7395_v30 = vadd.f32 %v13667_v50, %v7363_v1  ;;  %v4903_v29 = vmax.f32 %v4871_v7, 0.0  ;;  %v6455_v23 = vrot.slane %v6453_v14, 5 }
 0x517   : > { %v6440_v48 = vor.u32 %v6439_v47, %v6436_v39  ;;  %v6451_v42 = vrot.slane %v6450_v32, 4  ;;  %v6157_v47 = vld [vmem:[#allocation2 + $0xa8] sm:$0xf]  ;;  %v10622_v32 = vld [vmem:[#allocation2 + $0xac] sm:$0xf] }
 0x518   : > { %v7427_v45 = vmax.f32 %v7395_v30, 0.0  ;;  %v6471_v19 = vshrl.u32 %v10622_v32, 16 }
 0x519   : > { %v7102_v36 = vpop.f32.mrf.mxu3  ;;  %v6456_v39 = vsel %vm10846_vm4, %v6451_v42, %v6455_v23  ;;  %v6458_v42 = vshrl.u32 %v6157_v47, 16  ;;  %v6461_v23 = vshll.u32 %v6157_v47, 16 }
 0x51a   : > { %v7178_v21 = vadd.f32 %v7102_v36, %v6949_v20  ;;  %8588 = vrot.lane.b32.xlu1 %v7427_v45, %s10701_s14  ;;  %6990 = vmatmul.bf16.gmra.mxu2 %v13971_v12  ;;  %v6752_v2 = vpop.f32.mrf.mxu1  ;;  %v10425_v20 = vld [vmem:[%s14604_s3 + $0x8] sm:$0xff]  ;;  %v10621_v45 = vld [vmem:[#allocation2 + $0x90] sm:$0xff] }
 0x51b   : > { %7905 = vmatpush.bf16.msra.mxu2 %v10425_v20  ;;  %v10433_v20 = vld [vmem:[%s14604_s3 + $0x88] sm:$0xff] }
 0x51c   : > { %v7364_v51 = vadd.f32 %v13929_v46, %v7178_v21  ;;  %v8503_v24 = vpop.permute.xlu2 %8502  ;;  %v10441_v46 = vld [vmem:[%s14604_s3 + $0x208] sm:$0xff]  ;;  %v4869_v21 = vadd.f32 %v13667_v50, %v13154_v38  ;;  %7704 = vmatpush.bf16.msra.mxu1 %v10433_v20 }
 0x51d   : > { %v13978_v30 = vsel %vm8808_vm1, %v4903_v29, %v8503_v24  ;;  %v6951_v1 = vpop.f32.mrf.mxu2  ;;  %v13980_v59 = vpop.f32.mrf.mxu0  ;;  %v6467_v29 = vshll.u32 %v10622_v32, 16  ;;  %8059 = vmatpush.bf16.msra.mxu3 %v10441_v46 }
 0x51e   : > { %14894 = vst [vmem:[#allocation43_spill] sm:$0xff] %v13978_v30  ;;  %7144 = vmatmul.bf16.gmra.mxu3 %v12809_v58  ;;  %v6952_v53 = vadd.f32 %v6951_v1, %v6750_v61  ;;  %v7396_v9 = vadd.f32 %v13667_v50, %v7364_v51  ;;  %v6441_v61 = vrot.slane %v6440_v48, 4  ;;  %v4901_v38 = vmax.f32 %v4869_v21, 0.0  ;;  %v10387_v50 = vld [vmem:[#allocation2 + $0x9c] sm:$0xff] }
 0x520   : > { %v7428_v7 = vmax.f32 %v7396_v9, 0.0  ;;  %7335 = vmatmul.bf16.gmra.mxu0 %v10621_v45  ;;  %v6446_v14 = vsel %vm10846_vm4, %v6441_v61, %v13966_v22  ;;  %v6843_v9 = vunpack.c.l.b16 %v6456_v39  ;;  %v6473_v22 = vrot.slane %v6471_v19, 4 }
 0x521   : > { %v7105_v36 = vpop.f32.mrf.mxu3  ;;  %v6842_v39 = vunpack.c.l.b16 %v6446_v14 }
 0x522   : > { %v7179_v51 = vadd.f32 %v7105_v36, %v6952_v53  ;;  %8590 = vrot.lane.b32.xlu2 %v7428_v7, %s10701_s14  ;;  %v6755_v24 = vpop.f32.mrf.mxu1  ;;  %v14007_v7 = vrot.slane %v6467_v29, 5  ;;  %v14015_v36 = vld [vmem:[%s14605_s4] ss:$0 sm:$0xff] }
 0x523   : > { %v4870_v47 = vadd.f32 %v14015_v36, %v13168_v33  ;;  %v14020_v29 = vpack.c.b16 %v6843_v9, %v6842_v39  ;;  %v4874_v39 = vadd.f32 %v14015_v36, %v13238_v43 }
 0x524   : > { %v7365_v1 = vadd.f32 %v13948_v26, %v7179_v51  ;;  %v8499_v48 = vpop.permute.xlu0 %8498  ;;  %v10449_v26 = vld [vmem:[%s14604_s3 + $0x288] sm:$0xff]  ;;  %v6460_v51 = vrot.slane %v6458_v42, 4 }
 0x525   : > { %v14003_v53 = vsel %vm8808_vm1, %v4901_v38, %v8499_v48  ;;  %v6953_v46 = vpop.f32.mrf.mxu2  ;;  %6794 = vmatmul.bf16.gmra.mxu1 %v10387_v50  ;;  %v14005_v21 = vpop.f32.mrf.mxu0  ;;  %8245 = vmatpush.bf16.msra.mxu0 %v10449_v26  ;;  %v6463_v38 = vrot.slane %v6461_v23, 5  ;;  %v4902_v14 = vmax.f32 %v4870_v47, 0.0  ;;  %v10624_v48 = vld [vmem:[#allocation2 + $0xb0] sm:$0x1] }
 0x526   : > { %v6954_v45 = vadd.f32 %v6953_v46, %v6752_v2  ;;  %v7397_v61 = vadd.f32 %v14015_v36, %v7365_v1  ;;  %v6474_v2 = vor.u32 %v6473_v22, %v14007_v7  ;;  %v6477_v20 = vshll.u32 %v10624_v48, 16  ;;  %v6160_v48 = vld [vmem:[#allocation2 + $0xb4] sm:$0xf] }
 0x527   : > { %v6464_v23 = vor.u32 %v6463_v38, %v6460_v51  ;;  %v10626_v51 = vld [vmem:[#allocation2 + $0xb8] sm:$0xf] }
 0x528   : > { %v7429_v32 = vmax.f32 %v7397_v61, 0.0  ;;  %v6475_v22 = vrot.slane %v6474_v2, 4  ;;  %v6479_v47 = vrot.slane %v6477_v20, 5  ;;  %v6491_v38 = vshll.u32 %v10626_v51, 16 }
 0x529   : > { %v7107_v19 = vpop.f32.mrf.mxu3  ;;  %v6495_v2 = vshrl.u32 %v10626_v51, 16 }
 0x52a   : > { %v7180_v50 = vadd.f32 %v7107_v19, %v6954_v45  ;;  %8592 = vrot.lane.b32.xlu0 %v7429_v32, %s10701_s14  ;;  %6995 = vmatmul.bf16.gmra.mxu2 %v14020_v29  ;;  %v6757_v1 = vpop.f32.mrf.mxu1 }
 0x52c   : > { %v7366_v33 = vadd.f32 %v13964_v34, %v7180_v50  ;;  %v8501_v46 = vpop.permute.xlu1 %8500  ;;  %v10625_v34 = vld [vmem:[#allocation2 + $0x9c] sm:$0xff]  ;;  %v6465_v50 = vrot.slane %v6464_v23, 4 }
 0x52d   : > { %v14027_v9 = vsel %vm8808_vm1, %v4902_v14, %v8501_v46  ;;  %v6956_v26 = vpop.f32.mrf.mxu2  ;;  %v14029_v42 = vpop.f32.mrf.mxu0  ;;  %v6480_v14 = vsel %vm10846_vm4, %v6475_v22, %v6479_v47 }
 0x52e   : > { %7149 = vmatmul.bf16.gmra.mxu3 %v12847_v10  ;;  %v6957_v45 = vadd.f32 %v6956_v26, %v6755_v24  ;;  %v7398_v61 = vadd.f32 %v14015_v36, %v7366_v33  ;;  %v4906_v33 = vmax.f32 %v4874_v39, 0.0  ;;  %v10388_v26 = vld [vmem:[#allocation2 + $0xa8] sm:$0xff]  ;;  %v6470_v43 = vsel %vm10846_vm4, %v6465_v50, %v14007_v7 }
 0x52f   : > { %v6497_v39 = vrot.slane %v6495_v2, 4  ;;  %v6844_v7 = vunpack.c.l.b16 %v6470_v43 }
 0x530   : > { %v7430_v32 = vmax.f32 %v7398_v61, 0.0  ;;  %7340 = vmatmul.bf16.gmra.mxu0 %v10625_v34  ;;  %v6845_v61 = vunpack.c.l.b16 %v6480_v14  ;;  %v6482_v34 = vshrl.u32 %v6160_v48, 16 }
 0x531   : > { %v7110_v19 = vpop.f32.mrf.mxu3 }
 0x532   : > { %v7181_v46 = vadd.f32 %v7110_v19, %v6957_v45  ;;  %8594 = vrot.lane.b32.xlu1 %v7430_v32, %s10701_s14  ;;  %v6760_v24 = vpop.f32.mrf.mxu1  ;;  %v6485_v32 = vshll.u32 %v6160_v48, 16  ;;  %v14047_v19 = vrot.slane %v6491_v38, 5  ;;  %v14052_v14 = vpack.c.b16 %v6845_v61, %v6844_v7  ;;  %v10627_v38 = vld [vmem:[#allocation2 + $0xbc] sm:$0x1] }
 0x533   : > { %v6501_v2 = vshll.u32 %v10627_v38, 16 }
 0x534   : > { %v7367_v20 = vadd.f32 %v13980_v59, %v7181_v46  ;;  %v8509_v23 = vpop.permute.xlu2 %8508  ;;  %v4872_v59 = vadd.f32 %v14015_v36, %v13203_v40  ;;  %14896 = vst [vmem:[#allocation66_spill] sm:$0xff] %v14052_v14 }
 0x535   : > { %v14043_v22 = vsel %vm8808_vm1, %v4906_v33, %v8509_v23  ;;  %v6958_v47 = vpop.f32.mrf.mxu2  ;;  %6799 = vmatmul.bf16.gmra.mxu1 %v10388_v26  ;;  %v14045_v45 = vpop.f32.mrf.mxu0  ;;  %v6484_v33 = vrot.slane %v6482_v34, 4  ;;  %v6487_v23 = vrot.slane %v6485_v32, 5  ;;  %v6498_v26 = vor.u32 %v6497_v39, %v14047_v19 }
 0x536   : > { %14895 = vst [vmem:[#allocation65_spill] sm:$0xff] %v14043_v22  ;;  %v6959_v51 = vadd.f32 %v6958_v47, %v6757_v1  ;;  %v7399_v30 = vadd.f32 %v14015_v36, %v7367_v20  ;;  %v4904_v48 = vmax.f32 %v4872_v59, 0.0  ;;  %v6503_v59 = vrot.slane %v6501_v2, 5  ;;  %v10389_v2 = vld [vmem:[#allocation2 + $0xb4] sm:$0xff] }
 0x537   : > { %v6488_v34 = vor.u32 %v6487_v23, %v6484_v33  ;;  %v6499_v47 = vrot.slane %v6498_v26, 4  ;;  %v6163_v26 = vld [vmem:[#allocation2 + $0xc0] sm:$0xf] }
 0x538   : > { %v7431_v50 = vmax.f32 %v7399_v30, 0.0 }
 0x539   : > { %v7112_v46 = vpop.f32.mrf.mxu3  ;;  %v6504_v23 = vsel %vm10846_vm4, %v6499_v47, %v6503_v59  ;;  %v6506_v47 = vshrl.u32 %v6163_v26, 16  ;;  %v6509_v59 = vshll.u32 %v6163_v26, 16 }
 0x53a   : > { %v7182_v22 = vadd.f32 %v7112_v46, %v6959_v51  ;;  %8596 = vrot.lane.b32.xlu2 %v7431_v50, %s10701_s14  ;;  %7000 = vmatmul.bf16.gmra.mxu2 %v14052_v14  ;;  %v6762_v1 = vpop.f32.mrf.mxu1  ;;  %v10424_v51 = vld [vmem:[%s14604_s3] sm:$0xff]  ;;  %v10628_v46 = vld [vmem:[#allocation2 + $0xa8] sm:$0xff] }
 0x53b   : > { %7906 = vmatpush.bf16.msra.mxu2 %v10424_v51 }
 0x53c   : > { %v7368_v43 = vadd.f32 %v14005_v21, %v7182_v22  ;;  %v8505_v40 = vpop.permute.xlu0 %8504  ;;  %v10440_v21 = vld [vmem:[%s14604_s3 + $0x200] sm:$0xff] }
 0x53d   : > { %v14059_v30 = vsel %vm8808_vm1, %v4904_v48, %v8505_v40  ;;  %v6961_v20 = vpop.f32.mrf.mxu2  ;;  %v14061_v61 = vpop.f32.mrf.mxu0  ;;  %v14897_v22 = vld [vmem:[#allocation19_spill] sm:$0xff]  ;;  %8060 = vmatpush.bf16.msra.mxu3 %v10440_v21 }
 0x53e   : > { %7154 = vmatmul.bf16.gmra.mxu3 %v12885_v41  ;;  %v6962_v32 = vadd.f32 %v6961_v20, %v6760_v24  ;;  %v7400_v39 = vadd.f32 %v14015_v36, %v7368_v43  ;;  %v4873_v7 = vadd.f32 %v14015_v36, %v14897_v22  ;;  %v6489_v24 = vrot.slane %v6488_v34, 4  ;;  %v10629_v48 = vld [vmem:[#allocation2 + $0xc4] sm:$0xf] }
 0x53f   : > { %v6515_v38 = vshll.u32 %v10629_v48, 16  ;;  %v6519_v43 = vshrl.u32 %v10629_v48, 16  ;;  %v10432_v21 = vld [vmem:[%s14604_s3 + $0x80] sm:$0xff]  ;;  %v14899_v48 = vld [vmem:[#allocation48_spill] sm:$0xff] }
 0x540   : > { %v7432_v50 = vmax.f32 %v7400_v39, 0.0  ;;  %7345 = vmatmul.bf16.gmra.mxu0 %v10628_v46  ;;  %v4905_v22 = vmax.f32 %v4873_v7, 0.0  ;;  %v6494_v39 = vsel %vm10846_vm4, %v6489_v24, %v14047_v19  ;;  %v6847_v46 = vunpack.c.l.b16 %v6504_v23  ;;  %7705 = vmatpush.bf16.msra.mxu1 %v10432_v21 }
 0x541   : > { %v7115_v33 = vpop.f32.mrf.mxu3  ;;  %v6521_v19 = vrot.slane %v6519_v43, 4  ;;  %v6846_v26 = vunpack.c.l.b16 %v6494_v39 }
 0x542   : > { %v7183_v40 = vadd.f32 %v7115_v33, %v6962_v32  ;;  %8598 = vrot.lane.b32.xlu0 %v7432_v50, %s10701_s14  ;;  %v6765_v20 = vpop.f32.mrf.mxu1  ;;  %v14088_v33 = vrot.slane %v6515_v38, 5  ;;  %v6511_v38 = vrot.slane %v6509_v59, 5 }
 0x544   : > { %v7369_v34 = vadd.f32 %v14029_v42, %v7183_v40  ;;  %v8507_v51 = vpop.permute.xlu1 %8506  ;;  %v10448_v42 = vld [vmem:[%s14604_s3 + $0x280] sm:$0xff]  ;;  %v4877_v40 = vadd.f32 %v14015_v36, %v14899_v48  ;;  %v6522_v43 = vor.u32 %v6521_v19, %v14088_v33  ;;  %v10631_v48 = vld [vmem:[#allocation2 + $0xb4] sm:$0xff] }
 0x545   : > { %v14084_v32 = vsel %vm8808_vm1, %v4905_v22, %v8507_v51  ;;  %v6963_v50 = vpop.f32.mrf.mxu2  ;;  %6804 = vmatmul.bf16.gmra.mxu1 %v10389_v2  ;;  %v14086_v7 = vpop.f32.mrf.mxu0  ;;  %8246 = vmatpush.bf16.msra.mxu0 %v10448_v42  ;;  %v14096_v2 = vpack.c.b16 %v6847_v46, %v6846_v26  ;;  %v6508_v51 = vrot.slane %v6506_v47, 4  ;;  %v2452_v46 = vld [vmem:[#allocation2 + $0xcc] sm:$0x1]  ;;  %v2508_v26 = vld [vmem:[#allocation2 + $0xd4] sm:$0x1] }
 0x546   : > { %14898 = vst [vmem:[#allocation19_spill] sm:$0xff] %v14084_v32  ;;  %v6964_v24 = vadd.f32 %v6963_v50, %v6762_v1  ;;  %v7401_v23 = vadd.f32 %v14015_v36, %v7369_v34  ;;  %v4909_v39 = vmax.f32 %v4877_v40, 0.0  ;;  %v10630_v34 = vld [vmem:[#allocation2 + $0xc8] sm:$0x1]  ;;  %v6167_v47 = vld [vmem:[#allocation2 + $0xd0] sm:$0xf] }
 0x547   : > { %14900 = vst [vmem:[#allocation48_spill] sm:$0xff] %v14096_v2  ;;  %v6525_v21 = vshll.u32 %v10630_v34, 16  ;;  %v2509_v34 = vsel %vm11776_vm12, 0, %v2508_v26 }
 0x548   : > { %v7433_v22 = vmax.f32 %v7401_v23, 0.0  ;;  %v6512_v23 = vor.u32 %v6511_v38, %v6508_v51  ;;  %v14904_v51 = vld [vmem:[#allocation31_spill] sm:$0xff]  ;;  %2510 = vst [vmem:[#allocation2 + $0xd4] sm:$0x1] %v2509_v34 }
 0x549   : > { %v7117_v32 = vpop.f32.mrf.mxu3  ;;  %v4875_v38 = vadd.f32 %v14015_v36, %v14904_v51 }
 0x54a   : > { %v7184_v14 = vadd.f32 %v7117_v32, %v6964_v24  ;;  %8600 = vrot.lane.b32.xlu1 %v7433_v22, %s10701_s14  ;;  %7005 = vmatmul.bf16.gmra.mxu2 %v14096_v2  ;;  %v6767_v1 = vpop.f32.mrf.mxu1  ;;  %v6523_v24 = vrot.slane %v6522_v43, 4  ;;  %v2453_v22 = vsel %vm11763_vm10, 0, %v2452_v46  ;;  %v6513_v2 = vrot.slane %v6512_v23, 4 }
 0x54b   : > { %2454 = vst [vmem:[#allocation2 + $0xcc] sm:$0x1] %v2453_v22 }
 0x54c   : > { %v7370_v50 = vadd.f32 %v14045_v45, %v7184_v14  ;;  %v8515_v42 = vpop.permute.xlu2 %8514 }
 0x54d   : > { %v14103_v59 = vsel %vm8808_vm1, %v4909_v39, %v8515_v42  ;;  %v6966_v19 = vpop.f32.mrf.mxu2  ;;  %v14105_v32 = vpop.f32.mrf.mxu0  ;;  %v6527_v39 = vrot.slane %v6525_v21, 5  ;;  %v6539_v42 = vshll.u32 %v6167_v47, 16  ;;  %v4907_v21 = vmax.f32 %v4875_v38, 0.0 }
 0x54e   : > { %14901 = vst [vmem:[#allocation67_spill] sm:$0xff] %v14103_v59  ;;  %7159 = vmatmul.bf16.gmra.mxu3 %v12925_v13  ;;  %v6967_v45 = vadd.f32 %v6966_v19, %v6765_v20  ;;  %v7402_v14 = vadd.f32 %v14015_v36, %v7370_v50  ;;  %v6543_v59 = vshrl.u32 %v6167_v47, 16  ;;  %v6518_v50 = vsel %vm10846_vm4, %v6513_v2, %v14088_v33  ;;  %v10390_v19 = vld [vmem:[#allocation2 + $0xc0] sm:$0xff] }
 0x54f   : > { %v6528_v26 = vsel %vm10846_vm4, %v6523_v24, %v6527_v39  ;;  %v6541_v22 = vrot.slane %v6539_v42, 5  ;;  %v14126_v33 = vld [vmem:[#allocation2 + $0xd4] sm:$0x1] }
 0x550   : > { %v7434_v43 = vmax.f32 %v7402_v14, 0.0  ;;  %7350 = vmatmul.bf16.gmra.mxu0 %v10631_v48  ;;  %v6545_v47 = vrot.slane %v6543_v59, 4  ;;  %v6849_v14 = vunpack.c.l.b16 %v6528_v26  ;;  %14906 = vst [vmem:[#allocation13_spill] sm:$0xff] %v14126_v33  ;;  %v14907_v59 = vld [vmem:[#allocation28_spill] sm:$0xff]  ;;  %v6549_v26 = vshll.u32 %v14126_v33, 16 }
 0x551   : > { %v7120_v46 = vpop.f32.mrf.mxu3 }
 0x552   : > { %v7185_v40 = vadd.f32 %v7120_v46, %v6967_v45  ;;  %8602 = vrot.lane.b32.xlu2 %v7434_v43, %s10701_s14  ;;  %v6770_v20 = vpop.f32.mrf.mxu1  ;;  %v6848_v45 = vunpack.c.l.b16 %v6518_v50  ;;  %v6166_v43 = vld [vmem:[#allocation2 + $0xcc] sm:$0xf]  ;;  %v6546_v42 = vor.u32 %v6545_v47, %v6541_v22 }
 0x553   : > { %v6530_v2 = vshrl.u32 %v6166_v43, 16  ;;  %v6533_v38 = vshll.u32 %v6166_v43, 16 }
 0x554   : > { %v7371_v23 = vadd.f32 %v14061_v61, %v7185_v40  ;;  %v8511_v34 = vpop.permute.xlu0 %8510  ;;  %v4876_v61 = vadd.f32 %v14015_v36, %v14907_v59  ;;  %v6547_v43 = vrot.slane %v6546_v42, 4 }
 0x555   : > { %v14123_v51 = vsel %vm8808_vm1, %v4907_v21, %v8511_v34  ;;  %v6968_v24 = vpop.f32.mrf.mxu2  ;;  %6809 = vmatmul.bf16.gmra.mxu1 %v10390_v19  ;;  %v7313_v39 = vpop.f32.mrf.mxu0  ;;  %v14131_v21 = vpack.c.b16 %v6849_v14, %v6848_v45  ;;  %v6532_v19 = vrot.slane %v6530_v2, 4  ;;  %v6535_v50 = vrot.slane %v6533_v38, 5 }
 0x556   : > { %14905 = vst [vmem:[#allocation15_spill] sm:$0xff] %v14123_v51  ;;  %v6969_v48 = vadd.f32 %v6968_v24, %v6767_v1  ;;  %v7403_v46 = vadd.f32 %v14015_v36, %v7371_v23  ;;  %v4908_v24 = vmax.f32 %v4876_v61, 0.0  ;;  %v6551_v51 = vrot.slane %v6549_v26, 5  ;;  %v10391_v26 = vld [vmem:[#allocation2 + $0xcc] sm:$0xff] }
 0x557   : > { %v6536_v23 = vor.u32 %v6535_v50, %v6532_v19 }
 0x558   : > { %v7435_v40 = vmax.f32 %v7403_v46, 0.0  ;;  %v6552_v61 = vsel %vm10846_vm4, %v6547_v43, %v6551_v51 }
 0x559   : > { %v7122_v34 = vpop.f32.mrf.mxu3  ;;  %v6537_v33 = vrot.slane %v6536_v23, 4 }
 0x55a   : > { %v7186_v13 = vadd.f32 %v7122_v34, %v6969_v48  ;;  %8604 = vrot.lane.b32.xlu0 %v7435_v40, %s10701_s14  ;;  %7010 = vmatmul.bf16.gmra.mxu2 %v14131_v21  ;;  %v6772_v1 = vpop.f32.mrf.mxu1 }
 0x55b   : > { %v6542_v38 = vsel %vm10846_vm4, %v6537_v33, %v6541_v22 }
 0x55c   : > { %v7372_v47 = vadd.f32 %v14086_v7, %v7186_v13  ;;  %v8513_v59 = vpop.permute.xlu1 %8512  ;;  %v10632_v13 = vld [vmem:[#allocation2 + $0xc0] sm:$0xff]  ;;  %v6850_v50 = vunpack.c.l.b16 %v6542_v38 }
 0x55d   : > { %v14137_v14 = vsel %vm8808_vm1, %v4908_v24, %v8513_v59  ;;  %v6971_v45 = vpop.f32.mrf.mxu2  ;;  %v7316_v46 = vpop.f32.mrf.mxu0 }
 0x55e   : > { %7164 = vmatmul.bf16.gmra.mxu3 %v12959_v27  ;;  %v6972_v48 = vadd.f32 %v6971_v45, %v6770_v20  ;;  %v7404_v2 = vadd.f32 %v14015_v36, %v7372_v47  ;;  %v6851_v20 = vunpack.c.l.b16 %v6552_v61  ;;  %v14908_v47 = vld [vmem:[#allocation50_spill] sm:$0xff] }
 0x55f   : > { %v4878_v59 = vadd.f32 %v14015_v36, %v14908_v47 }
 0x560   : > { %v7436_v42 = vmax.f32 %v7404_v2, 0.0  ;;  %7355 = vmatmul.bf16.gmra.mxu0 %v10632_v13  ;;  %v14152_v43 = vpack.c.b16 %v6851_v20, %v6850_v50 }
 0x561   : > { %v7125_v7 = vpop.f32.mrf.mxu3 }
 0x562   : > { %v7187_v40 = vadd.f32 %v7125_v7, %v6972_v48  ;;  %8606 = vrot.lane.b32.xlu1 %v7436_v42, %s10701_s14  ;;  %v6775_v19 = vpop.f32.mrf.mxu1 }
 0x564   : > { %v7373_v34 = vadd.f32 %v14105_v32, %v7187_v40  ;;  %v8585_v23 = vpop.permute.xlu2 %8584  ;;  %v4910_v32 = vmax.f32 %v4878_v59, 0.0  ;;  %v14909_v40 = vld [vmem:[#allocation52_spill] sm:$0xff] }
 0x565   : > { %v14149_v22 = vsel %vm8841_vm2, %v13588_v16, %v8585_v23  ;;  %v6973_v35 = vpop.f32.mrf.mxu2  ;;  %6814 = vmatmul.bf16.gmra.mxu1 %v10391_v26  ;;  %v7318_v51 = vpop.f32.mrf.mxu0  ;;  %v4879_v50 = vadd.f32 %v14015_v36, %v14909_v40  ;;  %v14911_v40 = vld [vmem:[#allocation12_spill] sm:$0xff] }
 0x566   : > { %v6974_v33 = vadd.f32 %v6973_v35, %v6772_v1  ;;  %v7405_v24 = vadd.f32 %v14015_v36, %v7373_v34 }
 0x567   : > { %v4911_v35 = vmax.f32 %v4879_v50, 0.0 }
 0x568   : > { %v7437_v45 = vmax.f32 %v7405_v24, 0.0 }
 0x569   : > { %v7127_v48 = vpop.f32.mrf.mxu3 }
 0x56a   : > { %v7188_v2 = vadd.f32 %v7127_v48, %v6974_v33  ;;  %8608 = vrot.lane.b32.xlu2 %v7437_v45, %s10701_s14  ;;  %7015 = vmatmul.bf16.gmra.mxu2 %v14152_v43  ;;  %v6777_v16 = vpop.f32.mrf.mxu1 }
 0x56c   : > { %v7374_v38 = vadd.f32 %v7313_v39, %v7188_v2  ;;  %v8517_v61 = vpop.permute.xlu0 %8516 }
 0x56d   : > { %v14159_v1 = vsel %vm8808_vm1, %v4910_v32, %v8517_v61  ;;  %v6976_v42 = vpop.f32.mrf.mxu2  ;;  %v7321_v13 = vpop.f32.mrf.mxu0 }
 0x56e   : > { %7169 = vmatmul.bf16.gmra.mxu3 %v12993_v56  ;;  %v6977_v7 = vadd.f32 %v6976_v42, %v6775_v19  ;;  %v7406_v26 = vadd.f32 %v14015_v36, %v7374_v38  ;;  %v14910_v38 = vld [vmem:[#allocation24_spill] sm:$0xff] }
 0x570   : > { %v7438_v20 = vmax.f32 %v7406_v26, 0.0  ;;  %8247 = vmatmul.bf16.vlgmr.msra.gmra.mxu0 %v14863_v11 }
 0x571   : > { %v7130_v34 = vpop.f32.mrf.mxu3 }
 0x572   : > { %v7189_v23 = vadd.f32 %v7130_v34, %v6977_v7  ;;  %8610 = vrot.lane.b32.xlu0 %v7438_v20, %s10701_s14  ;;  %v6780_v39 = vpop.f32.mrf.mxu1 }
 0x574   : > { %v7375_v33 = vadd.f32 %v7316_v46, %v7189_v23  ;;  %v8519_v24 = vpop.permute.xlu1 %8518 }
 0x575   : > { %v14168_v47 = vsel %vm8808_vm1, %v4911_v35, %v8519_v24  ;;  %v6978_v19 = vpop.f32.mrf.mxu2  ;;  %7706 = vmatmul.bf16.vlgmr.msra.gmra.mxu1 %v13581_v0  ;;  %v7323_v59 = vpop.f32.mrf.mxu0 }
 0x576   : > { %v6979_v45 = vadd.f32 %v6978_v19, %v6777_v16  ;;  %v7407_v48 = vadd.f32 %v14015_v36, %v7375_v33 }
 0x578   : > { %v7439_v2 = vmax.f32 %v7407_v48, 0.0 }
 0x579   : > { %v7132_v11 = vpop.f32.mrf.mxu3 }
 0x57a   : > { %v7190_v32 = vadd.f32 %v7132_v11, %v6979_v45  ;;  %8612 = vrot.lane.b32.xlu1 %v7439_v2, %s10701_s14  ;;  %7907 = vmatmul.bf16.vlgmr.msra.gmra.mxu2 %v14910_v38  ;;  %v6782_v61 = vpop.f32.mrf.mxu1  ;;  %v14912_v2 = vld [vmem:[#allocation18_spill] sm:$0xff] }
 0x57c   : > { %v7376_v46 = vadd.f32 %v7318_v51, %v7190_v32  ;;  %v8591_v42 = vpop.permute.xlu2 %8590 }
 0x57d   : > { %v14176_v7 = vsel %vm8841_vm2, %v13658_v4, %v8591_v42  ;;  %v6981_v26 = vpop.f32.mrf.mxu2  ;;  %v7326_v0 = vpop.f32.mrf.mxu0 }
 0x57e   : > { %8061 = vmatmul.bf16.vlgmr.msra.gmra.mxu3 %v14911_v40  ;;  %v6982_v16 = vadd.f32 %v6981_v26, %v6780_v39  ;;  %v7408_v50 = vadd.f32 %v14015_v36, %v7376_v46  ;;  %v14913_v46 = vld [vmem:[#allocation20_spill] sm:$0xff] }
 0x580   : > { %v7440_v20 = vmax.f32 %v7408_v50, 0.0  ;;  %8252 = vmatmul.bf16.gmra.mxu0 %v12266_v52 }
 0x581   : > { %v7135_v34 = vpop.f32.mrf.mxu3 }
 0x582   : > { %v7191_v23 = vadd.f32 %v7135_v34, %v6982_v16  ;;  %8614 = vrot.lane.b32.xlu2 %v7440_v20, %s10701_s14  ;;  %v6785_v51 = vpop.f32.mrf.mxu1 }
 0x584   : > { %v7377_v35 = vadd.f32 %v7321_v13, %v7191_v23  ;;  %v14194_v50 = vpop.permute.xlu0 %8586 }
 0x585   : > { %v6983_v33 = vpop.f32.mrf.mxu2  ;;  %7711 = vmatmul.bf16.gmra.mxu1 %v13632_v25  ;;  %v7328_v4 = vpop.f32.mrf.mxu0 }
 0x586   : > { %v6984_v24 = vadd.f32 %v6983_v33, %v6782_v61  ;;  %v7409_v19 = vadd.f32 %v14015_v36, %v7377_v35 }
 0x588   : > { %v7441_v45 = vmax.f32 %v7409_v19, 0.0 }
 0x589   : > { %v7137_v39 = vpop.f32.mrf.mxu3 }
 0x58a   : > { %v7192_v48 = vadd.f32 %v7137_v39, %v6984_v24  ;;  %8616 = vrot.lane.b32.xlu0 %v7441_v45, %s10701_s14  ;;  %7912 = vmatmul.bf16.gmra.mxu2 %v14912_v2  ;;  %v6787_v52 = vpop.f32.mrf.mxu1  ;;  %v14914_v45 = vld [vmem:[#allocation21_spill] sm:$0xff] }
 0x58c   : > { %v7378_v11 = vadd.f32 %v7323_v59, %v7192_v48  ;;  %v8589_v32 = vpop.permute.xlu1 %8588 }
 0x58d   : > { %v14188_v13 = vsel %vm8841_vm2, %v13642_v15, %v8589_v32  ;;  %v6986_v38 = vpop.f32.mrf.mxu2  ;;  %v7331_v25 = vpop.f32.mrf.mxu0 }
 0x58e   : > { %8066 = vmatmul.bf16.gmra.mxu3 %v14913_v46  ;;  %v6987_v61 = vadd.f32 %v6986_v38, %v6785_v51  ;;  %v7410_v42 = vadd.f32 %v14015_v36, %v7378_v11  ;;  %v14915_v11 = vld [vmem:[#allocation47_spill] sm:$0xff] }
 0x590   : > { %v7442_v26 = vmax.f32 %v7410_v42, 0.0  ;;  %8257 = vmatmul.bf16.gmra.mxu0 %v12348_v49 }
 0x591   : > { %v7140_v40 = vpop.f32.mrf.mxu3 }
 0x592   : > { %v7193_v16 = vadd.f32 %v7140_v40, %v6987_v61  ;;  %8618 = vrot.lane.b32.xlu1 %v7442_v26, %s10701_s14  ;;  %v6790_v59 = vpop.f32.mrf.mxu1  ;;  %v14916_v40 = vld [vmem:[#allocation32_spill] sm:$0xff] }
 0x594   : > { %v7379_v20 = vadd.f32 %v7326_v0, %v7193_v16  ;;  %v8597_v15 = vpop.permute.xlu2 %8596 }
 0x595   : > { %v14198_v34 = vsel %vm8841_vm2, %v13718_v37, %v8597_v15  ;;  %v6988_v23 = vpop.f32.mrf.mxu2  ;;  %7716 = vmatmul.bf16.gmra.mxu1 %v13670_v60  ;;  %v7333_v51 = vpop.f32.mrf.mxu0 }
 0x596   : > { %v6989_v35 = vadd.f32 %v6988_v23, %v6787_v52  ;;  %v7411_v49 = vadd.f32 %v14015_v36, %v7379_v20  ;;  %v14917_v20 = vld [vmem:[#allocation29_spill] sm:$0xff] }
 0x598   : > { %v7443_v33 = vmax.f32 %v7411_v49, 0.0 }
 0x599   : > { %v7142_v24 = vpop.f32.mrf.mxu3 }
 0x59a   : > { %v7194_v19 = vadd.f32 %v7142_v24, %v6989_v35  ;;  %8620 = vrot.lane.b32.xlu2 %v7443_v33, %s10701_s14  ;;  %7917 = vmatmul.bf16.gmra.mxu2 %v14914_v45  ;;  %v6792_v0 = vpop.f32.mrf.mxu1  ;;  %v14918_v33 = vld [vmem:[#allocation7_spill] sm:$0xff] }
 0x59c   : > { %v7380_v39 = vadd.f32 %v7328_v4, %v7194_v19  ;;  %v8593_v48 = vpop.permute.xlu0 %8592 }
 0x59d   : > { %v14206_v37 = vsel %vm8841_vm2, %v13615_v44, %v8593_v48  ;;  %v6991_v2 = vpop.f32.mrf.mxu2  ;;  %v7336_v60 = vpop.f32.mrf.mxu0 }
 0x59e   : > { %8071 = vmatmul.bf16.gmra.mxu3 %v14915_v11  ;;  %v6992_v52 = vadd.f32 %v6991_v2, %v6790_v59  ;;  %v7412_v32 = vadd.f32 %v14015_v36, %v7380_v39  ;;  %v14919_v2 = vld [vmem:[#allocation44_spill] sm:$0xff] }
 0x5a0   : > { %v7444_v38 = vmax.f32 %v7412_v32, 0.0  ;;  %8262 = vmatmul.bf16.gmra.mxu0 %v12397_v8 }
 0x5a1   : > { %v7145_v46 = vpop.f32.mrf.mxu3 }
 0x5a2   : > { %v7195_v61 = vadd.f32 %v7145_v46, %v6992_v52  ;;  %8622 = vrot.lane.b32.xlu0 %v7444_v38, %s10701_s14  ;;  %v6795_v4 = vpop.f32.mrf.mxu1 }
 0x5a4   : > { %v7381_v42 = vadd.f32 %v7331_v25, %v7195_v61  ;;  %v8595_v26 = vpop.permute.xlu1 %8594 }
 0x5a5   : > { %v14214_v44 = vsel %vm8841_vm2, %v14916_v40, %v8595_v26  ;;  %v6993_v16 = vpop.f32.mrf.mxu2  ;;  %7721 = vmatmul.bf16.gmra.mxu1 %v14917_v20  ;;  %v7338_v59 = vpop.f32.mrf.mxu0  ;;  %v14921_v40 = vld [vmem:[#allocation23_spill] sm:$0xff] }
 0x5a6   : > { %v6994_v15 = vadd.f32 %v6993_v16, %v6792_v0  ;;  %v7413_v23 = vadd.f32 %v14015_v36, %v7381_v42  ;;  %v14920_v42 = vld [vmem:[#allocation30_spill] sm:$0xff] }
 0x5a8   : > { %v7445_v35 = vmax.f32 %v7413_v23, 0.0 }
 0x5a9   : > { %v7147_v8 = vpop.f32.mrf.mxu3 }
 0x5aa   : > { %v7196_v49 = vadd.f32 %v7147_v8, %v6994_v15  ;;  %8624 = vrot.lane.b32.xlu1 %v7445_v35, %s10701_s14  ;;  %7922 = vmatmul.bf16.gmra.mxu2 %v14918_v33  ;;  %v6797_v25 = vpop.f32.mrf.mxu1  ;;  %v14922_v35 = vld [vmem:[#allocation41_spill] sm:$0xff]  ;;  %v14923_v33 = vld [vmem:[#allocation39_spill] sm:$0xff] }
 0x5ac   : > { %v7382_v24 = vadd.f32 %v7333_v51, %v7196_v49  ;;  %v8603_v19 = vpop.permute.xlu2 %8602 }
 0x5ad   : > { %v14222_v45 = vsel %vm8841_vm2, %v13775_v3, %v8603_v19  ;;  %v6996_v39 = vpop.f32.mrf.mxu2  ;;  %v7341_v48 = vpop.f32.mrf.mxu0 }
 0x5ae   : > { %8076 = vmatmul.bf16.gmra.mxu3 %v14919_v2  ;;  %v6997_v0 = vadd.f32 %v6996_v39, %v6795_v4  ;;  %v7414_v11 = vadd.f32 %v14015_v36, %v7382_v24  ;;  %v14924_v2 = vld [vmem:[#allocation10_spill] sm:$0xff] }
 0x5b0   : > { %v7446_v52 = vmax.f32 %v7414_v11, 0.0  ;;  %8267 = vmatmul.bf16.gmra.mxu0 %v12478_v57 }
 0x5b1   : > { %v7150_v32 = vpop.f32.mrf.mxu3 }
 0x5b2   : > { %v7197_v38 = vadd.f32 %v7150_v32, %v6997_v0  ;;  %8626 = vrot.lane.b32.xlu2 %v7446_v52, %s10701_s14  ;;  %v6800_v51 = vpop.f32.mrf.mxu1  ;;  %v14925_v52 = vld [vmem:[#allocation34_spill] sm:$0xff] }
 0x5b4   : > { %v7383_v46 = vadd.f32 %v7336_v60, %v7197_v38  ;;  %v8599_v61 = vpop.permute.xlu0 %8598 }
 0x5b5   : > { %v14230_v3 = vsel %vm8841_vm2, %v14920_v42, %v8599_v61  ;;  %v6998_v26 = vpop.f32.mrf.mxu2  ;;  %7726 = vmatmul.bf16.gmra.mxu1 %v14921_v40  ;;  %v7343_v4 = vpop.f32.mrf.mxu0  ;;  %v14926_v40 = vld [vmem:[#allocation36_spill] sm:$0xff] }
 0x5b6   : > { %v6999_v16 = vadd.f32 %v6998_v26, %v6797_v25  ;;  %v7415_v20 = vadd.f32 %v14015_v36, %v7383_v46 }
 0x5b8   : > { %v7447_v15 = vmax.f32 %v7415_v20, 0.0 }
 0x5b9   : > { %v7152_v57 = vpop.f32.mrf.mxu3 }
 0x5ba   : > { %v7198_v23 = vadd.f32 %v7152_v57, %v6999_v16  ;;  %8628 = vrot.lane.b32.xlu0 %v7447_v15, %s10701_s14  ;;  %7927 = vmatmul.bf16.gmra.mxu2 %v14922_v35  ;;  %v6802_v60 = vpop.f32.mrf.mxu1  ;;  %v14927_v35 = vld [vmem:[#allocation42_spill] sm:$0xff] }
 0x5bc   : > { %v7384_v8 = vadd.f32 %v7338_v59, %v7198_v23  ;;  %v8601_v49 = vpop.permute.xlu1 %8600 }
 0x5bd   : > { %v14238_v24 = vsel %vm8841_vm2, %v14923_v33, %v8601_v49  ;;  %v7001_v19 = vpop.f32.mrf.mxu2  ;;  %v7346_v39 = vpop.f32.mrf.mxu0  ;;  %v14928_v33 = vld [vmem:[#allocation33_spill] sm:$0xff] }
 0x5be   : > { %8081 = vmatmul.bf16.gmra.mxu3 %v14924_v2  ;;  %v7002_v25 = vadd.f32 %v7001_v19, %v6800_v51  ;;  %v7416_v0 = vadd.f32 %v14015_v36, %v7384_v8 }
 0x5c0   : > { %v7448_v11 = vmax.f32 %v7416_v0, 0.0  ;;  %8272 = vmatmul.bf16.gmra.mxu0 %v14925_v52 }
 0x5c1   : > { %v7155_v32 = vpop.f32.mrf.mxu3 }
 0x5c2   : > { %v7199_v38 = vadd.f32 %v7155_v32, %v7002_v25  ;;  %8630 = vrot.lane.b32.xlu1 %v7448_v11, %s10701_s14  ;;  %v6805_v59 = vpop.f32.mrf.mxu1  ;;  %v14929_v25 = vld [vmem:[#allocation46_spill] sm:$0xff] }
 0x5c4   : > { %v7385_v46 = vadd.f32 %v7341_v48, %v7199_v38  ;;  %v8609_v61 = vpop.permute.xlu2 %8608 }
 0x5c5   : > { %v14246_v42 = vsel %vm8841_vm2, %v13826_v54, %v8609_v61  ;;  %v7003_v26 = vpop.f32.mrf.mxu2  ;;  %7731 = vmatmul.bf16.gmra.mxu1 %v14926_v40  ;;  %v7348_v51 = vpop.f32.mrf.mxu0  ;;  %v14930_v61 = vld [vmem:[#allocation6_spill] sm:$0xff] }
 0x5c6   : > { %v7004_v16 = vadd.f32 %v7003_v26, %v6802_v60  ;;  %v7417_v20 = vadd.f32 %v14015_v36, %v7385_v46 }
 0x5c8   : > { %v7449_v15 = vmax.f32 %v7417_v20, 0.0 }
 0x5c9   : > { %v7157_v57 = vpop.f32.mrf.mxu3 }
 0x5ca   : > { %v7200_v23 = vadd.f32 %v7157_v57, %v7004_v16  ;;  %8632 = vrot.lane.b32.xlu2 %v7449_v15, %s10701_s14  ;;  %7932 = vmatmul.bf16.gmra.mxu2 %v14927_v35  ;;  %v6807_v48 = vpop.f32.mrf.mxu1 }
 0x5cc   : > { %v7386_v8 = vadd.f32 %v7343_v4, %v7200_v23  ;;  %v8605_v49 = vpop.permute.xlu0 %8604  ;;  %v14931_v23 = vld [vmem:[#allocation45_spill] sm:$0xff] }
 0x5cd   : > { %v14254_v54 = vsel %vm8841_vm2, %v14928_v33, %v8605_v49  ;;  %v7006_v19 = vpop.f32.mrf.mxu2  ;;  %v7351_v2 = vpop.f32.mrf.mxu0 }
 0x5ce   : > { %8086 = vmatmul.bf16.gmra.mxu3 %v14929_v25  ;;  %v7007_v60 = vadd.f32 %v7006_v19, %v6805_v59  ;;  %v7418_v0 = vadd.f32 %v14015_v36, %v7386_v8  ;;  %v14932_v19 = vld [vmem:[#allocation22_spill] sm:$0xff] }
 0x5d0   : > { %v7450_v11 = vmax.f32 %v7418_v0, 0.0  ;;  %8277 = vmatmul.bf16.gmra.mxu0 %v12600_v55  ;;  %v14933_v0 = vld [vmem:[#allocation27_spill] sm:$0xff] }
 0x5d1   : > { %v7160_v52 = vpop.f32.mrf.mxu3 }
 0x5d2   : > { %v7201_v32 = vadd.f32 %v7160_v52, %v7007_v60  ;;  %8634 = vrot.lane.b32.xlu0 %v7450_v11, %s10701_s14  ;;  %v6810_v4 = vpop.f32.mrf.mxu1 }
 0x5d4   : > { %v7387_v38 = vadd.f32 %v7346_v39, %v7201_v32  ;;  %v8607_v46 = vpop.permute.xlu1 %8606 }
 0x5d5   : > { %v14262_v26 = vsel %vm8841_vm2, %v14930_v61, %v8607_v46  ;;  %v7008_v40 = vpop.f32.mrf.mxu2  ;;  %7736 = vmatmul.bf16.gmra.mxu1 %v13819_v6  ;;  %v7353_v59 = vpop.f32.mrf.mxu0  ;;  %v14934_v46 = vld [vmem:[#allocation37_spill] sm:$0xff] }
 0x5d6   : > { %v7009_v16 = vadd.f32 %v7008_v40, %v6807_v48  ;;  %v7419_v20 = vadd.f32 %v14015_v36, %v7387_v38  ;;  %v14935_v40 = vld [vmem:[#allocation8_spill] sm:$0xff] }
 0x5d8   : > { %v7451_v15 = vmax.f32 %v7419_v20, 0.0 }
 0x5d9   : > { %v7162_v55 = vpop.f32.mrf.mxu3 }
 0x5da   : > { %v7202_v57 = vadd.f32 %v7162_v55, %v7009_v16  ;;  %8636 = vrot.lane.b32.xlu1 %v7451_v15, %s10701_s14  ;;  %7937 = vmatmul.bf16.gmra.mxu2 %v14931_v23  ;;  %v6812_v39 = vpop.f32.mrf.mxu1  ;;  %v14936_v23 = vld [vmem:[#allocation14_spill] sm:$0xff] }
 0x5dc   : > { %v7388_v35 = vadd.f32 %v7348_v51, %v7202_v57  ;;  %v8615_v8 = vpop.permute.xlu2 %8614 }
 0x5dd   : > { %v14270_v49 = vsel %vm8841_vm2, %v13886_v62, %v8615_v8  ;;  %v7011_v33 = vpop.f32.mrf.mxu2  ;;  %v7356_v6 = vpop.f32.mrf.mxu0 }
 0x5de   : > { %8091 = vmatmul.bf16.gmra.mxu3 %v14932_v19  ;;  %v7012_v48 = vadd.f32 %v7011_v33, %v6810_v4  ;;  %v7420_v25 = vadd.f32 %v14015_v36, %v7388_v35  ;;  %v14937_v33 = vld [vmem:[#allocation40_spill] sm:$0xff] }
 0x5e0   : > { %v7452_v60 = vmax.f32 %v7420_v25, 0.0  ;;  %8282 = vmatmul.bf16.gmra.mxu0 %v14933_v0 }
 0x5e1   : > { %v7165_v11 = vpop.f32.mrf.mxu3 }
 0x5e2   : > { %v7203_v52 = vadd.f32 %v7165_v11, %v7012_v48  ;;  %8638 = vrot.lane.b32.xlu2 %v7452_v60, %s10701_s14  ;;  %v6815_v51 = vpop.f32.mrf.mxu1  ;;  %v14938_v60 = vld [vmem:[#allocation26_spill] sm:$0xff] }
 0x5e4   : > { %v7389_v32 = vadd.f32 %v7351_v2, %v7203_v52  ;;  %v8611_v38 = vpop.permute.xlu0 %8610 }
 0x5e5   : > { %v14278_v62 = vsel %vm8841_vm2, %v14934_v46, %v8611_v38  ;;  %v7013_v61 = vpop.f32.mrf.mxu2  ;;  %7741 = vmatmul.bf16.gmra.mxu1 %v14935_v40  ;;  %v7358_v4 = vpop.f32.mrf.mxu0 }
 0x5e6   : > { %v7014_v16 = vadd.f32 %v7013_v61, %v6812_v39  ;;  %v7421_v20 = vadd.f32 %v14015_v36, %v7389_v32 }
 0x5e8   : > { %v7453_v15 = vmax.f32 %v7421_v20, 0.0 }
 0x5e9   : > { %v7167_v55 = vpop.f32.mrf.mxu3 }
 0x5ea   : > { %v7204_v57 = vadd.f32 %v7167_v55, %v7014_v16  ;;  %8640 = vrot.lane.b32.xlu0 %v7453_v15, %s10701_s14  ;;  %7942 = vmatmul.bf16.gmra.mxu2 %v14936_v23  ;;  %v6817_v2 = vpop.f32.mrf.mxu1 }
 0x5ec   : > { %v7390_v35 = vadd.f32 %v7353_v59, %v7204_v57  ;;  %v8613_v8 = vpop.permute.xlu1 %8612  ;;  %v14939_v57 = vld [vmem:[#allocation38_spill] sm:$0xff] }
 0x5ed   : > { %v14286_v19 = vsel %vm8841_vm2, %v14937_v33, %v8613_v8  ;;  %v7016_v48 = vpop.f32.mrf.mxu2  ;;  %v8248_v25 = vpop.f32.mrf.mxu0  ;;  %v14940_v33 = vld [vmem:[#allocation51_spill] sm:$0xff] }
 0x5ee   : > { %8096 = vmatmul.bf16.gmra.mxu3 %v14938_v60  ;;  %v7017_v39 = vadd.f32 %v7016_v48, %v6815_v51  ;;  %v7422_v0 = vadd.f32 %v14015_v36, %v7390_v35 }
 0x5f0   : > { %v7454_v11 = vmax.f32 %v7422_v0, 0.0  ;;  %8287 = vmatmul.bf16.gmra.mxu0 %v12705_v17 }
 0x5f1   : > { %v7170_v52 = vpop.f32.mrf.mxu3 }
 0x5f2   : > { %v7205_v32 = vadd.f32 %v7170_v52, %v7017_v39  ;;  %8642 = vrot.lane.b32.xlu1 %v7454_v11, %s10701_s14  ;;  %v7707_v59 = vpop.f32.mrf.mxu1 }
 0x5f4   : > { %v7391_v38 = vadd.f32 %v7356_v6, %v7205_v32  ;;  %v8621_v46 = vpop.permute.xlu2 %8620  ;;  %v14941_v32 = vld [vmem:[#allocation9_spill] sm:$0xff] }
 0x5f5   : > { %v14294_v61 = vsel %vm8841_vm2, %v13946_v63, %v8621_v46  ;;  %v7018_v40 = vpop.f32.mrf.mxu2  ;;  %7746 = vmatmul.bf16.gmra.mxu1 %v13895_v5  ;;  %v8250_v51 = vpop.f32.mrf.mxu0 }
 0x5f6   : > { %v7019_v16 = vadd.f32 %v7018_v40, %v6817_v2  ;;  %v7423_v20 = vadd.f32 %v14015_v36, %v7391_v38 }
 0x5f8   : > { %v7455_v15 = vmax.f32 %v7423_v20, 0.0 }
 0x5f9   : > { %v7172_v17 = vpop.f32.mrf.mxu3 }
 0x5fa   : > { %v7206_v55 = vadd.f32 %v7172_v17, %v7019_v16  ;;  %8644 = vrot.lane.b32.xlu2 %v7455_v15, %s10701_s14  ;;  %7947 = vmatmul.bf16.gmra.mxu2 %v14939_v57  ;;  %v7709_v6 = vpop.f32.mrf.mxu1  ;;  %v14942_v15 = vld [vmem:[#allocation49_spill] sm:$0xff] }
 0x5fc   : > { %v7392_v23 = vadd.f32 %v7358_v4, %v7206_v55  ;;  %v8617_v35 = vpop.permute.xlu0 %8616 }
 0x5fd   : > { %v14302_v63 = vsel %vm8841_vm2, %v13902_v28, %v8617_v35  ;;  %v7908_v8 = vpop.f32.mrf.mxu2  ;;  %v8253_v5 = vpop.f32.mrf.mxu0  ;;  %v14324_v35 = vld [vmem:[%s14605_s4] ss:$0 sm:$0xff] }
 0x5fe   : > { %8101 = vmatmul.bf16.gmra.mxu3 %v14940_v33  ;;  %v7909_v2 = vadd.f32 %v7908_v8, %v7707_v59  ;;  %v7424_v48 = vadd.f32 %v14015_v36, %v7392_v23 }
 0x600   : > { %v7456_v60 = vmax.f32 %v7424_v48, 0.0  ;;  %8292 = vmatmul.bf16.gmra.mxu0 %v12760_v18 }
 0x601   : > { %v8062_v39 = vpop.f32.mrf.mxu3 }
 0x602   : > { %v8142_v0 = vadd.f32 %v8062_v39, %v7909_v2  ;;  %8646 = vrot.lane.b32.xlu0 %v7456_v60, %s10701_s14  ;;  %v7712_v4 = vpop.f32.mrf.mxu1  ;;  %v14944_v39 = vld [vmem:[#allocation11_spill] sm:$0xff] }
 0x604   : > { %v8328_v11 = vadd.f32 %v8248_v25, %v8142_v0  ;;  %v8619_v52 = vpop.permute.xlu1 %8618 }
 0x605   : > { %v14310_v28 = vsel %vm8841_vm2, %v14941_v32, %v8619_v52  ;;  %v7910_v38 = vpop.f32.mrf.mxu2  ;;  %7751 = vmatmul.bf16.gmra.mxu1 %v13939_v31  ;;  %v8255_v59 = vpop.f32.mrf.mxu0 }
 0x606   : > { %v7911_v46 = vadd.f32 %v7910_v38, %v7709_v6  ;;  %v8360_v40 = vadd.f32 %v14015_v36, %v8328_v11  ;;  %v14943_v6 = vld [vmem:[#allocation54_spill] sm:$0xff] }
 0x608   : > { %v8392_v16 = vmax.f32 %v8360_v40, 0.0  ;;  %v14945_v40 = vld [vmem:[#allocation53_spill] sm:$0xff] }
 0x609   : > { %v8064_v18 = vpop.f32.mrf.mxu3 }
 0x60a   : > { %v8143_v20 = vadd.f32 %v8064_v18, %v7911_v46  ;;  %8712 = vrot.lane.b32.xlu1 %v8392_v16, %s10702_s25  ;;  %7952 = vmatmul.bf16.gmra.mxu2 %v14942_v15  ;;  %v7714_v25 = vpop.f32.mrf.mxu1 }
 0x60c   : > { %v8329_v17 = vadd.f32 %v8250_v51, %v8143_v20  ;;  %v8627_v55 = vpop.permute.xlu2 %8626  ;;  %v14946_v20 = vld [vmem:[#allocation17_spill] sm:$0xff] }
 0x60d   : > { %v14318_v57 = vsel %vm8841_vm2, %v14003_v53, %v8627_v55  ;;  %v7913_v31 = vpop.f32.mrf.mxu2  ;;  %v8258_v23 = vpop.f32.mrf.mxu0  ;;  %v14947_v55 = vld [vmem:[#allocation56_spill] sm:$0xff] }
 0x60e   : > { %8106 = vmatmul.bf16.gmra.mxu3 %v14943_v6  ;;  %v7914_v36 = vadd.f32 %v7913_v31, %v7712_v4  ;;  %v8361_v8 = vadd.f32 %v14324_v35, %v8329_v17 }
 0x610   : > { %v8393_v33 = vmax.f32 %v8361_v8, 0.0  ;;  %8297 = vmatmul.bf16.gmra.mxu0 %v12809_v58 }
 0x611   : > { %v8067_v51 = vpop.f32.mrf.mxu3 }
 0x612   : > { %v8144_v2 = vadd.f32 %v8067_v51, %v7914_v36  ;;  %8714 = vrot.lane.b32.xlu2 %v8393_v33, %s10702_s25  ;;  %v7717_v53 = vpop.f32.mrf.mxu1 }
 0x614   : > { %v8330_v48 = vadd.f32 %v8253_v5, %v8144_v2  ;;  %v8623_v60 = vpop.permute.xlu0 %8622 }
 0x615   : > { %v14331_v0 = vsel %vm8841_vm2, %v14944_v39, %v8623_v60  ;;  %v7915_v4 = vpop.f32.mrf.mxu2  ;;  %7756 = vmatmul.bf16.gmra.mxu1 %v13971_v12  ;;  %v8260_v11 = vpop.f32.mrf.mxu0 }
 0x616   : > { %v7916_v52 = vadd.f32 %v7915_v4, %v7714_v25  ;;  %v8362_v32 = vadd.f32 %v14324_v35, %v8330_v48 }
 0x618   : > { %v8394_v38 = vmax.f32 %v8362_v32, 0.0  ;;  %v14948_v32 = vld [vmem:[#allocation55_spill] sm:$0xff] }
 0x619   : > { %v8069_v58 = vpop.f32.mrf.mxu3 }
 0x61a   : > { %v8145_v46 = vadd.f32 %v8069_v58, %v7916_v52  ;;  %8716 = vrot.lane.b32.xlu0 %v8394_v38, %s10702_s25  ;;  %7957 = vmatmul.bf16.gmra.mxu2 %v14945_v40  ;;  %v7719_v5 = vpop.f32.mrf.mxu1  ;;  %v14949_v40 = vld [vmem:[#allocation58_spill] sm:$0xff] }
 0x61c   : > { %v8331_v16 = vadd.f32 %v8255_v59, %v8145_v46  ;;  %v8625_v18 = vpop.permute.xlu1 %8624 }
 0x61d   : > { %v14339_v15 = vsel %vm8841_vm2, %v14946_v20, %v8625_v18  ;;  %v7918_v17 = vpop.f32.mrf.mxu2  ;;  %v8263_v12 = vpop.f32.mrf.mxu0 }
 0x61e   : > { %8111 = vmatmul.bf16.gmra.mxu3 %v14947_v55  ;;  %v7919_v25 = vadd.f32 %v7918_v17, %v7717_v53  ;;  %v8363_v31 = vadd.f32 %v14324_v35, %v8331_v16 }
 0x620   : > { %v8395_v6 = vmax.f32 %v8363_v31, 0.0  ;;  %8302 = vmatmul.bf16.gmra.mxu0 %v12847_v10  ;;  %v14950_v31 = vld [vmem:[#allocation43_spill] sm:$0xff] }
 0x621   : > { %v8072_v36 = vpop.f32.mrf.mxu3 }
 0x622   : > { %v8146_v8 = vadd.f32 %v8072_v36, %v7919_v25  ;;  %8718 = vrot.lane.b32.xlu1 %v8395_v6, %s10702_s25  ;;  %v7722_v59 = vpop.f32.mrf.mxu1  ;;  %v14951_v36 = vld [vmem:[#allocation66_spill] sm:$0xff] }
 0x624   : > { %v8332_v33 = vadd.f32 %v8258_v23, %v8146_v8  ;;  %v8633_v51 = vpop.permute.xlu2 %8632 }
 0x625   : > { %v14347_v2 = vsel %vm8841_vm2, %v14059_v30, %v8633_v51  ;;  %v7920_v48 = vpop.f32.mrf.mxu2  ;;  %7761 = vmatmul.bf16.gmra.mxu1 %v14020_v29  ;;  %v8265_v53 = vpop.f32.mrf.mxu0 }
 0x626   : > { %v7921_v60 = vadd.f32 %v7920_v48, %v7719_v5  ;;  %v8364_v39 = vadd.f32 %v14324_v35, %v8332_v33 }
 0x628   : > { %v8396_v4 = vmax.f32 %v8364_v39, 0.0 }
 0x629   : > { %v8074_v10 = vpop.f32.mrf.mxu3 }
 0x62a   : > { %v8147_v52 = vadd.f32 %v8074_v10, %v7921_v60  ;;  %8720 = vrot.lane.b32.xlu2 %v8396_v4, %s10702_s25  ;;  %7962 = vmatmul.bf16.gmra.mxu2 %v14948_v32  ;;  %v7724_v23 = vpop.f32.mrf.mxu1  ;;  %v14952_v60 = vld [vmem:[#allocation57_spill] sm:$0xff]  ;;  %v14953_v10 = vld [vmem:[#allocation15_spill] sm:$0xff] }
 0x62c   : > { %v8333_v38 = vadd.f32 %v8260_v11, %v8147_v52  ;;  %v8629_v58 = vpop.permute.xlu0 %8628 }
 0x62d   : > { %v14355_v30 = vsel %vm8841_vm2, %v14027_v9, %v8629_v58  ;;  %v7923_v46 = vpop.f32.mrf.mxu2  ;;  %v8268_v29 = vpop.f32.mrf.mxu0  ;;  %v14954_v58 = vld [vmem:[#allocation60_spill] sm:$0xff] }
 0x62e   : > { %8116 = vmatmul.bf16.gmra.mxu3 %v14949_v40  ;;  %v7924_v5 = vadd.f32 %v7923_v46, %v7722_v59  ;;  %v8365_v16 = vadd.f32 %v14324_v35, %v8333_v38 }
 0x630   : > { %v8397_v18 = vmax.f32 %v8365_v16, 0.0  ;;  %8307 = vmatmul.bf16.gmra.mxu0 %v12885_v41 }
 0x631   : > { %v8077_v20 = vpop.f32.mrf.mxu3 }
 0x632   : > { %v8148_v17 = vadd.f32 %v8077_v20, %v7924_v5  ;;  %8722 = vrot.lane.b32.xlu0 %v8397_v18, %s10702_s25  ;;  %v7727_v11 = vpop.f32.mrf.mxu1  ;;  %v14955_v5 = vld [vmem:[#allocation35_spill] sm:$0xff] }
 0x634   : > { %v8334_v55 = vadd.f32 %v8263_v12, %v8148_v17  ;;  %v8631_v25 = vpop.permute.xlu1 %8630 }
 0x635   : > { %v14363_v9 = vsel %vm8841_vm2, %v14950_v31, %v8631_v25  ;;  %v7925_v6 = vpop.f32.mrf.mxu2  ;;  %7766 = vmatmul.bf16.gmra.mxu1 %v14951_v36  ;;  %v8270_v8 = vpop.f32.mrf.mxu0 }
 0x636   : > { %v7926_v59 = vadd.f32 %v7925_v6, %v7724_v23  ;;  %v8366_v33 = vadd.f32 %v14324_v35, %v8334_v55  ;;  %v14956_v55 = vld [vmem:[#allocation19_spill] sm:$0xff]  ;;  %v14957_v6 = vld [vmem:[#allocation48_spill] sm:$0xff] }
 0x638   : > { %v8398_v51 = vmax.f32 %v8366_v33, 0.0 }
 0x639   : > { %v8079_v41 = vpop.f32.mrf.mxu3 }
 0x63a   : > { %v8149_v48 = vadd.f32 %v8079_v41, %v7926_v59  ;;  %8724 = vrot.lane.b32.xlu1 %v8398_v51, %s10702_s25  ;;  %7967 = vmatmul.bf16.gmra.mxu2 %v14952_v60  ;;  %v7729_v12 = vpop.f32.mrf.mxu1 }
 0x63c   : > { %v8335_v39 = vadd.f32 %v8265_v53, %v8149_v48  ;;  %v8639_v4 = vpop.permute.xlu2 %8638  ;;  %v14958_v48 = vld [vmem:[#allocation59_spill] sm:$0xff] }
 0x63d   : > { %v14371_v52 = vsel %vm8841_vm2, %v14953_v10, %v8639_v4  ;;  %v7928_v32 = vpop.f32.mrf.mxu2  ;;  %v8273_v38 = vpop.f32.mrf.mxu0  ;;  %v14959_v4 = vld [vmem:[#allocation65_spill] sm:$0xff] }
 0x63e   : > { %8121 = vmatmul.bf16.gmra.mxu3 %v14954_v58  ;;  %v7929_v23 = vadd.f32 %v7928_v32, %v7727_v11  ;;  %v8367_v46 = vadd.f32 %v14324_v35, %v8335_v39 }
 0x640   : > { %v8399_v40 = vmax.f32 %v8367_v46, 0.0  ;;  %8312 = vmatmul.bf16.gmra.mxu0 %v14955_v5 }
 0x641   : > { %v8082_v16 = vpop.f32.mrf.mxu3 }
 0x642   : > { %v8150_v18 = vadd.f32 %v8082_v16, %v7929_v23  ;;  %8726 = vrot.lane.b32.xlu2 %v8399_v40, %s10702_s25  ;;  %v7732_v53 = vpop.f32.mrf.mxu1  ;;  %v14960_v23 = vld [vmem:[#allocation62_spill] sm:$0xff] }
 0x644   : > { %v8336_v20 = vadd.f32 %v8268_v29, %v8150_v18  ;;  %v8635_v17 = vpop.permute.xlu0 %8634 }
 0x645   : > { %v14379_v25 = vsel %vm8841_vm2, %v14956_v55, %v8635_v17  ;;  %v7930_v31 = vpop.f32.mrf.mxu2  ;;  %7771 = vmatmul.bf16.gmra.mxu1 %v14957_v6  ;;  %v8275_v11 = vpop.f32.mrf.mxu0 }
 0x646   : > { %v7931_v36 = vadd.f32 %v7930_v31, %v7729_v12  ;;  %v8368_v59 = vadd.f32 %v14324_v35, %v8336_v20 }
 0x648   : > { %v8400_v33 = vmax.f32 %v8368_v59, 0.0 }
 0x649   : > { %v8084_v51 = vpop.f32.mrf.mxu3 }
 0x64a   : > { %v8151_v41 = vadd.f32 %v8084_v51, %v7931_v36  ;;  %8728 = vrot.lane.b32.xlu0 %v8400_v33, %s10702_s25  ;;  %7972 = vmatmul.bf16.gmra.mxu2 %v14958_v48  ;;  %v7734_v29 = vpop.f32.mrf.mxu1  ;;  %v10634_v36 = vld [vmem:[#allocation2 + $0xd0] sm:$0xf]  ;;  %v7472_v33 = vld [vmem:[#allocation2 + $0xcc] sm:$0xe] }
 0x64c   : > { %v8337_v60 = vadd.f32 %v8270_v8, %v8151_v41  ;;  %v8637_v39 = vpop.permute.xlu1 %8636 }
 0x64d   : > { %v14387_v10 = vsel %vm8841_vm2, %v14959_v4, %v8637_v39  ;;  %v7933_v32 = vpop.f32.mrf.mxu2  ;;  %v8278_v58 = vpop.f32.mrf.mxu0  ;;  %v14962_v39 = vld [vmem:[#allocation13_spill] sm:$0xff] }
 0x64e   : > { %8126 = vmatmul.bf16.gmra.mxu3 %v14960_v23  ;;  %v7934_v12 = vadd.f32 %v7933_v32, %v7732_v53  ;;  %v8369_v46 = vadd.f32 %v14324_v35, %v8337_v60  ;;  %v7615_v4 = vrot.slane %v14962_v39, 5 }
 0x650   : > { %v8401_v40 = vmax.f32 %v8369_v46, 0.0  ;;  %8317 = vmatmul.bf16.gmra.mxu0 %v12959_v27  ;;  %v7612_v27 = vrot.slane %v10634_v36, 5  ;;  %v14963_v46 = vld [vmem:[#allocation63_spill] sm:$0xff] }
 0x651   : > { %v8087_v5 = vpop.f32.mrf.mxu3 }
 0x652   : > { %v8152_v16 = vadd.f32 %v8087_v5, %v7934_v12  ;;  %8730 = vrot.lane.b32.xlu1 %v8401_v40, %s10702_s25  ;;  %v7737_v8 = vpop.f32.mrf.mxu1  ;;  %v7614_v60 = vrot.slane %v7612_v27, 4 }
 0x654   : > { %v8338_v18 = vadd.f32 %v8273_v38, %v8152_v16  ;;  %v8645_v20 = vpop.permute.xlu2 %8644  ;;  %v14961_v38 = vld [vmem:[#allocation61_spill] sm:$0xff] }
 0x655   : > { %v14395_v17 = vsel %vm8841_vm2, %v14159_v1, %v8645_v20  ;;  %v7935_v55 = vpop.f32.mrf.mxu2  ;;  %7776 = vmatmul.bf16.gmra.mxu1 %v14131_v21  ;;  %v8280_v53 = vpop.f32.mrf.mxu0  ;;  %v10080_v1 = vrot.slane %v7472_v33, 9  ;;  %v7616_v20 = vsel %vm11159_vm7, %v7614_v60, %v7615_v4  ;;  %v14965_v33 = vld [vmem:[#allocation67_spill] sm:$0xff] }
 0x656   : > { %v7936_v31 = vadd.f32 %v7935_v55, %v7734_v29  ;;  %v8370_v6 = vadd.f32 %v14324_v35, %v8338_v18 }
 0x657   : > { %v7613_v18 = vsel %vm11159_vm7, %v10080_v1, %v7612_v27 }
 0x658   : > { %v8402_v59 = vmax.f32 %v8370_v6, 0.0  ;;  %v7817_v6 = vunpack.c.l.b16 %v7613_v18 }
 0x659   : > { %v8089_v51 = vpop.f32.mrf.mxu3 }
 0x65a   : > { %v8153_v41 = vadd.f32 %v8089_v51, %v7936_v31  ;;  %8732 = vrot.lane.b32.xlu2 %v8402_v59, %s10702_s25  ;;  %7977 = vmatmul.bf16.gmra.mxu2 %v14961_v38  ;;  %v7739_v48 = vpop.f32.mrf.mxu1 }
 0x65c   : > { %v8339_v21 = vadd.f32 %v8275_v11, %v8153_v41  ;;  %v8641_v32 = vpop.permute.xlu0 %8640 }
 0x65d   : > { %v14404_v29 = vsel %vm8841_vm2, %v14137_v14, %v8641_v32  ;;  %v7938_v23 = vpop.f32.mrf.mxu2  ;;  %v8283_v12 = vpop.f32.mrf.mxu0 }
 0x65e   : > { %8131 = vmatmul.bf16.gmra.mxu3 %v14963_v46  ;;  %v7939_v40 = vadd.f32 %v7938_v23, %v7737_v8  ;;  %v8371_v5 = vadd.f32 %v14324_v35, %v8339_v21  ;;  %v7818_v8 = vunpack.c.l.b16 %v7616_v20  ;;  %v14966_v21 = vld [vmem:[#allocation16_spill] sm:$0xff] }
 0x660   : > { %v8403_v11 = vmax.f32 %v8371_v5, 0.0  ;;  %8322 = vmatmul.bf16.gmra.mxu0 %v12993_v56  ;;  %v7834_v1 = vpack.c.b16 %v7818_v8, %v7817_v6  ;;  %v14967_v5 = vld [vmem:[#allocation64_spill] sm:$0xff] }
 0x661   : > { %v8092_v55 = vpop.f32.mrf.mxu3 }
 0x662   : > { %v8154_v14 = vadd.f32 %v8092_v55, %v7939_v40  ;;  %8734 = vrot.lane.b32.xlu0 %v8403_v11, %s10702_s25  ;;  %v7742_v31 = vpop.f32.mrf.mxu1 }
 0x664   : > { %v8340_v36 = vadd.f32 %v8278_v58, %v8154_v14  ;;  %v8643_v59 = vpop.permute.xlu1 %8642 }
 0x665   : > { %v14416_v51 = vsel %vm8841_vm2, %v14965_v33, %v8643_v59  ;;  %v7940_v27 = vpop.f32.mrf.mxu2  ;;  %7781 = vmatmul.bf16.gmra.mxu1 %v14152_v43  ;;  %v8285_v41 = vpop.f32.mrf.mxu0  ;;  %v8843_v43 = vsel %vm8841_vm2, %v14966_v21, %v14194_v50 }
 0x666   : > { %v7941_v56 = vadd.f32 %v7940_v27, %v7739_v48  ;;  %v8372_v38 = vadd.f32 %v14324_v35, %v8340_v36 }
 0x668   : > { %v8404_v60 = vmax.f32 %v8372_v38, 0.0 }
 0x669   : > { %v8094_v39 = vpop.f32.mrf.mxu3 }
 0x66a   : > { %v8155_v4 = vadd.f32 %v8094_v39, %v7941_v56  ;;  %8736 = vrot.lane.b32.xlu1 %v8404_v60, %s10702_s25  ;;  %7982 = vmatmul.bf16.gmra.mxu2 %v7834_v1  ;;  %v7744_v58 = vpop.f32.mrf.mxu1 }
 0x66c   : > { %v8341_v32 = vadd.f32 %v8280_v53, %v8155_v4  ;;  %v8715_v23 = vpop.permute.xlu2 %8714 }
 0x66d   : > { %v8876_v48 = vsel %vm8874_vm3, %v8843_v43, %v8715_v23  ;;  %v7943_v46 = vpop.f32.mrf.mxu2  ;;  %v8288_v40 = vpop.f32.mrf.mxu0 }
 0x66e   : > { %8136 = vmatmul.bf16.gmra.mxu3 %v14967_v5  ;;  %8908 = vst [vmem:[%s14429_s6 + $0x8] sm:$0xff] %v8876_v48  ;;  %v7944_v16 = vadd.f32 %v7943_v46, %v7742_v31  ;;  %v8373_v18 = vadd.f32 %v14324_v35, %v8341_v32 }
 0x670   : > { %v8405_v20 = vmax.f32 %v8373_v18, 0.0 }
 0x671   : > { %v8097_v11 = vpop.f32.mrf.mxu3 }
 0x672   : > { %v8156_v55 = vadd.f32 %v8097_v11, %v7944_v16  ;;  %8738 = vrot.lane.b32.xlu2 %v8405_v20, %s10702_s25  ;;  %v7747_v50 = vpop.f32.mrf.mxu1 }
 0x674   : > { %v8342_v53 = vadd.f32 %v8283_v12, %v8156_v55  ;;  %v8647_v14 = vpop.permute.xlu0 %8646 }
 0x675   : > { %v14436_v6 = vsel %vm8841_vm2, %v14168_v47, %v8647_v14  ;;  %v7945_v8 = vpop.f32.mrf.mxu2  ;;  %v8290_v36 = vpop.f32.mrf.mxu0 }
 0x676   : > { %v7946_v59 = vadd.f32 %v7945_v8, %v7744_v58  ;;  %v8374_v31 = vadd.f32 %v14324_v35, %v8342_v53 }
 0x678   : > { %v8406_v33 = vmax.f32 %v8374_v31, 0.0 }
 0x679   : > { %v8099_v27 = vpop.f32.mrf.mxu3 }
 0x67a   : > { %v8157_v56 = vadd.f32 %v8099_v27, %v7946_v59  ;;  %8740 = vrot.lane.b32.xlu0 %v8406_v33, %s10702_s25  ;;  %v7749_v38 = vpop.f32.mrf.mxu1 }
 0x67c   : > { %v8343_v1 = vadd.f32 %v8285_v41, %v8157_v56  ;;  %v8713_v60 = vpop.permute.xlu1 %8712 }
 0x67d   : > { %v8875_v12 = vsel %vm8874_vm3, %v14149_v22, %v8713_v60  ;;  %v7948_v39 = vpop.f32.mrf.mxu2  ;;  %v8293_v47 = vpop.f32.mrf.mxu0 }
 0x67e   : > { %8907 = vst [vmem:[%s14429_s6] sm:$0xff] %v8875_v12  ;;  %v7949_v4 = vadd.f32 %v7948_v39, %v7747_v50  ;;  %v8375_v58 = vadd.f32 %v14324_v35, %v8343_v1 }
 0x680   : > { %v8407_v21 = vmax.f32 %v8375_v58, 0.0 }
 0x681   : > { %v8102_v43 = vpop.f32.mrf.mxu3 }
 0x682   : > { %v8158_v32 = vadd.f32 %v8102_v43, %v7949_v4  ;;  %8742 = vrot.lane.b32.xlu1 %v8407_v21, %s10702_s25  ;;  %v7752_v23 = vpop.f32.mrf.mxu1 }
 0x684   : > { %v8344_v48 = vadd.f32 %v8288_v40, %v8158_v32  ;;  %v8721_v46 = vpop.permute.xlu2 %8720 }
 0x685   : > { %v8879_v41 = vsel %vm8874_vm3, %v14206_v37, %v8721_v46  ;;  %v7950_v22 = vpop.f32.mrf.mxu2  ;;  %v8295_v5 = vpop.f32.mrf.mxu0 }
 0x686   : > { %8911 = vst [vmem:[%s14429_s6 + $0x20] sm:$0xff] %v8879_v41  ;;  %v7951_v16 = vadd.f32 %v7950_v22, %v7749_v38  ;;  %v8376_v18 = vadd.f32 %v14324_v35, %v8344_v48 }
 0x688   : > { %v8408_v20 = vmax.f32 %v8376_v18, 0.0 }
 0x689   : > { %v8104_v11 = vpop.f32.mrf.mxu3 }
 0x68a   : > { %v8159_v55 = vadd.f32 %v8104_v11, %v7951_v16  ;;  %8744 = vrot.lane.b32.xlu2 %v8408_v20, %s10702_s25  ;;  %v7754_v50 = vpop.f32.mrf.mxu1 }
 0x68c   : > { %v8345_v53 = vadd.f32 %v8290_v36, %v8159_v55  ;;  %v8717_v14 = vpop.permute.xlu0 %8716 }
 0x68d   : > { %v8877_v40 = vsel %vm8874_vm3, %v14188_v13, %v8717_v14  ;;  %v7953_v37 = vpop.f32.mrf.mxu2  ;;  %v8298_v8 = vpop.f32.mrf.mxu0 }
 0x68e   : > { %8909 = vst [vmem:[%s14429_s6 + $0x10] sm:$0xff] %v8877_v40  ;;  %v7954_v59 = vadd.f32 %v7953_v37, %v7752_v23  ;;  %v8377_v31 = vadd.f32 %v14324_v35, %v8345_v53 }
 0x690   : > { %v8409_v33 = vmax.f32 %v8377_v31, 0.0 }
 0x691   : > { %v8107_v27 = vpop.f32.mrf.mxu3 }
 0x692   : > { %v8160_v56 = vadd.f32 %v8107_v27, %v7954_v59  ;;  %8746 = vrot.lane.b32.xlu0 %v8409_v33, %s10702_s25  ;;  %v7757_v38 = vpop.f32.mrf.mxu1 }
 0x694   : > { %v8346_v1 = vadd.f32 %v8293_v47, %v8160_v56  ;;  %v8719_v60 = vpop.permute.xlu1 %8718 }
 0x695   : > { %v8878_v36 = vsel %vm8874_vm3, %v14176_v7, %v8719_v60  ;;  %v7955_v12 = vpop.f32.mrf.mxu2  ;;  %v8300_v4 = vpop.f32.mrf.mxu0 }
 0x696   : > { %8910 = vst [vmem:[%s14429_s6 + $0x18] sm:$0xff] %v8878_v36  ;;  %v7956_v13 = vadd.f32 %v7955_v12, %v7754_v50  ;;  %v8378_v39 = vadd.f32 %v14324_v35, %v8346_v1 }
 0x698   : > { %v8410_v58 = vmax.f32 %v8378_v39, 0.0 }
 0x699   : > { %v8109_v21 = vpop.f32.mrf.mxu3 }
 0x69a   : > { %v8161_v43 = vadd.f32 %v8109_v21, %v7956_v13  ;;  %8748 = vrot.lane.b32.xlu1 %v8410_v58, %s10702_s25  ;;  %v7759_v32 = vpop.f32.mrf.mxu1 }
 0x69c   : > { %v8347_v23 = vadd.f32 %v8295_v5, %v8161_v43  ;;  %v8727_v48 = vpop.permute.xlu2 %8726 }
 0x69d   : > { %v8882_v47 = vsel %vm8874_vm3, %v14230_v3, %v8727_v48  ;;  %v7958_v46 = vpop.f32.mrf.mxu2  ;;  %v8303_v18 = vpop.f32.mrf.mxu0 }
 0x69e   : > { %8914 = vst [vmem:[%s14429_s6 + $0x38] sm:$0xff] %v8882_v47  ;;  %v7959_v7 = vadd.f32 %v7958_v46, %v7757_v38  ;;  %v8379_v41 = vadd.f32 %v14324_v35, %v8347_v23 }
 0x6a0   : > { %v8411_v22 = vmax.f32 %v8379_v41, 0.0 }
 0x6a1   : > { %v8112_v16 = vpop.f32.mrf.mxu3 }
 0x6a2   : > { %v8162_v20 = vadd.f32 %v8112_v16, %v7959_v7  ;;  %8750 = vrot.lane.b32.xlu2 %v8411_v22, %s10702_s25  ;;  %v7762_v11 = vpop.f32.mrf.mxu1 }
 0x6a4   : > { %v8348_v55 = vadd.f32 %v8298_v8, %v8162_v20  ;;  %v8723_v50 = vpop.permute.xlu0 %8722 }
 0x6a5   : > { %v8880_v5 = vsel %vm8874_vm3, %v14214_v44, %v8723_v50  ;;  %v7960_v53 = vpop.f32.mrf.mxu2  ;;  %v8305_v33 = vpop.f32.mrf.mxu0 }
 0x6a6   : > { %8912 = vst [vmem:[%s14429_s6 + $0x28] sm:$0xff] %v8880_v5  ;;  %v7961_v3 = vadd.f32 %v7960_v53, %v7759_v32  ;;  %v8380_v14 = vadd.f32 %v14324_v35, %v8348_v55 }
 0x6a8   : > { %v8412_v40 = vmax.f32 %v8380_v14, 0.0 }
 0x6a9   : > { %v8114_v37 = vpop.f32.mrf.mxu3 }
 0x6aa   : > { %v8163_v59 = vadd.f32 %v8114_v37, %v7961_v3  ;;  %8752 = vrot.lane.b32.xlu0 %v8412_v40, %s10702_s25  ;;  %v7764_v31 = vpop.f32.mrf.mxu1 }
 0x6ac   : > { %v8349_v27 = vadd.f32 %v8300_v4, %v8163_v59  ;;  %v8725_v56 = vpop.permute.xlu1 %8724 }
 0x6ad   : > { %v8881_v8 = vsel %vm8874_vm3, %v14198_v34, %v8725_v56  ;;  %v7963_v38 = vpop.f32.mrf.mxu2  ;;  %v8308_v43 = vpop.f32.mrf.mxu0 }
 0x6ae   : > { %8913 = vst [vmem:[%s14429_s6 + $0x30] sm:$0xff] %v8881_v8  ;;  %v7964_v44 = vadd.f32 %v7963_v38, %v7762_v11  ;;  %v8381_v1 = vadd.f32 %v14324_v35, %v8349_v27 }
 0x6b0   : > { %v8413_v60 = vmax.f32 %v8381_v1, 0.0 }
 0x6b1   : > { %v8117_v36 = vpop.f32.mrf.mxu3 }
 0x6b2   : > { %v8164_v12 = vadd.f32 %v8117_v36, %v7964_v44  ;;  %8754 = vrot.lane.b32.xlu1 %v8413_v60, %s10702_s25  ;;  %v7767_v13 = vpop.f32.mrf.mxu1 }
 0x6b4   : > { %v8350_v39 = vadd.f32 %v8303_v18, %v8164_v12  ;;  %v8733_v58 = vpop.permute.xlu2 %8732 }
 0x6b5   : > { %v8885_v4 = vsel %vm8874_vm3, %v14254_v54, %v8733_v58  ;;  %v7965_v21 = vpop.f32.mrf.mxu2  ;;  %v8310_v20 = vpop.f32.mrf.mxu0 }
 0x6b6   : > { %8917 = vst [vmem:[%s14429_s6 + $0x50] sm:$0xff] %v8885_v4  ;;  %v7966_v34 = vadd.f32 %v7965_v21, %v7764_v31  ;;  %v8382_v32 = vadd.f32 %v14324_v35, %v8350_v39 }
 0x6b8   : > { %v8414_v23 = vmax.f32 %v8382_v32, 0.0 }
 0x6b9   : > { %v8119_v48 = vpop.f32.mrf.mxu3 }
 0x6ba   : > { %v8165_v47 = vadd.f32 %v8119_v48, %v7966_v34  ;;  %8756 = vrot.lane.b32.xlu2 %v8414_v23, %s10702_s25  ;;  %v7769_v46 = vpop.f32.mrf.mxu1 }
 0x6bc   : > { %v8351_v7 = vadd.f32 %v8305_v33, %v8165_v47  ;;  %v8729_v41 = vpop.permute.xlu0 %8728 }
 0x6bd   : > { %v8883_v22 = vsel %vm8874_vm3, %v14238_v24, %v8729_v41  ;;  %v7968_v16 = vpop.f32.mrf.mxu2  ;;  %v8313_v33 = vpop.f32.mrf.mxu0 }
 0x6be   : > { %8915 = vst [vmem:[%s14429_s6 + $0x40] sm:$0xff] %v8883_v22  ;;  %v7969_v54 = vadd.f32 %v7968_v16, %v7767_v13  ;;  %v8383_v18 = vadd.f32 %v14324_v35, %v8351_v7 }
 0x6c0   : > { %v8415_v11 = vmax.f32 %v8383_v18, 0.0 }
 0x6c1   : > { %v8122_v55 = vpop.f32.mrf.mxu3 }
 0x6c2   : > { %v8166_v50 = vadd.f32 %v8122_v55, %v7969_v54  ;;  %8758 = vrot.lane.b32.xlu0 %v8415_v11, %s10702_s25  ;;  %v7772_v5 = vpop.f32.mrf.mxu1 }
 0x6c4   : > { %v8352_v53 = vadd.f32 %v8308_v43, %v8166_v50  ;;  %v8731_v3 = vpop.permute.xlu1 %8730 }
 0x6c5   : > { %v8884_v14 = vsel %vm8874_vm3, %v14222_v45, %v8731_v3  ;;  %v7970_v40 = vpop.f32.mrf.mxu2  ;;  %v8315_v39 = vpop.f32.mrf.mxu0 }
 0x6c6   : > { %8916 = vst [vmem:[%s14429_s6 + $0x48] sm:$0xff] %v8884_v14  ;;  %v7971_v24 = vadd.f32 %v7970_v40, %v7769_v46  ;;  %v8384_v37 = vadd.f32 %v14324_v35, %v8352_v53 }
 0x6c8   : > { %v8416_v59 = vmax.f32 %v8384_v37, 0.0 }
 0x6c9   : > { %v8124_v31 = vpop.f32.mrf.mxu3 }
 0x6ca   : > { %v8167_v27 = vadd.f32 %v8124_v31, %v7971_v24  ;;  %8760 = vrot.lane.b32.xlu1 %v8416_v59, %s10702_s25  ;;  %v7774_v1 = vpop.f32.mrf.mxu1 }
 0x6cc   : > { %v8353_v56 = vadd.f32 %v8310_v20, %v8167_v27  ;;  %v8739_v8 = vpop.permute.xlu2 %8738 }
 0x6cd   : > { %v8888_v38 = vsel %vm8874_vm3, %v14278_v62, %v8739_v8  ;;  %v7973_v44 = vpop.f32.mrf.mxu2  ;;  %v8318_v41 = vpop.f32.mrf.mxu0 }
 0x6ce   : > { %8920 = vst [vmem:[%s14429_s6 + $0x68] sm:$0xff] %v8888_v38  ;;  %v7974_v45 = vadd.f32 %v7973_v44, %v7772_v5  ;;  %v8385_v60 = vadd.f32 %v14324_v35, %v8353_v56 }
 0x6d0   : > { %v8417_v36 = vmax.f32 %v8385_v60, 0.0 }
 0x6d1   : > { %v8127_v12 = vpop.f32.mrf.mxu3 }
 0x6d2   : > { %v8168_v13 = vadd.f32 %v8127_v12, %v7974_v45  ;;  %8762 = vrot.lane.b32.xlu2 %v8417_v36, %s10702_s25  ;;  %v7777_v32 = vpop.f32.mrf.mxu1 }
 0x6d4   : > { %v8354_v58 = vadd.f32 %v8313_v33, %v8168_v13  ;;  %v8735_v4 = vpop.permute.xlu0 %8734 }
 0x6d5   : > { %v8886_v21 = vsel %vm8874_vm3, %v14262_v26, %v8735_v4  ;;  %v7975_v43 = vpop.f32.mrf.mxu2  ;;  %v8320_v40 = vpop.f32.mrf.mxu0 }
 0x6d6   : > { %8918 = vst [vmem:[%s14429_s6 + $0x58] sm:$0xff] %v8886_v21  ;;  %v7976_v62 = vadd.f32 %v7975_v43, %v7774_v1  ;;  %v8386_v34 = vadd.f32 %v14324_v35, %v8354_v58 }
 0x6d8   : > { %v8418_v23 = vmax.f32 %v8386_v34, 0.0 }
 0x6d9   : > { %v8129_v48 = vpop.f32.mrf.mxu3 }
 0x6da   : > { %v8169_v47 = vadd.f32 %v8129_v48, %v7976_v62  ;;  %8764 = vrot.lane.b32.xlu0 %v8418_v23, %s10702_s25  ;;  %v7779_v11 = vpop.f32.mrf.mxu1 }
 0x6dc   : > { %v8355_v46 = vadd.f32 %v8315_v39, %v8169_v47  ;;  %v8737_v7 = vpop.permute.xlu1 %8736 }
 0x6dd   : > { %v8887_v22 = vsel %vm8874_vm3, %v14246_v42, %v8737_v7  ;;  %v7978_v16 = vpop.f32.mrf.mxu2  ;;  %v8323_v1 = vpop.f32.mrf.mxu0 }
 0x6de   : > { %8919 = vst [vmem:[%s14429_s6 + $0x60] sm:$0xff] %v8887_v22  ;;  %v7979_v26 = vadd.f32 %v7978_v16, %v7777_v32  ;;  %v8387_v54 = vadd.f32 %v14324_v35, %v8355_v46 }
 0x6e0   : > { %v8419_v18 = vmax.f32 %v8387_v54, 0.0 }
 0x6e1   : > { %v8132_v20 = vpop.f32.mrf.mxu3 }
 0x6e2   : > { %v8170_v55 = vadd.f32 %v8132_v20, %v7979_v26  ;;  %8766 = vrot.lane.b32.xlu1 %v8419_v18, %s10702_s25  ;;  %v7782_v31 = vpop.f32.mrf.mxu1 }
 0x6e4   : > { %v8356_v50 = vadd.f32 %v8318_v41, %v8170_v55  ;;  %v8745_v5 = vpop.permute.xlu2 %8744 }
 0x6e5   : > { %v8891_v53 = vsel %vm8874_vm3, %v14302_v63, %v8745_v5  ;;  %v7980_v3 = vpop.f32.mrf.mxu2  ;;  %v8325_v34 = vpop.f32.mrf.mxu0 }
 0x6e6   : > { %8923 = vst [vmem:[%s14429_s6 + $0x80] sm:$0xff] %v8891_v53  ;;  %v7981_v42 = vadd.f32 %v7980_v3, %v7779_v11  ;;  %v8388_v14 = vadd.f32 %v14324_v35, %v8356_v50 }
 0x6e8   : > { %v8420_v24 = vmax.f32 %v8388_v14, 0.0 }
 0x6e9   : > { %v8134_v37 = vpop.f32.mrf.mxu3 }
 0x6ea   : > { %v8171_v59 = vadd.f32 %v8134_v37, %v7981_v42  ;;  %8768 = vrot.lane.b32.xlu2 %v8420_v24, %s10702_s25  ;;  %v7784_v13 = vpop.f32.mrf.mxu1 }
 0x6ec   : > { %v8357_v33 = vadd.f32 %v8320_v40, %v8171_v59  ;;  %v8741_v27 = vpop.permute.xlu0 %8740 }
 0x6ed   : > { %v8889_v56 = vsel %vm8874_vm3, %v14286_v19, %v8741_v27  ;;  %v7983_v8 = vpop.f32.mrf.mxu2 }
 0x6ee   : > { %8921 = vst [vmem:[%s14429_s6 + $0x70] sm:$0xff] %v8889_v56  ;;  %v7984_v63 = vadd.f32 %v7983_v8, %v7782_v31  ;;  %v8389_v38 = vadd.f32 %v14324_v35, %v8357_v33 }
 0x6f0   : > { %v8421_v44 = vmax.f32 %v8389_v38, 0.0 }
 0x6f1   : > { %v8137_v45 = vpop.f32.mrf.mxu3 }
 0x6f2   : > { %v8172_v60 = vadd.f32 %v8137_v45, %v7984_v63  ;;  %8770 = vrot.lane.b32.xlu0 %v8421_v44, %s10702_s25 }
 0x6f4   : > { %v8358_v36 = vadd.f32 %v8323_v1, %v8172_v60  ;;  %v8743_v12 = vpop.permute.xlu1 %8742 }
 0x6f5   : > { %v8890_v39 = vsel %vm8874_vm3, %v14270_v49, %v8743_v12  ;;  %v7985_v58 = vpop.f32.mrf.mxu2 }
 0x6f6   : > { %8922 = vst [vmem:[%s14429_s6 + $0x78] sm:$0xff] %v8890_v39  ;;  %v7986_v19 = vadd.f32 %v7985_v58, %v7784_v13  ;;  %v8390_v4 = vadd.f32 %v14324_v35, %v8358_v36 }
 0x6f8   : > { %v8422_v21 = vmax.f32 %v8390_v4, 0.0 }
 0x6f9   : > { %v8139_v43 = vpop.f32.mrf.mxu3 }
 0x6fa   : > { %v8173_v62 = vadd.f32 %v8139_v43, %v7986_v19  ;;  %8772 = vrot.lane.b32.xlu1 %v8422_v21, %s10702_s25 }
 0x6fc   : > { %v8359_v32 = vadd.f32 %v8325_v34, %v8173_v62  ;;  %v8751_v23 = vpop.permute.xlu2 %8750 }
 0x6fd   : > { %v8894_v48 = vsel %vm8874_vm3, %v14331_v0, %v8751_v23 }
 0x6fe   : > { %8926 = vst [vmem:[%s14429_s6 + $0x98] sm:$0xff] %v8894_v48  ;;  %v8391_v49 = vadd.f32 %v14324_v35, %v8359_v32 }
 0x700   : > { %v8423_v47 = vmax.f32 %v8391_v49, 0.0 }
 0x702   : > { %8774 = vrot.lane.b32.xlu2 %v8423_v47, %s10702_s25  ;;  %s10655_s25 = scalar_lea.hbm %s14606_s5, 512 }
 0x703   : > { %p10657_p1 = scmp.lt.s32.totalorder %s10655_s25, %s10651_s15 }
 0x704   : > { %v8747_v46 = vpop.permute.xlu0 %8746 }
 0x705   : > { %v8892_v7 = vsel %vm8874_vm3, %v14310_v28, %v8747_v46  ;;  %p10658_p2 = por %p10657_p1, %p10656_p0 }
 0x706   : > { %8924 = vst [vmem:[%s14429_s6 + $0x88] sm:$0xff] %v8892_v7 }
 0x707   : > { %p10659_p3 = pnand %p10658_p2, %p10654_p13 }
 0x70c   : > { %v8749_v41 = vpop.permute.xlu1 %8748 }
 0x70d   : > { %v8893_v22 = vsel %vm8874_vm3, %v14294_v61, %v8749_v41 }
 0x70e   : > { %8925 = vst [vmem:[%s14429_s6 + $0x90] sm:$0xff] %v8893_v22 }
 0x714   : > { %v8757_v0 = vpop.permute.xlu2 %8756 }
 0x715   : > { %v8897_v35 = vsel %vm8874_vm3, %v14355_v30, %v8757_v0 }
 0x716   : > { %8929 = vst [vmem:[%s14429_s6 + $0xb0] sm:$0xff] %v8897_v35 }
 0x71c   : > { %v8753_v16 = vpop.permute.xlu0 %8752 }
 0x71d   : > { %v8895_v26 = vsel %vm8874_vm3, %v14339_v15, %v8753_v16 }
 0x71e   : > { %8927 = vst [vmem:[%s14429_s6 + $0xa0] sm:$0xff] %v8895_v26 }
 0x724   : > { %v8755_v28 = vpop.permute.xlu1 %8754 }
 0x725   : > { %v8896_v54 = vsel %vm8874_vm3, %v14318_v57, %v8755_v28 }
 0x726   : > { %8928 = vst [vmem:[%s14429_s6 + $0xa8] sm:$0xff] %v8896_v54 }
 0x72c   : > { %v8763_v61 = vpop.permute.xlu2 %8762 }
 0x72d   : > { %v8900_v18 = vsel %vm8874_vm3, %v14379_v25, %v8763_v61 }
 0x72e   : > { %8932 = vst [vmem:[%s14429_s6 + $0xc8] sm:$0xff] %v8900_v18 }
 0x734   : > { %v8759_v30 = vpop.permute.xlu0 %8758 }
 0x735   : > { %v8898_v20 = vsel %vm8874_vm3, %v14363_v9, %v8759_v30 }
 0x736   : > { %8930 = vst [vmem:[%s14429_s6 + $0xb8] sm:$0xff] %v8898_v20 }
 0x73c   : > { %v8761_v15 = vpop.permute.xlu1 %8760 }
 0x73d   : > { %v8899_v11 = vsel %vm8874_vm3, %v14347_v2, %v8761_v15 }
 0x73e   : > { %8931 = vst [vmem:[%s14429_s6 + $0xc0] sm:$0xff] %v8899_v11 }
 0x744   : > { %v8769_v57 = vpop.permute.xlu2 %8768 }
 0x745   : > { %v8903_v55 = vsel %vm8874_vm3, %v14404_v29, %v8769_v57 }
 0x746   : > { %8935 = vst [vmem:[%s14429_s6 + $0xe0] sm:$0xff] %v8903_v55 }
 0x74c   : > { %v8765_v25 = vpop.permute.xlu0 %8764 }
 0x74d   : > { %v8901_v50 = vsel %vm8874_vm3, %v14387_v10, %v8765_v25 }
 0x74e   : > { %8933 = vst [vmem:[%s14429_s6 + $0xd0] sm:$0xff] %v8901_v50 }
 0x754   : > { %v8767_v9 = vpop.permute.xlu1 %8766 }
 0x755   : > { %v8902_v5 = vsel %vm8874_vm3, %v14371_v52, %v8767_v9 }
 0x756   : > { %8934 = vst [vmem:[%s14429_s6 + $0xd8] sm:$0xff] %v8902_v5 }
 0x75c   : > { %v8775_v2 = vpop.permute.xlu2 %8774 }
 0x75d   : > { %v8906_v53 = vsel %vm8874_vm3, %v14436_v6, %v8775_v2 }
 0x75e   : > { %8938 = vst [vmem:[%s14429_s6 + $0xf8] sm:$0xff] %v8906_v53 }
 0x764   : > { %v8771_v29 = vpop.permute.xlu0 %8770 }
 0x765   : > { %v8904_v3 = vsel %vm8874_vm3, %v14416_v51, %v8771_v29 }
 0x766   : > { %8936 = vst [vmem:[%s14429_s6 + $0xe8] sm:$0xff] %v8904_v3 }
 0x76c   : > { %v8773_v52 = vpop.permute.xlu1 %8772 }
 0x76d   : > { %v8905_v10 = vsel %vm8874_vm3, %v14395_v17, %v8773_v52 }
 0x76e   : > { %8937 = vst [vmem:[%s14429_s6 + $0xf0] sm:$0xff] %v8905_v10 }
 0x76f   : > { %10662 = shalt.err (!%p10659_p3)
}
 0x770   : > { %s10703_s26 = smov 128   ;;  %s10704_s30 = smov 8  }
 0x771   : > { %10461 = dma.vmem_to_hbm [thread:$0]  (%p10773_p5), %s8953_s12, 4096, %s8955_s8, %s8940_s22, %s10703_s26, %s10703_s26, %s10704_s30  }
 0x772 PF: > { %p10467_p4 = scmp.ge.s32.totalorder %s10697_s21, 2  ;;  %s8969_s6 = sand.u32 1, %s10685_s18  }
 0x773   : > { %s8970_s7 = scalar_lea.sflag [#allocation4], %s8969_s6 }
 0x774   : > { %p10464_p7 = pnand %p10467_p4, %p10777_p6 }
 0x776   : > { %p10465_p8 = pneg %p10464_p7 }
 0x778   : > { %10680 = dma.done.wait (%p10465_p8), %s8970_s7, 4096  }
 0x779   : > { %10682 = vsyncadd (%p10465_p8), %s8970_s7, 4294963200  ;;  %p15_p9 = scmp.ge.s32.totalorder %s10760_s24, 4   ;;  %s14968_s18 = smov %s10689_s19 }
 0x77a   : > { %s14969_s19 = smov %s10693_s20  ;;  %s14970_s20 = smov %s10771_s27 }
 0x77b   : > { %s14971_s21 = smov %s10760_s24  ;;  %17 = sbr.rel (!%p15_p9) target bundleno = 3 (0x3), region = 101 }
 0x780   :  { %8976 = vsyncpa [#allocation4], 1 }
 0x781   :  { %8978 = vsyncpa [#allocation4 + $0x1], 1 }

</bundles_post_ra>
